<compile_context>
chip_gen: v7x
topology: tpu7x:2x2x1
jax: 0.10.0
libtpu: 0.0.40
codegen_flags: <defaults>
</compile_context>

<pallas_src>
import functools

import jax
import jax.numpy as jnp
from jax import lax
from jax.experimental import pallas as pl
from jax.experimental.pallas import tpu as pltpu


def _elu(v):
    # ELU(alpha=1). exp(min(v,0))-1 is kept (instead of expm1) for maximal
    # Mosaic lowering compatibility; the accuracy delta near 0 is ~1 ulp of 1.
    return jnp.where(v > 0, v, jnp.exp(jnp.minimum(v, 0.0)) - 1.0)


def _fused_resnet_block_se_kernel(*refs, D, H, W, Cin, Cout, has_conv1):
    """Whole ResNetBlockSE forward for one batch element, VMEM-resident."""
    S = D * H * W
    HW = H * W
    C = Cout
    f32 = jnp.float32
    bf16 = jnp.bfloat16

    x_ref = refs[0]
    if has_conv1:
        w1_ref, b1_ref = refs[1], refs[2]
        rest = refs[3:]
    else:
        w1_ref = b1_ref = None
        rest = refs[1:]
    (w2_ref, g2_ref, be2_ref, w3_ref, g3_ref, be3_ref,
     fc1w_ref, fc1b_ref, fc2w_ref, fc2b_ref, ssew_ref, sseb_ref, gsel_ref,
     o_ref, pad_ref, work_ref, res_ref) = rest

    # ---- zero ONLY the six halo faces (interior is always overwritten) ------
    zd = jnp.zeros((1, H + 2, W + 2, C), bf16)
    pad_ref[0:1] = zd
    pad_ref[D + 1:D + 2] = zd
    zh = jnp.zeros((D + 2, 1, W + 2, C), bf16)
    pad_ref[:, 0:1] = zh
    pad_ref[:, H + 1:H + 2] = zh
    zw = jnp.zeros((D + 2, H + 2, 1, C), bf16)
    pad_ref[:, :, 0:1] = zw
    pad_ref[:, :, W + 1:W + 2] = zw

    # ---- conv1 (1x1x1 + bias) or identity -> residual (f32) + pad interior --
    def residual_body(d, carry):
        x_d = x_ref[0:1, pl.ds(d, 1)].reshape(HW, Cin)
        if has_conv1:
            r_d = jnp.dot(x_d.astype(bf16), w1_ref[...],
                          preferred_element_type=f32) + b1_ref[...]
        else:
            r_d = x_d
        res_ref[pl.ds(d, 1)] = r_d.reshape(1, HW, C)
        pad_ref[pl.ds(d + 1, 1), 1:H + 1, 1:W + 1, :] = (
            r_d.astype(bf16).reshape(1, H, W, C))
        return carry
    lax.fori_loop(0, D, residual_body, 0)

    # ---- 3x3x3 conv, padding=1, no bias: per depth slice, 9 accumulated -----
    # K=3*C bf16 matmuls (kw taps packed along lanes); raw f32 result goes to
    # work_ref and the per-channel sum is carried for GroupNorm.
    def conv3x3x3(w_ref):
        def body(d, s1):
            acc = jnp.zeros((HW, C), f32)
            for kd in range(3):
                for kh in range(3):
                    p = jnp.concatenate(
                        [pad_ref[pl.ds(d + kd, 1), kh:kh + H, kw:kw + W, :]
                         for kw in range(3)],
                        axis=-1).reshape(HW, 3 * C)
                    r0 = (kd * 3 + kh) * 3 * C
                    acc = acc + jnp.dot(p, w_ref[r0:r0 + 3 * C, :],
                                        preferred_element_type=f32)
            work_ref[pl.ds(d, 1)] = acc.reshape(1, HW, C)
            return s1 + jnp.sum(acc, axis=0, keepdims=True)
        return lax.fori_loop(0, D, body, jnp.zeros((1, C), f32))

    # ---- GroupNorm: centered two-pass over the VMEM-resident conv output ----
    def groupnorm_scale_shift(s1, gamma_ref, beta_ref):
        mean = jnp.dot(s1, gsel_ref[...], preferred_element_type=f32)   # [1, C]

        def body(d, s2):
            dv = work_ref[pl.ds(d, 1)].reshape(HW, C) - mean
            return s2 + jnp.sum(dv * dv, axis=0, keepdims=True)
        s2 = lax.fori_loop(0, D, body, jnp.zeros((1, C), f32))
        var = jnp.dot(s2, gsel_ref[...], preferred_element_type=f32)    # [1, C]
        scale = gamma_ref[...] * lax.rsqrt(var + 1e-5)
        shift = beta_ref[...] - mean * scale
        return scale, shift

    # conv2 = SingleConv('cge'): conv -> GroupNorm -> ELU, back into pad interior
    s1 = conv3x3x3(w2_ref)
    scale2, shift2 = groupnorm_scale_shift(s1, g2_ref, be2_ref)

    def gn_elu_to_pad(d, carry):
        v = work_ref[pl.ds(d, 1)].reshape(HW, C)
        y = _elu(v * scale2 + shift2)
        pad_ref[pl.ds(d + 1, 1), 1:H + 1, 1:W + 1, :] = (
            y.astype(bf16).reshape(1, H, W, C))
        return carry
    lax.fori_loop(0, D, gn_elu_to_pad, 0)

    # conv3 = SingleConv('cg'): conv -> GroupNorm
    s1 = conv3x3x3(w3_ref)
    scale3, shift3 = groupnorm_scale_shift(s1, g3_ref, be3_ref)

    # h = ELU(GN3 + residual); keep h in work_ref, accumulate channel sums
    def resid_elu(d, zsum):
        v = work_ref[pl.ds(d, 1)].reshape(HW, C) * scale3 + shift3
        h = _elu(v + res_ref[pl.ds(d, 1)].reshape(HW, C))
        work_ref[pl.ds(d, 1)] = h.reshape(1, HW, C)
        return zsum + jnp.sum(h, axis=0, keepdims=True)
    zsum = lax.fori_loop(0, D, resid_elu, jnp.zeros((1, C), f32))

    # ---- SCSE (reduction_ratio=1): max(channel-SE, spatial-SE) --------------
    z = zsum * (1.0 / S)                                                # [1, C]
    t1 = jnp.maximum(
        jnp.dot(z, fc1w_ref[...], preferred_element_type=f32) + fc1b_ref[...],
        0.0)
    cse = jax.nn.sigmoid(
        jnp.dot(t1, fc2w_ref[...], preferred_element_type=f32) + fc2b_ref[...])

    def se_out(d, carry):
        h = work_ref[pl.ds(d, 1)].reshape(HW, C)
        sse = jax.nn.sigmoid(
            jnp.sum(h * ssew_ref[...], axis=-1, keepdims=True) + sseb_ref[...])
        y = jnp.maximum(h * cse, h * sse)
        o_ref[0:1, pl.ds(d, 1)] = y.reshape(1, 1, H, W, C)
        return carry
    lax.fori_loop(0, D, se_out, 0)


# ---------------------------------------------------------------------------
# Wrapper: layout transposes + host-side weight reshapes + pallas_call plumbing
# ---------------------------------------------------------------------------

def _vmem_limit_bytes():
    # Never request the full physical per-core VMEM (v7x has only 64 MiB/TC);
    # leave headroom for Mosaic internal scratch and the pipeline buffers.
    cap = 64 * 1024 * 1024  # conservative fallback (assume v7x)
    try:
        info = pltpu.get_tpu_info()
        cap = int(getattr(info, "vmem_capacity_bytes", cap) or cap)
    except Exception:
        pass
    return min(64 * 1024 * 1024, (cap * 3) // 4)


def resnet_block_se_forward(x_ncdhw, params, *, num_groups):
    """ResNetBlockSE forward. Accepts/returns PyTorch-style NCDHW."""
    x = jnp.transpose(x_ncdhw, (0, 2, 3, 4, 1)).astype(jnp.float32)   # -> NDHWC
    N, D, H, W, Cin = x.shape
    Cout = params["w2"].shape[-1]
    G = num_groups if Cout >= num_groups else 1
    assert Cout % G == 0
    S = D * H * W
    Cg = Cout // G
    has_conv1 = (Cin != Cout)

    # Host-side (free) reshapes / casts:
    #  * 3x3x3 weights flattened tap-major (kd,kh,kw), channel-minor -> [27C, C]
    #    and cast to bf16; the kernel contracts one K=3C block per (kd, kh).
    #  * pre-scaled same-group selection matrix for the GroupNorm group average.
    # Note: PyTorch Conv3d weights are [Cout,Cin,kD,kH,kW]; real checkpoints
    # must be permuted to [kD,kH,kW,Cin,Cout] before this reshape.
    w2col = params["w2"].reshape(27 * Cout, Cout).astype(jnp.bfloat16)
    w3col = params["w3"].reshape(27 * Cout, Cout).astype(jnp.bfloat16)
    gidx = jnp.arange(Cout, dtype=jnp.int32) // Cg
    gsel = (gidx[:, None] == gidx[None, :]).astype(jnp.float32) / float(S * Cg)

    def full_spec(shape):
        nd = len(shape)
        return pl.BlockSpec(shape, lambda n, _nd=nd: (0,) * _nd)

    in_arrays = [x]
    in_specs = [pl.BlockSpec((1, D, H, W, Cin), lambda n: (n, 0, 0, 0, 0))]
    if has_conv1:
        in_arrays += [params["w1"].astype(jnp.bfloat16), params["b1"]]
        in_specs += [full_spec((Cin, Cout)), full_spec((1, Cout))]
    in_arrays += [w2col, params["g2"], params["be2"],
                  w3col, params["g3"], params["be3"],
                  params["fc1w"], params["fc1b"], params["fc2w"], params["fc2b"],
                  params["ssew"], params["sseb"], gsel]
    in_specs += [full_spec((27 * Cout, Cout)), full_spec((1, Cout)), full_spec((1, Cout)),
                 full_spec((27 * Cout, Cout)), full_spec((1, Cout)), full_spec((1, Cout)),
                 full_spec((Cout, Cout)), full_spec((1, Cout)),
                 full_spec((Cout, Cout)), full_spec((1, Cout)),
                 full_spec((1, Cout)), full_spec((1, 1)), full_spec((Cout, Cout))]

    out = pl.pallas_call(
        functools.partial(_fused_resnet_block_se_kernel,
                          D=D, H=H, W=W, Cin=Cin, Cout=Cout, has_conv1=has_conv1),
        out_shape=jax.ShapeDtypeStruct((N, D, H, W, Cout), jnp.float32),
        grid=(N,),
        in_specs=in_specs,
        out_specs=pl.BlockSpec((1, D, H, W, Cout), lambda n: (n, 0, 0, 0, 0)),
        scratch_shapes=[
            pltpu.VMEM((D + 2, H + 2, W + 2, Cout), jnp.bfloat16),  # halo'd conv input
            pltpu.VMEM((D, H * W, Cout), jnp.float32),              # raw conv out / h
            pltpu.VMEM((D, H * W, Cout), jnp.float32),              # residual
        ],
        compiler_params=pltpu.CompilerParams(
            dimension_semantics=("parallel",),      # batch can shard across cores
            vmem_limit_bytes=_vmem_limit_bytes(),
        ),
    )(*in_arrays)

    return jnp.transpose(out, (0, 4, 1, 2, 3))  # back to NCDHW


# ---------------------------------------------------------------------------
# Deterministic parameter init + smoke test
# ---------------------------------------------------------------------------

if __name__ == "__main__":
    N, Cin, Cout = 2, 4, 8
    D = H = W = 8
    num_groups = 8

    keys = jax.random.split(jax.random.PRNGKey(0), 12)
    x = jax.random.normal(keys[0], (N, Cin, D, H, W), jnp.float32)

    params = {
        # conv1: 1x1x1 Conv3d(Cin, Cout) with bias  (weight stored [Cin, Cout])
        "w1": 0.2 * jax.random.normal(keys[1], (Cin, Cout), jnp.float32),
        "b1": 0.05 * jax.random.normal(keys[2], (1, Cout), jnp.float32),
        # conv2 / conv3: 3x3x3 Conv3d, no bias  (weight stored [kD,kH,kW,Cin,Cout])
        "w2": 0.1 * jax.random.normal(keys[3], (3, 3, 3, Cout, Cout), jnp.float32),
        "g2": 1.0 + 0.1 * jax.random.normal(keys[4], (1, Cout), jnp.float32),
        "be2": 0.1 * jax.random.normal(keys[5], (1, Cout), jnp.float32),
        "w3": 0.1 * jax.random.normal(keys[6], (3, 3, 3, Cout, Cout), jnp.float32),
        "g3": 1.0 + 0.1 * jax.random.normal(keys[7], (1, Cout), jnp.float32),
        "be3": 0.1 * jax.random.normal(keys[8], (1, Cout), jnp.float32),
        # SCSE (reduction_ratio=1): fc weights stored transposed for x @ W
        "fc1w": 0.3 * jax.random.normal(keys[9], (Cout, Cout), jnp.float32),
        "fc1b": jnp.zeros((1, Cout), jnp.float32),
        "fc2w": 0.3 * jax.random.normal(keys[10], (Cout, Cout), jnp.float32),
        "fc2b": jnp.zeros((1, Cout), jnp.float32),
        # spatial SE: 1x1x1 conv C->1 with bias
        "ssew": 0.3 * jax.random.normal(keys[11], (1, Cout), jnp.float32),
        "sseb": jnp.zeros((1, 1), jnp.float32),
    }

    out = resnet_block_se_forward(x, params, num_groups=num_groups)
    out = jax.block_until_ready(out)
    assert out.shape == (N, Cout, D, H, W), out.shape
    assert bool(jnp.all(jnp.isfinite(out)))
    print("KERNEL_OK")
</pallas_src>

<mosaic_0001>
module attributes {stable_mosaic.version = 11 : i64} {
  func.func @_fused_resnet_block_se_kernel(%arg0: i32, %arg1: memref<1x8x8x8x4xf32, #tpu.memory_space<vmem>>, %arg2: memref<4x8xbf16, #tpu.memory_space<vmem>>, %arg3: memref<1x8xf32, #tpu.memory_space<vmem>>, %arg4: memref<216x8xbf16, #tpu.memory_space<vmem>>, %arg5: memref<1x8xf32, #tpu.memory_space<vmem>>, %arg6: memref<1x8xf32, #tpu.memory_space<vmem>>, %arg7: memref<216x8xbf16, #tpu.memory_space<vmem>>, %arg8: memref<1x8xf32, #tpu.memory_space<vmem>>, %arg9: memref<1x8xf32, #tpu.memory_space<vmem>>, %arg10: memref<8x8xf32, #tpu.memory_space<vmem>>, %arg11: memref<1x8xf32, #tpu.memory_space<vmem>>, %arg12: memref<8x8xf32, #tpu.memory_space<vmem>>, %arg13: memref<1x8xf32, #tpu.memory_space<vmem>>, %arg14: memref<1x8xf32, #tpu.memory_space<vmem>>, %arg15: memref<1x1xf32, #tpu.memory_space<vmem>>, %arg16: memref<8x8xf32, #tpu.memory_space<vmem>>, %arg17: memref<1x8x8x8x8xf32, #tpu.memory_space<vmem>>, %arg18: memref<10x10x10x8xbf16, #tpu.memory_space<vmem>>, %arg19: memref<8x64x8xf32, #tpu.memory_space<vmem>>, %arg20: memref<8x64x8xf32, #tpu.memory_space<vmem>>) attributes {dimension_semantics = [#tpu.dimension_semantics<parallel>], iteration_bounds = array<i64: 2>, scalar_prefetch = 0 : i64, scratch_operands = 3 : i64, tpu.core_type = #tpu.core_type<tc>, window_params = [{transform_indices = @transform_0, window_bounds = array<i64: 1, 8, 8, 8, 4>}, {pipeline_mode = #tpu.pipeline_mode<synchronous>, transform_indices = @transform_1, window_bounds = array<i64: 4, 8>}, {pipeline_mode = #tpu.pipeline_mode<synchronous>, transform_indices = @transform_2, window_bounds = array<i64: 1, 8>}, {pipeline_mode = #tpu.pipeline_mode<synchronous>, transform_indices = @transform_3, window_bounds = array<i64: 216, 8>}, {pipeline_mode = #tpu.pipeline_mode<synchronous>, transform_indices = @transform_4, window_bounds = array<i64: 1, 8>}, {pipeline_mode = #tpu.pipeline_mode<synchronous>, transform_indices = @transform_5, window_bounds = array<i64: 1, 8>}, {pipeline_mode = #tpu.pipeline_mode<synchronous>, transform_indices = @transform_6, window_bounds = array<i64: 216, 8>}, {pipeline_mode = #tpu.pipeline_mode<synchronous>, transform_indices = @transform_7, window_bounds = array<i64: 1, 8>}, {pipeline_mode = #tpu.pipeline_mode<synchronous>, transform_indices = @transform_8, window_bounds = array<i64: 1, 8>}, {pipeline_mode = #tpu.pipeline_mode<synchronous>, transform_indices = @transform_9, window_bounds = array<i64: 8, 8>}, {pipeline_mode = #tpu.pipeline_mode<synchronous>, transform_indices = @transform_10, window_bounds = array<i64: 1, 8>}, {pipeline_mode = #tpu.pipeline_mode<synchronous>, transform_indices = @transform_11, window_bounds = array<i64: 8, 8>}, {pipeline_mode = #tpu.pipeline_mode<synchronous>, transform_indices = @transform_12, window_bounds = array<i64: 1, 8>}, {pipeline_mode = #tpu.pipeline_mode<synchronous>, transform_indices = @transform_13, window_bounds = array<i64: 1, 8>}, {pipeline_mode = #tpu.pipeline_mode<synchronous>, transform_indices = @transform_14, window_bounds = array<i64: 1, 1>}, {pipeline_mode = #tpu.pipeline_mode<synchronous>, transform_indices = @transform_15, window_bounds = array<i64: 8, 8>}, {transform_indices = @transform_16, window_bounds = array<i64: 1, 8, 8, 8, 8>}]} {
    %cst = arith.constant 0.000000e+00 : bf16
    %0 = vector.broadcast %cst : bf16 to vector<1x10x10x8xbf16>
    %c0 = arith.constant 0 : index
    %c0_0 = arith.constant 0 : index
    %c0_1 = arith.constant 0 : index
    %c0_2 = arith.constant 0 : index
    %1 = vector.load %arg18[%c0, %c0_0, %c0_1, %c0_2] : memref<10x10x10x8xbf16, #tpu.memory_space<vmem>>, vector<1x10x10x8xbf16>
    tpu.vector_store %arg18[%c0, %c0_0, %c0_1, %c0_2], %0 {strides = array<i32>} : memref<10x10x10x8xbf16, #tpu.memory_space<vmem>>, vector<1x10x10x8xbf16>,
    %c9 = arith.constant 9 : index
    %c0_3 = arith.constant 0 : index
    %c0_4 = arith.constant 0 : index
    %c0_5 = arith.constant 0 : index
    %2 = vector.load %arg18[%c9, %c0_3, %c0_4, %c0_5] : memref<10x10x10x8xbf16, #tpu.memory_space<vmem>>, vector<1x10x10x8xbf16>
    tpu.vector_store %arg18[%c9, %c0_3, %c0_4, %c0_5], %0 {strides = array<i32>} : memref<10x10x10x8xbf16, #tpu.memory_space<vmem>>, vector<1x10x10x8xbf16>,
    %cst_6 = arith.constant 0.000000e+00 : bf16
    %3 = vector.broadcast %cst_6 : bf16 to vector<10x1x10x8xbf16>
    %c0_7 = arith.constant 0 : index
    %c0_8 = arith.constant 0 : index
    %c0_9 = arith.constant 0 : index
    %c0_10 = arith.constant 0 : index
    %4 = vector.load %arg18[%c0_7, %c0_8, %c0_9, %c0_10] : memref<10x10x10x8xbf16, #tpu.memory_space<vmem>>, vector<10x1x10x8xbf16>
    tpu.vector_store %arg18[%c0_7, %c0_8, %c0_9, %c0_10], %3 {strides = array<i32>} : memref<10x10x10x8xbf16, #tpu.memory_space<vmem>>, vector<10x1x10x8xbf16>,
    %c0_11 = arith.constant 0 : index
    %c9_12 = arith.constant 9 : index
    %c0_13 = arith.constant 0 : index
    %c0_14 = arith.constant 0 : index
    %5 = vector.load %arg18[%c0_11, %c9_12, %c0_13, %c0_14] : memref<10x10x10x8xbf16, #tpu.memory_space<vmem>>, vector<10x1x10x8xbf16>
    tpu.vector_store %arg18[%c0_11, %c9_12, %c0_13, %c0_14], %3 {strides = array<i32>} : memref<10x10x10x8xbf16, #tpu.memory_space<vmem>>, vector<10x1x10x8xbf16>,
    %cst_15 = arith.constant 0.000000e+00 : bf16
    %6 = vector.broadcast %cst_15 : bf16 to vector<10x10x1x8xbf16>
    %c0_16 = arith.constant 0 : index
    %c0_17 = arith.constant 0 : index
    %c0_18 = arith.constant 0 : index
    %c0_19 = arith.constant 0 : index
    %7 = vector.load %arg18[%c0_16, %c0_17, %c0_18, %c0_19] : memref<10x10x10x8xbf16, #tpu.memory_space<vmem>>, vector<10x10x1x8xbf16>
    tpu.vector_store %arg18[%c0_16, %c0_17, %c0_18, %c0_19], %6 {strides = array<i32>} : memref<10x10x10x8xbf16, #tpu.memory_space<vmem>>, vector<10x10x1x8xbf16>,
    %c0_20 = arith.constant 0 : index
    %c0_21 = arith.constant 0 : index
    %c9_22 = arith.constant 9 : index
    %c0_23 = arith.constant 0 : index
    %8 = vector.load %arg18[%c0_20, %c0_21, %c9_22, %c0_23] : memref<10x10x10x8xbf16, #tpu.memory_space<vmem>>, vector<10x10x1x8xbf16>
    tpu.vector_store %arg18[%c0_20, %c0_21, %c9_22, %c0_23], %6 {strides = array<i32>} : memref<10x10x10x8xbf16, #tpu.memory_space<vmem>>, vector<10x10x1x8xbf16>,
    %c0_i32 = arith.constant 0 : i32
    %c8_i32 = arith.constant 8 : i32
    %9 = arith.addi %c0_i32, %c8_i32 : i32
    %c1_i32 = arith.constant 1 : i32
    scf.for %arg21 = %c0_i32 to %9 step %c1_i32  : i32 {
      %c0_93 = arith.constant 0 : index
      %68 = arith.index_cast %arg21 : i32 to index
      %c0_94 = arith.constant 0 : index
      %c0_95 = arith.constant 0 : index
      %c0_96 = arith.constant 0 : index
      %69 = vector.load %arg1[%c0_93, %68, %c0_94, %c0_95, %c0_96] : memref<1x8x8x8x4xf32, #tpu.memory_space<vmem>>, vector<1x1x8x8x4xf32>
      %70 = vector.shape_cast %69 : vector<1x1x8x8x4xf32> to vector<64x4xf32>
      %71 = arith.truncf %70 : vector<64x4xf32> to vector<64x4xbf16>
      %c0_97 = arith.constant 0 : index
      %c0_98 = arith.constant 0 : index
      %72 = vector.load %arg2[%c0_97, %c0_98] : memref<4x8xbf16, #tpu.memory_space<vmem>>, vector<4x8xbf16>
      %cst_99 = arith.constant dense<0.000000e+00> : vector<64x8xf32>
      %73 = tpu.matmul %71, %72, %cst_99 {dimension_numbers = #tpu.dot_dimension_numbers<[1], [0], [0], [1], [0, 0, 1, 1], [], []>} : vector<64x4xbf16>, vector<4x8xbf16>, vector<64x8xf32> -> vector<64x8xf32>
      %c0_100 = arith.constant 0 : index
      %c0_101 = arith.constant 0 : index
      %74 = vector.load %arg3[%c0_100, %c0_101] : memref<1x8xf32, #tpu.memory_space<vmem>>, vector<1x8xf32>
      %75 = vector.broadcast %74 : vector<1x8xf32> to vector<64x8xf32>
      %76 = arith.addf %73, %75 : vector<64x8xf32>
      %77 = vector.shape_cast %76 : vector<64x8xf32> to vector<1x64x8xf32>
      %78 = arith.index_cast %arg21 : i32 to index
      %c0_102 = arith.constant 0 : index
      %c0_103 = arith.constant 0 : index
      %79 = vector.load %arg20[%78, %c0_102, %c0_103] : memref<8x64x8xf32, #tpu.memory_space<vmem>>, vector<1x64x8xf32>
      tpu.vector_store %arg20[%78, %c0_102, %c0_103], %77 {strides = array<i32>} : memref<8x64x8xf32, #tpu.memory_space<vmem>>, vector<1x64x8xf32>,
      %80 = arith.truncf %76 : vector<64x8xf32> to vector<64x8xbf16>
      %81 = vector.shape_cast %80 : vector<64x8xbf16> to vector<1x8x8x8xbf16>
      %c1_i32_104 = arith.constant 1 : i32
      %82 = arith.addi %arg21, %c1_i32_104 : i32
      %83 = arith.index_cast %82 : i32 to index
      %c1 = arith.constant 1 : index
      %c1_105 = arith.constant 1 : index
      %c0_106 = arith.constant 0 : index
      %84 = vector.load %arg18[%83, %c1, %c1_105, %c0_106] : memref<10x10x10x8xbf16, #tpu.memory_space<vmem>>, vector<1x8x8x8xbf16>
      tpu.vector_store %arg18[%83, %c1, %c1_105, %c0_106], %81 {strides = array<i32>} : memref<10x10x10x8xbf16, #tpu.memory_space<vmem>>, vector<1x8x8x8xbf16>,
    }
    %c8_i32_24 = arith.constant 8 : i32
    %cst_25 = arith.constant 0.000000e+00 : f32
    %10 = vector.broadcast %cst_25 : f32 to vector<1x8xf32>
    %c0_i32_26 = arith.constant 0 : i32
    %c8_i32_27 = arith.constant 8 : i32
    %11 = arith.addi %c0_i32_26, %c8_i32_27 : i32
    %c1_i32_28 = arith.constant 1 : i32
    %12 = scf.for %arg21 = %c0_i32_26 to %11 step %c1_i32_28 iter_args(%arg22 = %10) -> (vector<1x8xf32>)  : i32 {
      %cst_93 = arith.constant 0.000000e+00 : f32
      %68 = vector.broadcast %cst_93 : f32 to vector<64x8xf32>
      %c0_i32_94 = arith.constant 0 : i32
      %69 = arith.addi %arg21, %c0_i32_94 : i32
      %70 = arith.index_cast %69 : i32 to index
      %c0_95 = arith.constant 0 : index
      %c0_96 = arith.constant 0 : index
      %c0_97 = arith.constant 0 : index
      %71 = vector.load %arg18[%70, %c0_95, %c0_96, %c0_97] : memref<10x10x10x8xbf16, #tpu.memory_space<vmem>>, vector<1x8x8x8xbf16>
      %c0_i32_98 = arith.constant 0 : i32
      %72 = arith.addi %arg21, %c0_i32_98 : i32
      %73 = arith.index_cast %72 : i32 to index
      %c0_99 = arith.constant 0 : index
      %c1 = arith.constant 1 : index
      %c0_100 = arith.constant 0 : index
      %74 = vector.load %arg18[%73, %c0_99, %c1, %c0_100] : memref<10x10x10x8xbf16, #tpu.memory_space<vmem>>, vector<1x8x8x8xbf16>
      %c0_i32_101 = arith.constant 0 : i32
      %75 = arith.addi %arg21, %c0_i32_101 : i32
      %76 = arith.index_cast %75 : i32 to index
      %c0_102 = arith.constant 0 : index
      %c2 = arith.constant 2 : index
      %c0_103 = arith.constant 0 : index
      %77 = vector.load %arg18[%76, %c0_102, %c2, %c0_103] : memref<10x10x10x8xbf16, #tpu.memory_space<vmem>>, vector<1x8x8x8xbf16>
      %78 = tpu.concatenate %71, %74, %77 in 3 : vector<1x8x8x8xbf16>, vector<1x8x8x8xbf16>, vector<1x8x8x8xbf16> -> vector<1x8x8x24xbf16>
      %79 = vector.shape_cast %78 : vector<1x8x8x24xbf16> to vector<64x24xbf16>
      %c0_104 = arith.constant 0 : index
      %c0_105 = arith.constant 0 : index
      %80 = vector.load %arg4[%c0_104, %c0_105] : memref<216x8xbf16, #tpu.memory_space<vmem>>, vector<24x8xbf16>
      %cst_106 = arith.constant dense<0.000000e+00> : vector<64x8xf32>
      %81 = tpu.matmul %79, %80, %cst_106 {dimension_numbers = #tpu.dot_dimension_numbers<[1], [0], [0], [1], [0, 0, 1, 1], [], []>} : vector<64x24xbf16>, vector<24x8xbf16>, vector<64x8xf32> -> vector<64x8xf32>
      %82 = arith.addf %68, %81 : vector<64x8xf32>
      %c0_i32_107 = arith.constant 0 : i32
      %83 = arith.addi %arg21, %c0_i32_107 : i32
      %84 = arith.index_cast %83 : i32 to index
      %c1_108 = arith.constant 1 : index
      %c0_109 = arith.constant 0 : index
      %c0_110 = arith.constant 0 : index
      %85 = vector.load %arg18[%84, %c1_108, %c0_109, %c0_110] : memref<10x10x10x8xbf16, #tpu.memory_space<vmem>>, vector<1x8x8x8xbf16>
      %c0_i32_111 = arith.constant 0 : i32
      %86 = arith.addi %arg21, %c0_i32_111 : i32
      %87 = arith.index_cast %86 : i32 to index
      %c1_112 = arith.constant 1 : index
      %c1_113 = arith.constant 1 : index
      %c0_114 = arith.constant 0 : index
      %88 = vector.load %arg18[%87, %c1_112, %c1_113, %c0_114] : memref<10x10x10x8xbf16, #tpu.memory_space<vmem>>, vector<1x8x8x8xbf16>
      %c0_i32_115 = arith.constant 0 : i32
      %89 = arith.addi %arg21, %c0_i32_115 : i32
      %90 = arith.index_cast %89 : i32 to index
      %c1_116 = arith.constant 1 : index
      %c2_117 = arith.constant 2 : index
      %c0_118 = arith.constant 0 : index
      %91 = vector.load %arg18[%90, %c1_116, %c2_117, %c0_118] : memref<10x10x10x8xbf16, #tpu.memory_space<vmem>>, vector<1x8x8x8xbf16>
      %92 = tpu.concatenate %85, %88, %91 in 3 : vector<1x8x8x8xbf16>, vector<1x8x8x8xbf16>, vector<1x8x8x8xbf16> -> vector<1x8x8x24xbf16>
      %93 = vector.shape_cast %92 : vector<1x8x8x24xbf16> to vector<64x24xbf16>
      %c24 = arith.constant 24 : index
      %c0_119 = arith.constant 0 : index
      %94 = vector.load %arg4[%c24, %c0_119] : memref<216x8xbf16, #tpu.memory_space<vmem>>, vector<24x8xbf16>
      %cst_120 = arith.constant dense<0.000000e+00> : vector<64x8xf32>
      %95 = tpu.matmul %93, %94, %cst_120 {dimension_numbers = #tpu.dot_dimension_numbers<[1], [0], [0], [1], [0, 0, 1, 1], [], []>} : vector<64x24xbf16>, vector<24x8xbf16>, vector<64x8xf32> -> vector<64x8xf32>
      %96 = arith.addf %82, %95 : vector<64x8xf32>
      %c0_i32_121 = arith.constant 0 : i32
      %97 = arith.addi %arg21, %c0_i32_121 : i32
      %98 = arith.index_cast %97 : i32 to index
      %c2_122 = arith.constant 2 : index
      %c0_123 = arith.constant 0 : index
      %c0_124 = arith.constant 0 : index
      %99 = vector.load %arg18[%98, %c2_122, %c0_123, %c0_124] : memref<10x10x10x8xbf16, #tpu.memory_space<vmem>>, vector<1x8x8x8xbf16>
      %c0_i32_125 = arith.constant 0 : i32
      %100 = arith.addi %arg21, %c0_i32_125 : i32
      %101 = arith.index_cast %100 : i32 to index
      %c2_126 = arith.constant 2 : index
      %c1_127 = arith.constant 1 : index
      %c0_128 = arith.constant 0 : index
      %102 = vector.load %arg18[%101, %c2_126, %c1_127, %c0_128] : memref<10x10x10x8xbf16, #tpu.memory_space<vmem>>, vector<1x8x8x8xbf16>
      %c0_i32_129 = arith.constant 0 : i32
      %103 = arith.addi %arg21, %c0_i32_129 : i32
      %104 = arith.index_cast %103 : i32 to index
      %c2_130 = arith.constant 2 : index
      %c2_131 = arith.constant 2 : index
      %c0_132 = arith.constant 0 : index
      %105 = vector.load %arg18[%104, %c2_130, %c2_131, %c0_132] : memref<10x10x10x8xbf16, #tpu.memory_space<vmem>>, vector<1x8x8x8xbf16>
      %106 = tpu.concatenate %99, %102, %105 in 3 : vector<1x8x8x8xbf16>, vector<1x8x8x8xbf16>, vector<1x8x8x8xbf16> -> vector<1x8x8x24xbf16>
      %107 = vector.shape_cast %106 : vector<1x8x8x24xbf16> to vector<64x24xbf16>
      %c48 = arith.constant 48 : index
      %c0_133 = arith.constant 0 : index
      %108 = vector.load %arg4[%c48, %c0_133] : memref<216x8xbf16, #tpu.memory_space<vmem>>, vector<24x8xbf16>
      %cst_134 = arith.constant dense<0.000000e+00> : vector<64x8xf32>
      %109 = tpu.matmul %107, %108, %cst_134 {dimension_numbers = #tpu.dot_dimension_numbers<[1], [0], [0], [1], [0, 0, 1, 1], [], []>} : vector<64x24xbf16>, vector<24x8xbf16>, vector<64x8xf32> -> vector<64x8xf32>
      %110 = arith.addf %96, %109 : vector<64x8xf32>
      %c1_i32_135 = arith.constant 1 : i32
      %111 = arith.addi %arg21, %c1_i32_135 : i32
      %112 = arith.index_cast %111 : i32 to index
      %c0_136 = arith.constant 0 : index
      %c0_137 = arith.constant 0 : index
      %c0_138 = arith.constant 0 : index
      %113 = vector.load %arg18[%112, %c0_136, %c0_137, %c0_138] : memref<10x10x10x8xbf16, #tpu.memory_space<vmem>>, vector<1x8x8x8xbf16>
      %c1_i32_139 = arith.constant 1 : i32
      %114 = arith.addi %arg21, %c1_i32_139 : i32
      %115 = arith.index_cast %114 : i32 to index
      %c0_140 = arith.constant 0 : index
      %c1_141 = arith.constant 1 : index
      %c0_142 = arith.constant 0 : index
      %116 = vector.load %arg18[%115, %c0_140, %c1_141, %c0_142] : memref<10x10x10x8xbf16, #tpu.memory_space<vmem>>, vector<1x8x8x8xbf16>
      %c1_i32_143 = arith.constant 1 : i32
      %117 = arith.addi %arg21, %c1_i32_143 : i32
      %118 = arith.index_cast %117 : i32 to index
      %c0_144 = arith.constant 0 : index
      %c2_145 = arith.constant 2 : index
      %c0_146 = arith.constant 0 : index
      %119 = vector.load %arg18[%118, %c0_144, %c2_145, %c0_146] : memref<10x10x10x8xbf16, #tpu.memory_space<vmem>>, vector<1x8x8x8xbf16>
      %120 = tpu.concatenate %113, %116, %119 in 3 : vector<1x8x8x8xbf16>, vector<1x8x8x8xbf16>, vector<1x8x8x8xbf16> -> vector<1x8x8x24xbf16>
      %121 = vector.shape_cast %120 : vector<1x8x8x24xbf16> to vector<64x24xbf16>
      %c72 = arith.constant 72 : index
      %c0_147 = arith.constant 0 : index
      %122 = vector.load %arg4[%c72, %c0_147] : memref<216x8xbf16, #tpu.memory_space<vmem>>, vector<24x8xbf16>
      %cst_148 = arith.constant dense<0.000000e+00> : vector<64x8xf32>
      %123 = tpu.matmul %121, %122, %cst_148 {dimension_numbers = #tpu.dot_dimension_numbers<[1], [0], [0], [1], [0, 0, 1, 1], [], []>} : vector<64x24xbf16>, vector<24x8xbf16>, vector<64x8xf32> -> vector<64x8xf32>
      %124 = arith.addf %110, %123 : vector<64x8xf32>
      %c1_i32_149 = arith.constant 1 : i32
      %125 = arith.addi %arg21, %c1_i32_149 : i32
      %126 = arith.index_cast %125 : i32 to index
      %c1_150 = arith.constant 1 : index
      %c0_151 = arith.constant 0 : index
      %c0_152 = arith.constant 0 : index
      %127 = vector.load %arg18[%126, %c1_150, %c0_151, %c0_152] : memref<10x10x10x8xbf16, #tpu.memory_space<vmem>>, vector<1x8x8x8xbf16>
      %c1_i32_153 = arith.constant 1 : i32
      %128 = arith.addi %arg21, %c1_i32_153 : i32
      %129 = arith.index_cast %128 : i32 to index
      %c1_154 = arith.constant 1 : index
      %c1_155 = arith.constant 1 : index
      %c0_156 = arith.constant 0 : index
      %130 = vector.load %arg18[%129, %c1_154, %c1_155, %c0_156] : memref<10x10x10x8xbf16, #tpu.memory_space<vmem>>, vector<1x8x8x8xbf16>
      %c1_i32_157 = arith.constant 1 : i32
      %131 = arith.addi %arg21, %c1_i32_157 : i32
      %132 = arith.index_cast %131 : i32 to index
      %c1_158 = arith.constant 1 : index
      %c2_159 = arith.constant 2 : index
      %c0_160 = arith.constant 0 : index
      %133 = vector.load %arg18[%132, %c1_158, %c2_159, %c0_160] : memref<10x10x10x8xbf16, #tpu.memory_space<vmem>>, vector<1x8x8x8xbf16>
      %134 = tpu.concatenate %127, %130, %133 in 3 : vector<1x8x8x8xbf16>, vector<1x8x8x8xbf16>, vector<1x8x8x8xbf16> -> vector<1x8x8x24xbf16>
      %135 = vector.shape_cast %134 : vector<1x8x8x24xbf16> to vector<64x24xbf16>
      %c96 = arith.constant 96 : index
      %c0_161 = arith.constant 0 : index
      %136 = vector.load %arg4[%c96, %c0_161] : memref<216x8xbf16, #tpu.memory_space<vmem>>, vector<24x8xbf16>
      %cst_162 = arith.constant dense<0.000000e+00> : vector<64x8xf32>
      %137 = tpu.matmul %135, %136, %cst_162 {dimension_numbers = #tpu.dot_dimension_numbers<[1], [0], [0], [1], [0, 0, 1, 1], [], []>} : vector<64x24xbf16>, vector<24x8xbf16>, vector<64x8xf32> -> vector<64x8xf32>
      %138 = arith.addf %124, %137 : vector<64x8xf32>
      %c1_i32_163 = arith.constant 1 : i32
      %139 = arith.addi %arg21, %c1_i32_163 : i32
      %140 = arith.index_cast %139 : i32 to index
      %c2_164 = arith.constant 2 : index
      %c0_165 = arith.constant 0 : index
      %c0_166 = arith.constant 0 : index
      %141 = vector.load %arg18[%140, %c2_164, %c0_165, %c0_166] : memref<10x10x10x8xbf16, #tpu.memory_space<vmem>>, vector<1x8x8x8xbf16>
      %c1_i32_167 = arith.constant 1 : i32
      %142 = arith.addi %arg21, %c1_i32_167 : i32
      %143 = arith.index_cast %142 : i32 to index
      %c2_168 = arith.constant 2 : index
      %c1_169 = arith.constant 1 : index
      %c0_170 = arith.constant 0 : index
      %144 = vector.load %arg18[%143, %c2_168, %c1_169, %c0_170] : memref<10x10x10x8xbf16, #tpu.memory_space<vmem>>, vector<1x8x8x8xbf16>
      %c1_i32_171 = arith.constant 1 : i32
      %145 = arith.addi %arg21, %c1_i32_171 : i32
      %146 = arith.index_cast %145 : i32 to index
      %c2_172 = arith.constant 2 : index
      %c2_173 = arith.constant 2 : index
      %c0_174 = arith.constant 0 : index
      %147 = vector.load %arg18[%146, %c2_172, %c2_173, %c0_174] : memref<10x10x10x8xbf16, #tpu.memory_space<vmem>>, vector<1x8x8x8xbf16>
      %148 = tpu.concatenate %141, %144, %147 in 3 : vector<1x8x8x8xbf16>, vector<1x8x8x8xbf16>, vector<1x8x8x8xbf16> -> vector<1x8x8x24xbf16>
      %149 = vector.shape_cast %148 : vector<1x8x8x24xbf16> to vector<64x24xbf16>
      %c120 = arith.constant 120 : index
      %c0_175 = arith.constant 0 : index
      %150 = vector.load %arg4[%c120, %c0_175] : memref<216x8xbf16, #tpu.memory_space<vmem>>, vector<24x8xbf16>
      %cst_176 = arith.constant dense<0.000000e+00> : vector<64x8xf32>
      %151 = tpu.matmul %149, %150, %cst_176 {dimension_numbers = #tpu.dot_dimension_numbers<[1], [0], [0], [1], [0, 0, 1, 1], [], []>} : vector<64x24xbf16>, vector<24x8xbf16>, vector<64x8xf32> -> vector<64x8xf32>
      %152 = arith.addf %138, %151 : vector<64x8xf32>
      %c2_i32 = arith.constant 2 : i32
      %153 = arith.addi %arg21, %c2_i32 : i32
      %154 = arith.index_cast %153 : i32 to index
      %c0_177 = arith.constant 0 : index
      %c0_178 = arith.constant 0 : index
      %c0_179 = arith.constant 0 : index
      %155 = vector.load %arg18[%154, %c0_177, %c0_178, %c0_179] : memref<10x10x10x8xbf16, #tpu.memory_space<vmem>>, vector<1x8x8x8xbf16>
      %c2_i32_180 = arith.constant 2 : i32
      %156 = arith.addi %arg21, %c2_i32_180 : i32
      %157 = arith.index_cast %156 : i32 to index
      %c0_181 = arith.constant 0 : index
      %c1_182 = arith.constant 1 : index
      %c0_183 = arith.constant 0 : index
      %158 = vector.load %arg18[%157, %c0_181, %c1_182, %c0_183] : memref<10x10x10x8xbf16, #tpu.memory_space<vmem>>, vector<1x8x8x8xbf16>
      %c2_i32_184 = arith.constant 2 : i32
      %159 = arith.addi %arg21, %c2_i32_184 : i32
      %160 = arith.index_cast %159 : i32 to index
      %c0_185 = arith.constant 0 : index
      %c2_186 = arith.constant 2 : index
      %c0_187 = arith.constant 0 : index
      %161 = vector.load %arg18[%160, %c0_185, %c2_186, %c0_187] : memref<10x10x10x8xbf16, #tpu.memory_space<vmem>>, vector<1x8x8x8xbf16>
      %162 = tpu.concatenate %155, %158, %161 in 3 : vector<1x8x8x8xbf16>, vector<1x8x8x8xbf16>, vector<1x8x8x8xbf16> -> vector<1x8x8x24xbf16>
      %163 = vector.shape_cast %162 : vector<1x8x8x24xbf16> to vector<64x24xbf16>
      %c144 = arith.constant 144 : index
      %c0_188 = arith.constant 0 : index
      %164 = vector.load %arg4[%c144, %c0_188] : memref<216x8xbf16, #tpu.memory_space<vmem>>, vector<24x8xbf16>
      %cst_189 = arith.constant dense<0.000000e+00> : vector<64x8xf32>
      %165 = tpu.matmul %163, %164, %cst_189 {dimension_numbers = #tpu.dot_dimension_numbers<[1], [0], [0], [1], [0, 0, 1, 1], [], []>} : vector<64x24xbf16>, vector<24x8xbf16>, vector<64x8xf32> -> vector<64x8xf32>
      %166 = arith.addf %152, %165 : vector<64x8xf32>
      %c2_i32_190 = arith.constant 2 : i32
      %167 = arith.addi %arg21, %c2_i32_190 : i32
      %168 = arith.index_cast %167 : i32 to index
      %c1_191 = arith.constant 1 : index
      %c0_192 = arith.constant 0 : index
      %c0_193 = arith.constant 0 : index
      %169 = vector.load %arg18[%168, %c1_191, %c0_192, %c0_193] : memref<10x10x10x8xbf16, #tpu.memory_space<vmem>>, vector<1x8x8x8xbf16>
      %c2_i32_194 = arith.constant 2 : i32
      %170 = arith.addi %arg21, %c2_i32_194 : i32
      %171 = arith.index_cast %170 : i32 to index
      %c1_195 = arith.constant 1 : index
      %c1_196 = arith.constant 1 : index
      %c0_197 = arith.constant 0 : index
      %172 = vector.load %arg18[%171, %c1_195, %c1_196, %c0_197] : memref<10x10x10x8xbf16, #tpu.memory_space<vmem>>, vector<1x8x8x8xbf16>
      %c2_i32_198 = arith.constant 2 : i32
      %173 = arith.addi %arg21, %c2_i32_198 : i32
      %174 = arith.index_cast %173 : i32 to index
      %c1_199 = arith.constant 1 : index
      %c2_200 = arith.constant 2 : index
      %c0_201 = arith.constant 0 : index
      %175 = vector.load %arg18[%174, %c1_199, %c2_200, %c0_201] : memref<10x10x10x8xbf16, #tpu.memory_space<vmem>>, vector<1x8x8x8xbf16>
      %176 = tpu.concatenate %169, %172, %175 in 3 : vector<1x8x8x8xbf16>, vector<1x8x8x8xbf16>, vector<1x8x8x8xbf16> -> vector<1x8x8x24xbf16>
      %177 = vector.shape_cast %176 : vector<1x8x8x24xbf16> to vector<64x24xbf16>
      %c168 = arith.constant 168 : index
      %c0_202 = arith.constant 0 : index
      %178 = vector.load %arg4[%c168, %c0_202] : memref<216x8xbf16, #tpu.memory_space<vmem>>, vector<24x8xbf16>
      %cst_203 = arith.constant dense<0.000000e+00> : vector<64x8xf32>
      %179 = tpu.matmul %177, %178, %cst_203 {dimension_numbers = #tpu.dot_dimension_numbers<[1], [0], [0], [1], [0, 0, 1, 1], [], []>} : vector<64x24xbf16>, vector<24x8xbf16>, vector<64x8xf32> -> vector<64x8xf32>
      %180 = arith.addf %166, %179 : vector<64x8xf32>
      %c2_i32_204 = arith.constant 2 : i32
      %181 = arith.addi %arg21, %c2_i32_204 : i32
      %182 = arith.index_cast %181 : i32 to index
      %c2_205 = arith.constant 2 : index
      %c0_206 = arith.constant 0 : index
      %c0_207 = arith.constant 0 : index
      %183 = vector.load %arg18[%182, %c2_205, %c0_206, %c0_207] : memref<10x10x10x8xbf16, #tpu.memory_space<vmem>>, vector<1x8x8x8xbf16>
      %c2_i32_208 = arith.constant 2 : i32
      %184 = arith.addi %arg21, %c2_i32_208 : i32
      %185 = arith.index_cast %184 : i32 to index
      %c2_209 = arith.constant 2 : index
      %c1_210 = arith.constant 1 : index
      %c0_211 = arith.constant 0 : index
      %186 = vector.load %arg18[%185, %c2_209, %c1_210, %c0_211] : memref<10x10x10x8xbf16, #tpu.memory_space<vmem>>, vector<1x8x8x8xbf16>
      %c2_i32_212 = arith.constant 2 : i32
      %187 = arith.addi %arg21, %c2_i32_212 : i32
      %188 = arith.index_cast %187 : i32 to index
      %c2_213 = arith.constant 2 : index
      %c2_214 = arith.constant 2 : index
      %c0_215 = arith.constant 0 : index
      %189 = vector.load %arg18[%188, %c2_213, %c2_214, %c0_215] : memref<10x10x10x8xbf16, #tpu.memory_space<vmem>>, vector<1x8x8x8xbf16>
      %190 = tpu.concatenate %183, %186, %189 in 3 : vector<1x8x8x8xbf16>, vector<1x8x8x8xbf16>, vector<1x8x8x8xbf16> -> vector<1x8x8x24xbf16>
      %191 = vector.shape_cast %190 : vector<1x8x8x24xbf16> to vector<64x24xbf16>
      %c192 = arith.constant 192 : index
      %c0_216 = arith.constant 0 : index
      %192 = vector.load %arg4[%c192, %c0_216] : memref<216x8xbf16, #tpu.memory_space<vmem>>, vector<24x8xbf16>
      %cst_217 = arith.constant dense<0.000000e+00> : vector<64x8xf32>
      %193 = tpu.matmul %191, %192, %cst_217 {dimension_numbers = #tpu.dot_dimension_numbers<[1], [0], [0], [1], [0, 0, 1, 1], [], []>} : vector<64x24xbf16>, vector<24x8xbf16>, vector<64x8xf32> -> vector<64x8xf32>
      %194 = arith.addf %180, %193 : vector<64x8xf32>
      %195 = vector.shape_cast %194 : vector<64x8xf32> to vector<1x64x8xf32>
      %196 = arith.index_cast %arg21 : i32 to index
      %c0_218 = arith.constant 0 : index
      %c0_219 = arith.constant 0 : index
      %197 = vector.load %arg19[%196, %c0_218, %c0_219] : memref<8x64x8xf32, #tpu.memory_space<vmem>>, vector<1x64x8xf32>
      tpu.vector_store %arg19[%196, %c0_218, %c0_219], %195 {strides = array<i32>} : memref<8x64x8xf32, #tpu.memory_space<vmem>>, vector<1x64x8xf32>,
      %cst_220 = arith.constant dense<0.000000e+00> : vector<8xf32>
      %198 = vector.multi_reduction <add>, %194, %cst_220 [0] : vector<64x8xf32> to vector<8xf32>
      %199 = vector.shape_cast %198 : vector<8xf32> to vector<1x8xf32>
      %200 = arith.addf %arg22, %199 : vector<1x8xf32>
      scf.yield %200 : vector<1x8xf32>
    }
    %c8_i32_29 = arith.constant 8 : i32
    %c0_30 = arith.constant 0 : index
    %c0_31 = arith.constant 0 : index
    %13 = vector.load %arg16[%c0_30, %c0_31] : memref<8x8xf32, #tpu.memory_space<vmem>>, vector<8x8xf32>
    %cst_32 = arith.constant dense<0.000000e+00> : vector<1x8xf32>
    %14 = tpu.matmul %12, %13, %cst_32 {dimension_numbers = #tpu.dot_dimension_numbers<[1], [0], [0], [1], [0, 0, 1, 1], [], []>} : vector<1x8xf32>, vector<8x8xf32>, vector<1x8xf32> -> vector<1x8xf32>
    %cst_33 = arith.constant 0.000000e+00 : f32
    %15 = vector.broadcast %cst_33 : f32 to vector<1x8xf32>
    %c0_i32_34 = arith.constant 0 : i32
    %c8_i32_35 = arith.constant 8 : i32
    %16 = arith.addi %c0_i32_34, %c8_i32_35 : i32
    %c1_i32_36 = arith.constant 1 : i32
    %17 = scf.for %arg21 = %c0_i32_34 to %16 step %c1_i32_36 iter_args(%arg22 = %15) -> (vector<1x8xf32>)  : i32 {
      %68 = arith.index_cast %arg21 : i32 to index
      %c0_93 = arith.constant 0 : index
      %c0_94 = arith.constant 0 : index
      %69 = vector.load %arg19[%68, %c0_93, %c0_94] : memref<8x64x8xf32, #tpu.memory_space<vmem>>, vector<1x64x8xf32>
      %70 = vector.shape_cast %69 : vector<1x64x8xf32> to vector<64x8xf32>
      %71 = vector.broadcast %14 : vector<1x8xf32> to vector<64x8xf32>
      %72 = arith.subf %70, %71 : vector<64x8xf32>
      %73 = arith.mulf %72, %72 : vector<64x8xf32>
      %cst_95 = arith.constant dense<0.000000e+00> : vector<8xf32>
      %74 = vector.multi_reduction <add>, %73, %cst_95 [0] : vector<64x8xf32> to vector<8xf32>
      %75 = vector.shape_cast %74 : vector<8xf32> to vector<1x8xf32>
      %76 = arith.addf %arg22, %75 : vector<1x8xf32>
      scf.yield %76 : vector<1x8xf32>
    }
    %c8_i32_37 = arith.constant 8 : i32
    %c0_38 = arith.constant 0 : index
    %c0_39 = arith.constant 0 : index
    %18 = vector.load %arg16[%c0_38, %c0_39] : memref<8x8xf32, #tpu.memory_space<vmem>>, vector<8x8xf32>
    %cst_40 = arith.constant dense<0.000000e+00> : vector<1x8xf32>
    %19 = tpu.matmul %17, %18, %cst_40 {dimension_numbers = #tpu.dot_dimension_numbers<[1], [0], [0], [1], [0, 0, 1, 1], [], []>} : vector<1x8xf32>, vector<8x8xf32>, vector<1x8xf32> -> vector<1x8xf32>
    %c0_41 = arith.constant 0 : index
    %c0_42 = arith.constant 0 : index
    %20 = vector.load %arg5[%c0_41, %c0_42] : memref<1x8xf32, #tpu.memory_space<vmem>>, vector<1x8xf32>
    %cst_43 = arith.constant 9.99999974E-6 : f32
    %21 = vector.broadcast %cst_43 : f32 to vector<1x8xf32>
    %22 = arith.addf %19, %21 : vector<1x8xf32>
    %23 = math.rsqrt %22 : vector<1x8xf32>
    %24 = arith.mulf %20, %23 : vector<1x8xf32>
    %c0_44 = arith.constant 0 : index
    %c0_45 = arith.constant 0 : index
    %25 = vector.load %arg6[%c0_44, %c0_45] : memref<1x8xf32, #tpu.memory_space<vmem>>, vector<1x8xf32>
    %26 = arith.mulf %14, %24 : vector<1x8xf32>
    %27 = arith.subf %25, %26 : vector<1x8xf32>
    %c0_i32_46 = arith.constant 0 : i32
    %c8_i32_47 = arith.constant 8 : i32
    %28 = arith.addi %c0_i32_46, %c8_i32_47 : i32
    %c1_i32_48 = arith.constant 1 : i32
    scf.for %arg21 = %c0_i32_46 to %28 step %c1_i32_48  : i32 {
      %68 = arith.index_cast %arg21 : i32 to index
      %c0_93 = arith.constant 0 : index
      %c0_94 = arith.constant 0 : index
      %69 = vector.load %arg19[%68, %c0_93, %c0_94] : memref<8x64x8xf32, #tpu.memory_space<vmem>>, vector<1x64x8xf32>
      %70 = vector.shape_cast %69 : vector<1x64x8xf32> to vector<64x8xf32>
      %71 = vector.broadcast %24 : vector<1x8xf32> to vector<64x8xf32>
      %72 = arith.mulf %70, %71 : vector<64x8xf32>
      %73 = vector.broadcast %27 : vector<1x8xf32> to vector<64x8xf32>
      %74 = arith.addf %72, %73 : vector<64x8xf32>
      %cst_95 = arith.constant 0.000000e+00 : f32
      %75 = vector.broadcast %cst_95 : f32 to vector<64x8xf32>
      %76 = arith.cmpf ogt, %74, %75 : vector<64x8xf32>
      %cst_96 = arith.constant 0.000000e+00 : f32
      %77 = vector.broadcast %cst_96 : f32 to vector<64x8xf32>
      %78 = arith.minimumf %74, %77 : vector<64x8xf32>
      %79 = math.exp %78 : vector<64x8xf32>
      %cst_97 = arith.constant 1.000000e+00 : f32
      %80 = vector.broadcast %cst_97 : f32 to vector<64x8xf32>
      %81 = arith.subf %79, %80 : vector<64x8xf32>
      %82 = arith.select %76, %74, %81 : vector<64x8xi1>, vector<64x8xf32>
      %83 = arith.truncf %82 : vector<64x8xf32> to vector<64x8xbf16>
      %84 = vector.shape_cast %83 : vector<64x8xbf16> to vector<1x8x8x8xbf16>
      %c1_i32_98 = arith.constant 1 : i32
      %85 = arith.addi %arg21, %c1_i32_98 : i32
      %86 = arith.index_cast %85 : i32 to index
      %c1 = arith.constant 1 : index
      %c1_99 = arith.constant 1 : index
      %c0_100 = arith.constant 0 : index
      %87 = vector.load %arg18[%86, %c1, %c1_99, %c0_100] : memref<10x10x10x8xbf16, #tpu.memory_space<vmem>>, vector<1x8x8x8xbf16>
      tpu.vector_store %arg18[%86, %c1, %c1_99, %c0_100], %84 {strides = array<i32>} : memref<10x10x10x8xbf16, #tpu.memory_space<vmem>>, vector<1x8x8x8xbf16>,
    }
    %c8_i32_49 = arith.constant 8 : i32
    %cst_50 = arith.constant 0.000000e+00 : f32
    %29 = vector.broadcast %cst_50 : f32 to vector<1x8xf32>
    %c0_i32_51 = arith.constant 0 : i32
    %c8_i32_52 = arith.constant 8 : i32
    %30 = arith.addi %c0_i32_51, %c8_i32_52 : i32
    %c1_i32_53 = arith.constant 1 : i32
    %31 = scf.for %arg21 = %c0_i32_51 to %30 step %c1_i32_53 iter_args(%arg22 = %29) -> (vector<1x8xf32>)  : i32 {
      %cst_93 = arith.constant 0.000000e+00 : f32
      %68 = vector.broadcast %cst_93 : f32 to vector<64x8xf32>
      %c0_i32_94 = arith.constant 0 : i32
      %69 = arith.addi %arg21, %c0_i32_94 : i32
      %70 = arith.index_cast %69 : i32 to index
      %c0_95 = arith.constant 0 : index
      %c0_96 = arith.constant 0 : index
      %c0_97 = arith.constant 0 : index
      %71 = vector.load %arg18[%70, %c0_95, %c0_96, %c0_97] : memref<10x10x10x8xbf16, #tpu.memory_space<vmem>>, vector<1x8x8x8xbf16>
      %c0_i32_98 = arith.constant 0 : i32
      %72 = arith.addi %arg21, %c0_i32_98 : i32
      %73 = arith.index_cast %72 : i32 to index
      %c0_99 = arith.constant 0 : index
      %c1 = arith.constant 1 : index
      %c0_100 = arith.constant 0 : index
      %74 = vector.load %arg18[%73, %c0_99, %c1, %c0_100] : memref<10x10x10x8xbf16, #tpu.memory_space<vmem>>, vector<1x8x8x8xbf16>
      %c0_i32_101 = arith.constant 0 : i32
      %75 = arith.addi %arg21, %c0_i32_101 : i32
      %76 = arith.index_cast %75 : i32 to index
      %c0_102 = arith.constant 0 : index
      %c2 = arith.constant 2 : index
      %c0_103 = arith.constant 0 : index
      %77 = vector.load %arg18[%76, %c0_102, %c2, %c0_103] : memref<10x10x10x8xbf16, #tpu.memory_space<vmem>>, vector<1x8x8x8xbf16>
      %78 = tpu.concatenate %71, %74, %77 in 3 : vector<1x8x8x8xbf16>, vector<1x8x8x8xbf16>, vector<1x8x8x8xbf16> -> vector<1x8x8x24xbf16>
      %79 = vector.shape_cast %78 : vector<1x8x8x24xbf16> to vector<64x24xbf16>
      %c0_104 = arith.constant 0 : index
      %c0_105 = arith.constant 0 : index
      %80 = vector.load %arg7[%c0_104, %c0_105] : memref<216x8xbf16, #tpu.memory_space<vmem>>, vector<24x8xbf16>
      %cst_106 = arith.constant dense<0.000000e+00> : vector<64x8xf32>
      %81 = tpu.matmul %79, %80, %cst_106 {dimension_numbers = #tpu.dot_dimension_numbers<[1], [0], [0], [1], [0, 0, 1, 1], [], []>} : vector<64x24xbf16>, vector<24x8xbf16>, vector<64x8xf32> -> vector<64x8xf32>
      %82 = arith.addf %68, %81 : vector<64x8xf32>
      %c0_i32_107 = arith.constant 0 : i32
      %83 = arith.addi %arg21, %c0_i32_107 : i32
      %84 = arith.index_cast %83 : i32 to index
      %c1_108 = arith.constant 1 : index
      %c0_109 = arith.constant 0 : index
      %c0_110 = arith.constant 0 : index
      %85 = vector.load %arg18[%84, %c1_108, %c0_109, %c0_110] : memref<10x10x10x8xbf16, #tpu.memory_space<vmem>>, vector<1x8x8x8xbf16>
      %c0_i32_111 = arith.constant 0 : i32
      %86 = arith.addi %arg21, %c0_i32_111 : i32
      %87 = arith.index_cast %86 : i32 to index
      %c1_112 = arith.constant 1 : index
      %c1_113 = arith.constant 1 : index
      %c0_114 = arith.constant 0 : index
      %88 = vector.load %arg18[%87, %c1_112, %c1_113, %c0_114] : memref<10x10x10x8xbf16, #tpu.memory_space<vmem>>, vector<1x8x8x8xbf16>
      %c0_i32_115 = arith.constant 0 : i32
      %89 = arith.addi %arg21, %c0_i32_115 : i32
      %90 = arith.index_cast %89 : i32 to index
      %c1_116 = arith.constant 1 : index
      %c2_117 = arith.constant 2 : index
      %c0_118 = arith.constant 0 : index
      %91 = vector.load %arg18[%90, %c1_116, %c2_117, %c0_118] : memref<10x10x10x8xbf16, #tpu.memory_space<vmem>>, vector<1x8x8x8xbf16>
      %92 = tpu.concatenate %85, %88, %91 in 3 : vector<1x8x8x8xbf16>, vector<1x8x8x8xbf16>, vector<1x8x8x8xbf16> -> vector<1x8x8x24xbf16>
      %93 = vector.shape_cast %92 : vector<1x8x8x24xbf16> to vector<64x24xbf16>
      %c24 = arith.constant 24 : index
      %c0_119 = arith.constant 0 : index
      %94 = vector.load %arg7[%c24, %c0_119] : memref<216x8xbf16, #tpu.memory_space<vmem>>, vector<24x8xbf16>
      %cst_120 = arith.constant dense<0.000000e+00> : vector<64x8xf32>
      %95 = tpu.matmul %93, %94, %cst_120 {dimension_numbers = #tpu.dot_dimension_numbers<[1], [0], [0], [1], [0, 0, 1, 1], [], []>} : vector<64x24xbf16>, vector<24x8xbf16>, vector<64x8xf32> -> vector<64x8xf32>
      %96 = arith.addf %82, %95 : vector<64x8xf32>
      %c0_i32_121 = arith.constant 0 : i32
      %97 = arith.addi %arg21, %c0_i32_121 : i32
      %98 = arith.index_cast %97 : i32 to index
      %c2_122 = arith.constant 2 : index
      %c0_123 = arith.constant 0 : index
      %c0_124 = arith.constant 0 : index
      %99 = vector.load %arg18[%98, %c2_122, %c0_123, %c0_124] : memref<10x10x10x8xbf16, #tpu.memory_space<vmem>>, vector<1x8x8x8xbf16>
      %c0_i32_125 = arith.constant 0 : i32
      %100 = arith.addi %arg21, %c0_i32_125 : i32
      %101 = arith.index_cast %100 : i32 to index
      %c2_126 = arith.constant 2 : index
      %c1_127 = arith.constant 1 : index
      %c0_128 = arith.constant 0 : index
      %102 = vector.load %arg18[%101, %c2_126, %c1_127, %c0_128] : memref<10x10x10x8xbf16, #tpu.memory_space<vmem>>, vector<1x8x8x8xbf16>
      %c0_i32_129 = arith.constant 0 : i32
      %103 = arith.addi %arg21, %c0_i32_129 : i32
      %104 = arith.index_cast %103 : i32 to index
      %c2_130 = arith.constant 2 : index
      %c2_131 = arith.constant 2 : index
      %c0_132 = arith.constant 0 : index
      %105 = vector.load %arg18[%104, %c2_130, %c2_131, %c0_132] : memref<10x10x10x8xbf16, #tpu.memory_space<vmem>>, vector<1x8x8x8xbf16>
      %106 = tpu.concatenate %99, %102, %105 in 3 : vector<1x8x8x8xbf16>, vector<1x8x8x8xbf16>, vector<1x8x8x8xbf16> -> vector<1x8x8x24xbf16>
      %107 = vector.shape_cast %106 : vector<1x8x8x24xbf16> to vector<64x24xbf16>
      %c48 = arith.constant 48 : index
      %c0_133 = arith.constant 0 : index
      %108 = vector.load %arg7[%c48, %c0_133] : memref<216x8xbf16, #tpu.memory_space<vmem>>, vector<24x8xbf16>
      %cst_134 = arith.constant dense<0.000000e+00> : vector<64x8xf32>
      %109 = tpu.matmul %107, %108, %cst_134 {dimension_numbers = #tpu.dot_dimension_numbers<[1], [0], [0], [1], [0, 0, 1, 1], [], []>} : vector<64x24xbf16>, vector<24x8xbf16>, vector<64x8xf32> -> vector<64x8xf32>
      %110 = arith.addf %96, %109 : vector<64x8xf32>
      %c1_i32_135 = arith.constant 1 : i32
      %111 = arith.addi %arg21, %c1_i32_135 : i32
      %112 = arith.index_cast %111 : i32 to index
      %c0_136 = arith.constant 0 : index
      %c0_137 = arith.constant 0 : index
      %c0_138 = arith.constant 0 : index
      %113 = vector.load %arg18[%112, %c0_136, %c0_137, %c0_138] : memref<10x10x10x8xbf16, #tpu.memory_space<vmem>>, vector<1x8x8x8xbf16>
      %c1_i32_139 = arith.constant 1 : i32
      %114 = arith.addi %arg21, %c1_i32_139 : i32
      %115 = arith.index_cast %114 : i32 to index
      %c0_140 = arith.constant 0 : index
      %c1_141 = arith.constant 1 : index
      %c0_142 = arith.constant 0 : index
      %116 = vector.load %arg18[%115, %c0_140, %c1_141, %c0_142] : memref<10x10x10x8xbf16, #tpu.memory_space<vmem>>, vector<1x8x8x8xbf16>
      %c1_i32_143 = arith.constant 1 : i32
      %117 = arith.addi %arg21, %c1_i32_143 : i32
      %118 = arith.index_cast %117 : i32 to index
      %c0_144 = arith.constant 0 : index
      %c2_145 = arith.constant 2 : index
      %c0_146 = arith.constant 0 : index
      %119 = vector.load %arg18[%118, %c0_144, %c2_145, %c0_146] : memref<10x10x10x8xbf16, #tpu.memory_space<vmem>>, vector<1x8x8x8xbf16>
      %120 = tpu.concatenate %113, %116, %119 in 3 : vector<1x8x8x8xbf16>, vector<1x8x8x8xbf16>, vector<1x8x8x8xbf16> -> vector<1x8x8x24xbf16>
      %121 = vector.shape_cast %120 : vector<1x8x8x24xbf16> to vector<64x24xbf16>
      %c72 = arith.constant 72 : index
      %c0_147 = arith.constant 0 : index
      %122 = vector.load %arg7[%c72, %c0_147] : memref<216x8xbf16, #tpu.memory_space<vmem>>, vector<24x8xbf16>
      %cst_148 = arith.constant dense<0.000000e+00> : vector<64x8xf32>
      %123 = tpu.matmul %121, %122, %cst_148 {dimension_numbers = #tpu.dot_dimension_numbers<[1], [0], [0], [1], [0, 0, 1, 1], [], []>} : vector<64x24xbf16>, vector<24x8xbf16>, vector<64x8xf32> -> vector<64x8xf32>
      %124 = arith.addf %110, %123 : vector<64x8xf32>
      %c1_i32_149 = arith.constant 1 : i32
      %125 = arith.addi %arg21, %c1_i32_149 : i32
      %126 = arith.index_cast %125 : i32 to index
      %c1_150 = arith.constant 1 : index
      %c0_151 = arith.constant 0 : index
      %c0_152 = arith.constant 0 : index
      %127 = vector.load %arg18[%126, %c1_150, %c0_151, %c0_152] : memref<10x10x10x8xbf16, #tpu.memory_space<vmem>>, vector<1x8x8x8xbf16>
      %c1_i32_153 = arith.constant 1 : i32
      %128 = arith.addi %arg21, %c1_i32_153 : i32
      %129 = arith.index_cast %128 : i32 to index
      %c1_154 = arith.constant 1 : index
      %c1_155 = arith.constant 1 : index
      %c0_156 = arith.constant 0 : index
      %130 = vector.load %arg18[%129, %c1_154, %c1_155, %c0_156] : memref<10x10x10x8xbf16, #tpu.memory_space<vmem>>, vector<1x8x8x8xbf16>
      %c1_i32_157 = arith.constant 1 : i32
      %131 = arith.addi %arg21, %c1_i32_157 : i32
      %132 = arith.index_cast %131 : i32 to index
      %c1_158 = arith.constant 1 : index
      %c2_159 = arith.constant 2 : index
      %c0_160 = arith.constant 0 : index
      %133 = vector.load %arg18[%132, %c1_158, %c2_159, %c0_160] : memref<10x10x10x8xbf16, #tpu.memory_space<vmem>>, vector<1x8x8x8xbf16>
      %134 = tpu.concatenate %127, %130, %133 in 3 : vector<1x8x8x8xbf16>, vector<1x8x8x8xbf16>, vector<1x8x8x8xbf16> -> vector<1x8x8x24xbf16>
      %135 = vector.shape_cast %134 : vector<1x8x8x24xbf16> to vector<64x24xbf16>
      %c96 = arith.constant 96 : index
      %c0_161 = arith.constant 0 : index
      %136 = vector.load %arg7[%c96, %c0_161] : memref<216x8xbf16, #tpu.memory_space<vmem>>, vector<24x8xbf16>
      %cst_162 = arith.constant dense<0.000000e+00> : vector<64x8xf32>
      %137 = tpu.matmul %135, %136, %cst_162 {dimension_numbers = #tpu.dot_dimension_numbers<[1], [0], [0], [1], [0, 0, 1, 1], [], []>} : vector<64x24xbf16>, vector<24x8xbf16>, vector<64x8xf32> -> vector<64x8xf32>
      %138 = arith.addf %124, %137 : vector<64x8xf32>
      %c1_i32_163 = arith.constant 1 : i32
      %139 = arith.addi %arg21, %c1_i32_163 : i32
      %140 = arith.index_cast %139 : i32 to index
      %c2_164 = arith.constant 2 : index
      %c0_165 = arith.constant 0 : index
      %c0_166 = arith.constant 0 : index
      %141 = vector.load %arg18[%140, %c2_164, %c0_165, %c0_166] : memref<10x10x10x8xbf16, #tpu.memory_space<vmem>>, vector<1x8x8x8xbf16>
      %c1_i32_167 = arith.constant 1 : i32
      %142 = arith.addi %arg21, %c1_i32_167 : i32
      %143 = arith.index_cast %142 : i32 to index
      %c2_168 = arith.constant 2 : index
      %c1_169 = arith.constant 1 : index
      %c0_170 = arith.constant 0 : index
      %144 = vector.load %arg18[%143, %c2_168, %c1_169, %c0_170] : memref<10x10x10x8xbf16, #tpu.memory_space<vmem>>, vector<1x8x8x8xbf16>
      %c1_i32_171 = arith.constant 1 : i32
      %145 = arith.addi %arg21, %c1_i32_171 : i32
      %146 = arith.index_cast %145 : i32 to index
      %c2_172 = arith.constant 2 : index
      %c2_173 = arith.constant 2 : index
      %c0_174 = arith.constant 0 : index
      %147 = vector.load %arg18[%146, %c2_172, %c2_173, %c0_174] : memref<10x10x10x8xbf16, #tpu.memory_space<vmem>>, vector<1x8x8x8xbf16>
      %148 = tpu.concatenate %141, %144, %147 in 3 : vector<1x8x8x8xbf16>, vector<1x8x8x8xbf16>, vector<1x8x8x8xbf16> -> vector<1x8x8x24xbf16>
      %149 = vector.shape_cast %148 : vector<1x8x8x24xbf16> to vector<64x24xbf16>
      %c120 = arith.constant 120 : index
      %c0_175 = arith.constant 0 : index
      %150 = vector.load %arg7[%c120, %c0_175] : memref<216x8xbf16, #tpu.memory_space<vmem>>, vector<24x8xbf16>
      %cst_176 = arith.constant dense<0.000000e+00> : vector<64x8xf32>
      %151 = tpu.matmul %149, %150, %cst_176 {dimension_numbers = #tpu.dot_dimension_numbers<[1], [0], [0], [1], [0, 0, 1, 1], [], []>} : vector<64x24xbf16>, vector<24x8xbf16>, vector<64x8xf32> -> vector<64x8xf32>
      %152 = arith.addf %138, %151 : vector<64x8xf32>
      %c2_i32 = arith.constant 2 : i32
      %153 = arith.addi %arg21, %c2_i32 : i32
      %154 = arith.index_cast %153 : i32 to index
      %c0_177 = arith.constant 0 : index
      %c0_178 = arith.constant 0 : index
      %c0_179 = arith.constant 0 : index
      %155 = vector.load %arg18[%154, %c0_177, %c0_178, %c0_179] : memref<10x10x10x8xbf16, #tpu.memory_space<vmem>>, vector<1x8x8x8xbf16>
      %c2_i32_180 = arith.constant 2 : i32
      %156 = arith.addi %arg21, %c2_i32_180 : i32
      %157 = arith.index_cast %156 : i32 to index
      %c0_181 = arith.constant 0 : index
      %c1_182 = arith.constant 1 : index
      %c0_183 = arith.constant 0 : index
      %158 = vector.load %arg18[%157, %c0_181, %c1_182, %c0_183] : memref<10x10x10x8xbf16, #tpu.memory_space<vmem>>, vector<1x8x8x8xbf16>
      %c2_i32_184 = arith.constant 2 : i32
      %159 = arith.addi %arg21, %c2_i32_184 : i32
      %160 = arith.index_cast %159 : i32 to index
      %c0_185 = arith.constant 0 : index
      %c2_186 = arith.constant 2 : index
      %c0_187 = arith.constant 0 : index
      %161 = vector.load %arg18[%160, %c0_185, %c2_186, %c0_187] : memref<10x10x10x8xbf16, #tpu.memory_space<vmem>>, vector<1x8x8x8xbf16>
      %162 = tpu.concatenate %155, %158, %161 in 3 : vector<1x8x8x8xbf16>, vector<1x8x8x8xbf16>, vector<1x8x8x8xbf16> -> vector<1x8x8x24xbf16>
      %163 = vector.shape_cast %162 : vector<1x8x8x24xbf16> to vector<64x24xbf16>
      %c144 = arith.constant 144 : index
      %c0_188 = arith.constant 0 : index
      %164 = vector.load %arg7[%c144, %c0_188] : memref<216x8xbf16, #tpu.memory_space<vmem>>, vector<24x8xbf16>
      %cst_189 = arith.constant dense<0.000000e+00> : vector<64x8xf32>
      %165 = tpu.matmul %163, %164, %cst_189 {dimension_numbers = #tpu.dot_dimension_numbers<[1], [0], [0], [1], [0, 0, 1, 1], [], []>} : vector<64x24xbf16>, vector<24x8xbf16>, vector<64x8xf32> -> vector<64x8xf32>
      %166 = arith.addf %152, %165 : vector<64x8xf32>
      %c2_i32_190 = arith.constant 2 : i32
      %167 = arith.addi %arg21, %c2_i32_190 : i32
      %168 = arith.index_cast %167 : i32 to index
      %c1_191 = arith.constant 1 : index
      %c0_192 = arith.constant 0 : index
      %c0_193 = arith.constant 0 : index
      %169 = vector.load %arg18[%168, %c1_191, %c0_192, %c0_193] : memref<10x10x10x8xbf16, #tpu.memory_space<vmem>>, vector<1x8x8x8xbf16>
      %c2_i32_194 = arith.constant 2 : i32
      %170 = arith.addi %arg21, %c2_i32_194 : i32
      %171 = arith.index_cast %170 : i32 to index
      %c1_195 = arith.constant 1 : index
      %c1_196 = arith.constant 1 : index
      %c0_197 = arith.constant 0 : index
      %172 = vector.load %arg18[%171, %c1_195, %c1_196, %c0_197] : memref<10x10x10x8xbf16, #tpu.memory_space<vmem>>, vector<1x8x8x8xbf16>
      %c2_i32_198 = arith.constant 2 : i32
      %173 = arith.addi %arg21, %c2_i32_198 : i32
      %174 = arith.index_cast %173 : i32 to index
      %c1_199 = arith.constant 1 : index
      %c2_200 = arith.constant 2 : index
      %c0_201 = arith.constant 0 : index
      %175 = vector.load %arg18[%174, %c1_199, %c2_200, %c0_201] : memref<10x10x10x8xbf16, #tpu.memory_space<vmem>>, vector<1x8x8x8xbf16>
      %176 = tpu.concatenate %169, %172, %175 in 3 : vector<1x8x8x8xbf16>, vector<1x8x8x8xbf16>, vector<1x8x8x8xbf16> -> vector<1x8x8x24xbf16>
      %177 = vector.shape_cast %176 : vector<1x8x8x24xbf16> to vector<64x24xbf16>
      %c168 = arith.constant 168 : index
      %c0_202 = arith.constant 0 : index
      %178 = vector.load %arg7[%c168, %c0_202] : memref<216x8xbf16, #tpu.memory_space<vmem>>, vector<24x8xbf16>
      %cst_203 = arith.constant dense<0.000000e+00> : vector<64x8xf32>
      %179 = tpu.matmul %177, %178, %cst_203 {dimension_numbers = #tpu.dot_dimension_numbers<[1], [0], [0], [1], [0, 0, 1, 1], [], []>} : vector<64x24xbf16>, vector<24x8xbf16>, vector<64x8xf32> -> vector<64x8xf32>
      %180 = arith.addf %166, %179 : vector<64x8xf32>
      %c2_i32_204 = arith.constant 2 : i32
      %181 = arith.addi %arg21, %c2_i32_204 : i32
      %182 = arith.index_cast %181 : i32 to index
      %c2_205 = arith.constant 2 : index
      %c0_206 = arith.constant 0 : index
      %c0_207 = arith.constant 0 : index
      %183 = vector.load %arg18[%182, %c2_205, %c0_206, %c0_207] : memref<10x10x10x8xbf16, #tpu.memory_space<vmem>>, vector<1x8x8x8xbf16>
      %c2_i32_208 = arith.constant 2 : i32
      %184 = arith.addi %arg21, %c2_i32_208 : i32
      %185 = arith.index_cast %184 : i32 to index
      %c2_209 = arith.constant 2 : index
      %c1_210 = arith.constant 1 : index
      %c0_211 = arith.constant 0 : index
      %186 = vector.load %arg18[%185, %c2_209, %c1_210, %c0_211] : memref<10x10x10x8xbf16, #tpu.memory_space<vmem>>, vector<1x8x8x8xbf16>
      %c2_i32_212 = arith.constant 2 : i32
      %187 = arith.addi %arg21, %c2_i32_212 : i32
      %188 = arith.index_cast %187 : i32 to index
      %c2_213 = arith.constant 2 : index
      %c2_214 = arith.constant 2 : index
      %c0_215 = arith.constant 0 : index
      %189 = vector.load %arg18[%188, %c2_213, %c2_214, %c0_215] : memref<10x10x10x8xbf16, #tpu.memory_space<vmem>>, vector<1x8x8x8xbf16>
      %190 = tpu.concatenate %183, %186, %189 in 3 : vector<1x8x8x8xbf16>, vector<1x8x8x8xbf16>, vector<1x8x8x8xbf16> -> vector<1x8x8x24xbf16>
      %191 = vector.shape_cast %190 : vector<1x8x8x24xbf16> to vector<64x24xbf16>
      %c192 = arith.constant 192 : index
      %c0_216 = arith.constant 0 : index
      %192 = vector.load %arg7[%c192, %c0_216] : memref<216x8xbf16, #tpu.memory_space<vmem>>, vector<24x8xbf16>
      %cst_217 = arith.constant dense<0.000000e+00> : vector<64x8xf32>
      %193 = tpu.matmul %191, %192, %cst_217 {dimension_numbers = #tpu.dot_dimension_numbers<[1], [0], [0], [1], [0, 0, 1, 1], [], []>} : vector<64x24xbf16>, vector<24x8xbf16>, vector<64x8xf32> -> vector<64x8xf32>
      %194 = arith.addf %180, %193 : vector<64x8xf32>
      %195 = vector.shape_cast %194 : vector<64x8xf32> to vector<1x64x8xf32>
      %196 = arith.index_cast %arg21 : i32 to index
      %c0_218 = arith.constant 0 : index
      %c0_219 = arith.constant 0 : index
      %197 = vector.load %arg19[%196, %c0_218, %c0_219] : memref<8x64x8xf32, #tpu.memory_space<vmem>>, vector<1x64x8xf32>
      tpu.vector_store %arg19[%196, %c0_218, %c0_219], %195 {strides = array<i32>} : memref<8x64x8xf32, #tpu.memory_space<vmem>>, vector<1x64x8xf32>,
      %cst_220 = arith.constant dense<0.000000e+00> : vector<8xf32>
      %198 = vector.multi_reduction <add>, %194, %cst_220 [0] : vector<64x8xf32> to vector<8xf32>
      %199 = vector.shape_cast %198 : vector<8xf32> to vector<1x8xf32>
      %200 = arith.addf %arg22, %199 : vector<1x8xf32>
      scf.yield %200 : vector<1x8xf32>
    }
    %c8_i32_54 = arith.constant 8 : i32
    %c0_55 = arith.constant 0 : index
    %c0_56 = arith.constant 0 : index
    %32 = vector.load %arg16[%c0_55, %c0_56] : memref<8x8xf32, #tpu.memory_space<vmem>>, vector<8x8xf32>
    %cst_57 = arith.constant dense<0.000000e+00> : vector<1x8xf32>
    %33 = tpu.matmul %31, %32, %cst_57 {dimension_numbers = #tpu.dot_dimension_numbers<[1], [0], [0], [1], [0, 0, 1, 1], [], []>} : vector<1x8xf32>, vector<8x8xf32>, vector<1x8xf32> -> vector<1x8xf32>
    %cst_58 = arith.constant 0.000000e+00 : f32
    %34 = vector.broadcast %cst_58 : f32 to vector<1x8xf32>
    %c0_i32_59 = arith.constant 0 : i32
    %c8_i32_60 = arith.constant 8 : i32
    %35 = arith.addi %c0_i32_59, %c8_i32_60 : i32
    %c1_i32_61 = arith.constant 1 : i32
    %36 = scf.for %arg21 = %c0_i32_59 to %35 step %c1_i32_61 iter_args(%arg22 = %34) -> (vector<1x8xf32>)  : i32 {
      %68 = arith.index_cast %arg21 : i32 to index
      %c0_93 = arith.constant 0 : index
      %c0_94 = arith.constant 0 : index
      %69 = vector.load %arg19[%68, %c0_93, %c0_94] : memref<8x64x8xf32, #tpu.memory_space<vmem>>, vector<1x64x8xf32>
      %70 = vector.shape_cast %69 : vector<1x64x8xf32> to vector<64x8xf32>
      %71 = vector.broadcast %33 : vector<1x8xf32> to vector<64x8xf32>
      %72 = arith.subf %70, %71 : vector<64x8xf32>
      %73 = arith.mulf %72, %72 : vector<64x8xf32>
      %cst_95 = arith.constant dense<0.000000e+00> : vector<8xf32>
      %74 = vector.multi_reduction <add>, %73, %cst_95 [0] : vector<64x8xf32> to vector<8xf32>
      %75 = vector.shape_cast %74 : vector<8xf32> to vector<1x8xf32>
      %76 = arith.addf %arg22, %75 : vector<1x8xf32>
      scf.yield %76 : vector<1x8xf32>
    }
    %c8_i32_62 = arith.constant 8 : i32
    %c0_63 = arith.constant 0 : index
    %c0_64 = arith.constant 0 : index
    %37 = vector.load %arg16[%c0_63, %c0_64] : memref<8x8xf32, #tpu.memory_space<vmem>>, vector<8x8xf32>
    %cst_65 = arith.constant dense<0.000000e+00> : vector<1x8xf32>
    %38 = tpu.matmul %36, %37, %cst_65 {dimension_numbers = #tpu.dot_dimension_numbers<[1], [0], [0], [1], [0, 0, 1, 1], [], []>} : vector<1x8xf32>, vector<8x8xf32>, vector<1x8xf32> -> vector<1x8xf32>
    %c0_66 = arith.constant 0 : index
    %c0_67 = arith.constant 0 : index
    %39 = vector.load %arg8[%c0_66, %c0_67] : memref<1x8xf32, #tpu.memory_space<vmem>>, vector<1x8xf32>
    %cst_68 = arith.constant 9.99999974E-6 : f32
    %40 = vector.broadcast %cst_68 : f32 to vector<1x8xf32>
    %41 = arith.addf %38, %40 : vector<1x8xf32>
    %42 = math.rsqrt %41 : vector<1x8xf32>
    %43 = arith.mulf %39, %42 : vector<1x8xf32>
    %c0_69 = arith.constant 0 : index
    %c0_70 = arith.constant 0 : index
    %44 = vector.load %arg9[%c0_69, %c0_70] : memref<1x8xf32, #tpu.memory_space<vmem>>, vector<1x8xf32>
    %45 = arith.mulf %33, %43 : vector<1x8xf32>
    %46 = arith.subf %44, %45 : vector<1x8xf32>
    %cst_71 = arith.constant 0.000000e+00 : f32
    %47 = vector.broadcast %cst_71 : f32 to vector<1x8xf32>
    %c0_i32_72 = arith.constant 0 : i32
    %c8_i32_73 = arith.constant 8 : i32
    %48 = arith.addi %c0_i32_72, %c8_i32_73 : i32
    %c1_i32_74 = arith.constant 1 : i32
    %49 = scf.for %arg21 = %c0_i32_72 to %48 step %c1_i32_74 iter_args(%arg22 = %47) -> (vector<1x8xf32>)  : i32 {
      %68 = arith.index_cast %arg21 : i32 to index
      %c0_93 = arith.constant 0 : index
      %c0_94 = arith.constant 0 : index
      %69 = vector.load %arg19[%68, %c0_93, %c0_94] : memref<8x64x8xf32, #tpu.memory_space<vmem>>, vector<1x64x8xf32>
      %70 = vector.shape_cast %69 : vector<1x64x8xf32> to vector<64x8xf32>
      %71 = vector.broadcast %43 : vector<1x8xf32> to vector<64x8xf32>
      %72 = arith.mulf %70, %71 : vector<64x8xf32>
      %73 = vector.broadcast %46 : vector<1x8xf32> to vector<64x8xf32>
      %74 = arith.addf %72, %73 : vector<64x8xf32>
      %75 = arith.index_cast %arg21 : i32 to index
      %c0_95 = arith.constant 0 : index
      %c0_96 = arith.constant 0 : index
      %76 = vector.load %arg20[%75, %c0_95, %c0_96] : memref<8x64x8xf32, #tpu.memory_space<vmem>>, vector<1x64x8xf32>
      %77 = vector.shape_cast %76 : vector<1x64x8xf32> to vector<64x8xf32>
      %78 = arith.addf %74, %77 : vector<64x8xf32>
      %cst_97 = arith.constant 0.000000e+00 : f32
      %79 = vector.broadcast %cst_97 : f32 to vector<64x8xf32>
      %80 = arith.cmpf ogt, %78, %79 : vector<64x8xf32>
      %cst_98 = arith.constant 0.000000e+00 : f32
      %81 = vector.broadcast %cst_98 : f32 to vector<64x8xf32>
      %82 = arith.minimumf %78, %81 : vector<64x8xf32>
      %83 = math.exp %82 : vector<64x8xf32>
      %cst_99 = arith.constant 1.000000e+00 : f32
      %84 = vector.broadcast %cst_99 : f32 to vector<64x8xf32>
      %85 = arith.subf %83, %84 : vector<64x8xf32>
      %86 = arith.select %80, %78, %85 : vector<64x8xi1>, vector<64x8xf32>
      %87 = vector.shape_cast %86 : vector<64x8xf32> to vector<1x64x8xf32>
      %88 = arith.index_cast %arg21 : i32 to index
      %c0_100 = arith.constant 0 : index
      %c0_101 = arith.constant 0 : index
      %89 = vector.load %arg19[%88, %c0_100, %c0_101] : memref<8x64x8xf32, #tpu.memory_space<vmem>>, vector<1x64x8xf32>
      tpu.vector_store %arg19[%88, %c0_100, %c0_101], %87 {strides = array<i32>} : memref<8x64x8xf32, #tpu.memory_space<vmem>>, vector<1x64x8xf32>,
      %cst_102 = arith.constant dense<0.000000e+00> : vector<8xf32>
      %90 = vector.multi_reduction <add>, %86, %cst_102 [0] : vector<64x8xf32> to vector<8xf32>
      %91 = vector.shape_cast %90 : vector<8xf32> to vector<1x8xf32>
      %92 = arith.addf %arg22, %91 : vector<1x8xf32>
      scf.yield %92 : vector<1x8xf32>
    }
    %c8_i32_75 = arith.constant 8 : i32
    %cst_76 = arith.constant 0.001953125 : f32
    %50 = vector.broadcast %cst_76 : f32 to vector<1x8xf32>
    %51 = arith.mulf %49, %50 : vector<1x8xf32>
    %c0_77 = arith.constant 0 : index
    %c0_78 = arith.constant 0 : index
    %52 = vector.load %arg10[%c0_77, %c0_78] : memref<8x8xf32, #tpu.memory_space<vmem>>, vector<8x8xf32>
    %cst_79 = arith.constant dense<0.000000e+00> : vector<1x8xf32>
    %53 = tpu.matmul %51, %52, %cst_79 {dimension_numbers = #tpu.dot_dimension_numbers<[1], [0], [0], [1], [0, 0, 1, 1], [], []>} : vector<1x8xf32>, vector<8x8xf32>, vector<1x8xf32> -> vector<1x8xf32>
    %c0_80 = arith.constant 0 : index
    %c0_81 = arith.constant 0 : index
    %54 = vector.load %arg11[%c0_80, %c0_81] : memref<1x8xf32, #tpu.memory_space<vmem>>, vector<1x8xf32>
    %55 = arith.addf %53, %54 : vector<1x8xf32>
    %cst_82 = arith.constant 0.000000e+00 : f32
    %56 = vector.broadcast %cst_82 : f32 to vector<1x8xf32>
    %57 = arith.maximumf %55, %56 : vector<1x8xf32>
    %c0_83 = arith.constant 0 : index
    %c0_84 = arith.constant 0 : index
    %58 = vector.load %arg12[%c0_83, %c0_84] : memref<8x8xf32, #tpu.memory_space<vmem>>, vector<8x8xf32>
    %cst_85 = arith.constant dense<0.000000e+00> : vector<1x8xf32>
    %59 = tpu.matmul %57, %58, %cst_85 {dimension_numbers = #tpu.dot_dimension_numbers<[1], [0], [0], [1], [0, 0, 1, 1], [], []>} : vector<1x8xf32>, vector<8x8xf32>, vector<1x8xf32> -> vector<1x8xf32>
    %c0_86 = arith.constant 0 : index
    %c0_87 = arith.constant 0 : index
    %60 = vector.load %arg13[%c0_86, %c0_87] : memref<1x8xf32, #tpu.memory_space<vmem>>, vector<1x8xf32>
    %61 = arith.addf %59, %60 : vector<1x8xf32>
    %62 = arith.negf %61 : vector<1x8xf32>
    %63 = math.exp %62 : vector<1x8xf32>
    %cst_88 = arith.constant 1.000000e+00 : f32
    %64 = vector.broadcast %cst_88 : f32 to vector<1x8xf32>
    %65 = arith.addf %64, %63 : vector<1x8xf32>
    %66 = arith.divf %64, %65 : vector<1x8xf32>
    %c0_i32_89 = arith.constant 0 : i32
    %c8_i32_90 = arith.constant 8 : i32
    %67 = arith.addi %c0_i32_89, %c8_i32_90 : i32
    %c1_i32_91 = arith.constant 1 : i32
    scf.for %arg21 = %c0_i32_89 to %67 step %c1_i32_91  : i32 {
      %68 = arith.index_cast %arg21 : i32 to index
      %c0_93 = arith.constant 0 : index
      %c0_94 = arith.constant 0 : index
      %69 = vector.load %arg19[%68, %c0_93, %c0_94] : memref<8x64x8xf32, #tpu.memory_space<vmem>>, vector<1x64x8xf32>
      %70 = vector.shape_cast %69 : vector<1x64x8xf32> to vector<64x8xf32>
      %c0_95 = arith.constant 0 : index
      %c0_96 = arith.constant 0 : index
      %71 = vector.load %arg14[%c0_95, %c0_96] : memref<1x8xf32, #tpu.memory_space<vmem>>, vector<1x8xf32>
      %72 = vector.broadcast %71 : vector<1x8xf32> to vector<64x8xf32>
      %73 = arith.mulf %70, %72 : vector<64x8xf32>
      %cst_97 = arith.constant dense<0.000000e+00> : vector<64xf32>
      %74 = vector.multi_reduction <add>, %73, %cst_97 [1] : vector<64x8xf32> to vector<64xf32>
      %75 = vector.shape_cast %74 : vector<64xf32> to vector<64x1xf32>
      %c0_98 = arith.constant 0 : index
      %c0_99 = arith.constant 0 : index
      %76 = vector.load %arg15[%c0_98, %c0_99] : memref<1x1xf32, #tpu.memory_space<vmem>>, vector<1x1xf32>
      %77 = vector.broadcast %76 : vector<1x1xf32> to vector<64x1xf32>
      %78 = arith.addf %75, %77 : vector<64x1xf32>
      %79 = arith.negf %78 : vector<64x1xf32>
      %80 = math.exp %79 : vector<64x1xf32>
      %cst_100 = arith.constant 1.000000e+00 : f32
      %81 = vector.broadcast %cst_100 : f32 to vector<64x1xf32>
      %82 = arith.addf %81, %80 : vector<64x1xf32>
      %83 = arith.divf %81, %82 : vector<64x1xf32>
      %84 = vector.broadcast %66 : vector<1x8xf32> to vector<64x8xf32>
      %85 = arith.mulf %70, %84 : vector<64x8xf32>
      %86 = vector.broadcast %83 : vector<64x1xf32> to vector<64x8xf32>
      %87 = arith.mulf %70, %86 : vector<64x8xf32>
      %88 = arith.maximumf %85, %87 : vector<64x8xf32>
      %89 = vector.shape_cast %88 : vector<64x8xf32> to vector<1x1x8x8x8xf32>
      %c0_101 = arith.constant 0 : index
      %90 = arith.index_cast %arg21 : i32 to index
      %c0_102 = arith.constant 0 : index
      %c0_103 = arith.constant 0 : index
      %c0_104 = arith.constant 0 : index
      %91 = vector.load %arg17[%c0_101, %90, %c0_102, %c0_103, %c0_104] : memref<1x8x8x8x8xf32, #tpu.memory_space<vmem>>, vector<1x1x8x8x8xf32>
      tpu.vector_store %arg17[%c0_101, %90, %c0_102, %c0_103, %c0_104], %89 {strides = array<i32>} : memref<1x8x8x8x8xf32, #tpu.memory_space<vmem>>, vector<1x1x8x8x8xf32>,
    }
    %c8_i32_92 = arith.constant 8 : i32
    return
  }
  func.func @transform_0(%arg0: i32) -> (i32, i32, i32, i32, i32) {
    %c0_i32 = arith.constant 0 : i32
    %c0_i32_0 = arith.constant 0 : i32
    %c0_i32_1 = arith.constant 0 : i32
    %c0_i32_2 = arith.constant 0 : i32
    %c0_i32_3 = arith.constant 0 : i32
    return %arg0, %c0_i32, %c0_i32_0, %c0_i32_1, %c0_i32_2 : i32, i32, i32, i32, i32
  }
  func.func @transform_1(%arg0: i32) -> (i32, i32) {
    %c0_i32 = arith.constant 0 : i32
    %c0_i32_0 = arith.constant 0 : i32
    %c0_i32_1 = arith.constant 0 : i32
    return %c0_i32, %c0_i32_0 : i32, i32
  }
  func.func @transform_2(%arg0: i32) -> (i32, i32) {
    %c0_i32 = arith.constant 0 : i32
    %c0_i32_0 = arith.constant 0 : i32
    %c0_i32_1 = arith.constant 0 : i32
    return %c0_i32, %c0_i32_0 : i32, i32
  }
  func.func @transform_3(%arg0: i32) -> (i32, i32) {
    %c0_i32 = arith.constant 0 : i32
    %c0_i32_0 = arith.constant 0 : i32
    %c0_i32_1 = arith.constant 0 : i32
    return %c0_i32, %c0_i32_0 : i32, i32
  }
  func.func @transform_4(%arg0: i32) -> (i32, i32) {
    %c0_i32 = arith.constant 0 : i32
    %c0_i32_0 = arith.constant 0 : i32
    %c0_i32_1 = arith.constant 0 : i32
    return %c0_i32, %c0_i32_0 : i32, i32
  }
  func.func @transform_5(%arg0: i32) -> (i32, i32) {
    %c0_i32 = arith.constant 0 : i32
    %c0_i32_0 = arith.constant 0 : i32
    %c0_i32_1 = arith.constant 0 : i32
    return %c0_i32, %c0_i32_0 : i32, i32
  }
  func.func @transform_6(%arg0: i32) -> (i32, i32) {
    %c0_i32 = arith.constant 0 : i32
    %c0_i32_0 = arith.constant 0 : i32
    %c0_i32_1 = arith.constant 0 : i32
    return %c0_i32, %c0_i32_0 : i32, i32
  }
  func.func @transform_7(%arg0: i32) -> (i32, i32) {
    %c0_i32 = arith.constant 0 : i32
    %c0_i32_0 = arith.constant 0 : i32
    %c0_i32_1 = arith.constant 0 : i32
    return %c0_i32, %c0_i32_0 : i32, i32
  }
  func.func @transform_8(%arg0: i32) -> (i32, i32) {
    %c0_i32 = arith.constant 0 : i32
    %c0_i32_0 = arith.constant 0 : i32
    %c0_i32_1 = arith.constant 0 : i32
    return %c0_i32, %c0_i32_0 : i32, i32
  }
  func.func @transform_9(%arg0: i32) -> (i32, i32) {
    %c0_i32 = arith.constant 0 : i32
    %c0_i32_0 = arith.constant 0 : i32
    %c0_i32_1 = arith.constant 0 : i32
    return %c0_i32, %c0_i32_0 : i32, i32
  }
  func.func @transform_10(%arg0: i32) -> (i32, i32) {
    %c0_i32 = arith.constant 0 : i32
    %c0_i32_0 = arith.constant 0 : i32
    %c0_i32_1 = arith.constant 0 : i32
    return %c0_i32, %c0_i32_0 : i32, i32
  }
  func.func @transform_11(%arg0: i32) -> (i32, i32) {
    %c0_i32 = arith.constant 0 : i32
    %c0_i32_0 = arith.constant 0 : i32
    %c0_i32_1 = arith.constant 0 : i32
    return %c0_i32, %c0_i32_0 : i32, i32
  }
  func.func @transform_12(%arg0: i32) -> (i32, i32) {
    %c0_i32 = arith.constant 0 : i32
    %c0_i32_0 = arith.constant 0 : i32
    %c0_i32_1 = arith.constant 0 : i32
    return %c0_i32, %c0_i32_0 : i32, i32
  }
  func.func @transform_13(%arg0: i32) -> (i32, i32) {
    %c0_i32 = arith.constant 0 : i32
    %c0_i32_0 = arith.constant 0 : i32
    %c0_i32_1 = arith.constant 0 : i32
    return %c0_i32, %c0_i32_0 : i32, i32
  }
  func.func @transform_14(%arg0: i32) -> (i32, i32) {
    %c0_i32 = arith.constant 0 : i32
    %c0_i32_0 = arith.constant 0 : i32
    %c0_i32_1 = arith.constant 0 : i32
    return %c0_i32, %c0_i32_0 : i32, i32
  }
  func.func @transform_15(%arg0: i32) -> (i32, i32) {
    %c0_i32 = arith.constant 0 : i32
    %c0_i32_0 = arith.constant 0 : i32
    %c0_i32_1 = arith.constant 0 : i32
    return %c0_i32, %c0_i32_0 : i32, i32
  }
  func.func @transform_16(%arg0: i32) -> (i32, i32, i32, i32, i32) {
    %c0_i32 = arith.constant 0 : i32
    %c0_i32_0 = arith.constant 0 : i32
    %c0_i32_1 = arith.constant 0 : i32
    %c0_i32_2 = arith.constant 0 : i32
    %c0_i32_3 = arith.constant 0 : i32
    return %arg0, %c0_i32, %c0_i32_0, %c0_i32_1, %c0_i32_2 : i32, i32, i32, i32, i32
  }
}

</mosaic_0001>

<bundles_post_ra>
// kernel: tpu_custom_call.1
= control target key start
LH: loop header
LB: loop body
LE: loop exit
PB: predicated region body
PF: predicated region fallthrough
CT: control target
= control target key end

     0   :  { %s15210_s0 = inlined_call_operand.vmem [shape: f32[2,8,8,8,4], index: 0, kind: input, shape index: {}]   ;;  %s15211_s1 = inlined_call_operand.vmem [shape: bf16[4,8], index: 1, kind: input, shape index: {}]   ;;  %s15212_s2 = inlined_call_operand.vmem [shape: f32[1,8], index: 2, kind: input, shape index: {}]   ;;  %s15213_s3 = inlined_call_operand.vmem [shape: bf16[216,8], index: 3, kind: input, shape index: {}]   ;;  %s15214_s4 = inlined_call_operand.vmem [shape: f32[1,8], index: 4, kind: input, shape index: {}]   ;;  %s15215_s5 = inlined_call_operand.vmem [shape: f32[1,8], index: 5, kind: input, shape index: {}]   ;;  %s15216_s6 = inlined_call_operand.vmem [shape: bf16[216,8], index: 6, kind: input, shape index: {}]   ;;  %s15217_s7 = inlined_call_operand.vmem [shape: f32[1,8], index: 7, kind: input, shape index: {}]   ;;  %s15218_s8 = inlined_call_operand.vmem [shape: f32[1,8], index: 8, kind: input, shape index: {}]   ;;  %s15219_s9 = inlined_call_operand.vmem [shape: f32[8,8], index: 9, kind: input, shape index: {}]   ;;  %s15220_s10 = inlined_call_operand.vmem [shape: f32[1,8], index: 10, kind: input, shape index: {}]   ;;  %s15221_s11 = inlined_call_operand.vmem [shape: f32[8,8], index: 11, kind: input, shape index: {}]   ;;  %s15222_s12 = inlined_call_operand.vmem [shape: f32[1,8], index: 12, kind: input, shape index: {}]   ;;  %s15223_s13 = inlined_call_operand.vmem [shape: f32[1,8], index: 13, kind: input, shape index: {}]   ;;  %s15224_s14 = inlined_call_operand.<no memory space> [shape: f32[1,1], index: 14, kind: input, shape index: {}]   ;;  %s15225_s15 = inlined_call_operand.vmem [shape: f32[8,8], index: 15, kind: input, shape index: {}]   ;;  %s15226_s16 = inlined_call_operand.hbm [shape: f32[2,8,8,8,8], index: 16, kind: output, shape index: {}]  }
   0x1   :  { %15228 = sst [smem:[#allocation9_spill]] %s15210_s0  ;;  %v21_v0 = vstv %s15224_s14 }
   0x2   :  { %15229 = sst [smem:[#allocation10_spill]] %s15211_s1  ;;  %22 = vst [vmem:[#allocation5] sm:$0x1] %v21_v0 }
   0x3   :  { %15230 = sst [smem:[#allocation11_spill]] %s15212_s2 }
   0x4   :  { %15231 = sst [smem:[#allocation12_spill]] %s15213_s3 }
   0x5   :  { %15232 = sst [smem:[#allocation13_spill]] %s15214_s4 }
   0x6   :  { %23 = vsyncpa [#allocation7], 0 }
   0x7   :  { %25 = vsyncpa [#allocation7 + $0x1], 0  ;;  %s11657_s23 = smov 0   ;;  %s11659_s24 = smov 0  }
   0x8   :  { %s11661_s25 = smov 0   ;;  %s11663_s26 = smov 0  }
   0x9 LB: > { %s11678_s14 = sadd.s32 4294967295, %s11504_s26   ;;  %s9188_s27 = sadd.s32 4294967294, %s11504_s26   ;;  %s11504_s26 = sphi %s11663_s26, %s15256_s26   ;;  %s11500_s25 = sphi %s11661_s25, %s15255_s25   ;;  %s11496_s24 = sphi %s11659_s24, %s15254_s24   ;;  %s11492_s23 = sphi %s11657_s23, %s15253_s23  }
   0xa   : > { %s11682_s28 = sadd.s32 1, %s11504_s26   ;;  %s379_s29 = sadd.s32 1, %s11500_s25 }
   0xb   : > { %s376_s30 = ssub.s32 %s11504_s26, %s11682_s28  ;;  %p389_p0 = scmp.ne.s32.totalorder %s11500_s25, %s11496_s24 }
   0xc   : > { %p377_p1 = scmp.eq.s32.totalorder %s376_s30, 0  ;;  %p390_p2 = scmp.eq.s32.totalorder %s11678_s14, 1 }
   0xd   : > { %p395_p3 = scmp.ne.s32.totalorder %s11496_s24, %s11492_s23  ;;  %p396_p4 = scmp.eq.s32.totalorder %s9188_s27, 1 }
   0xe   : > { %s11693_s0 = scalar_select %p377_p1, %s11500_s25, %s379_s29  }
   0xf   : > { %p11695_p5 = por %p390_p2, %p389_p0  ;;  %p11699_p6 = por %p396_p4, %p395_p3 }
  0x10   : > { %p9191_p7 = scmp.ge.s32.totalorder %s11504_s26, 1  ;;  %p467_p8 = scmp.lt.s32.totalorder %s11504_s26, 3 }
  0x12   : > { %p468_p9 = pnand %p9191_p7, %p467_p8 }
  0x13   : > { %s15227_s19 = sand.u32 (!%p468_p9), 1, %s11496_s24   ;;  %p517_p10 = scmp.lt.s32.totalorder (!%p468_p9), %s11678_s14, 1  ;;  %vm523_vm0 = vcmask (!%p468_p9), 60416   ;;  %vm525_vm1 = vcmask (!%p468_p9), 57344   ;;  %v11558_v1 = vmov (!%p468_p9), 0  }
  0x14   : > { %471 = sbr.rel (%p468_p9) target bundleno = 3653 (0xe45), region = 84  ;;  %s11709_s20 = sshll.u32 (!%p468_p9), %s15227_s19, 9  ;;  %524 = vst.msk [vmem:[#allocation2] sm:$0xf] (!%p468_p9), %vm523_vm0, %v11558_v1  ;;  %527 = vst.msk [vmem:[#allocation2 + $0x8] sm:$0xf] (!%p468_p9), %vm523_vm0, %v11558_v1 }
  0x15   : > { %529 = vst.msk [vmem:[#allocation2 + $0x10] sm:$0xf] (!%p468_p9), %vm523_vm0, %v11558_v1  ;;  %531 = vst.msk [vmem:[#allocation2 + $0x18] sm:$0xf] (!%p468_p9), %vm523_vm0, %v11558_v1  ;;  %vm608_vm2 = vsmask.f32 (!%p468_p9), 256 }
  0x16   : > { %533 = vst.msk [vmem:[#allocation2 + $0x20] sm:$0xf] (!%p468_p9), %vm523_vm0, %v11558_v1  ;;  %535 = vst.msk [vmem:[#allocation2 + $0x28] sm:$0xf] (!%p468_p9), %vm523_vm0, %v11558_v1  ;;  %v643_v2 = vld [vmem:[#allocation2 + $0x58] sm:$0x1] (!%p468_p9) }
  0x17   : > { %537 = vst.msk [vmem:[#allocation2 + $0x30] sm:$0xf] (!%p468_p9), %vm523_vm0, %v11558_v1  ;;  %539 = vst.msk [vmem:[#allocation2 + $0x38] sm:$0xf] (!%p468_p9), %vm523_vm0, %v11558_v1  ;;  %v646_v4 = vld [vmem:[#allocation2 + $0x60] sm:$0x1] (!%p468_p9) }
  0x18   : > { %541 = vst.msk [vmem:[#allocation2 + $0x40] sm:$0xf] (!%p468_p9), %vm523_vm0, %v11558_v1  ;;  %543 = vst.msk [vmem:[#allocation2 + $0x48] sm:$0xf] (!%p468_p9), %vm523_vm0, %v11558_v1  ;;  %v649_v5 = vld [vmem:[#allocation2 + $0x68] sm:$0x1] (!%p468_p9) }
  0x19   : > { %546 = vst.msk [vmem:[#allocation2 + $0x2d0] sm:$0xf] (!%p468_p9), %vm523_vm0, %v11558_v1  ;;  %548 = vst.msk [vmem:[#allocation2 + $0x2d8] sm:$0xf] (!%p468_p9), %vm523_vm0, %v11558_v1  ;;  %v652_v9 = vld [vmem:[#allocation2 + $0x70] sm:$0x1] (!%p468_p9) }
  0x1a   : > { %550 = vst.msk [vmem:[#allocation2 + $0x2e0] sm:$0xf] (!%p468_p9), %vm523_vm0, %v11558_v1  ;;  %552 = vst.msk [vmem:[#allocation2 + $0x2e8] sm:$0xf] (!%p468_p9), %vm523_vm0, %v11558_v1  ;;  %v655_v11 = vld [vmem:[#allocation2 + $0x78] sm:$0x1] (!%p468_p9) }
  0x1b   : > { %554 = vst.msk [vmem:[#allocation2 + $0x2f0] sm:$0xf] %vm523_vm0, %v11558_v1  ;;  %556 = vst.msk [vmem:[#allocation2 + $0x2f8] sm:$0xf] %vm523_vm0, %v11558_v1  ;;  %s518_s21 = scalar_select %p517_p10, %s11678_s14, 1 }
  0x1c   : > { %558 = vst.msk [vmem:[#allocation2 + $0x300] sm:$0xf] %vm523_vm0, %v11558_v1  ;;  %560 = vst.msk [vmem:[#allocation2 + $0x308] sm:$0xf] %vm523_vm0, %v11558_v1  ;;  %v658_v12 = vld [vmem:[#allocation2 + $0x80] sm:$0x1] }
  0x1d   : > { %562 = vst.msk [vmem:[#allocation2 + $0x310] sm:$0xf] %vm523_vm0, %v11558_v1  ;;  %564 = vst.msk [vmem:[#allocation2 + $0x318] sm:$0xf] %vm523_vm0, %v11558_v1  ;;  %s10194_s22 = sshll.u32 %s518_s21, 9  ;;  %s15237_s30 = sld [smem:[#allocation9_spill]] }
  0x1e   : > { %568 = vst.msk [vmem:[#allocation2 + $0x50] sm:$0xf] %vm523_vm0, %v11558_v1  ;;  %570 = vst.msk [vmem:[#allocation2 + $0xa0] sm:$0xf] %vm523_vm0, %v11558_v1  ;;  %v661_v15 = vld [vmem:[#allocation2 + $0x88] sm:$0x1] }
  0x1f   : > { %572 = vst.msk [vmem:[#allocation2 + $0xf0] sm:$0xf] %vm523_vm0, %v11558_v1  ;;  %574 = vst.msk [vmem:[#allocation2 + $0x140] sm:$0xf] %vm523_vm0, %v11558_v1  ;;  %v664_v17 = vld [vmem:[#allocation2 + $0x90] sm:$0x1] }
  0x20   : > { %576 = vst.msk [vmem:[#allocation2 + $0x190] sm:$0xf] %vm523_vm0, %v11558_v1  ;;  %578 = vst.msk [vmem:[#allocation2 + $0x1e0] sm:$0xf] %vm523_vm0, %v11558_v1  ;;  %v673_v18 = vld [vmem:[#allocation2 + $0xa8] sm:$0x1] }
  0x21   : > { %580 = vst.msk [vmem:[#allocation2 + $0x230] sm:$0xf] %vm523_vm0, %v11558_v1  ;;  %582 = vst.msk [vmem:[#allocation2 + $0x280] sm:$0xf] %vm523_vm0, %v11558_v1  ;;  %v676_v21 = vld [vmem:[#allocation2 + $0xb0] sm:$0x1] }
  0x22   : > { %589 = vst.msk [vmem:[#allocation2 + $0x98] sm:$0xf] %vm523_vm0, %v11558_v1  ;;  %591 = vst.msk [vmem:[#allocation2 + $0xe8] sm:$0xf] %vm523_vm0, %v11558_v1  ;;  %v679_v22 = vld [vmem:[#allocation2 + $0xb8] sm:$0x1] }
  0x23   : > { %593 = vst.msk [vmem:[#allocation2 + $0x138] sm:$0xf] %vm523_vm0, %v11558_v1  ;;  %595 = vst.msk [vmem:[#allocation2 + $0x188] sm:$0xf] %vm523_vm0, %v11558_v1  ;;  %s11894_s19 = scalar_lea.vmem %s15237_s30, %s10194_s22  ;;  %v613_v23 = vld [vmem:[#allocation2 + $0x8] sm:$0x1] }
  0x24   : > { %597 = vst.msk [vmem:[#allocation2 + $0x1d8] sm:$0xf] %vm523_vm0, %v11558_v1  ;;  %599 = vst.msk [vmem:[#allocation2 + $0x228] sm:$0xf] %vm523_vm0, %v11558_v1  ;;  %v616_v24 = vld [vmem:[#allocation2 + $0x10] sm:$0x1] }
  0x25   : > { %601 = vst.msk [vmem:[#allocation2 + $0x278] sm:$0xf] %vm523_vm0, %v11558_v1  ;;  %603 = vst.msk [vmem:[#allocation2 + $0x2c8] sm:$0xf] %vm523_vm0, %v11558_v1  ;;  %v619_v25 = vld [vmem:[#allocation2 + $0x18] sm:$0x1] }
  0x26   : > { %526 = vst.msk [vmem:[#allocation2 + $0x4] sm:$0x1] %vm525_vm1, %v11558_v1  ;;  %528 = vst.msk [vmem:[#allocation2 + $0xc] sm:$0x1] %vm525_vm1, %v11558_v1  ;;  %v622_v32 = vld [vmem:[#allocation2 + $0x20] sm:$0x1] }
  0x27   : > { %530 = vst.msk [vmem:[#allocation2 + $0x14] sm:$0x1] %vm525_vm1, %v11558_v1  ;;  %532 = vst.msk [vmem:[#allocation2 + $0x1c] sm:$0x1] %vm525_vm1, %v11558_v1  ;;  %v625_v33 = vld [vmem:[#allocation2 + $0x28] sm:$0x1] }
  0x28   : > { %534 = vst.msk [vmem:[#allocation2 + $0x24] sm:$0x1] %vm525_vm1, %v11558_v1  ;;  %536 = vst.msk [vmem:[#allocation2 + $0x2c] sm:$0x1] %vm525_vm1, %v11558_v1  ;;  %v628_v37 = vld [vmem:[#allocation2 + $0x30] sm:$0x1] }
  0x29   : > { %538 = vst.msk [vmem:[#allocation2 + $0x34] sm:$0x1] %vm525_vm1, %v11558_v1  ;;  %540 = vst.msk [vmem:[#allocation2 + $0x3c] sm:$0x1] %vm525_vm1, %v11558_v1  ;;  %v631_v38 = vld [vmem:[#allocation2 + $0x38] sm:$0x1] }
  0x2a   : > { %542 = vst.msk [vmem:[#allocation2 + $0x44] sm:$0x1] %vm525_vm1, %v11558_v1  ;;  %544 = vst.msk [vmem:[#allocation2 + $0x4c] sm:$0x1] %vm525_vm1, %v11558_v1  ;;  %v634_v41 = vld [vmem:[#allocation2 + $0x40] sm:$0x1] }
  0x2b   : > { %547 = vst.msk [vmem:[#allocation2 + $0x2d4] sm:$0x1] %vm525_vm1, %v11558_v1  ;;  %549 = vst.msk [vmem:[#allocation2 + $0x2dc] sm:$0x1] %vm525_vm1, %v11558_v1  ;;  %v640_v45 = vld [vmem:[#allocation2 + $0x50] sm:$0x1] }
  0x2c   : > { %551 = vst.msk [vmem:[#allocation2 + $0x2e4] sm:$0x1] %vm525_vm1, %v11558_v1  ;;  %553 = vst.msk [vmem:[#allocation2 + $0x2ec] sm:$0x1] %vm525_vm1, %v11558_v1  ;;  %v667_v46 = vld [vmem:[#allocation2 + $0x98] sm:$0x1] }
  0x2d   : > { %555 = vst.msk [vmem:[#allocation2 + $0x2f4] sm:$0x1] %vm525_vm1, %v11558_v1  ;;  %557 = vst.msk [vmem:[#allocation2 + $0x2fc] sm:$0x1] %vm525_vm1, %v11558_v1  ;;  %v670_v49 = vld [vmem:[#allocation2 + $0xa0] sm:$0x1] }
  0x2e   : > { %559 = vst.msk [vmem:[#allocation2 + $0x304] sm:$0x1] %vm525_vm1, %v11558_v1  ;;  %561 = vst.msk [vmem:[#allocation2 + $0x30c] sm:$0x1] %vm525_vm1, %v11558_v1  ;;  %v682_v50 = vld [vmem:[#allocation2 + $0xc0] sm:$0x1] }
  0x2f   : > { %563 = vst.msk [vmem:[#allocation2 + $0x314] sm:$0x1] %vm525_vm1, %v11558_v1  ;;  %565 = vst.msk [vmem:[#allocation2 + $0x31c] sm:$0x1] %vm525_vm1, %v11558_v1  ;;  %v685_v53 = vld [vmem:[#allocation2 + $0xc8] sm:$0x1] }
  0x30   : > { %569 = vst.msk [vmem:[#allocation2 + $0x54] sm:$0x1] %vm525_vm1, %v11558_v1  ;;  %571 = vst.msk [vmem:[#allocation2 + $0xa4] sm:$0x1] %vm525_vm1, %v11558_v1  ;;  %v688_v54 = vld [vmem:[#allocation2 + $0xd0] sm:$0x1] }
  0x31   : > { %573 = vst.msk [vmem:[#allocation2 + $0xf4] sm:$0x1] %vm525_vm1, %v11558_v1  ;;  %575 = vst.msk [vmem:[#allocation2 + $0x144] sm:$0x1] %vm525_vm1, %v11558_v1  ;;  %v691_v57 = vld [vmem:[#allocation2 + $0xd8] sm:$0x1] }
  0x32   : > { %577 = vst.msk [vmem:[#allocation2 + $0x194] sm:$0x1] %vm525_vm1, %v11558_v1  ;;  %579 = vst.msk [vmem:[#allocation2 + $0x1e4] sm:$0x1] %vm525_vm1, %v11558_v1  ;;  %v694_v58 = vld [vmem:[#allocation2 + $0xe0] sm:$0x1] }
  0x33   : > { %581 = vst.msk [vmem:[#allocation2 + $0x234] sm:$0x1] %vm525_vm1, %v11558_v1  ;;  %583 = vst.msk [vmem:[#allocation2 + $0x284] sm:$0x1] %vm525_vm1, %v11558_v1  ;;  %v697_v61 = vld [vmem:[#allocation2 + $0xe8] sm:$0x1] }
  0x34   : > { %590 = vst.msk [vmem:[#allocation2 + $0x9c] sm:$0x1] %vm525_vm1, %v11558_v1  ;;  %592 = vst.msk [vmem:[#allocation2 + $0xec] sm:$0x1] %vm525_vm1, %v11558_v1  ;;  %v700_v62 = vld [vmem:[#allocation2 + $0xf0] sm:$0x1] }
  0x35   : > { %594 = vst.msk [vmem:[#allocation2 + $0x13c] sm:$0x1] %vm525_vm1, %v11558_v1  ;;  %596 = vst.msk [vmem:[#allocation2 + $0x18c] sm:$0x1] %vm525_vm1, %v11558_v1  ;;  %vm910_vm4 = vsmask.f32 7938 }
  0x36   : > { %598 = vst.msk [vmem:[#allocation2 + $0x1dc] sm:$0x1] %vm525_vm1, %v11558_v1  ;;  %600 = vst.msk [vmem:[#allocation2 + $0x22c] sm:$0x1] %vm525_vm1, %v11558_v1  ;;  %s12291_s22 = smov 0  }
  0x37   : > { %602 = vst.msk [vmem:[#allocation2 + $0x27c] sm:$0x1] %vm525_vm1, %v11558_v1  ;;  %604 = vst.msk [vmem:[#allocation2 + $0x2cc] sm:$0x1] %vm525_vm1, %v11558_v1 }
  0x38   : > { %566 = vst.msk [vmem:[#allocation2] sm:$0xf] %vm523_vm0, %v11558_v1  ;;  %584 = vst.msk [vmem:[#allocation2 + $0x2d0] sm:$0xf] %vm523_vm0, %v11558_v1 }
  0x39   : > { %567 = vst.msk [vmem:[#allocation2 + $0x4] sm:$0x1] %vm525_vm1, %v11558_v1  ;;  %585 = vst.msk [vmem:[#allocation2 + $0x2d4] sm:$0x1] %vm525_vm1, %v11558_v1 }
  0x3a   : > { %587 = vst.msk [vmem:[#allocation2 + $0x48] sm:$0xf] %vm523_vm0, %v11558_v1  ;;  %605 = vst.msk [vmem:[#allocation2 + $0x318] sm:$0xf] %vm523_vm0, %v11558_v1 }
  0x3b   : > { %588 = vst.msk [vmem:[#allocation2 + $0x4c] sm:$0x1] %vm525_vm1, %v11558_v1  ;;  %606 = vst.msk [vmem:[#allocation2 + $0x31c] sm:$0x1] %vm525_vm1, %v11558_v1  ;;  %v703_v1 = vld [vmem:[#allocation2 + $0xf8] sm:$0x1] }
  0x3c   : > { %vm11872_vm3 = vmand %vm525_vm1, %vm608_vm2 }
  0x3d   : > { %v644_v6 = vsel %vm11872_vm3, 0, %v643_v2  ;;  %v647_v7 = vsel %vm11872_vm3, 0, %v646_v4  ;;  %v650_v8 = vsel %vm11872_vm3, 0, %v649_v5  ;;  %v653_v10 = vsel %vm11872_vm3, 0, %v652_v9  ;;  %v706_v2 = vld [vmem:[#allocation2 + $0x100] sm:$0x1]  ;;  %vm12086_vm5 = vmand %vm525_vm1, %vm910_vm4 }
  0x3e   : > { %645 = vst [vmem:[#allocation2 + $0x58] sm:$0x1] %v644_v6  ;;  %648 = vst [vmem:[#allocation2 + $0x60] sm:$0x1] %v647_v7  ;;  %v656_v13 = vsel %vm11872_vm3, 0, %v655_v11  ;;  %v659_v14 = vsel %vm11872_vm3, 0, %v658_v12 }
  0x3f   : > { %651 = vst [vmem:[#allocation2 + $0x68] sm:$0x1] %v650_v8  ;;  %654 = vst [vmem:[#allocation2 + $0x70] sm:$0x1] %v653_v10  ;;  %v662_v16 = vsel %vm11872_vm3, 0, %v661_v15  ;;  %v665_v19 = vsel %vm11872_vm3, 0, %v664_v17 }
  0x40   : > { %657 = vst [vmem:[#allocation2 + $0x78] sm:$0x1] %v656_v13  ;;  %660 = vst [vmem:[#allocation2 + $0x80] sm:$0x1] %v659_v14  ;;  %v674_v20 = vsel %vm11872_vm3, 0, %v673_v18  ;;  %v614_v27 = vsel %vm11872_vm3, 0, %v613_v23 }
  0x41   : > { %663 = vst [vmem:[#allocation2 + $0x88] sm:$0x1] %v662_v16  ;;  %666 = vst [vmem:[#allocation2 + $0x90] sm:$0x1] %v665_v19  ;;  %v610_v26 = vld [vmem:[#allocation2] sm:$0x1] }
  0x42   : > { %675 = vst [vmem:[#allocation2 + $0xa8] sm:$0x1] %v674_v20  ;;  %v617_v28 = vsel %vm11872_vm3, 0, %v616_v24  ;;  %v620_v29 = vsel %vm11872_vm3, 0, %v619_v25  ;;  %v677_v30 = vsel %vm11872_vm3, 0, %v676_v21  ;;  %v611_v31 = vsel %vm11872_vm3, 0, %v610_v26 }
  0x43   : > { %615 = vst [vmem:[#allocation2 + $0x8] sm:$0x1] %v614_v27  ;;  %618 = vst [vmem:[#allocation2 + $0x10] sm:$0x1] %v617_v28  ;;  %v680_v34 = vsel %vm11872_vm3, 0, %v679_v22  ;;  %v623_v35 = vsel %vm11872_vm3, 0, %v622_v32 }
  0x44   : > { %621 = vst [vmem:[#allocation2 + $0x18] sm:$0x1] %v620_v29  ;;  %678 = vst [vmem:[#allocation2 + $0xb0] sm:$0x1] %v677_v30  ;;  %v626_v36 = vsel %vm11872_vm3, 0, %v625_v33  ;;  %v629_v39 = vsel %vm11872_vm3, 0, %v628_v37 }
  0x45   : > { %612 = vst [vmem:[#allocation2] sm:$0x1] %v611_v31  ;;  %681 = vst [vmem:[#allocation2 + $0xb8] sm:$0x1] %v680_v34  ;;  %v632_v40 = vsel %vm11872_vm3, 0, %v631_v38  ;;  %v635_v43 = vsel %vm11872_vm3, 0, %v634_v41 }
  0x46   : > { %624 = vst [vmem:[#allocation2 + $0x20] sm:$0x1] %v623_v35  ;;  %627 = vst [vmem:[#allocation2 + $0x28] sm:$0x1] %v626_v36  ;;  %v637_v42 = vld [vmem:[#allocation2 + $0x48] sm:$0x1] }
  0x47   : > { %630 = vst [vmem:[#allocation2 + $0x30] sm:$0x1] %v629_v39  ;;  %633 = vst [vmem:[#allocation2 + $0x38] sm:$0x1] %v632_v40  ;;  %v638_v44 = vsel %vm11872_vm3, 0, %v637_v42  ;;  %v641_v47 = vsel %vm11872_vm3, 0, %v640_v45 }
  0x48   : > { %636 = vst [vmem:[#allocation2 + $0x40] sm:$0x1] %v635_v43  ;;  %639 = vst [vmem:[#allocation2 + $0x48] sm:$0x1] %v638_v44  ;;  %v668_v48 = vsel %vm11872_vm3, 0, %v667_v46  ;;  %v671_v51 = vsel %vm11872_vm3, 0, %v670_v49 }
  0x49   : > { %642 = vst [vmem:[#allocation2 + $0x50] sm:$0x1] %v641_v47  ;;  %669 = vst [vmem:[#allocation2 + $0x98] sm:$0x1] %v668_v48  ;;  %v683_v52 = vsel %vm11872_vm3, 0, %v682_v50  ;;  %v686_v55 = vsel %vm11872_vm3, 0, %v685_v53 }
  0x4a   : > { %672 = vst [vmem:[#allocation2 + $0xa0] sm:$0x1] %v671_v51  ;;  %684 = vst [vmem:[#allocation2 + $0xc0] sm:$0x1] %v683_v52  ;;  %v689_v56 = vsel %vm11872_vm3, 0, %v688_v54  ;;  %v692_v59 = vsel %vm11872_vm3, 0, %v691_v57 }
  0x4b   : > { %687 = vst [vmem:[#allocation2 + $0xc8] sm:$0x1] %v686_v55  ;;  %690 = vst [vmem:[#allocation2 + $0xd0] sm:$0x1] %v689_v56  ;;  %v695_v60 = vsel %vm11872_vm3, 0, %v694_v58  ;;  %v698_v63 = vsel %vm11872_vm3, 0, %v697_v61 }
  0x4c   : > { %693 = vst [vmem:[#allocation2 + $0xd8] sm:$0x1] %v692_v59  ;;  %696 = vst [vmem:[#allocation2 + $0xe0] sm:$0x1] %v695_v60  ;;  %v701_v0 = vsel %vm11872_vm3, 0, %v700_v62  ;;  %v704_v4 = vsel %vm11872_vm3, 0, %v703_v1 }
  0x4d   : > { %699 = vst [vmem:[#allocation2 + $0xe8] sm:$0x1] %v698_v63  ;;  %702 = vst [vmem:[#allocation2 + $0xf0] sm:$0x1] %v701_v0  ;;  %v707_v5 = vsel %vm11872_vm3, 0, %v706_v2 }
  0x4e   : > { %v709_v6 = vld [vmem:[#allocation2 + $0x108] sm:$0x1]  ;;  %v712_v7 = vld [vmem:[#allocation2 + $0x110] sm:$0x1]  ;;  %705 = vst [vmem:[#allocation2 + $0xf8] sm:$0x1] %v704_v4 }
  0x4f   : > { %708 = vst [vmem:[#allocation2 + $0x100] sm:$0x1] %v707_v5  ;;  %v710_v8 = vsel %vm11872_vm3, 0, %v709_v6  ;;  %v713_v9 = vsel %vm11872_vm3, 0, %v712_v7  ;;  %v715_v10 = vld [vmem:[#allocation2 + $0x118] sm:$0x1] }
  0x50   : > { %v718_v11 = vld [vmem:[#allocation2 + $0x120] sm:$0x1]  ;;  %711 = vst [vmem:[#allocation2 + $0x108] sm:$0x1] %v710_v8  ;;  %714 = vst [vmem:[#allocation2 + $0x110] sm:$0x1] %v713_v9 }
  0x51   : > { %v716_v12 = vsel %vm11872_vm3, 0, %v715_v10  ;;  %v719_v13 = vsel %vm11872_vm3, 0, %v718_v11  ;;  %v721_v14 = vld [vmem:[#allocation2 + $0x128] sm:$0x1]  ;;  %v724_v15 = vld [vmem:[#allocation2 + $0x130] sm:$0x1] }
  0x52   : > { %717 = vst [vmem:[#allocation2 + $0x118] sm:$0x1] %v716_v12  ;;  %720 = vst [vmem:[#allocation2 + $0x120] sm:$0x1] %v719_v13  ;;  %v722_v16 = vsel %vm11872_vm3, 0, %v721_v14  ;;  %v725_v17 = vsel %vm11872_vm3, 0, %v724_v15 }
  0x53   : > { %v727_v18 = vld [vmem:[#allocation2 + $0x138] sm:$0x1]  ;;  %v730_v19 = vld [vmem:[#allocation2 + $0x140] sm:$0x1]  ;;  %723 = vst [vmem:[#allocation2 + $0x128] sm:$0x1] %v722_v16 }
  0x54   : > { %726 = vst [vmem:[#allocation2 + $0x130] sm:$0x1] %v725_v17  ;;  %v728_v20 = vsel %vm11872_vm3, 0, %v727_v18  ;;  %v731_v21 = vsel %vm11872_vm3, 0, %v730_v19  ;;  %v733_v22 = vld [vmem:[#allocation2 + $0x148] sm:$0x1] }
  0x55   : > { %v736_v23 = vld [vmem:[#allocation2 + $0x150] sm:$0x1]  ;;  %729 = vst [vmem:[#allocation2 + $0x138] sm:$0x1] %v728_v20  ;;  %732 = vst [vmem:[#allocation2 + $0x140] sm:$0x1] %v731_v21 }
  0x56   : > { %v734_v24 = vsel %vm11872_vm3, 0, %v733_v22  ;;  %v737_v25 = vsel %vm11872_vm3, 0, %v736_v23  ;;  %v739_v26 = vld [vmem:[#allocation2 + $0x158] sm:$0x1]  ;;  %v742_v27 = vld [vmem:[#allocation2 + $0x160] sm:$0x1] }
  0x57   : > { %735 = vst [vmem:[#allocation2 + $0x148] sm:$0x1] %v734_v24  ;;  %738 = vst [vmem:[#allocation2 + $0x150] sm:$0x1] %v737_v25  ;;  %v740_v28 = vsel %vm11872_vm3, 0, %v739_v26  ;;  %v743_v29 = vsel %vm11872_vm3, 0, %v742_v27 }
  0x58   : > { %v745_v30 = vld [vmem:[#allocation2 + $0x168] sm:$0x1]  ;;  %v748_v31 = vld [vmem:[#allocation2 + $0x170] sm:$0x1]  ;;  %741 = vst [vmem:[#allocation2 + $0x158] sm:$0x1] %v740_v28 }
  0x59   : > { %744 = vst [vmem:[#allocation2 + $0x160] sm:$0x1] %v743_v29  ;;  %v746_v32 = vsel %vm11872_vm3, 0, %v745_v30  ;;  %v749_v33 = vsel %vm11872_vm3, 0, %v748_v31  ;;  %v751_v34 = vld [vmem:[#allocation2 + $0x178] sm:$0x1] }
  0x5a   : > { %v754_v35 = vld [vmem:[#allocation2 + $0x180] sm:$0x1]  ;;  %747 = vst [vmem:[#allocation2 + $0x168] sm:$0x1] %v746_v32  ;;  %750 = vst [vmem:[#allocation2 + $0x170] sm:$0x1] %v749_v33 }
  0x5b   : > { %v752_v36 = vsel %vm11872_vm3, 0, %v751_v34  ;;  %v755_v37 = vsel %vm11872_vm3, 0, %v754_v35  ;;  %v757_v38 = vld [vmem:[#allocation2 + $0x188] sm:$0x1]  ;;  %v760_v39 = vld [vmem:[#allocation2 + $0x190] sm:$0x1] }
  0x5c   : > { %753 = vst [vmem:[#allocation2 + $0x178] sm:$0x1] %v752_v36  ;;  %756 = vst [vmem:[#allocation2 + $0x180] sm:$0x1] %v755_v37  ;;  %v758_v40 = vsel %vm11872_vm3, 0, %v757_v38  ;;  %v761_v41 = vsel %vm11872_vm3, 0, %v760_v39 }
  0x5d   : > { %v763_v42 = vld [vmem:[#allocation2 + $0x198] sm:$0x1]  ;;  %v766_v43 = vld [vmem:[#allocation2 + $0x1a0] sm:$0x1]  ;;  %759 = vst [vmem:[#allocation2 + $0x188] sm:$0x1] %v758_v40 }
  0x5e   : > { %762 = vst [vmem:[#allocation2 + $0x190] sm:$0x1] %v761_v41  ;;  %v764_v44 = vsel %vm11872_vm3, 0, %v763_v42  ;;  %v767_v45 = vsel %vm11872_vm3, 0, %v766_v43  ;;  %v769_v46 = vld [vmem:[#allocation2 + $0x1a8] sm:$0x1] }
  0x5f   : > { %v772_v47 = vld [vmem:[#allocation2 + $0x1b0] sm:$0x1]  ;;  %765 = vst [vmem:[#allocation2 + $0x198] sm:$0x1] %v764_v44  ;;  %768 = vst [vmem:[#allocation2 + $0x1a0] sm:$0x1] %v767_v45 }
  0x60   : > { %v770_v48 = vsel %vm11872_vm3, 0, %v769_v46  ;;  %v773_v49 = vsel %vm11872_vm3, 0, %v772_v47  ;;  %v775_v50 = vld [vmem:[#allocation2 + $0x1b8] sm:$0x1]  ;;  %v778_v51 = vld [vmem:[#allocation2 + $0x1c0] sm:$0x1] }
  0x61   : > { %771 = vst [vmem:[#allocation2 + $0x1a8] sm:$0x1] %v770_v48  ;;  %774 = vst [vmem:[#allocation2 + $0x1b0] sm:$0x1] %v773_v49  ;;  %v776_v52 = vsel %vm11872_vm3, 0, %v775_v50  ;;  %v779_v53 = vsel %vm11872_vm3, 0, %v778_v51 }
  0x62   : > { %v781_v54 = vld [vmem:[#allocation2 + $0x1c8] sm:$0x1]  ;;  %v784_v55 = vld [vmem:[#allocation2 + $0x1d0] sm:$0x1]  ;;  %777 = vst [vmem:[#allocation2 + $0x1b8] sm:$0x1] %v776_v52 }
  0x63   : > { %780 = vst [vmem:[#allocation2 + $0x1c0] sm:$0x1] %v779_v53  ;;  %v782_v56 = vsel %vm11872_vm3, 0, %v781_v54  ;;  %v785_v57 = vsel %vm11872_vm3, 0, %v784_v55  ;;  %v787_v58 = vld [vmem:[#allocation2 + $0x1d8] sm:$0x1] }
  0x64   : > { %v790_v59 = vld [vmem:[#allocation2 + $0x1e0] sm:$0x1]  ;;  %783 = vst [vmem:[#allocation2 + $0x1c8] sm:$0x1] %v782_v56  ;;  %786 = vst [vmem:[#allocation2 + $0x1d0] sm:$0x1] %v785_v57 }
  0x65   : > { %v788_v60 = vsel %vm11872_vm3, 0, %v787_v58  ;;  %v791_v61 = vsel %vm11872_vm3, 0, %v790_v59  ;;  %v793_v62 = vld [vmem:[#allocation2 + $0x1e8] sm:$0x1]  ;;  %v796_v63 = vld [vmem:[#allocation2 + $0x1f0] sm:$0x1] }
  0x66   : > { %789 = vst [vmem:[#allocation2 + $0x1d8] sm:$0x1] %v788_v60  ;;  %792 = vst [vmem:[#allocation2 + $0x1e0] sm:$0x1] %v791_v61  ;;  %v794_v0 = vsel %vm11872_vm3, 0, %v793_v62  ;;  %v797_v1 = vsel %vm11872_vm3, 0, %v796_v63 }
  0x67   : > { %v799_v2 = vld [vmem:[#allocation2 + $0x1f8] sm:$0x1]  ;;  %v802_v4 = vld [vmem:[#allocation2 + $0x200] sm:$0x1]  ;;  %795 = vst [vmem:[#allocation2 + $0x1e8] sm:$0x1] %v794_v0 }
  0x68   : > { %798 = vst [vmem:[#allocation2 + $0x1f0] sm:$0x1] %v797_v1  ;;  %v800_v5 = vsel %vm11872_vm3, 0, %v799_v2  ;;  %v803_v6 = vsel %vm11872_vm3, 0, %v802_v4  ;;  %v805_v7 = vld [vmem:[#allocation2 + $0x208] sm:$0x1] }
  0x69   : > { %v808_v8 = vld [vmem:[#allocation2 + $0x210] sm:$0x1]  ;;  %801 = vst [vmem:[#allocation2 + $0x1f8] sm:$0x1] %v800_v5  ;;  %804 = vst [vmem:[#allocation2 + $0x200] sm:$0x1] %v803_v6 }
  0x6a   : > { %v806_v9 = vsel %vm11872_vm3, 0, %v805_v7  ;;  %v809_v10 = vsel %vm11872_vm3, 0, %v808_v8  ;;  %v811_v11 = vld [vmem:[#allocation2 + $0x218] sm:$0x1]  ;;  %v814_v12 = vld [vmem:[#allocation2 + $0x220] sm:$0x1] }
  0x6b   : > { %807 = vst [vmem:[#allocation2 + $0x208] sm:$0x1] %v806_v9  ;;  %810 = vst [vmem:[#allocation2 + $0x210] sm:$0x1] %v809_v10  ;;  %v812_v13 = vsel %vm11872_vm3, 0, %v811_v11  ;;  %v815_v14 = vsel %vm11872_vm3, 0, %v814_v12 }
  0x6c   : > { %v817_v15 = vld [vmem:[#allocation2 + $0x228] sm:$0x1]  ;;  %v820_v16 = vld [vmem:[#allocation2 + $0x230] sm:$0x1]  ;;  %813 = vst [vmem:[#allocation2 + $0x218] sm:$0x1] %v812_v13 }
  0x6d   : > { %816 = vst [vmem:[#allocation2 + $0x220] sm:$0x1] %v815_v14  ;;  %v818_v17 = vsel %vm11872_vm3, 0, %v817_v15  ;;  %v821_v18 = vsel %vm11872_vm3, 0, %v820_v16  ;;  %v823_v19 = vld [vmem:[#allocation2 + $0x238] sm:$0x1] }
  0x6e   : > { %v826_v20 = vld [vmem:[#allocation2 + $0x240] sm:$0x1]  ;;  %819 = vst [vmem:[#allocation2 + $0x228] sm:$0x1] %v818_v17  ;;  %822 = vst [vmem:[#allocation2 + $0x230] sm:$0x1] %v821_v18 }
  0x6f   : > { %v824_v21 = vsel %vm11872_vm3, 0, %v823_v19  ;;  %v827_v22 = vsel %vm11872_vm3, 0, %v826_v20  ;;  %v829_v23 = vld [vmem:[#allocation2 + $0x248] sm:$0x1]  ;;  %v832_v24 = vld [vmem:[#allocation2 + $0x250] sm:$0x1] }
  0x70   : > { %825 = vst [vmem:[#allocation2 + $0x238] sm:$0x1] %v824_v21  ;;  %828 = vst [vmem:[#allocation2 + $0x240] sm:$0x1] %v827_v22  ;;  %v830_v25 = vsel %vm11872_vm3, 0, %v829_v23  ;;  %v833_v26 = vsel %vm11872_vm3, 0, %v832_v24 }
  0x71   : > { %v835_v27 = vld [vmem:[#allocation2 + $0x258] sm:$0x1]  ;;  %v838_v28 = vld [vmem:[#allocation2 + $0x260] sm:$0x1]  ;;  %831 = vst [vmem:[#allocation2 + $0x248] sm:$0x1] %v830_v25 }
  0x72   : > { %834 = vst [vmem:[#allocation2 + $0x250] sm:$0x1] %v833_v26  ;;  %v836_v29 = vsel %vm11872_vm3, 0, %v835_v27  ;;  %v839_v30 = vsel %vm11872_vm3, 0, %v838_v28  ;;  %v841_v31 = vld [vmem:[#allocation2 + $0x268] sm:$0x1] }
  0x73   : > { %v844_v32 = vld [vmem:[#allocation2 + $0x270] sm:$0x1]  ;;  %837 = vst [vmem:[#allocation2 + $0x258] sm:$0x1] %v836_v29  ;;  %840 = vst [vmem:[#allocation2 + $0x260] sm:$0x1] %v839_v30 }
  0x74   : > { %v842_v33 = vsel %vm11872_vm3, 0, %v841_v31  ;;  %v845_v34 = vsel %vm11872_vm3, 0, %v844_v32  ;;  %v847_v35 = vld [vmem:[#allocation2 + $0x278] sm:$0x1]  ;;  %v850_v36 = vld [vmem:[#allocation2 + $0x280] sm:$0x1] }
  0x75   : > { %843 = vst [vmem:[#allocation2 + $0x268] sm:$0x1] %v842_v33  ;;  %846 = vst [vmem:[#allocation2 + $0x270] sm:$0x1] %v845_v34  ;;  %v848_v37 = vsel %vm11872_vm3, 0, %v847_v35  ;;  %v851_v38 = vsel %vm11872_vm3, 0, %v850_v36 }
  0x76   : > { %v853_v39 = vld [vmem:[#allocation2 + $0x288] sm:$0x1]  ;;  %v856_v40 = vld [vmem:[#allocation2 + $0x290] sm:$0x1]  ;;  %849 = vst [vmem:[#allocation2 + $0x278] sm:$0x1] %v848_v37 }
  0x77   : > { %852 = vst [vmem:[#allocation2 + $0x280] sm:$0x1] %v851_v38  ;;  %v854_v41 = vsel %vm11872_vm3, 0, %v853_v39  ;;  %v857_v42 = vsel %vm11872_vm3, 0, %v856_v40  ;;  %v859_v43 = vld [vmem:[#allocation2 + $0x298] sm:$0x1] }
  0x78   : > { %v862_v44 = vld [vmem:[#allocation2 + $0x2a0] sm:$0x1]  ;;  %855 = vst [vmem:[#allocation2 + $0x288] sm:$0x1] %v854_v41  ;;  %858 = vst [vmem:[#allocation2 + $0x290] sm:$0x1] %v857_v42 }
  0x79   : > { %v860_v45 = vsel %vm11872_vm3, 0, %v859_v43  ;;  %v863_v46 = vsel %vm11872_vm3, 0, %v862_v44  ;;  %v865_v47 = vld [vmem:[#allocation2 + $0x2a8] sm:$0x1]  ;;  %v868_v48 = vld [vmem:[#allocation2 + $0x2b0] sm:$0x1] }
  0x7a   : > { %861 = vst [vmem:[#allocation2 + $0x298] sm:$0x1] %v860_v45  ;;  %864 = vst [vmem:[#allocation2 + $0x2a0] sm:$0x1] %v863_v46  ;;  %v866_v49 = vsel %vm11872_vm3, 0, %v865_v47  ;;  %v869_v50 = vsel %vm11872_vm3, 0, %v868_v48 }
  0x7b   : > { %v871_v51 = vld [vmem:[#allocation2 + $0x2b8] sm:$0x1]  ;;  %v874_v52 = vld [vmem:[#allocation2 + $0x2c0] sm:$0x1]  ;;  %867 = vst [vmem:[#allocation2 + $0x2a8] sm:$0x1] %v866_v49 }
  0x7c   : > { %870 = vst [vmem:[#allocation2 + $0x2b0] sm:$0x1] %v869_v50  ;;  %v872_v53 = vsel %vm11872_vm3, 0, %v871_v51  ;;  %v875_v54 = vsel %vm11872_vm3, 0, %v874_v52  ;;  %v877_v55 = vld [vmem:[#allocation2 + $0x2c8] sm:$0x1] }
  0x7d   : > { %v880_v56 = vld [vmem:[#allocation2 + $0x2d0] sm:$0x1]  ;;  %873 = vst [vmem:[#allocation2 + $0x2b8] sm:$0x1] %v872_v53  ;;  %876 = vst [vmem:[#allocation2 + $0x2c0] sm:$0x1] %v875_v54 }
  0x7e   : > { %v878_v57 = vsel %vm11872_vm3, 0, %v877_v55  ;;  %v881_v58 = vsel %vm11872_vm3, 0, %v880_v56  ;;  %v883_v59 = vld [vmem:[#allocation2 + $0x2d8] sm:$0x1]  ;;  %v886_v60 = vld [vmem:[#allocation2 + $0x2e0] sm:$0x1] }
  0x7f   : > { %879 = vst [vmem:[#allocation2 + $0x2c8] sm:$0x1] %v878_v57  ;;  %882 = vst [vmem:[#allocation2 + $0x2d0] sm:$0x1] %v881_v58  ;;  %v884_v61 = vsel %vm11872_vm3, 0, %v883_v59  ;;  %v887_v62 = vsel %vm11872_vm3, 0, %v886_v60 }
  0x80   : > { %v889_v63 = vld [vmem:[#allocation2 + $0x2e8] sm:$0x1]  ;;  %v892_v0 = vld [vmem:[#allocation2 + $0x2f0] sm:$0x1]  ;;  %885 = vst [vmem:[#allocation2 + $0x2d8] sm:$0x1] %v884_v61 }
  0x81   : > { %888 = vst [vmem:[#allocation2 + $0x2e0] sm:$0x1] %v887_v62  ;;  %v890_v1 = vsel %vm11872_vm3, 0, %v889_v63  ;;  %v893_v2 = vsel %vm11872_vm3, 0, %v892_v0  ;;  %v895_v4 = vld [vmem:[#allocation2 + $0x2f8] sm:$0x1] }
  0x82   : > { %v898_v5 = vld [vmem:[#allocation2 + $0x300] sm:$0x1]  ;;  %891 = vst [vmem:[#allocation2 + $0x2e8] sm:$0x1] %v890_v1  ;;  %894 = vst [vmem:[#allocation2 + $0x2f0] sm:$0x1] %v893_v2 }
  0x83   : > { %v896_v6 = vsel %vm11872_vm3, 0, %v895_v4  ;;  %v899_v7 = vsel %vm11872_vm3, 0, %v898_v5  ;;  %v901_v8 = vld [vmem:[#allocation2 + $0x308] sm:$0x1]  ;;  %v904_v9 = vld [vmem:[#allocation2 + $0x310] sm:$0x1] }
  0x84   : > { %897 = vst [vmem:[#allocation2 + $0x2f8] sm:$0x1] %v896_v6  ;;  %900 = vst [vmem:[#allocation2 + $0x300] sm:$0x1] %v899_v7  ;;  %v902_v10 = vsel %vm11872_vm3, 0, %v901_v8  ;;  %v905_v11 = vsel %vm11872_vm3, 0, %v904_v9 }
  0x85   : > { %v907_v12 = vld [vmem:[#allocation2 + $0x318] sm:$0x1]  ;;  %903 = vst [vmem:[#allocation2 + $0x308] sm:$0x1] %v902_v10  ;;  %906 = vst [vmem:[#allocation2 + $0x310] sm:$0x1] %v905_v11 }
  0x86   : > { %v908_v13 = vsel %vm11872_vm3, 0, %v907_v12  ;;  %v912_v15 = vld [vmem:[#allocation2 + $0x4] sm:$0x1]  ;;  %v915_v16 = vld [vmem:[#allocation2 + $0xc] sm:$0x1] }
  0x87   : > { %909 = vst [vmem:[#allocation2 + $0x318] sm:$0x1] %v908_v13  ;;  %v913_v17 = vsel %vm12086_vm5, 0, %v912_v15  ;;  %v916_v18 = vsel %vm12086_vm5, 0, %v915_v16  ;;  %v918_v19 = vld [vmem:[#allocation2 + $0x14] sm:$0x1] }
  0x88   : > { %v921_v20 = vld [vmem:[#allocation2 + $0x1c] sm:$0x1]  ;;  %914 = vst [vmem:[#allocation2 + $0x4] sm:$0x1] %v913_v17  ;;  %917 = vst [vmem:[#allocation2 + $0xc] sm:$0x1] %v916_v18 }
  0x89   : > { %v919_v21 = vsel %vm12086_vm5, 0, %v918_v19  ;;  %v922_v22 = vsel %vm12086_vm5, 0, %v921_v20  ;;  %v924_v23 = vld [vmem:[#allocation2 + $0x24] sm:$0x1]  ;;  %v927_v24 = vld [vmem:[#allocation2 + $0x2c] sm:$0x1] }
  0x8a   : > { %920 = vst [vmem:[#allocation2 + $0x14] sm:$0x1] %v919_v21  ;;  %923 = vst [vmem:[#allocation2 + $0x1c] sm:$0x1] %v922_v22  ;;  %v925_v25 = vsel %vm12086_vm5, 0, %v924_v23  ;;  %v928_v26 = vsel %vm12086_vm5, 0, %v927_v24 }
  0x8b   : > { %v930_v27 = vld [vmem:[#allocation2 + $0x34] sm:$0x1]  ;;  %v933_v28 = vld [vmem:[#allocation2 + $0x3c] sm:$0x1]  ;;  %926 = vst [vmem:[#allocation2 + $0x24] sm:$0x1] %v925_v25 }
  0x8c   : > { %929 = vst [vmem:[#allocation2 + $0x2c] sm:$0x1] %v928_v26  ;;  %v931_v29 = vsel %vm12086_vm5, 0, %v930_v27  ;;  %v934_v30 = vsel %vm12086_vm5, 0, %v933_v28  ;;  %v936_v31 = vld [vmem:[#allocation2 + $0x44] sm:$0x1] }
  0x8d   : > { %v939_v32 = vld [vmem:[#allocation2 + $0x4c] sm:$0x1]  ;;  %932 = vst [vmem:[#allocation2 + $0x34] sm:$0x1] %v931_v29  ;;  %935 = vst [vmem:[#allocation2 + $0x3c] sm:$0x1] %v934_v30 }
  0x8e   : > { %v937_v33 = vsel %vm12086_vm5, 0, %v936_v31  ;;  %v940_v34 = vsel %vm12086_vm5, 0, %v939_v32  ;;  %v942_v35 = vld [vmem:[#allocation2 + $0x54] sm:$0x1]  ;;  %v945_v36 = vld [vmem:[#allocation2 + $0x5c] sm:$0x1] }
  0x8f   : > { %938 = vst [vmem:[#allocation2 + $0x44] sm:$0x1] %v937_v33  ;;  %941 = vst [vmem:[#allocation2 + $0x4c] sm:$0x1] %v940_v34  ;;  %v943_v37 = vsel %vm12086_vm5, 0, %v942_v35  ;;  %v946_v38 = vsel %vm12086_vm5, 0, %v945_v36 }
  0x90   : > { %v948_v39 = vld [vmem:[#allocation2 + $0x64] sm:$0x1]  ;;  %v951_v40 = vld [vmem:[#allocation2 + $0x6c] sm:$0x1]  ;;  %944 = vst [vmem:[#allocation2 + $0x54] sm:$0x1] %v943_v37 }
  0x91   : > { %947 = vst [vmem:[#allocation2 + $0x5c] sm:$0x1] %v946_v38  ;;  %v949_v41 = vsel %vm12086_vm5, 0, %v948_v39  ;;  %v952_v42 = vsel %vm12086_vm5, 0, %v951_v40  ;;  %v954_v43 = vld [vmem:[#allocation2 + $0x74] sm:$0x1] }
  0x92   : > { %v957_v44 = vld [vmem:[#allocation2 + $0x7c] sm:$0x1]  ;;  %950 = vst [vmem:[#allocation2 + $0x64] sm:$0x1] %v949_v41  ;;  %953 = vst [vmem:[#allocation2 + $0x6c] sm:$0x1] %v952_v42 }
  0x93   : > { %v955_v45 = vsel %vm12086_vm5, 0, %v954_v43  ;;  %v958_v46 = vsel %vm12086_vm5, 0, %v957_v44  ;;  %v960_v47 = vld [vmem:[#allocation2 + $0x84] sm:$0x1]  ;;  %v963_v48 = vld [vmem:[#allocation2 + $0x8c] sm:$0x1] }
  0x94   : > { %956 = vst [vmem:[#allocation2 + $0x74] sm:$0x1] %v955_v45  ;;  %959 = vst [vmem:[#allocation2 + $0x7c] sm:$0x1] %v958_v46  ;;  %v961_v49 = vsel %vm12086_vm5, 0, %v960_v47  ;;  %v964_v50 = vsel %vm12086_vm5, 0, %v963_v48 }
  0x95   : > { %v966_v51 = vld [vmem:[#allocation2 + $0x94] sm:$0x1]  ;;  %v969_v52 = vld [vmem:[#allocation2 + $0x9c] sm:$0x1]  ;;  %962 = vst [vmem:[#allocation2 + $0x84] sm:$0x1] %v961_v49 }
  0x96   : > { %965 = vst [vmem:[#allocation2 + $0x8c] sm:$0x1] %v964_v50  ;;  %v967_v53 = vsel %vm12086_vm5, 0, %v966_v51  ;;  %v970_v54 = vsel %vm12086_vm5, 0, %v969_v52  ;;  %v972_v55 = vld [vmem:[#allocation2 + $0xa4] sm:$0x1] }
  0x97   : > { %v975_v56 = vld [vmem:[#allocation2 + $0xac] sm:$0x1]  ;;  %968 = vst [vmem:[#allocation2 + $0x94] sm:$0x1] %v967_v53  ;;  %971 = vst [vmem:[#allocation2 + $0x9c] sm:$0x1] %v970_v54 }
  0x98   : > { %v973_v57 = vsel %vm12086_vm5, 0, %v972_v55  ;;  %v976_v58 = vsel %vm12086_vm5, 0, %v975_v56  ;;  %v978_v59 = vld [vmem:[#allocation2 + $0xb4] sm:$0x1]  ;;  %v981_v60 = vld [vmem:[#allocation2 + $0xbc] sm:$0x1] }
  0x99   : > { %974 = vst [vmem:[#allocation2 + $0xa4] sm:$0x1] %v973_v57  ;;  %977 = vst [vmem:[#allocation2 + $0xac] sm:$0x1] %v976_v58  ;;  %v979_v61 = vsel %vm12086_vm5, 0, %v978_v59  ;;  %v982_v62 = vsel %vm12086_vm5, 0, %v981_v60 }
  0x9a   : > { %v984_v63 = vld [vmem:[#allocation2 + $0xc4] sm:$0x1]  ;;  %v987_v0 = vld [vmem:[#allocation2 + $0xcc] sm:$0x1]  ;;  %980 = vst [vmem:[#allocation2 + $0xb4] sm:$0x1] %v979_v61 }
  0x9b   : > { %983 = vst [vmem:[#allocation2 + $0xbc] sm:$0x1] %v982_v62  ;;  %v985_v1 = vsel %vm12086_vm5, 0, %v984_v63  ;;  %v988_v2 = vsel %vm12086_vm5, 0, %v987_v0  ;;  %v990_v4 = vld [vmem:[#allocation2 + $0xd4] sm:$0x1] }
  0x9c   : > { %v993_v5 = vld [vmem:[#allocation2 + $0xdc] sm:$0x1]  ;;  %986 = vst [vmem:[#allocation2 + $0xc4] sm:$0x1] %v985_v1  ;;  %989 = vst [vmem:[#allocation2 + $0xcc] sm:$0x1] %v988_v2 }
  0x9d   : > { %v991_v6 = vsel %vm12086_vm5, 0, %v990_v4  ;;  %v994_v7 = vsel %vm12086_vm5, 0, %v993_v5  ;;  %v996_v8 = vld [vmem:[#allocation2 + $0xe4] sm:$0x1]  ;;  %v999_v9 = vld [vmem:[#allocation2 + $0xec] sm:$0x1] }
  0x9e   : > { %992 = vst [vmem:[#allocation2 + $0xd4] sm:$0x1] %v991_v6  ;;  %995 = vst [vmem:[#allocation2 + $0xdc] sm:$0x1] %v994_v7  ;;  %v997_v10 = vsel %vm12086_vm5, 0, %v996_v8  ;;  %v1000_v11 = vsel %vm12086_vm5, 0, %v999_v9 }
  0x9f   : > { %v1002_v12 = vld [vmem:[#allocation2 + $0xf4] sm:$0x1]  ;;  %v1005_v13 = vld [vmem:[#allocation2 + $0xfc] sm:$0x1]  ;;  %998 = vst [vmem:[#allocation2 + $0xe4] sm:$0x1] %v997_v10 }
  0xa0   : > { %1001 = vst [vmem:[#allocation2 + $0xec] sm:$0x1] %v1000_v11  ;;  %v1003_v15 = vsel %vm12086_vm5, 0, %v1002_v12  ;;  %v1006_v16 = vsel %vm12086_vm5, 0, %v1005_v13  ;;  %v1008_v17 = vld [vmem:[#allocation2 + $0x104] sm:$0x1] }
  0xa1   : > { %v1011_v18 = vld [vmem:[#allocation2 + $0x10c] sm:$0x1]  ;;  %1004 = vst [vmem:[#allocation2 + $0xf4] sm:$0x1] %v1003_v15  ;;  %1007 = vst [vmem:[#allocation2 + $0xfc] sm:$0x1] %v1006_v16 }
  0xa2   : > { %v1009_v19 = vsel %vm12086_vm5, 0, %v1008_v17  ;;  %v1012_v20 = vsel %vm12086_vm5, 0, %v1011_v18  ;;  %v1014_v21 = vld [vmem:[#allocation2 + $0x114] sm:$0x1]  ;;  %v1017_v22 = vld [vmem:[#allocation2 + $0x11c] sm:$0x1] }
  0xa3   : > { %1010 = vst [vmem:[#allocation2 + $0x104] sm:$0x1] %v1009_v19  ;;  %1013 = vst [vmem:[#allocation2 + $0x10c] sm:$0x1] %v1012_v20  ;;  %v1015_v23 = vsel %vm12086_vm5, 0, %v1014_v21  ;;  %v1018_v24 = vsel %vm12086_vm5, 0, %v1017_v22 }
  0xa4   : > { %v1020_v25 = vld [vmem:[#allocation2 + $0x124] sm:$0x1]  ;;  %v1023_v26 = vld [vmem:[#allocation2 + $0x12c] sm:$0x1]  ;;  %1016 = vst [vmem:[#allocation2 + $0x114] sm:$0x1] %v1015_v23 }
  0xa5   : > { %1019 = vst [vmem:[#allocation2 + $0x11c] sm:$0x1] %v1018_v24  ;;  %v1021_v27 = vsel %vm12086_vm5, 0, %v1020_v25  ;;  %v1024_v28 = vsel %vm12086_vm5, 0, %v1023_v26  ;;  %v1026_v29 = vld [vmem:[#allocation2 + $0x134] sm:$0x1] }
  0xa6   : > { %v1029_v30 = vld [vmem:[#allocation2 + $0x13c] sm:$0x1]  ;;  %1022 = vst [vmem:[#allocation2 + $0x124] sm:$0x1] %v1021_v27  ;;  %1025 = vst [vmem:[#allocation2 + $0x12c] sm:$0x1] %v1024_v28 }
  0xa7   : > { %v1027_v31 = vsel %vm12086_vm5, 0, %v1026_v29  ;;  %v1030_v32 = vsel %vm12086_vm5, 0, %v1029_v30  ;;  %v1032_v33 = vld [vmem:[#allocation2 + $0x144] sm:$0x1]  ;;  %v1035_v34 = vld [vmem:[#allocation2 + $0x14c] sm:$0x1] }
  0xa8   : > { %1028 = vst [vmem:[#allocation2 + $0x134] sm:$0x1] %v1027_v31  ;;  %1031 = vst [vmem:[#allocation2 + $0x13c] sm:$0x1] %v1030_v32  ;;  %v1033_v35 = vsel %vm12086_vm5, 0, %v1032_v33  ;;  %v1036_v36 = vsel %vm12086_vm5, 0, %v1035_v34 }
  0xa9   : > { %v1038_v37 = vld [vmem:[#allocation2 + $0x154] sm:$0x1]  ;;  %v1041_v38 = vld [vmem:[#allocation2 + $0x15c] sm:$0x1]  ;;  %1034 = vst [vmem:[#allocation2 + $0x144] sm:$0x1] %v1033_v35 }
  0xaa   : > { %1037 = vst [vmem:[#allocation2 + $0x14c] sm:$0x1] %v1036_v36  ;;  %v1039_v39 = vsel %vm12086_vm5, 0, %v1038_v37  ;;  %v1042_v40 = vsel %vm12086_vm5, 0, %v1041_v38  ;;  %v1044_v41 = vld [vmem:[#allocation2 + $0x164] sm:$0x1] }
  0xab   : > { %v1047_v42 = vld [vmem:[#allocation2 + $0x16c] sm:$0x1]  ;;  %1040 = vst [vmem:[#allocation2 + $0x154] sm:$0x1] %v1039_v39  ;;  %1043 = vst [vmem:[#allocation2 + $0x15c] sm:$0x1] %v1042_v40 }
  0xac   : > { %v1045_v43 = vsel %vm12086_vm5, 0, %v1044_v41  ;;  %v1048_v44 = vsel %vm12086_vm5, 0, %v1047_v42  ;;  %v1050_v45 = vld [vmem:[#allocation2 + $0x174] sm:$0x1]  ;;  %v1053_v46 = vld [vmem:[#allocation2 + $0x17c] sm:$0x1] }
  0xad   : > { %1046 = vst [vmem:[#allocation2 + $0x164] sm:$0x1] %v1045_v43  ;;  %1049 = vst [vmem:[#allocation2 + $0x16c] sm:$0x1] %v1048_v44  ;;  %v1051_v47 = vsel %vm12086_vm5, 0, %v1050_v45  ;;  %v1054_v48 = vsel %vm12086_vm5, 0, %v1053_v46 }
  0xae   : > { %v1056_v49 = vld [vmem:[#allocation2 + $0x184] sm:$0x1]  ;;  %v1059_v50 = vld [vmem:[#allocation2 + $0x18c] sm:$0x1]  ;;  %1052 = vst [vmem:[#allocation2 + $0x174] sm:$0x1] %v1051_v47 }
  0xaf   : > { %1055 = vst [vmem:[#allocation2 + $0x17c] sm:$0x1] %v1054_v48  ;;  %v1057_v51 = vsel %vm12086_vm5, 0, %v1056_v49  ;;  %v1060_v52 = vsel %vm12086_vm5, 0, %v1059_v50  ;;  %v1062_v53 = vld [vmem:[#allocation2 + $0x194] sm:$0x1] }
  0xb0   : > { %v1065_v54 = vld [vmem:[#allocation2 + $0x19c] sm:$0x1]  ;;  %1058 = vst [vmem:[#allocation2 + $0x184] sm:$0x1] %v1057_v51  ;;  %1061 = vst [vmem:[#allocation2 + $0x18c] sm:$0x1] %v1060_v52 }
  0xb1   : > { %v1063_v55 = vsel %vm12086_vm5, 0, %v1062_v53  ;;  %v1066_v56 = vsel %vm12086_vm5, 0, %v1065_v54  ;;  %v1068_v57 = vld [vmem:[#allocation2 + $0x1a4] sm:$0x1]  ;;  %v1071_v58 = vld [vmem:[#allocation2 + $0x1ac] sm:$0x1] }
  0xb2   : > { %1064 = vst [vmem:[#allocation2 + $0x194] sm:$0x1] %v1063_v55  ;;  %1067 = vst [vmem:[#allocation2 + $0x19c] sm:$0x1] %v1066_v56  ;;  %v1069_v59 = vsel %vm12086_vm5, 0, %v1068_v57  ;;  %v1072_v60 = vsel %vm12086_vm5, 0, %v1071_v58 }
  0xb3   : > { %v1074_v61 = vld [vmem:[#allocation2 + $0x1b4] sm:$0x1]  ;;  %v1077_v62 = vld [vmem:[#allocation2 + $0x1bc] sm:$0x1]  ;;  %1070 = vst [vmem:[#allocation2 + $0x1a4] sm:$0x1] %v1069_v59 }
  0xb4   : > { %1073 = vst [vmem:[#allocation2 + $0x1ac] sm:$0x1] %v1072_v60  ;;  %v1075_v63 = vsel %vm12086_vm5, 0, %v1074_v61  ;;  %v1078_v0 = vsel %vm12086_vm5, 0, %v1077_v62  ;;  %v1080_v1 = vld [vmem:[#allocation2 + $0x1c4] sm:$0x1] }
  0xb5   : > { %v1083_v2 = vld [vmem:[#allocation2 + $0x1cc] sm:$0x1]  ;;  %1076 = vst [vmem:[#allocation2 + $0x1b4] sm:$0x1] %v1075_v63  ;;  %1079 = vst [vmem:[#allocation2 + $0x1bc] sm:$0x1] %v1078_v0 }
  0xb6   : > { %v1081_v4 = vsel %vm12086_vm5, 0, %v1080_v1  ;;  %v1084_v5 = vsel %vm12086_vm5, 0, %v1083_v2  ;;  %v1086_v6 = vld [vmem:[#allocation2 + $0x1d4] sm:$0x1]  ;;  %v1089_v7 = vld [vmem:[#allocation2 + $0x1dc] sm:$0x1] }
  0xb7   : > { %1082 = vst [vmem:[#allocation2 + $0x1c4] sm:$0x1] %v1081_v4  ;;  %1085 = vst [vmem:[#allocation2 + $0x1cc] sm:$0x1] %v1084_v5  ;;  %v1087_v8 = vsel %vm12086_vm5, 0, %v1086_v6  ;;  %v1090_v9 = vsel %vm12086_vm5, 0, %v1089_v7 }
  0xb8   : > { %v1092_v10 = vld [vmem:[#allocation2 + $0x1e4] sm:$0x1]  ;;  %v1095_v11 = vld [vmem:[#allocation2 + $0x1ec] sm:$0x1]  ;;  %1088 = vst [vmem:[#allocation2 + $0x1d4] sm:$0x1] %v1087_v8 }
  0xb9   : > { %1091 = vst [vmem:[#allocation2 + $0x1dc] sm:$0x1] %v1090_v9  ;;  %v1093_v12 = vsel %vm12086_vm5, 0, %v1092_v10  ;;  %v1096_v13 = vsel %vm12086_vm5, 0, %v1095_v11  ;;  %v1098_v15 = vld [vmem:[#allocation2 + $0x1f4] sm:$0x1] }
  0xba   : > { %v1101_v16 = vld [vmem:[#allocation2 + $0x1fc] sm:$0x1]  ;;  %1094 = vst [vmem:[#allocation2 + $0x1e4] sm:$0x1] %v1093_v12  ;;  %1097 = vst [vmem:[#allocation2 + $0x1ec] sm:$0x1] %v1096_v13 }
  0xbb   : > { %v1099_v17 = vsel %vm12086_vm5, 0, %v1098_v15  ;;  %v1102_v18 = vsel %vm12086_vm5, 0, %v1101_v16  ;;  %v1104_v19 = vld [vmem:[#allocation2 + $0x204] sm:$0x1]  ;;  %v1107_v20 = vld [vmem:[#allocation2 + $0x20c] sm:$0x1] }
  0xbc   : > { %1100 = vst [vmem:[#allocation2 + $0x1f4] sm:$0x1] %v1099_v17  ;;  %1103 = vst [vmem:[#allocation2 + $0x1fc] sm:$0x1] %v1102_v18  ;;  %v1105_v21 = vsel %vm12086_vm5, 0, %v1104_v19  ;;  %v1108_v22 = vsel %vm12086_vm5, 0, %v1107_v20 }
  0xbd   : > { %v1110_v23 = vld [vmem:[#allocation2 + $0x214] sm:$0x1]  ;;  %v1113_v24 = vld [vmem:[#allocation2 + $0x21c] sm:$0x1]  ;;  %1106 = vst [vmem:[#allocation2 + $0x204] sm:$0x1] %v1105_v21 }
  0xbe   : > { %1109 = vst [vmem:[#allocation2 + $0x20c] sm:$0x1] %v1108_v22  ;;  %v1111_v25 = vsel %vm12086_vm5, 0, %v1110_v23  ;;  %v1114_v26 = vsel %vm12086_vm5, 0, %v1113_v24  ;;  %v1116_v27 = vld [vmem:[#allocation2 + $0x224] sm:$0x1] }
  0xbf   : > { %v1119_v28 = vld [vmem:[#allocation2 + $0x22c] sm:$0x1]  ;;  %1112 = vst [vmem:[#allocation2 + $0x214] sm:$0x1] %v1111_v25  ;;  %1115 = vst [vmem:[#allocation2 + $0x21c] sm:$0x1] %v1114_v26 }
  0xc0   : > { %v1117_v29 = vsel %vm12086_vm5, 0, %v1116_v27  ;;  %v1120_v30 = vsel %vm12086_vm5, 0, %v1119_v28  ;;  %v1122_v31 = vld [vmem:[#allocation2 + $0x234] sm:$0x1]  ;;  %v1125_v32 = vld [vmem:[#allocation2 + $0x23c] sm:$0x1] }
  0xc1   : > { %1118 = vst [vmem:[#allocation2 + $0x224] sm:$0x1] %v1117_v29  ;;  %1121 = vst [vmem:[#allocation2 + $0x22c] sm:$0x1] %v1120_v30  ;;  %v1123_v33 = vsel %vm12086_vm5, 0, %v1122_v31  ;;  %v1126_v34 = vsel %vm12086_vm5, 0, %v1125_v32 }
  0xc2   : > { %v1128_v35 = vld [vmem:[#allocation2 + $0x244] sm:$0x1]  ;;  %v1131_v36 = vld [vmem:[#allocation2 + $0x24c] sm:$0x1]  ;;  %1124 = vst [vmem:[#allocation2 + $0x234] sm:$0x1] %v1123_v33 }
  0xc3   : > { %1127 = vst [vmem:[#allocation2 + $0x23c] sm:$0x1] %v1126_v34  ;;  %v1129_v37 = vsel %vm12086_vm5, 0, %v1128_v35  ;;  %v1132_v38 = vsel %vm12086_vm5, 0, %v1131_v36  ;;  %v1134_v39 = vld [vmem:[#allocation2 + $0x254] sm:$0x1] }
  0xc4   : > { %v1137_v40 = vld [vmem:[#allocation2 + $0x25c] sm:$0x1]  ;;  %1130 = vst [vmem:[#allocation2 + $0x244] sm:$0x1] %v1129_v37  ;;  %1133 = vst [vmem:[#allocation2 + $0x24c] sm:$0x1] %v1132_v38 }
  0xc5   : > { %v1135_v41 = vsel %vm12086_vm5, 0, %v1134_v39  ;;  %v1138_v42 = vsel %vm12086_vm5, 0, %v1137_v40  ;;  %v1140_v43 = vld [vmem:[#allocation2 + $0x264] sm:$0x1]  ;;  %v1143_v44 = vld [vmem:[#allocation2 + $0x26c] sm:$0x1] }
  0xc6   : > { %1136 = vst [vmem:[#allocation2 + $0x254] sm:$0x1] %v1135_v41  ;;  %1139 = vst [vmem:[#allocation2 + $0x25c] sm:$0x1] %v1138_v42  ;;  %v1141_v45 = vsel %vm12086_vm5, 0, %v1140_v43  ;;  %v1144_v46 = vsel %vm12086_vm5, 0, %v1143_v44 }
  0xc7   : > { %v1146_v47 = vld [vmem:[#allocation2 + $0x274] sm:$0x1]  ;;  %v1149_v48 = vld [vmem:[#allocation2 + $0x27c] sm:$0x1]  ;;  %1142 = vst [vmem:[#allocation2 + $0x264] sm:$0x1] %v1141_v45 }
  0xc8   : > { %1145 = vst [vmem:[#allocation2 + $0x26c] sm:$0x1] %v1144_v46  ;;  %v1147_v49 = vsel %vm12086_vm5, 0, %v1146_v47  ;;  %v1150_v50 = vsel %vm12086_vm5, 0, %v1149_v48  ;;  %v1152_v51 = vld [vmem:[#allocation2 + $0x284] sm:$0x1] }
  0xc9   : > { %v1155_v52 = vld [vmem:[#allocation2 + $0x28c] sm:$0x1]  ;;  %1148 = vst [vmem:[#allocation2 + $0x274] sm:$0x1] %v1147_v49  ;;  %1151 = vst [vmem:[#allocation2 + $0x27c] sm:$0x1] %v1150_v50 }
  0xca   : > { %v1153_v53 = vsel %vm12086_vm5, 0, %v1152_v51  ;;  %v1156_v54 = vsel %vm12086_vm5, 0, %v1155_v52  ;;  %v1158_v55 = vld [vmem:[#allocation2 + $0x294] sm:$0x1]  ;;  %v1161_v56 = vld [vmem:[#allocation2 + $0x29c] sm:$0x1] }
  0xcb   : > { %1154 = vst [vmem:[#allocation2 + $0x284] sm:$0x1] %v1153_v53  ;;  %1157 = vst [vmem:[#allocation2 + $0x28c] sm:$0x1] %v1156_v54  ;;  %v1159_v57 = vsel %vm12086_vm5, 0, %v1158_v55  ;;  %v1162_v58 = vsel %vm12086_vm5, 0, %v1161_v56 }
  0xcc   : > { %v1164_v59 = vld [vmem:[#allocation2 + $0x2a4] sm:$0x1]  ;;  %v1167_v60 = vld [vmem:[#allocation2 + $0x2ac] sm:$0x1]  ;;  %1160 = vst [vmem:[#allocation2 + $0x294] sm:$0x1] %v1159_v57 }
  0xcd   : > { %1163 = vst [vmem:[#allocation2 + $0x29c] sm:$0x1] %v1162_v58  ;;  %v1165_v61 = vsel %vm12086_vm5, 0, %v1164_v59  ;;  %v1168_v62 = vsel %vm12086_vm5, 0, %v1167_v60  ;;  %v1170_v63 = vld [vmem:[#allocation2 + $0x2b4] sm:$0x1] }
  0xce   : > { %v1173_v0 = vld [vmem:[#allocation2 + $0x2bc] sm:$0x1]  ;;  %1166 = vst [vmem:[#allocation2 + $0x2a4] sm:$0x1] %v1165_v61  ;;  %1169 = vst [vmem:[#allocation2 + $0x2ac] sm:$0x1] %v1168_v62 }
  0xcf   : > { %v1171_v1 = vsel %vm12086_vm5, 0, %v1170_v63  ;;  %v1174_v2 = vsel %vm12086_vm5, 0, %v1173_v0  ;;  %v1176_v4 = vld [vmem:[#allocation2 + $0x2c4] sm:$0x1]  ;;  %v1179_v5 = vld [vmem:[#allocation2 + $0x2cc] sm:$0x1] }
  0xd0   : > { %1172 = vst [vmem:[#allocation2 + $0x2b4] sm:$0x1] %v1171_v1  ;;  %1175 = vst [vmem:[#allocation2 + $0x2bc] sm:$0x1] %v1174_v2  ;;  %v1177_v6 = vsel %vm12086_vm5, 0, %v1176_v4  ;;  %v1180_v7 = vsel %vm12086_vm5, 0, %v1179_v5 }
  0xd1   : > { %v1182_v8 = vld [vmem:[#allocation2 + $0x2d4] sm:$0x1]  ;;  %v1185_v9 = vld [vmem:[#allocation2 + $0x2dc] sm:$0x1]  ;;  %1178 = vst [vmem:[#allocation2 + $0x2c4] sm:$0x1] %v1177_v6 }
  0xd2   : > { %1181 = vst [vmem:[#allocation2 + $0x2cc] sm:$0x1] %v1180_v7  ;;  %v1183_v10 = vsel %vm12086_vm5, 0, %v1182_v8  ;;  %v1186_v11 = vsel %vm12086_vm5, 0, %v1185_v9  ;;  %v1188_v12 = vld [vmem:[#allocation2 + $0x2e4] sm:$0x1] }
  0xd3   : > { %v1191_v13 = vld [vmem:[#allocation2 + $0x2ec] sm:$0x1]  ;;  %1184 = vst [vmem:[#allocation2 + $0x2d4] sm:$0x1] %v1183_v10  ;;  %1187 = vst [vmem:[#allocation2 + $0x2dc] sm:$0x1] %v1186_v11 }
  0xd4   : > { %v1189_v15 = vsel %vm12086_vm5, 0, %v1188_v12  ;;  %v1192_v16 = vsel %vm12086_vm5, 0, %v1191_v13  ;;  %v1194_v17 = vld [vmem:[#allocation2 + $0x2f4] sm:$0x1]  ;;  %v1197_v18 = vld [vmem:[#allocation2 + $0x2fc] sm:$0x1] }
  0xd5   : > { %1190 = vst [vmem:[#allocation2 + $0x2e4] sm:$0x1] %v1189_v15  ;;  %1193 = vst [vmem:[#allocation2 + $0x2ec] sm:$0x1] %v1192_v16  ;;  %v1195_v19 = vsel %vm12086_vm5, 0, %v1194_v17  ;;  %v1198_v20 = vsel %vm12086_vm5, 0, %v1197_v18 }
  0xd6   : > { %v1200_v21 = vld [vmem:[#allocation2 + $0x304] sm:$0x1]  ;;  %v1203_v22 = vld [vmem:[#allocation2 + $0x30c] sm:$0x1]  ;;  %1196 = vst [vmem:[#allocation2 + $0x2f4] sm:$0x1] %v1195_v19 }
  0xd7   : > { %1199 = vst [vmem:[#allocation2 + $0x2fc] sm:$0x1] %v1198_v20  ;;  %v1201_v23 = vsel %vm12086_vm5, 0, %v1200_v21  ;;  %v1204_v24 = vsel %vm12086_vm5, 0, %v1203_v22  ;;  %v1206_v25 = vld [vmem:[#allocation2 + $0x314] sm:$0x1] }
  0xd8   : > { %v1209_v26 = vld [vmem:[#allocation2 + $0x31c] sm:$0x1]  ;;  %1202 = vst [vmem:[#allocation2 + $0x304] sm:$0x1] %v1201_v23  ;;  %1205 = vst [vmem:[#allocation2 + $0x30c] sm:$0x1] %v1204_v24 }
  0xd9   : > { %v1207_v27 = vsel %vm12086_vm5, 0, %v1206_v25  ;;  %v1210_v28 = vsel %vm12086_vm5, 0, %v1209_v26 }
  0xda   : > { %1208 = vst [vmem:[#allocation2 + $0x314] sm:$0x1] %v1207_v27  ;;  %1211 = vst [vmem:[#allocation2 + $0x31c] sm:$0x1] %v1210_v28 }
  0xdb LB: >> { %s15240_s1 = sld [smem:[#allocation10_spill]]  ;;  %vm1253_vm6 = vcmask 1041408   ;;  %s9195_s30 = sshll.u32 %s11508_s22, 6  ;;  %vm1240_vm7 = vcmask 31744   ;;  %vm1323_vm8 = vcmask 64512   ;;  %vm12340_vm9 = vmand %vm523_vm0, %vm910_vm4  ;;  %s11508_s22 = sphi %s12291_s22, %s1217_s22  }
  0xdc   : >> { %s1219_s21 = scalar_lea.vmem %s11894_s19, %s9195_s30  ;;  %s15241_s2 = sld [smem:[#allocation11_spill]] }
  0xdd   : >> { %v1220_v30 = vld [vmem:[%s1219_s21] sm:$0xff]  ;;  %v1221_v31 = vld [vmem:[%s1219_s21 + $0x8] sm:$0xff]  ;;  %v1222_v35 = vld [vmem:[%s1219_s21 + $0x10] sm:$0xff] }
  0xde   : >> { %v1224_v32 = vld [vmem:[%s1219_s21 + $0x20] sm:$0xff]  ;;  %v1228_v33 = vpack.c.bf16 %v1221_v31, %v1220_v30  ;;  %v1225_v34 = vld [vmem:[%s1219_s21 + $0x28] sm:$0xff]  ;;  %v1223_v36 = vld [vmem:[%s1219_s21 + $0x18] sm:$0xff] }
  0xdf   : >> { %v1230_v37 = vpack.c.bf16 %v1225_v34, %v1224_v32  ;;  %v1229_v38 = vpack.c.bf16 %v1223_v36, %v1222_v35  ;;  %v1226_v39 = vld [vmem:[%s1219_s21 + $0x30] sm:$0xff]  ;;  %v1227_v40 = vld [vmem:[%s1219_s21 + $0x38] sm:$0xff]  ;;  %s12310_s21 = scalar_lea.vmem [#allocation4], %s9195_s30 }
  0xe0   : >> { %10341 = vmatprep.mubr.msk.bf16.mxu0 %vm1240_vm7, %v1228_v33  ;;  %v1231_v41 = vpack.c.bf16 %v1227_v40, %v1226_v39 }
  0xe1   : >> { %v1232_v29 = vld [vmem:[%s15240_s1] sm:$0x3]  ;;  %10345 = vmatprep.mubr.msk.bf16.mxu1 %vm1240_vm7, %v1230_v37  ;;  %s9209_s1 = smul.u32 80, %s11508_s22  ;;  %s1217_s22 = sadd.s32 1, %s11508_s22  }
  0xe2   : >> { %10733 = vmatprep.subr.msk.bf16.mxu0 %vm1253_vm6, %v1232_v29  ;;  %10734 = vmatprep.subr.msk.bf16.mxu1 %vm1253_vm6, %v1232_v29  ;;  %v1255_v14 = vsel %vm1253_vm6, %v1232_v29, 0  ;;  %v12304_v42 = vld [vmem:[%s15241_s2] ss:$0 sm:$0xff]  ;;  %p1214_p11 = scmp.ge.s32.totalorder %s1217_s22, 8  }
  0xe3   : >> { %10340 = vmatpush3.bf16.msra.mxu0 %v1255_v14  ;;  %10596 = vmatpush3.bf16.msra.mxu1 %v1255_v14  ;;  %s12328_s30 = scalar_lea.vmem [#allocation2], %s9209_s1  ;;  %s12413_s1 = smov (%p1214_p11), 0  }
  0xe4   : >> { %v9218_v1 = vld [vmem:[%s12328_s30 + $0x68] sm:$0xf]  ;;  %v9220_v2 = vld [vmem:[%s12328_s30 + $0x6c] sm:$0x1]  ;;  %v9210_v18 = vld [vmem:[%s12328_s30 + $0x58] sm:$0xf] }
  0xe5   : >> { %v9234_v9 = vld [vmem:[%s12328_s30 + $0x88] sm:$0xf]  ;;  %v9236_v10 = vld [vmem:[%s12328_s30 + $0x8c] sm:$0x1]  ;;  %v9212_v23 = vld [vmem:[%s12328_s30 + $0x5c] sm:$0x1] }
  0xe6   : >> { %10342 = vmatmul.mubr.msk.bf16.vlgmr.msra.gmra.mrb[0].mxu0 %vm1240_vm7, %v1229_v38  ;;  %10346 = vmatmul.mubr.msk.bf16.vlgmr.msra.gmra.mrb[0].mxu1 %vm1240_vm7, %v1231_v41  ;;  %v9226_v14 = vld [vmem:[%s12328_s30 + $0x78] sm:$0xf]  ;;  %v9228_v30 = vld [vmem:[%s12328_s30 + $0x7c] sm:$0x1]  ;;  %v9222_v39 = vld [vmem:[%s12328_s30 + $0x70] sm:$0xf] }
  0xe7   : >> { %v9224_v40 = vld [vmem:[%s12328_s30 + $0x74] sm:$0x1] }
 0x1b9   : >> { %v10343_v43 = vpop.f32.mrb[0].mxu0  ;;  %v10347_v45 = vpop.f32.mrb[0].mxu1 }
 0x1ba   : >> { %v1300_v44 = vadd.f32 %v10343_v43, %v12304_v42  ;;  %v1291_v46 = vpop.f32.mrb[1].mxu0  ;;  %v1316_v47 = vadd.f32 %v10347_v45, %v12304_v42  ;;  %v1307_v49 = vpop.f32.mrb[1].mxu1 }
 0x1bb   : >> { %v1292_v48 = vadd.f32 %v12304_v42, %v1291_v46  ;;  %v10344_v50 = vpop.f32.mrb[2].mxu0  ;;  %v1308_v52 = vadd.f32 %v12304_v42, %v1307_v49  ;;  %v10348_v54 = vpop.f32.mrb[2].mxu1 }
 0x1bc   : >> { %1326 = vst.msk [vmem:[%s12310_s21 + $0x10] sm:$0xff] %vm1323_vm8, %v1300_v44  ;;  %v10197_v51 = vpack.c.bf16 %v1300_v44, %v1300_v44  ;;  %v1303_v53 = vadd.f32 %v10344_v50, %v12304_v42  ;;  %v1294_v55 = vpop.f32.mrb[3].mxu0  ;;  %1330 = vst.msk [vmem:[%s12310_s21 + $0x30] sm:$0xff] %vm1323_vm8, %v1316_v47  ;;  %v10201_v56 = vpack.c.bf16 %v1316_v47, %v1316_v47  ;;  %v12322_v60 = vpop.f32.mrb[3].mxu1 }
 0x1bd   : >> { %1324 = vst.msk [vmem:[%s12310_s21] sm:$0xff] %vm1323_vm8, %v1292_v48  ;;  %v10195_v57 = vpack.c.bf16 %v1292_v48, %v1292_v48  ;;  %v1319_v58 = vadd.f32 %v10348_v54, %v12304_v42  ;;  %v1295_v59 = vadd.f32 %v12304_v42, %v1294_v55  ;;  %1328 = vst.msk [vmem:[%s12310_s21 + $0x20] sm:$0xff] %vm1323_vm8, %v1308_v52  ;;  %v9238_v55 = vld [vmem:[%s12328_s30 + $0x90] sm:$0xf] }
 0x1be   : >> { %v1374_v61 = vshrl.u32 %v10197_v51, 16  ;;  %v1377_v62 = vshll.u32 %v10197_v51, 16  ;;  %v10199_v63 = vpack.c.bf16 %v1308_v52, %v1308_v52  ;;  %1327 = vst.msk [vmem:[%s12310_s21 + $0x18] sm:$0xff] %vm1323_vm8, %v1303_v53  ;;  %v10198_v0 = vpack.c.bf16 %v1303_v53, %v1303_v53 }
 0x1bf   : >> { %v1406_v4 = vshrl.u32 %v10201_v56, 16  ;;  %v1409_v5 = vshll.u32 %v10201_v56, 16  ;;  %v1358_v6 = vshrl.u32 %v10195_v57, 16  ;;  %v1361_v7 = vshll.u32 %v10195_v57, 16  ;;  %1331 = vst.msk [vmem:[%s12310_s21 + $0x38] sm:$0xff] %vm1323_vm8, %v1319_v58  ;;  %1325 = vst.msk [vmem:[%s12310_s21 + $0x8] sm:$0xff] %vm1323_vm8, %v1295_v59 }
 0x1c0   : >> { %v1376_v8 = vrot.slane %v1374_v61, 7  ;;  %v1390_v11 = vshrl.u32 %v10199_v63, 16  ;;  %v1393_v12 = vshll.u32 %v10199_v63, 16  ;;  %v1382_v13 = vshrl.u32 %v10198_v0, 16  ;;  %v9214_v61 = vld [vmem:[%s12328_s30 + $0x60] sm:$0xf] }
 0x1c1   : >> { %v1408_v16 = vrot.slane %v1406_v4, 7  ;;  %v1360_v17 = vrot.slane %v1358_v6, 7  ;;  %v1385_v19 = vshll.u32 %v10198_v0, 16  ;;  %v10202_v20 = vpack.c.bf16 %v1319_v58, %v1319_v58 }
 0x1c2   : >> { %v1379_v21 = vor.u32 %v1377_v62, %v1376_v8  ;;  %v1380_v22 = vrot.slane %v1376_v8, 4  ;;  %v1392_v24 = vrot.slane %v1390_v11, 7  ;;  %v1384_v25 = vrot.slane %v1382_v13, 7  ;;  %v9216_v62 = vld [vmem:[%s12328_s30 + $0x64] sm:$0x1] }
 0x1c3   : >> { %v1411_v26 = vor.u32 %v1409_v5, %v1408_v16  ;;  %v1412_v27 = vrot.slane %v1408_v16, 4  ;;  %v1363_v28 = vor.u32 %v1361_v7, %v1360_v17  ;;  %v1364_v29 = vrot.slane %v1360_v17, 4  ;;  %v9230_v8 = vld [vmem:[%s12328_s30 + $0x80] sm:$0xf] }
 0x1c4   : >> { %v1456_v31 = vsel %vm12340_vm9, %v1379_v21, %v9218_v1  ;;  %v1459_v32 = vsel %vm11872_vm3, %v1380_v22, %v9220_v2  ;;  %v1395_v33 = vor.u32 %v1393_v12, %v1392_v24  ;;  %v1396_v34 = vrot.slane %v1392_v24, 4 }
 0x1c5   : >> { %9219 = vst [vmem:[%s12328_s30 + $0x68] sm:$0xf] %v1456_v31  ;;  %9221 = vst [vmem:[%s12328_s30 + $0x6c] sm:$0x1] %v1459_v32  ;;  %v1480_v35 = vsel %vm12340_vm9, %v1411_v26, %v9234_v9  ;;  %v1483_v36 = vsel %vm11872_vm3, %v1412_v27, %v9236_v10  ;;  %v1444_v37 = vsel %vm12340_vm9, %v1363_v28, %v9210_v18  ;;  %v1388_v45 = vrot.slane %v1384_v25, 4 }
 0x1c6   : >> { %v1447_v38 = vsel %vm11872_vm3, %v1364_v29, %v9212_v23  ;;  %9235 = vst [vmem:[%s12328_s30 + $0x88] sm:$0xf] %v1480_v35  ;;  %9237 = vst [vmem:[%s12328_s30 + $0x8c] sm:$0x1] %v1483_v36  ;;  %v1468_v41 = vsel %vm12340_vm9, %v1395_v33, %v9226_v14  ;;  %v1471_v43 = vsel %vm11872_vm3, %v1396_v34, %v9228_v30  ;;  %v1414_v46 = vshrl.u32 %v10202_v20, 16 }
 0x1c7   : >> { %9211 = vst [vmem:[%s12328_s30 + $0x58] sm:$0xf] %v1444_v37  ;;  %9213 = vst [vmem:[%s12328_s30 + $0x5c] sm:$0x1] %v1447_v38  ;;  %v1387_v44 = vor.u32 %v1385_v19, %v1384_v25  ;;  %v10196_v47 = vpack.c.bf16 %v1295_v59, %v1295_v59  ;;  %v1311_v48 = vadd.f32 %v12304_v42, %v12322_v60  ;;  %v1417_v52 = vshll.u32 %v10202_v20, 16 }
 0x1c8   : >> { %9227 = vst [vmem:[%s12328_s30 + $0x78] sm:$0xf] %v1468_v41  ;;  %9229 = vst [vmem:[%s12328_s30 + $0x7c] sm:$0x1] %v1471_v43  ;;  %v1465_v50 = vsel %vm11872_vm3, %v1388_v45, %v9224_v40  ;;  %v1416_v51 = vrot.slane %v1414_v46, 7  ;;  %v12411_v16 = vmov (%p1214_p11), 0.0  }
 0x1c9   : >> { %v1462_v49 = vsel %vm12340_vm9, %v1387_v44, %v9222_v39  ;;  %9225 = vst [vmem:[%s12328_s30 + $0x74] sm:$0x1] %v1465_v50  ;;  %v1366_v53 = vshrl.u32 %v10196_v47, 16  ;;  %1329 = vst.msk [vmem:[%s12310_s21 + $0x28] sm:$0xff] %vm1323_vm8, %v1311_v48  ;;  %v10200_v54 = vpack.c.bf16 %v1311_v48, %v1311_v48  ;;  %v9240_v42 = vld [vmem:[%s12328_s30 + $0x94] sm:$0x1] }
 0x1ca   : >> { %9223 = vst [vmem:[%s12328_s30 + $0x70] sm:$0xf] %v1462_v49  ;;  %v1369_v56 = vshll.u32 %v10196_v47, 16  ;;  %v1419_v57 = vor.u32 %v1417_v52, %v1416_v51  ;;  %v1420_v58 = vrot.slane %v1416_v51, 4  ;;  %v9232_v9 = vld [vmem:[%s12328_s30 + $0x84] sm:$0x1] }
 0x1cb   : >> { %v1368_v59 = vrot.slane %v1366_v53, 7  ;;  %v1398_v60 = vshrl.u32 %v10200_v54, 16  ;;  %v1401_v5 = vshll.u32 %v10200_v54, 16 }
 0x1cc   : >> { %v1486_v63 = vsel %vm12340_vm9, %v1419_v57, %v9238_v55  ;;  %v1489_v0 = vsel %vm11872_vm3, %v1420_v58, %v9240_v42  ;;  %1216 = sbr.rel (!%p1214_p11) target bundleno = 219 (0xdb), region = 208 }
 0x1cd   : >> { %v1371_v1 = vor.u32 %v1369_v56, %v1368_v59  ;;  %v1372_v2 = vrot.slane %v1368_v59, 4  ;;  %9239 = vst [vmem:[%s12328_s30 + $0x90] sm:$0xf] %v1486_v63  ;;  %9241 = vst [vmem:[%s12328_s30 + $0x94] sm:$0x1] %v1489_v0  ;;  %v1400_v4 = vrot.slane %v1398_v60, 7 }
 0x1cf   : >> { %v1450_v6 = vsel %vm12340_vm9, %v1371_v1, %v9214_v61  ;;  %v1453_v7 = vsel %vm11872_vm3, %v1372_v2, %v9216_v62  ;;  %v1403_v10 = vor.u32 %v1401_v5, %v1400_v4  ;;  %v1404_v11 = vrot.slane %v1400_v4, 4 }
 0x1d0   : >> { %9215 = vst [vmem:[%s12328_s30 + $0x60] sm:$0xf] %v1450_v6  ;;  %9217 = vst [vmem:[%s12328_s30 + $0x64] sm:$0x1] %v1453_v7 }
 0x1d1   : >> { %v1474_v12 = vsel %vm12340_vm9, %v1403_v10, %v9230_v8  ;;  %v1477_v13 = vsel %vm11872_vm3, %v1404_v11, %v9232_v9 }
 0x1d2   : >> { %9231 = vst [vmem:[%s12328_s30 + $0x80] sm:$0xf] %v1474_v12  ;;  %9233 = vst [vmem:[%s12328_s30 + $0x84] sm:$0x1] %v1477_v13 }
 0x1d3 LB: >> { %s10203_s27 = smul.u32 80, %s11516_s1  ;;  %s11559_s19 = smov 16   ;;  %vm2002_vm10 = vcmask 1043456   ;;  %vm1710_vm11 = vcmask 130048   ;;  %vm1989_vm12 = vcmask 195584   ;;  %s11516_s1 = sphi %s12413_s1, %s1496_s1   ;;  %v11512_v16 = vphi %v12411_v16, %v15245_v16  }
 0x1d4   : >> { %s11560_s22 = smov 8   ;;  %s15244_s3 = sld [smem:[#allocation12_spill]] }
 0x1d5   : >> { %s12422_s29 = scalar_lea.vmem [#allocation2], %s10203_s27  ;;  %s9675_s27 = sshll.u32 %s11516_s1, 6 }
 0x1d6   : >> { %s13544_s2 = scalar_lea.vmem [#allocation3], %s9675_s27  ;;  %s1496_s1 = sadd.s32 1, %s11516_s1  }
 0x1d7   : >> { %p1493_p12 = scmp.ge.s32.totalorder %s1496_s1, 8  }
 0x1d8   : > { %vm11562_vm13 = vmmov (%p1493_p12), 0   ;;  %s13590_s1 = smov (%p1493_p12), 0  }
 0x1d9   : >> { %v9269_v17 = vld [vmem:[%s12422_s29 + $0x14] sm:$0x1]  ;;  %v9277_v18 = vld [vmem:[%s12422_s29 + $0x10] sm:$0xe]  ;;  %v9268_v22 = vld [vmem:[%s12422_s29 + $0xc] sm:$0x1] }
 0x1da   : >> { %v12427_v19 = vld [vmem:[%s12422_s29 + $0x10] sm:$0xf]  ;;  %v9293_v20 = vcombine.low %v9277_v18, %v9269_v17  ;;  %v9276_v23 = vld [vmem:[%s12422_s29 + $0x8] sm:$0xe]  ;;  %v12437_v27 = vld [vmem:[%s12422_s29 + $0x58] sm:$0xf] }
 0x1db   : >> { %v9285_v21 = vcombine.low %v12427_v19, %v9269_v17  ;;  %v12433_v24 = vld [vmem:[%s12422_s29 + $0x8] sm:$0xf]  ;;  %v9292_v25 = vcombine.low %v9276_v23, %v9268_v22  ;;  %v12440_v28 = vld [vmem:[%s12422_s29 + $0x5c] sm:$0x1]  ;;  %v12443_v29 = vld [vmem:[%s12422_s29 + $0x60] sm:$0xf] }
 0x1dc   : >> { %v9284_v26 = vcombine.low %v12433_v24, %v9268_v22  ;;  %v1894_v14 = vrot.slane %v9293_v20, 1  ;;  %v9446_v31 = vcombine.low %v12437_v27, %v12440_v28  ;;  %v12448_v32 = vld [vmem:[%s12422_s29 + $0x64] sm:$0x1]  ;;  %v12453_v37 = vld [vmem:[%s12422_s29 + $0x20] sm:$0xf]  ;;  %v10976_v6 = vld [vmem:[%s15244_s3 + $0xc] sm:$0xff]  }
 0x1dd   : >> { %v1807_v30 = vshll.u32 %v9285_v21, 16  ;;  %v1893_v33 = vrot.slane %v9292_v25, 1  ;;  %v9447_v36 = vcombine.low %v12443_v29, %v12448_v32  ;;  %v1805_v40 = vshrl.u32 %v9285_v21, 16  ;;  %v12457_v43 = vld [vmem:[%s12422_s29 + $0x24] sm:$0x1]  ;;  %10349 = vmatprep.subr.bf16.mxu1 %v10976_v6  ;;  %v10980_v20 = vld [vmem:[%s15244_s3 + $0x30] sm:$0xff]  }
 0x1de   : >> { %v1800_v34 = vshll.u32 %v9284_v26, 16  ;;  %v1798_v35 = vshrl.u32 %v9284_v26, 16  ;;  %1903 = vrot.lane.b32.xlu1 %v1894_v14, %s11559_s19  ;;  %v2943_v38 = vshrl.u32 %v9446_v31, 16  ;;  %v2945_v39 = vshll.u32 %v9446_v31, 16  ;;  %v12463_v48 = vld [vmem:[%s12422_s29 + $0x18] sm:$0xf]  ;;  %10350 = vmatpush3.bf16.msra.mxu1 %v10976_v6 }
 0x1df   : >> { %v1809_v41 = vrot.slane %v1807_v30, 1  ;;  %1901 = vrot.lane.b32.xlu0 %v1893_v33, %s11559_s19  ;;  %v2950_v45 = vshrl.u32 %v9447_v36, 16  ;;  %v2952_v46 = vshll.u32 %v9447_v36, 16  ;;  %v9287_v47 = vcombine.low %v12453_v37, %v12457_v43  ;;  %v12466_v50 = vld [vmem:[%s12422_s29 + $0x1c] sm:$0x1]  ;;  %10397 = vmatprep.subr.bf16.mxu0 %v10980_v20 }
 0x1e0   : >> { %v1802_v44 = vrot.slane %v1800_v34, 1  ;;  %v2947_v49 = vrot.slane %v2945_v39, 1  ;;  %v12469_v51 = vld [vmem:[%s12422_s29 + $0x70] sm:$0xf]  ;;  %v12472_v55 = vld [vmem:[%s12422_s29 + $0x74] sm:$0x1]  ;;  %v9286_v56 = vcombine.low %v12463_v48, %v12466_v50  ;;  %10398 = vmatpush3.bf16.msra.mxu0 %v10980_v20 }
 0x1e1   : >> { %v2954_v53 = vrot.slane %v2952_v46, 1  ;;  %v1821_v54 = vshll.u32 %v9287_v47, 16  ;;  %v9449_v57 = vcombine.low %v12469_v51, %v12472_v55  ;;  %v12479_v58 = vld [vmem:[%s12422_s29 + $0x68] sm:$0xf]  ;;  %v12482_v59 = vld [vmem:[%s12422_s29 + $0x6c] sm:$0x1]  ;;  %v1810_v61 = vor.u32 %v1809_v41, %v1805_v40 }
 0x1e2   : >> { %v1803_v52 = vor.u32 %v1802_v44, %v1798_v35  ;;  %v2948_v42 = vor.u32 %v2947_v49, %v2943_v38  ;;  %v1819_v62 = vshrl.u32 %v9287_v47, 16  ;;  %v9448_v63 = vcombine.low %v12479_v58, %v12482_v59  ;;  %v9439_v17 = vld [vmem:[%s12422_s29 + $0x60] sm:$0xe]  ;;  %v9438_v18 = vld [vmem:[%s12422_s29 + $0x58] sm:$0xe] }
 0x1e3   : >> { %v2955_v60 = vor.u32 %v2954_v53, %v2950_v45  ;;  %v1823_v0 = vrot.slane %v1821_v54, 1  ;;  %v1812_v1 = vshrl.u32 %v9286_v56, 16  ;;  %v1814_v2 = vshll.u32 %v9286_v56, 16  ;;  %v9278_v26 = vld [vmem:[%s12422_s29 + $0x18] sm:$0xe] }
 0x1e4   : >> { %1853 = vrot.lane.b32.xlu0 %v1803_v52, %s11560_s22  ;;  %2998 = vrot.lane.b32.xlu1 %v2948_v42, %s11560_s22  ;;  %v2966_v4 = vshll.u32 %v9449_v57, 16  ;;  %v2959_v5 = vshll.u32 %v9448_v63, 16  ;;  %v2957_v8 = vshrl.u32 %v9448_v63, 16  ;;  %v2964_v12 = vshrl.u32 %v9449_v57, 16  ;;  %v9264_v14 = vld [vmem:[%s12422_s29 + $0x28] sm:$0xf] }
 0x1e5   : >> { %v1816_v7 = vrot.slane %v1814_v2, 1  ;;  %v1824_v10 = vor.u32 %v1823_v0, %v1819_v62  ;;  %v9455_v22 = vcombine.low %v9439_v17, %v12448_v32  ;;  %v9454_v23 = vcombine.low %v9438_v18, %v12440_v28  ;;  %v12505_v30 = vld [vmem:[%s12422_s29 + $0x2c] sm:$0x1]  ;;  %v9279_v31 = vld [vmem:[%s12422_s29 + $0x20] sm:$0xe] }
 0x1e6   : >> { %v2961_v9 = vrot.slane %v2959_v5, 1  ;;  %v2968_v13 = vrot.slane %v2966_v4, 1  ;;  %v9265_v33 = vld [vmem:[%s12422_s29 + $0x30] sm:$0xf]  ;;  %v12510_v32 = vld [vmem:[%s12422_s29 + $0x34] sm:$0x1]  ;;  %v9294_v35 = vcombine.low %v9278_v26, %v12466_v50  ;;  %v9288_v36 = vcombine.low %v9264_v14, %v12505_v30 }
 0x1e7   : >> { %v1817_v11 = vor.u32 %v1816_v7, %v1812_v1  ;;  %v3039_v28 = vrot.slane %v9455_v22, 1  ;;  %v3038_v34 = vrot.slane %v9454_v23, 1  ;;  %v9295_v38 = vcombine.low %v9279_v31, %v12457_v43  ;;  %v9440_v39 = vld [vmem:[%s12422_s29 + $0x68] sm:$0xe]  ;;  %v9266_v41 = vld [vmem:[%s12422_s29 + $0x38] sm:$0xf] }
 0x1e8   : >> { %1855 = vrot.lane.b32.xlu0 %v1810_v61, %s11560_s22  ;;  %3000 = vrot.lane.b32.xlu1 %v2955_v60, %s11560_s22  ;;  %v2962_v21 = vor.u32 %v2961_v9, %v2957_v8  ;;  %v2969_v25 = vor.u32 %v2968_v13, %v2964_v12  ;;  %v9289_v40 = vcombine.low %v9265_v33, %v12510_v32  ;;  %v12521_v44 = vld [vmem:[%s12422_s29 + $0x3c] sm:$0x1]  ;;  %v9441_v45 = vld [vmem:[%s12422_s29 + $0x70] sm:$0xe]  ;;  %v1895_v49 = vrot.slane %v9294_v35, 1 }
 0x1e9   : >> { %v9267_v46 = vld [vmem:[%s12422_s29 + $0x40] sm:$0xf]  ;;  %v12526_v47 = vld [vmem:[%s12422_s29 + $0x44] sm:$0x1]  ;;  %v9456_v50 = vcombine.low %v9440_v39, %v12482_v59  ;;  %v1828_v52 = vshll.u32 %v9288_v36, 16  ;;  %v9290_v53 = vcombine.low %v9266_v41, %v12521_v44  ;;  %v1896_v43 = vrot.slane %v9295_v38, 1 }
 0x1ea   : >> { %v9457_v54 = vcombine.low %v9441_v45, %v12472_v55  ;;  %v1835_v42 = vshll.u32 %v9289_v40, 16  ;;  %v9291_v56 = vcombine.low %v9267_v46, %v12526_v47  ;;  %v1826_v60 = vshrl.u32 %v9288_v36, 16  ;;  %v9280_v5 = vld [vmem:[%s12422_s29 + $0x28] sm:$0xe]  ;;  %v9473_v9 = vld [vmem:[%s12422_s29 + $0x60] sm:$0xf] }
 0x1eb   : >> { %v3040_v57 = vrot.slane %v9456_v50, 1  ;;  %v1830_v61 = vrot.slane %v1828_v52, 1  ;;  %v1842_v62 = vshll.u32 %v9290_v53, 16  ;;  %v1833_v63 = vshrl.u32 %v9289_v40, 16  ;;  %v9474_v12 = vld [vmem:[%s12422_s29 + $0x68] sm:$0xf] }
 0x1ec   : >> { %1857 = vrot.lane.b32.xlu0 %v1817_v11, %s11560_s22  ;;  %1859 = vrot.lane.b32.xlu1 %v1824_v10, %s11560_s22  ;;  %v3041_v59 = vrot.slane %v9457_v54, 1  ;;  %v1837_v55 = vrot.slane %v1835_v42, 1  ;;  %v1849_v0 = vshll.u32 %v9291_v56, 16  ;;  %v1840_v2 = vshrl.u32 %v9290_v53, 16  ;;  %v12541_v10 = vld [vmem:[%s12422_s29 + $0x64] sm:$0x1] }
 0x1ed   : >> { %v1831_v1 = vor.u32 %v1830_v61, %v1826_v60  ;;  %v1844_v4 = vrot.slane %v1842_v62, 1  ;;  %v1847_v7 = vshrl.u32 %v9291_v56, 16  ;;  %v9281_v11 = vld [vmem:[%s12422_s29 + $0x30] sm:$0xe]  ;;  %v12546_v13 = vld [vmem:[%s12422_s29 + $0x6c] sm:$0x1]  ;;  %v9296_v18 = vcombine.low %v9280_v5, %v12505_v30 }
 0x1ee   : >> { %v1838_v6 = vor.u32 %v1837_v55, %v1833_v63  ;;  %v1851_v8 = vrot.slane %v1849_v0, 1  ;;  %v9497_v20 = vcombine.low %v9473_v9, %v12541_v10  ;;  %v9297_v22 = vcombine.low %v9281_v11, %v12510_v32  ;;  %v9282_v23 = vld [vmem:[%s12422_s29 + $0x38] sm:$0xe]  ;;  %v9475_v26 = vld [vmem:[%s12422_s29 + $0x70] sm:$0xf] }
 0x1ef   : >> { %v1845_v17 = vor.u32 %v1844_v4, %v1840_v2  ;;  %v9483_v14 = vld [vmem:[%s12422_s29 + $0x74] sm:$0x1]  ;;  %v9283_v31 = vld [vmem:[%s12422_s29 + $0x40] sm:$0xe]  ;;  %v9476_v33 = vld [vmem:[%s12422_s29 + $0x78] sm:$0xf]  ;;  %v9298_v30 = vcombine.low %v9282_v23, %v12521_v44 }
 0x1f0   : >> { %3002 = vrot.lane.b32.xlu0 %v2962_v21, %s11560_s22  ;;  %3004 = vrot.lane.b32.xlu1 %v2969_v25, %s11560_s22  ;;  %v1852_v21 = vor.u32 %v1851_v8, %v1847_v7  ;;  %v9498_v25 = vcombine.low %v9474_v12, %v12546_v13  ;;  %v3292_v35 = vshll.u32 %v9497_v20, 16  ;;  %v9499_v36 = vcombine.low %v9475_v26, %v9483_v14  ;;  %v9489_v42 = vld [vmem:[%s12422_s29 + $0x60] sm:$0xe]  ;;  %v12574_v62 = vld [vmem:[%s12422_s29 + $0x4] sm:$0x1] }
 0x1f1   : >> { %v1898_v38 = vrot.slane %v9297_v22, 1  ;;  %v9299_v32 = vcombine.low %v9283_v31, %v12526_v47  ;;  %v1899_v41 = vrot.slane %v9298_v30, 1  ;;  %v3290_v45 = vshrl.u32 %v9497_v20, 16  ;;  %v1501_v61 = vld [vmem:[%s12422_s29] sm:$0xf] }
 0x1f2   : >> { %v3299_v39 = vshll.u32 %v9498_v25, 16  ;;  %v3294_v46 = vrot.slane %v3292_v35, 1  ;;  %v3297_v50 = vshrl.u32 %v9498_v25, 16  ;;  %v1502_v63 = vld [vmem:[%s12422_s29 + $0x8] sm:$0xf]  ;;  %v9243_v4 = vcombine.low %v1501_v61, %v12574_v62 }
 0x1f3   : >> { %v1900_v44 = vrot.slane %v9299_v32, 1  ;;  %v12579_v55 = vld [vmem:[%s12422_s29 + $0xc] sm:$0x1]  ;;  %v9491_v2 = vld [vmem:[%s12422_s29 + $0x70] sm:$0xe]  ;;  %v12615_v32 = vld [vmem:[%s15244_s3 + $0x3c] sm:$0xff]  }
 0x1f4   : >> { %3046 = vrot.lane.b32.xlu0 %v3038_v34, %s11559_s19  ;;  %3048 = vrot.lane.b32.xlu1 %v3039_v28, %s11559_s19  ;;  %v12560_v28 = vld [vmem:[%s12422_s29 + $0x7c] sm:$0x1]  ;;  %v1897_v34 = vrot.slane %v9296_v18, 1  ;;  %v3301_v47 = vrot.slane %v3299_v39, 1  ;;  %v3295_v53 = vor.u32 %v3294_v46, %v3290_v45  ;;  %v9244_v7 = vcombine.low %v1502_v63, %v12579_v55  ;;  %v1503_v8 = vld [vmem:[%s12422_s29 + $0x10] sm:$0xf] }
 0x1f5   : >> { %v9500_v40 = vcombine.low %v9476_v33, %v12560_v28  ;;  %v12590_v9 = vld [vmem:[%s12422_s29 + $0x14] sm:$0x1]  ;;  %v9492_v11 = vld [vmem:[%s12422_s29 + $0x78] sm:$0xe]  ;;  %v9507_v18 = vcombine.low %v9491_v2, %v9483_v14  ;;  %v1568_v20 = vshll.u32 %v9243_v4, 16  ;;  %v1566_v14 = vshrl.u32 %v9243_v4, 16 }
 0x1f6   : >> { %v3302_v56 = vor.u32 %v3301_v47, %v3297_v50  ;;  %v1504_v12 = vld [vmem:[%s12422_s29 + $0x18] sm:$0xf]  ;;  %v1575_v23 = vshll.u32 %v9244_v7, 16  ;;  %v10979_v31 = vld [vmem:[%s15244_s3 + $0x14] ss:$0 sps:$4 sm:$0xff]   ;;  %v1573_v35 = vshrl.u32 %v9244_v7, 16 }
 0x1f7   : >> { %v3313_v52 = vshll.u32 %v9500_v40, 16  ;;  %v3387_v26 = vrot.slane %v9507_v18, 1  ;;  %v1570_v33 = vrot.slane %v1568_v20, 1  ;;  %v10983_v30 = vld [vmem:[%s15244_s3 + $0x38] ss:$0 sps:$4 sm:$0xff]   ;;  %10735 = vmatprep.subr.msk.bf16.mxu1 %vm2002_vm10, %v10979_v31  ;;  %v12620_v39 = vld [vmem:[%s15244_s3] sm:$0xff]  }
 0x1f8   : >> { %1905 = vrot.lane.b32.xlu0 %v1895_v49, %s11559_s19  ;;  %1907 = vrot.lane.b32.xlu1 %v1896_v43, %s11559_s19  ;;  %v3306_v49 = vshll.u32 %v9499_v36, 16  ;;  %v3304_v43 = vshrl.u32 %v9499_v36, 16  ;;  %v1577_v36 = vrot.slane %v1575_v23, 1  ;;  %v9479_v2 = vld [vmem:[%s12422_s29 + $0x90] sm:$0xf] }
 0x1f9   : >> { %v3315_v60 = vrot.slane %v3313_v52, 1  ;;  %10739 = vmatprep.subr.msk.bf16.mxu0 %vm2002_vm10, %v10983_v30  ;;  %v12650_v4 = vld [vmem:[%s12422_s29 + $0x94] sm:$0x1]  ;;  %v12655_v7 = vld [vmem:[%s12422_s29 + $0x9c] sm:$0x1] }
 0x1fa   : >> { %v3308_v54 = vrot.slane %v3306_v49, 1  ;;  %v1517_v49 = vld [vmem:[%s12422_s29] sm:$0xe]  ;;  %v1578_v50 = vor.u32 %v1577_v36, %v1573_v35 }
 0x1fc   : >> { %3050 = vrot.lane.b32.xlu0 %v3040_v57, %s11559_s19  ;;  %3052 = vrot.lane.b32.xlu1 %v3041_v59, %s11559_s19  ;;  %v3311_v57 = vshrl.u32 %v9500_v40, 16  ;;  %v9490_v59 = vld [vmem:[%s12422_s29 + $0x68] sm:$0xe]  ;;  %v3309_v0 = vor.u32 %v3308_v54, %v3304_v43  ;;  %v2004_v40 = vsel %vm2002_vm10, %v10979_v31, 0  ;;  %v12631_v43 = vld [vmem:[%s12422_s29 + $0x84] sm:$0x1] }
 0x1fd   : >> { %10352 = vmatpush3.bf16.msra.mxu1 %v2004_v40  ;;  %v1518_v54 = vld [vmem:[%s12422_s29 + $0x8] sm:$0xe]  ;;  %v12671_v40 = vld [vmem:[%s12422_s29 + $0x24] sm:$0x1] }
 0x1fe   : >> { %v3316_v5 = vor.u32 %v3315_v60, %v3311_v57  ;;  %10361 = vmatprep.subr.bf16.mxu1 %v12620_v39  ;;  %v9251_v60 = vcombine.low %v1517_v49, %v12574_v62  ;;  %v9252_v63 = vcombine.low %v1518_v54, %v12579_v55 }
 0x200   : >> { %1861 = vrot.lane.b32.xlu0 %v1831_v1, %s11560_s22  ;;  %1863 = vrot.lane.b32.xlu1 %v1838_v6, %s11560_s22  ;;  %v9505_v1 = vcombine.low %v9489_v42, %v12541_v10  ;;  %v9506_v6 = vcombine.low %v9490_v59, %v12546_v13  ;;  %v9508_v13 = vcombine.low %v9492_v11, %v12560_v28  ;;  %v9478_v42 = vld [vmem:[%s12422_s29 + $0x88] sm:$0xf]  ;;  %v1661_v62 = vrot.slane %v9251_v60, 1  ;;  %v9496_v60 = vld [vmem:[%s12422_s29 + $0x98] sm:$0xe] }
 0x201   : >> { %v1662_v55 = vrot.slane %v9252_v63, 1 }
 0x202   : >> { %v3385_v10 = vrot.slane %v9505_v1, 1  ;;  %v3386_v22 = vrot.slane %v9506_v6, 1  ;;  %v3388_v28 = vrot.slane %v9508_v13, 1  ;;  %v9480_v6 = vld [vmem:[%s12422_s29 + $0x98] sm:$0xf] }
 0x203   : >> { %v9504_v20 = vcombine.low %v9480_v6, %v12655_v7 }
 0x204   : >> { %1865 = vrot.lane.b32.xlu0 %v1845_v17, %s11560_s22  ;;  %1867 = vrot.lane.b32.xlu1 %v1852_v21, %s11560_s22  ;;  %v12595_v17 = vld [vmem:[%s12422_s29 + $0x1c] sm:$0x1]  ;;  %v9245_v21 = vcombine.low %v1503_v8, %v12590_v9 }
 0x205   : >> { %v9246_v25 = vcombine.low %v1504_v12, %v12595_v17  ;;  %v9503_v12 = vcombine.low %v9479_v2, %v12650_v4  ;;  %v3339_v35 = vshrl.u32 %v9504_v20, 16  ;;  %v9512_v2 = vcombine.low %v9496_v60, %v12655_v7 }
 0x206   : >> { %v1580_v45 = vshrl.u32 %v9245_v21, 16 }
 0x207   : >> { %v1587_v47 = vshrl.u32 %v9246_v25, 16  ;;  %v3334_v23 = vshll.u32 %v9503_v12, 16 }
 0x208   : >> { %1909 = vrot.lane.b32.xlu0 %v1897_v34, %s11559_s19  ;;  %1911 = vrot.lane.b32.xlu1 %v1898_v38, %s11559_s19  ;;  %v1582_v34 = vshll.u32 %v9245_v21, 16  ;;  %v1589_v38 = vshll.u32 %v9246_v25, 16 }
 0x20a   : >> { %v1584_v46 = vrot.slane %v1582_v34, 1  ;;  %v1591_v52 = vrot.slane %v1589_v38, 1  ;;  %v9494_v34 = vld [vmem:[%s12422_s29 + $0x88] sm:$0xe]  ;;  %v1505_v38 = vld [vmem:[%s12422_s29 + $0x20] sm:$0xf] }
 0x20c   : >> { %1913 = vrot.lane.b32.xlu0 %v1899_v41, %s11559_s19  ;;  %1915 = vrot.lane.b32.xlu1 %v1900_v44, %s11559_s19  ;;  %v1571_v41 = vor.u32 %v1570_v33, %v1566_v14  ;;  %v12626_v44 = vsel %vm2002_vm10, %v10983_v30, 0  ;;  %v1585_v57 = vor.u32 %v1584_v46, %v1580_v45  ;;  %v1592_v59 = vor.u32 %v1591_v52, %v1587_v47  ;;  %v9493_v30 = vld [vmem:[%s12422_s29 + $0x80] sm:$0xe]  ;;  %v12675_v45 = vld [vmem:[%s12422_s29 + $0x2c] sm:$0x1] }
 0x20d   : >> { %10400 = vmatpush3.bf16.msra.mxu0 %v12626_v44  ;;  %v3332_v14 = vshrl.u32 %v9503_v12, 16  ;;  %v3336_v33 = vrot.slane %v3334_v23, 1  ;;  %v9509_v49 = vcombine.low %v9493_v30, %v12631_v43 }
 0x20e   : >> { %10409 = vmatprep.subr.bf16.mxu0 %v12615_v32 }
 0x20f   : >> { %v3337_v46 = vor.u32 %v3336_v33, %v3332_v14  ;;  %v12711_v14 = vld [vmem:[%s12422_s29 + $0xac] sm:$0x1] }
 0x210   : >> { %3345 = vrot.lane.b32.xlu0 %v3295_v53, %s11560_s22  ;;  %3347 = vrot.lane.b32.xlu1 %v3302_v56, %s11560_s22  ;;  %v9477_v53 = vld [vmem:[%s12422_s29 + $0x80] sm:$0xf]  ;;  %v12637_v56 = vld [vmem:[%s12422_s29 + $0x8c] sm:$0x1] }
 0x211   : >> { %v9501_v61 = vcombine.low %v9477_v53, %v12631_v43  ;;  %v9502_v1 = vcombine.low %v9478_v42, %v12637_v56  ;;  %v9510_v52 = vcombine.low %v9494_v34, %v12637_v56  ;;  %v9495_v53 = vld [vmem:[%s12422_s29 + $0x90] sm:$0xe]  ;;  %v3389_v43 = vrot.slane %v9509_v49, 1  ;;  %v1524_v49 = vld [vmem:[%s12422_s29 + $0x38] sm:$0xe] }
 0x212   : >> { %v1507_v42 = vld [vmem:[%s12422_s29 + $0x30] sm:$0xf]  ;;  %v9511_v63 = vcombine.low %v9495_v53, %v12650_v4  ;;  %v3392_v4 = vrot.slane %v9512_v2, 1 }
 0x213   : >> { %v3320_v11 = vshll.u32 %v9501_v61, 16  ;;  %v3325_v25 = vshrl.u32 %v9502_v1, 16  ;;  %v3390_v56 = vrot.slane %v9510_v52, 1 }
 0x214   : >> { %3349 = vrot.lane.b32.xlu0 %v3309_v0, %s11560_s22  ;;  %3351 = vrot.lane.b32.xlu1 %v3316_v5, %s11560_s22  ;;  %v1519_v0 = vld [vmem:[%s12422_s29 + $0x10] sm:$0xe]  ;;  %v1520_v5 = vld [vmem:[%s12422_s29 + $0x18] sm:$0xe] }
 0x215   : >> { %v9253_v8 = vcombine.low %v1519_v0, %v12590_v9  ;;  %v9254_v18 = vcombine.low %v1520_v5, %v12595_v17  ;;  %v3322_v13 = vrot.slane %v3320_v11, 1 }
 0x217   : >> { %v1663_v21 = vrot.slane %v9253_v8, 1  ;;  %v1664_v9 = vrot.slane %v9254_v18, 1 }
 0x218   : >> { %3393 = vrot.lane.b32.xlu0 %v3385_v10, %s11559_s19  ;;  %3395 = vrot.lane.b32.xlu1 %v3386_v22, %s11559_s19  ;;  %v3327_v10 = vshll.u32 %v9502_v1, 16  ;;  %v3318_v22 = vshrl.u32 %v9501_v61, 16  ;;  %v1508_v61 = vld [vmem:[%s12422_s29 + $0x38] sm:$0xf] }
 0x21a   : >> { %v3329_v17 = vrot.slane %v3327_v10, 1  ;;  %v3323_v31 = vor.u32 %v3322_v13, %v3318_v22  ;;  %v1521_v22 = vld [vmem:[%s12422_s29 + $0x20] sm:$0xe] }
 0x21b   : >> { %v9255_v34 = vcombine.low %v1521_v22, %v12671_v40 }
 0x21c   : >> { %3397 = vrot.lane.b32.xlu0 %v3387_v26, %s11559_s19  ;;  %3399 = vrot.lane.b32.xlu1 %v3388_v28, %s11559_s19  ;;  %v3341_v26 = vshll.u32 %v9504_v20, 16  ;;  %v3330_v28 = vor.u32 %v3329_v17, %v3325_v25  ;;  %v9523_v25 = vld [vmem:[%s12422_s29 + $0xa0] sm:$0xf]  ;;  %v12706_v17 = vld [vmem:[%s12422_s29 + $0xa4] sm:$0x1] }
 0x21d   : >> { %v9547_v30 = vcombine.low %v9523_v25, %v12706_v17 }
 0x21e   : >> { %v3343_v36 = vrot.slane %v3341_v26, 1  ;;  %v1522_v26 = vld [vmem:[%s12422_s29 + $0x28] sm:$0xe] }
 0x21f   : >> { %v3640_v53 = vshll.u32 %v9547_v30, 16 }
 0x220   : >> { %1621 = vrot.lane.b32.xlu0 %v1571_v41, %s11560_s22  ;;  %1623 = vrot.lane.b32.xlu1 %v1578_v50, %s11560_s22  ;;  %v1506_v41 = vld [vmem:[%s12422_s29 + $0x28] sm:$0xf]  ;;  %v9247_v50 = vcombine.low %v1505_v38, %v12671_v40  ;;  %v3344_v47 = vor.u32 %v3343_v36, %v3339_v35  ;;  %v9256_v35 = vcombine.low %v1522_v26, %v12675_v45  ;;  %v1523_v36 = vld [vmem:[%s12422_s29 + $0x30] sm:$0xe]  ;;  %v1665_v40 = vrot.slane %v9255_v34, 1 }
 0x221   : >> { %v9248_v54 = vcombine.low %v1506_v41, %v12675_v45  ;;  %v9525_v41 = vld [vmem:[%s12422_s29 + $0xb0] sm:$0xf]  ;;  %v9323_v34 = vld [vmem:[%s12422_s29 + $0x20] sm:$0xf] }
 0x222   : >> { %v1596_v0 = vshll.u32 %v9247_v50, 16  ;;  %v1594_v8 = vshrl.u32 %v9247_v50, 16  ;;  %v9526_v50 = vld [vmem:[%s12422_s29 + $0xb8] sm:$0xf]  ;;  %v1666_v45 = vrot.slane %v9256_v35, 1 }
 0x223   : >> { %v1603_v5 = vshll.u32 %v9248_v54, 16  ;;  %v9324_v35 = vld [vmem:[%s12422_s29 + $0x28] sm:$0xf] }
 0x224   : >> { %1625 = vrot.lane.b32.xlu0 %v1585_v57, %s11560_s22  ;;  %1627 = vrot.lane.b32.xlu1 %v1592_v59, %s11560_s22  ;;  %v12686_v57 = vld [vmem:[%s12422_s29 + $0x34] sm:$0x1]  ;;  %v12691_v59 = vld [vmem:[%s12422_s29 + $0x3c] sm:$0x1]  ;;  %v1598_v11 = vrot.slane %v1596_v0, 1  ;;  %v3642_v0 = vrot.slane %v3640_v53, 1 }
 0x225   : >> { %v9249_v1 = vcombine.low %v1507_v42, %v12686_v57  ;;  %v9250_v6 = vcombine.low %v1508_v61, %v12691_v59  ;;  %v1605_v7 = vrot.slane %v1603_v5, 1  ;;  %v9257_v52 = vcombine.low %v1523_v36, %v12686_v57  ;;  %v12763_v36 = vld [vmem:[%s12422_s29 + $0x2c] sm:$0x1] }
 0x226   : >> { %v1599_v10 = vor.u32 %v1598_v11, %v1594_v8  ;;  %v9258_v42 = vcombine.low %v1524_v49, %v12691_v59  ;;  %v9540_v8 = vld [vmem:[%s12422_s29 + $0xa8] sm:$0xe]  ;;  %v9539_v11 = vld [vmem:[%s12422_s29 + $0xa0] sm:$0xe] }
 0x227   : >> { %v1610_v12 = vshll.u32 %v9249_v1, 16  ;;  %v1617_v18 = vshll.u32 %v9250_v6, 16  ;;  %v1608_v20 = vshrl.u32 %v9249_v1, 16  ;;  %v1615_v23 = vshrl.u32 %v9250_v6, 16 }
 0x228   : >> { %1669 = vrot.lane.b32.xlu0 %v1661_v62, %s11559_s19  ;;  %1671 = vrot.lane.b32.xlu1 %v1662_v55, %s11559_s19  ;;  %v3391_v62 = vrot.slane %v9511_v63, 1  ;;  %v1601_v55 = vshrl.u32 %v9248_v54, 16  ;;  %v3638_v63 = vshrl.u32 %v9547_v30, 16  ;;  %v1668_v57 = vrot.slane %v9258_v42, 1  ;;  %v12759_v30 = vld [vmem:[%s12422_s29 + $0x24] sm:$0x1] }
 0x22a   : >> { %v1606_v13 = vor.u32 %v1605_v7, %v1601_v55  ;;  %v3643_v5 = vor.u32 %v3642_v0, %v3638_v63  ;;  %v9321_v7 = vld [vmem:[%s12422_s29 + $0x10] sm:$0xf] }
 0x22c   : >> { %1673 = vrot.lane.b32.xlu0 %v1663_v21, %s11559_s19  ;;  %1675 = vrot.lane.b32.xlu1 %v1664_v9, %s11559_s19  ;;  %v1612_v21 = vrot.slane %v1610_v12, 1  ;;  %v1619_v9 = vrot.slane %v1617_v18, 1  ;;  %v12743_v18 = vld [vmem:[%s12422_s29 + $0x14] sm:$0x1] }
 0x22e   : >> { %v1613_v33 = vor.u32 %v1612_v21, %v1608_v20  ;;  %v12747_v20 = vld [vmem:[%s12422_s29 + $0x1c] sm:$0x1]  ;;  %v9542_v21 = vld [vmem:[%s12422_s29 + $0xb8] sm:$0xe] }
 0x230   : >> { %3353 = vrot.lane.b32.xlu0 %v3323_v31, %s11560_s22  ;;  %3355 = vrot.lane.b32.xlu1 %v3330_v28, %s11560_s22  ;;  %v9524_v31 = vld [vmem:[%s12422_s29 + $0xa8] sm:$0xf]  ;;  %v1620_v28 = vor.u32 %v1619_v9, %v1615_v23  ;;  %v9541_v23 = vld [vmem:[%s12422_s29 + $0xb0] sm:$0xe]  ;;  %v9345_v9 = vcombine.low %v9321_v7, %v12743_v18 }
 0x231   : >> { %v9548_v38 = vcombine.low %v9524_v31, %v12711_v14  ;;  %v9556_v31 = vcombine.low %v9540_v8, %v12711_v14 }
 0x232   : >> { %v2250_v49 = vshll.u32 %v9345_v9, 16  ;;  %v2248_v42 = vshrl.u32 %v9345_v9, 16 }
 0x233   : >> { %v3647_v60 = vshll.u32 %v9548_v38, 16  ;;  %v3734_v14 = vrot.slane %v9556_v31, 1  ;;  %v9530_v31 = vld [vmem:[%s12422_s29 + $0xd8] sm:$0xf] }
 0x234   : >> { %3357 = vrot.lane.b32.xlu0 %v3337_v46, %s11560_s22  ;;  %3359 = vrot.lane.b32.xlu1 %v3344_v47, %s11560_s22  ;;  %v12722_v46 = vld [vmem:[%s12422_s29 + $0xb4] sm:$0x1]  ;;  %v12727_v47 = vld [vmem:[%s12422_s29 + $0xbc] sm:$0x1] }
 0x235   : >> { %v9549_v54 = vcombine.low %v9525_v41, %v12722_v46  ;;  %v9550_v61 = vcombine.low %v9526_v50, %v12727_v47  ;;  %v3649_v59 = vrot.slane %v3647_v60, 1  ;;  %v9557_v41 = vcombine.low %v9541_v23, %v12722_v46 }
 0x236   : >> { %v9347_v50 = vcombine.low %v9323_v34, %v12759_v30  ;;  %v2252_v60 = vrot.slane %v2250_v49, 1  ;;  %v9340_v49 = vld [vmem:[%s12422_s29 + $0x28] sm:$0xe] }
 0x237   : >> { %v3654_v1 = vshll.u32 %v9549_v54, 16  ;;  %v3661_v2 = vshll.u32 %v9550_v61, 16  ;;  %v3652_v6 = vshrl.u32 %v9549_v54, 16 }
 0x238   : >> { %3401 = vrot.lane.b32.xlu0 %v3389_v43, %s11559_s19  ;;  %3403 = vrot.lane.b32.xlu1 %v3390_v56, %s11559_s19  ;;  %v1667_v43 = vrot.slane %v9257_v52, 1  ;;  %v3645_v56 = vshrl.u32 %v9548_v38, 16  ;;  %v9348_v52 = vcombine.low %v9324_v35, %v12763_v36  ;;  %v2264_v46 = vshll.u32 %v9347_v50, 16  ;;  %v12803_v35 = vld [vmem:[%s12422_s29 + $0xdc] sm:$0x1] }
 0x239   : >> { %v3663_v55 = vrot.slane %v3661_v2, 1 }
 0x23a   : >> { %v3650_v12 = vor.u32 %v3649_v59, %v3645_v56  ;;  %v2271_v0 = vshll.u32 %v9348_v52, 16  ;;  %v2262_v59 = vshrl.u32 %v9347_v50, 16 }
 0x23c   : >> { %3405 = vrot.lane.b32.xlu0 %v3391_v62, %s11559_s19  ;;  %3407 = vrot.lane.b32.xlu1 %v3392_v4, %s11559_s19  ;;  %v3656_v62 = vrot.slane %v3654_v1, 1  ;;  %v3659_v4 = vshrl.u32 %v9550_v61, 16 }
 0x23e   : >> { %v3657_v22 = vor.u32 %v3656_v62, %v3652_v6  ;;  %v3664_v26 = vor.u32 %v3663_v55, %v3659_v4  ;;  %v2266_v6 = vrot.slane %v2264_v46, 1  ;;  %v9337_v62 = vld [vmem:[%s12422_s29 + $0x10] sm:$0xe]  ;;  %v9527_v4 = vld [vmem:[%s12422_s29 + $0xc0] sm:$0xf] }
 0x23f   : >> { %v12786_v55 = vld [vmem:[%s12422_s29 + $0xc4] sm:$0x1]  ;;  %v9353_v9 = vcombine.low %v9337_v62, %v12743_v18 }
 0x240   : >> { %1629 = vrot.lane.b32.xlu0 %v1599_v10, %s11560_s22  ;;  %1631 = vrot.lane.b32.xlu1 %v1606_v13, %s11560_s22  ;;  %v9322_v10 = vld [vmem:[%s12422_s29 + $0x18] sm:$0xf]  ;;  %v9555_v13 = vcombine.low %v9539_v11, %v12706_v17  ;;  %v9558_v17 = vcombine.low %v9542_v21, %v12727_v47  ;;  %v3735_v47 = vrot.slane %v9557_v41, 1  ;;  %v9528_v21 = vld [vmem:[%s12422_s29 + $0xc8] sm:$0xf]  ;;  %v2267_v23 = vor.u32 %v2266_v6, %v2262_v59 }
 0x242   : >> { %v3733_v38 = vrot.slane %v9555_v13, 1 }
 0x244   : >> { %1633 = vrot.lane.b32.xlu0 %v1613_v33, %s11560_s22  ;;  %1635 = vrot.lane.b32.xlu1 %v1620_v28, %s11560_s22  ;;  %v9346_v33 = vcombine.low %v9322_v10, %v12747_v20  ;;  %v9338_v10 = vld [vmem:[%s12422_s29 + $0x18] sm:$0xe] }
 0x245   : >> { %v9354_v34 = vcombine.low %v9338_v10, %v12747_v20 }
 0x248   : >> { %1677 = vrot.lane.b32.xlu0 %v1665_v40, %s11559_s19  ;;  %1679 = vrot.lane.b32.xlu1 %v1666_v45, %s11559_s19  ;;  %v2257_v40 = vshll.u32 %v9346_v33, 16  ;;  %v3736_v45 = vrot.slane %v9558_v17, 1  ;;  %v9529_v17 = vld [vmem:[%s12422_s29 + $0xd0] sm:$0xf] }
 0x24a   : >> { %v2259_v63 = vrot.slane %v2257_v40, 1 }
 0x24c   : >> { %1681 = vrot.lane.b32.xlu0 %v1667_v43, %s11559_s19  ;;  %1683 = vrot.lane.b32.xlu1 %v1668_v57, %s11559_s19  ;;  %v2255_v43 = vshrl.u32 %v9346_v33, 16 }
 0x24e   : >> { %v2260_v11 = vor.u32 %v2259_v63, %v2255_v43 }
 0x250   : >> { %3693 = vrot.lane.b32.xlu0 %v3643_v5, %s11560_s22  ;;  %3695 = vrot.lane.b32.xlu1 %v3650_v12, %s11560_s22  ;;  %v1904_v25 = vpop.permute.xlu1 %1903  ;;  %v2253_v5 = vor.u32 %v2252_v60, %v2248_v42  ;;  %v2273_v12 = vrot.slane %v2271_v0, 1 }
 0x251   : >> { %v1902_v28 = vpop.permute.xlu0 %1901 }
 0x254   : >> { %3697 = vrot.lane.b32.xlu0 %v3657_v22, %s11560_s22  ;;  %3699 = vrot.lane.b32.xlu1 %v3664_v26, %s11560_s22  ;;  %v12791_v22 = vld [vmem:[%s12422_s29 + $0xcc] sm:$0x1]  ;;  %v9551_v26 = vcombine.low %v9527_v4, %v12786_v55  ;;  %v9543_v4 = vld [vmem:[%s12422_s29 + $0xc0] sm:$0xe] }
 0x256   : >> { %v1854_v53 = vpop.permute.xlu0 %1853  ;;  %v12771_v54 = vpop.permute.xlu1 %2998  ;;  %v3668_v40 = vshll.u32 %v9551_v26, 16  ;;  %v3666_v63 = vshrl.u32 %v9551_v26, 16  ;;  %v9326_v26 = vld [vmem:[%s12422_s29 + $0x38] sm:$0xf] }
 0x257   : >> { %v1919_v61 = vsel %vm1323_vm8, %v12433_v24, %v1854_v53  ;;  %v2344_v53 = vrot.slane %v9354_v34, 1  ;;  %v3064_v42 = vsel %vm1323_vm8, %v12437_v27, %v12771_v54 }
 0x258   : >> { %3741 = vrot.lane.b32.xlu0 %v3733_v38, %s11559_s19  ;;  %3743 = vrot.lane.b32.xlu1 %v3734_v14, %s11559_s19  ;;  %v1942_v24 = vsel %vm1710_vm11, %v1919_v61, %v1902_v28  ;;  %v9552_v28 = vcombine.low %v9528_v21, %v12791_v22  ;;  %v12807_v38 = vld [vmem:[%s12422_s29 + $0xd4] sm:$0x1]  ;;  %v2343_v14 = vrot.slane %v9353_v9, 1  ;;  %v9325_v21 = vld [vmem:[%s12422_s29 + $0x30] sm:$0xf] }
 0x259   : >> { %v9553_v20 = vcombine.low %v9529_v17, %v12807_v38 }
 0x25a   : >> { %v1856_v1 = vpop.permute.xlu0 %1855  ;;  %v3001_v57 = vpop.permute.xlu1 %3000  ;;  %v3673_v59 = vshrl.u32 %v9552_v28, 16 }
 0x25b   : >> { %v1922_v56 = vsel %vm1323_vm8, %v12427_v19, %v1856_v1  ;;  %v2269_v19 = vshrl.u32 %v9348_v52, 16  ;;  %v12813_v52 = vcombine.low %v9530_v31, %v12803_v35  ;;  %v3067_v60 = vsel %vm1323_vm8, %v12443_v29, %v3001_v57  ;;  %v12851_v31 = vld [vmem:[%s12422_s29 + $0x3c] sm:$0x1] }
 0x25c   : >> { %3745 = vrot.lane.b32.xlu0 %v3735_v47, %s11559_s19  ;;  %v1944_v2 = vsel %vm1710_vm11, %v1922_v56, %v1904_v25  ;;  %3747 = vrot.lane.b32.xlu1 %v3736_v45, %s11559_s19  ;;  %v9339_v25 = vld [vmem:[%s12422_s29 + $0x20] sm:$0xe]  ;;  %v9356_v45 = vcombine.low %v9340_v49, %v12763_v36  ;;  %v3675_v47 = vshll.u32 %v9552_v28, 16  ;;  %v3670_v1 = vrot.slane %v3668_v40, 1  ;;  %v12868_v40 = vld [vmem:[%s12422_s29 + $0x44] sm:$0x1] }
 0x25d   : >> { %v9300_v8 = vcombine.low %v1942_v24, %v1944_v2  ;;  %v2274_v33 = vor.u32 %v2273_v12, %v2269_v19  ;;  %v9355_v18 = vcombine.low %v9339_v25, %v12759_v30  ;;  %v3689_v36 = vshll.u32 %v12813_v52, 16 }
 0x25e   : >> { %v1858_v7 = vpop.permute.xlu0 %1857  ;;  %v1860_v13 = vpop.permute.xlu1 %1859  ;;  %v3682_v56 = vshll.u32 %v9553_v20, 16  ;;  %v2346_v54 = vrot.slane %v9356_v45, 1  ;;  %v3677_v29 = vrot.slane %v3675_v47, 1  ;;  %v3687_v62 = vshrl.u32 %v12813_v52, 16  ;;  %v11001_v52 = vld [vmem:[%s15244_s3 + $0x44] ss:$0 sps:$4 sm:$0xff]  }
 0x25f   : >> { %10353 = vmatprep.mubr.msk.bf16.mxu1 %vm1989_vm12, %v9300_v8  ;;  %v2345_v43 = vrot.slane %v9355_v18, 1  ;;  %v1925_v57 = vsel %vm1323_vm8, %v12463_v48, %v1858_v7  ;;  %v1928_v2 = vsel %vm1323_vm8, %v12453_v37, %v1860_v13  ;;  %v3680_v8 = vshrl.u32 %v9553_v20, 16  ;;  %v9544_v37 = vld [vmem:[%s12422_s29 + $0xc8] sm:$0xe]  ;;  %v12842_v13 = vld [vmem:[%s12422_s29 + $0x34] sm:$0x1] }
 0x260   : >> { %2303 = vrot.lane.b32.xlu0 %v2253_v5, %s11560_s22  ;;  %2305 = vrot.lane.b32.xlu1 %v2260_v11, %s11560_s22  ;;  %v3671_v48 = vor.u32 %v3670_v1, %v3666_v63  ;;  %v3691_v19 = vrot.slane %v3689_v36, 1  ;;  %v3684_v12 = vrot.slane %v3682_v56, 1  ;;  %v3678_v10 = vor.u32 %v3677_v29, %v3673_v59  ;;  %v9328_v45 = vld [vmem:[%s12422_s29 + $0x48] sm:$0xf]  ;;  %v12877_v47 = vld [vmem:[%s12422_s29 + $0x4c] sm:$0x1] }
 0x261   : >> { %v9560_v17 = vcombine.low %v9544_v37, %v12791_v22  ;;  %v9559_v49 = vcombine.low %v9543_v4, %v12786_v55  ;;  %v9350_v22 = vcombine.low %v9326_v26, %v12851_v31  ;;  %v9327_v55 = vld [vmem:[%s12422_s29 + $0x40] sm:$0xf]  ;;  %v9352_v36 = vcombine.low %v9328_v45, %v12877_v47 }
 0x262   : >> { %v3003_v41 = vpop.permute.xlu0 %3002  ;;  %v3005_v50 = vpop.permute.xlu1 %3004  ;;  %v9351_v63 = vcombine.low %v9327_v55, %v12868_v40  ;;  %v3494_v56 = vsel %vm2002_vm10, %v11001_v52, 0 }
 0x263   : >> { %v3070_v9 = vsel %vm1323_vm8, %v12479_v58, %v3003_v41  ;;  %v3685_v41 = vor.u32 %v3684_v12, %v3680_v8  ;;  %v2285_v1 = vshll.u32 %v9350_v22, 16 }
 0x264   : >> { %2307 = vrot.lane.b32.xlu0 %v2267_v23, %s11560_s22  ;;  %2309 = vrot.lane.b32.xlu1 %v2274_v33, %s11560_s22  ;;  %v11011_v23 = vld [vmem:[%s15244_s3 + $0x8] ss:$0 sps:$4 sm:$0xff]   ;;  %v3073_v33 = vsel %vm1323_vm8, %v12469_v51, %v3005_v50  ;;  %v9545_v51 = vld [vmem:[%s12422_s29 + $0xd0] sm:$0xe]  ;;  %v9349_v50 = vcombine.low %v9325_v21, %v12842_v13  ;;  %v2292_v29 = vshll.u32 %v9351_v63, 16 }
 0x265   : >> { %v9341_v21 = vld [vmem:[%s12422_s29 + $0x30] sm:$0xe] }
 0x266   : >> { %v3047_v30 = vpop.permute.xlu0 %3046  ;;  %v3049_v46 = vpop.permute.xlu1 %3048 }
 0x267   : >> { %v3087_v61 = vsel %vm1710_vm11, %v3064_v42, %v3047_v30  ;;  %v3089_v0 = vsel %vm1710_vm11, %v3067_v60, %v3049_v46  ;;  %v3738_v42 = vrot.slane %v9560_v17, 1  ;;  %v2113_v30 = vsel %vm2002_vm10, %v11011_v23, 0  ;;  %v12884_v60 = vld [vmem:[%s15244_s3 + $0x18] sm:$0xff]  }
 0x268   : >> { %2351 = vrot.lane.b32.xlu0 %v2343_v14, %s11559_s19  ;;  %2353 = vrot.lane.b32.xlu1 %v2344_v53, %s11559_s19  ;;  %v9462_v27 = vcombine.low %v3087_v61, %v3089_v0  ;;  %v3692_v14 = vor.u32 %v3691_v19, %v3687_v62  ;;  %v9546_v53 = vld [vmem:[%s12422_s29 + $0xd8] sm:$0xe]  ;;  %v3737_v46 = vrot.slane %v9559_v49, 1  ;;  %v9561_v61 = vcombine.low %v9545_v51, %v12807_v38  ;;  %v12898_v38 = vld [vmem:[%s15244_s3 + $0x48] sm:$0xff]  }
 0x269   : >> { %v9562_v0 = vcombine.low %v9546_v53, %v12803_v35  ;;  %v12922_v51 = vld [vmem:[%s12422_s29 + $0xb4] sm:$0x1] }
 0x26a   : >> { %v1906_v24 = vpop.permute.xlu0 %1905  ;;  %v1908_v5 = vpop.permute.xlu1 %1907  ;;  %10401 = vmatprep.mubr.msk.bf16.mxu0 %vm1989_vm12, %v9462_v27  ;;  %v3739_v35 = vrot.slane %v9561_v61, 1  ;;  %v9576_v61 = vld [vmem:[%s12422_s29 + $0xb8] sm:$0xf] }
 0x26b   : >> { %v1946_v6 = vsel %vm1710_vm11, %v1925_v57, %v1906_v24  ;;  %v1948_v11 = vsel %vm1710_vm11, %v1928_v2, %v1908_v5  ;;  %v3740_v57 = vrot.slane %v9562_v0, 1  ;;  %v2283_v24 = vshrl.u32 %v9350_v22, 16  ;;  %v9344_v0 = vld [vmem:[%s12422_s29 + $0x48] sm:$0xe] }
 0x26c   : >> { %2355 = vrot.lane.b32.xlu0 %v2345_v43, %s11559_s19  ;;  %v9301_v7 = vcombine.low %v1946_v6, %v1948_v11  ;;  %2357 = vrot.lane.b32.xlu1 %v2346_v54, %s11559_s19  ;;  %v2278_v43 = vshll.u32 %v9349_v50, 16  ;;  %v2276_v54 = vshrl.u32 %v9349_v50, 16  ;;  %v2287_v2 = vrot.slane %v2285_v1, 1  ;;  %v11070_v6 = vld [vmem:[%s12422_s29 + $0x28] sm:$0xf] }
 0x26d   : >> { %v2299_v5 = vshll.u32 %v9352_v36, 16  ;;  %v11071_v11 = vld [vmem:[%s12422_s29 + $0x30] sm:$0xf]  ;;  %v11073_v50 = vld [vmem:[%s12422_s29 + $0x40] sm:$0xf] }
 0x26e   : >> { %v3051_v25 = vpop.permute.xlu0 %3050  ;;  %v3053_v34 = vpop.permute.xlu1 %3052  ;;  %10354 = vmatmul.mubr.msk.bf16.vlgmr.msra.gmra.mrb[0].mxu1 %vm1989_vm12, %v9301_v7  ;;  %v2280_v59 = vrot.slane %v2278_v43, 1  ;;  %v2290_v7 = vshrl.u32 %v9351_v63, 16  ;;  %v12938_v43 = vld [vmem:[%s12422_s29 + $0xbc] sm:$0x1]  ;;  %v9577_v1 = vld [vmem:[%s12422_s29 + $0xc0] sm:$0xf] }
 0x26f   : >> { %v3091_v28 = vsel %vm1710_vm11, %v3070_v9, %v3051_v25  ;;  %v3093_v58 = vsel %vm1710_vm11, %v3073_v33, %v3053_v34  ;;  %10362 = vmatpush3.bf16.msra.mxu1 %v12620_v39  ;;  %v2288_v9 = vor.u32 %v2287_v2, %v2283_v24  ;;  %v2297_v25 = vshrl.u32 %v9352_v36, 16  ;;  %v9574_v33 = vld [vmem:[%s12422_s29 + $0xa8] sm:$0xf]  ;;  %v12915_v34 = vld [vmem:[%s12422_s29 + $0xac] sm:$0x1] }
 0x270   : >> { %3701 = vrot.lane.b32.xlu0 %v3671_v48, %s11560_s22  ;;  %v9463_v18 = vcombine.low %v3091_v28, %v3093_v58  ;;  %3703 = vrot.lane.b32.xlu1 %v3678_v10, %s11560_s22  ;;  %v2281_v4 = vor.u32 %v2280_v59, %v2276_v54  ;;  %v2294_v10 = vrot.slane %v2292_v29, 1  ;;  %v2301_v26 = vrot.slane %v2299_v5, 1  ;;  %v11072_v28 = vld [vmem:[%s12422_s29 + $0x38] sm:$0xf]  ;;  %v12943_v36 = vld [vmem:[%s12422_s29 + $0xc4] sm:$0x1] }
 0x271   : >> { %10736 = vmatprep.subr.msk.bf16.mxu1 %vm2002_vm10, %v11011_v23  ;;  %v9342_v58 = vld [vmem:[%s12422_s29 + $0x38] sm:$0xe]  ;;  %v9598_v53 = vcombine.low %v9574_v33, %v12915_v34  ;;  %v9360_v54 = vcombine.low %v9344_v0, %v12877_v47  ;;  %v9601_v29 = vcombine.low %v9577_v1, %v12943_v36  ;;  %v11074_v47 = vld [vmem:[%s12422_s29 + $0x60] sm:$0xf] }
 0x272   : >> { %v1862_v20 = vpop.permute.xlu0 %1861  ;;  %v1864_v39 = vpop.permute.xlu1 %1863  ;;  %10402 = vmatmul.mubr.msk.bf16.vlgmr.msra.gmra.mrb[0].mxu0 %vm1989_vm12, %v9463_v18 }
 0x273   : >> { %10410 = vmatpush3.bf16.msra.mxu0 %v12615_v32  ;;  %10364 = vmatpush3.bf16.msra.mxu1 %v2113_v30  ;;  %v1931_v62 = vsel %vm1323_vm8, %v11070_v6, %v1862_v20  ;;  %v1934_v48 = vsel %vm1323_vm8, %v11071_v11, %v1864_v39  ;;  %v9357_v20 = vcombine.low %v9341_v21, %v12842_v13  ;;  %v9343_v30 = vld [vmem:[%s12422_s29 + $0x40] sm:$0xe]  ;;  %v3985_v5 = vshrl.u32 %v9598_v53, 16 }
 0x274   : >> { %3705 = vrot.lane.b32.xlu0 %v3685_v41, %s11560_s22  ;;  %3707 = vrot.lane.b32.xlu1 %v3692_v14, %s11560_s22  ;;  %v9575_v41 = vld [vmem:[%s12422_s29 + $0xb0] sm:$0xf]  ;;  %v2302_v39 = vor.u32 %v2301_v26, %v2297_v25  ;;  %v9590_v26 = vld [vmem:[%s12422_s29 + $0xa8] sm:$0xe] }
 0x275   : >> { %10741 = vmatprep.subr.msk.bf16.mxu0 %vm2002_vm10, %v11001_v52  ;;  %10373 = vmatprep.subr.bf16.mxu1 %v12884_v60  ;;  %v2295_v52 = vor.u32 %v2294_v10, %v2290_v7 }
 0x276   : >> { %v1866_v27 = vpop.permute.xlu0 %1865  ;;  %v1868_v32 = vpop.permute.xlu1 %1867 }
 0x277   : >> { %10412 = vmatpush3.bf16.msra.mxu0 %v3494_v56  ;;  %v1937_v17 = vsel %vm1323_vm8, %v11072_v28, %v1866_v27  ;;  %v1940_v18 = vsel %vm1323_vm8, %v11073_v50, %v1868_v32  ;;  %v2347_v56 = vrot.slane %v9357_v20, 1  ;;  %v9359_v27 = vcombine.low %v9343_v30, %v12868_v40  ;;  %v11076_v50 = vld [vmem:[%s12422_s29 + $0x70] sm:$0xf]  ;;  %v11077_v20 = vld [vmem:[%s12422_s29 + $0x78] sm:$0xf] }
 0x278   : >> { %3749 = vrot.lane.b32.xlu0 %v3737_v46, %s11559_s19  ;;  %3751 = vrot.lane.b32.xlu1 %v3738_v42, %s11559_s19  ;;  %v9358_v42 = vcombine.low %v9342_v58, %v12851_v31  ;;  %v9599_v46 = vcombine.low %v9575_v41, %v12922_v51  ;;  %v3987_v31 = vshll.u32 %v9598_v53, 16  ;;  %v9600_v32 = vcombine.low %v9576_v61, %v12938_v43  ;;  %v9371_v58 = vld [vmem:[%s12422_s29 + $0x50] sm:$0xf]  ;;  %v12965_v41 = vld [vmem:[%s12422_s29 + $0x54] sm:$0x1] }
 0x279   : >> { %10421 = vmatprep.subr.bf16.mxu0 %v12898_v38  ;;  %v2349_v2 = vrot.slane %v9359_v27, 1  ;;  %v9593_v61 = vld [vmem:[%s12422_s29 + $0xc0] sm:$0xe]  ;;  %v9395_v0 = vcombine.low %v9371_v58, %v12965_v41 }
 0x27a   : >> { %v1910_v8 = vpop.permute.xlu0 %1909  ;;  %v1912_v19 = vpop.permute.xlu1 %1911  ;;  %v3994_v59 = vshll.u32 %v9599_v46, 16  ;;  %v3989_v40 = vrot.slane %v3987_v31, 1  ;;  %v4001_v6 = vshll.u32 %v9600_v32, 16  ;;  %v12991_v31 = vld [vmem:[%s12422_s29 + $0x60] sm:$0xf] }
 0x27b   : >> { %v1950_v12 = vsel %vm1710_vm11, %v1931_v62, %v1910_v8  ;;  %v1952_v37 = vsel %vm1710_vm11, %v1934_v48, %v1912_v19  ;;  %v2350_v62 = vrot.slane %v9360_v54, 1  ;;  %v3992_v8 = vshrl.u32 %v9599_v46, 16  ;;  %v13000_v54 = vld [vmem:[%s12422_s29 + $0x68] sm:$0xf] }
 0x27c   : >> { %3753 = vrot.lane.b32.xlu0 %v3739_v35, %s11559_s19  ;;  %v9302_v23 = vcombine.low %v1950_v12, %v1952_v37  ;;  %3755 = vrot.lane.b32.xlu1 %v3740_v57, %s11559_s19  ;;  %v2348_v35 = vrot.slane %v9358_v42, 1  ;;  %v3996_v11 = vrot.slane %v3994_v59, 1  ;;  %v4008_v48 = vshll.u32 %v9601_v29, 16  ;;  %v11075_v37 = vld [vmem:[%s12422_s29 + $0x68] sm:$0xf] }
 0x27d   : >> { %v4003_v25 = vrot.slane %v4001_v6, 1  ;;  %v9606_v46 = vcombine.low %v9590_v26, %v12915_v34  ;;  %v11037_v34 = vld [vmem:[%s15244_s3 + $0x50] ss:$0 sps:$4 sm:$0xff]   ;;  %v13003_v59 = vld [vmem:[%s12422_s29 + $0x6c] sm:$0x1] }
 0x27e   : >> { %v1914_v49 = vpop.permute.xlu0 %1913  ;;  %v1916_v14 = vpop.permute.xlu1 %1915  ;;  %10357 = vmatprep.mubr.msk.bf16.mxu1 %vm1989_vm12, %v9302_v23  ;;  %v3990_v23 = vor.u32 %v3989_v40, %v3985_v5  ;;  %v3997_v28 = vor.u32 %v3996_v11, %v3992_v8 }
 0x27f   : >> { %v1954_v22 = vsel %vm1710_vm11, %v1937_v17, %v1914_v49  ;;  %v1956_v55 = vsel %vm1710_vm11, %v1940_v18, %v1916_v14  ;;  %v4006_v17 = vshrl.u32 %v9601_v29, 16  ;;  %v4010_v49 = vrot.slane %v4008_v48, 1 }
 0x280   : >> { %2311 = vrot.lane.b32.xlu0 %v2281_v4, %s11560_s22  ;;  %v9303_v45 = vcombine.low %v1954_v22, %v1956_v55  ;;  %2313 = vrot.lane.b32.xlu1 %v2288_v9, %s11560_s22  ;;  %v3999_v9 = vshrl.u32 %v9600_v32, 16  ;;  %v9591_v22 = vld [vmem:[%s12422_s29 + $0xb0] sm:$0xe]  ;;  %v12971_v55 = vld [vmem:[%s12422_s29 + $0x58] sm:$0xf]  ;;  %v2596_v48 = vshrl.u32 %v9395_v0, 16 }
 0x281   : >> { %v12994_v32 = vld [vmem:[%s12422_s29 + $0x64] sm:$0x1] }
 0x282   : >> { %v3346_v63 = vpop.permute.xlu0 %3345  ;;  %v3348_v13 = vpop.permute.xlu1 %3347  ;;  %10358 = vmatmul.mubr.msk.bf16.gmra.mrb[4].mxu1 %vm1989_vm12, %v9303_v45  ;;  %v4004_v30 = vor.u32 %v4003_v25, %v3999_v9  ;;  %v9397_v5 = vcombine.low %v12991_v31, %v12994_v32  ;;  %v11079_v9 = vld [vmem:[%s12422_s29 + $0x8] sm:$0xf] }
 0x283   : >> { %v3411_v19 = vsel %vm1323_vm8, %v11074_v47, %v3346_v63  ;;  %v3414_v4 = vsel %vm1323_vm8, %v11075_v37, %v3348_v13  ;;  %v9592_v63 = vld [vmem:[%s12422_s29 + $0xb8] sm:$0xe]  ;;  %v4011_v13 = vor.u32 %v4010_v49, %v4006_v17 }
 0x284   : >> { %2315 = vrot.lane.b32.xlu0 %v2295_v52, %s11560_s22  ;;  %2317 = vrot.lane.b32.xlu1 %v2302_v39, %s11560_s22  ;;  %v12974_v52 = vld [vmem:[%s12422_s29 + $0x5c] sm:$0x1]  ;;  %v2610_v49 = vshrl.u32 %v9397_v5, 16 }
 0x285   : >> { %v9396_v27 = vcombine.low %v12971_v55, %v12974_v52 }
 0x286   : >> { %v3350_v57 = vpop.permute.xlu0 %3349  ;;  %v3352_v24 = vpop.permute.xlu1 %3351 }
 0x287   : >> { %v3417_v18 = vsel %vm1323_vm8, %v11076_v50, %v3350_v57  ;;  %v3420_v53 = vsel %vm1323_vm8, %v11077_v20, %v3352_v24  ;;  %v4080_v57 = vrot.slane %v9606_v46, 1  ;;  %v9608_v24 = vcombine.low %v9592_v63, %v12938_v43  ;;  %v13020_v43 = vld [vmem:[%s15244_s3 + $0x54] sm:$0xff]   ;;  %v9387_v50 = vld [vmem:[%s12422_s29 + $0x50] sm:$0xe] }
 0x288   : >> { %2359 = vrot.lane.b32.xlu0 %v2347_v56, %s11559_s19  ;;  %2361 = vrot.lane.b32.xlu1 %v2348_v35, %s11559_s19  ;;  %v9607_v56 = vcombine.low %v9591_v22, %v12922_v51  ;;  %v9609_v51 = vcombine.low %v9593_v61, %v12943_v36  ;;  %v2605_v6 = vshll.u32 %v9396_v27, 16  ;;  %v3842_v36 = vsel %vm2002_vm10, %v11037_v34, 0  ;;  %v9388_v46 = vld [vmem:[%s12422_s29 + $0x58] sm:$0xe]  ;;  %v13044_v61 = vld [vmem:[%s12422_s29 + $0xd0] sm:$0xf] }
 0x289   : >> { %v2603_v37 = vshrl.u32 %v9396_v27, 16  ;;  %v13047_v63 = vld [vmem:[%s12422_s29 + $0xd4] sm:$0x1] }
 0x28a   : >> { %v3394_v12 = vpop.permute.xlu0 %3393  ;;  %v3396_v7 = vpop.permute.xlu1 %3395  ;;  %v4081_v40 = vrot.slane %v9607_v56, 1 }
 0x28b   : >> { %v3434_v10 = vsel %vm1710_vm11, %v3411_v19, %v3394_v12  ;;  %v3436_v21 = vsel %vm1710_vm11, %v3414_v4, %v3396_v7  ;;  %v2612_v19 = vshll.u32 %v9397_v5, 16  ;;  %v4083_v12 = vrot.slane %v9609_v51, 1  ;;  %v9389_v51 = vld [vmem:[%s12422_s29 + $0x60] sm:$0xe] }
 0x28c   : >> { %2363 = vrot.lane.b32.xlu0 %v2349_v2, %s11559_s19  ;;  %v9513_v33 = vcombine.low %v3434_v10, %v3436_v21  ;;  %2365 = vrot.lane.b32.xlu1 %v2350_v62, %s11559_s19  ;;  %v2598_v2 = vshll.u32 %v9395_v0, 16  ;;  %v9398_v62 = vcombine.low %v13000_v54, %v13003_v59  ;;  %v2607_v4 = vrot.slane %v2605_v6, 1  ;;  %v11078_v10 = vld [vmem:[%s12422_s29] sm:$0xf]  ;;  %v11081_v0 = vld [vmem:[%s12422_s29 + $0x18] sm:$0xf] }
 0x28d   : >> { %v2614_v58 = vrot.slane %v2612_v19, 1  ;;  %v9404_v5 = vcombine.low %v9388_v46, %v12974_v52  ;;  %v13065_v6 = vld [vmem:[%s12422_s29 + $0xd8] sm:$0xf] }
 0x28e   : >> { %v3398_v14 = vpop.permute.xlu0 %3397  ;;  %v3400_v45 = vpop.permute.xlu1 %3399  ;;  %10413 = vmatprep.mubr.msk.bf16.mxu0 %vm1989_vm12, %v9513_v33  ;;  %v2600_v47 = vrot.slane %v2598_v2, 1  ;;  %v2619_v7 = vshll.u32 %v9398_v62, 16  ;;  %v2617_v22 = vshrl.u32 %v9398_v62, 16  ;;  %v13068_v62 = vld [vmem:[%s12422_s29 + $0xdc] sm:$0x1] }
 0x28f   : >> { %v3438_v39 = vsel %vm1710_vm11, %v3417_v18, %v3398_v14  ;;  %v3440_v42 = vsel %vm1710_vm11, %v3420_v53, %v3400_v45  ;;  %v2608_v14 = vor.u32 %v2607_v4, %v2603_v37  ;;  %v13035_v53 = vld [vmem:[%s12422_s29 + $0xc8] sm:$0xf]  ;;  %v13038_v45 = vld [vmem:[%s12422_s29 + $0xcc] sm:$0x1]  ;;  %v2692_v37 = vrot.slane %v9404_v5, 1 }
 0x290   : >> { %4040 = vrot.lane.b32.xlu0 %v3990_v23, %s11560_s22  ;;  %v9514_v1 = vcombine.low %v3438_v39, %v3440_v42  ;;  %4042 = vrot.lane.b32.xlu1 %v3997_v28, %s11560_s22  ;;  %v2601_v17 = vor.u32 %v2600_v47, %v2596_v48  ;;  %v2621_v20 = vrot.slane %v2619_v7, 1  ;;  %v11080_v39 = vld [vmem:[%s12422_s29 + $0x10] sm:$0xf]  ;;  %v9405_v47 = vcombine.low %v9389_v51, %v12994_v32  ;;  %v13094_v32 = vld [vmem:[%s15244_s3 + $0x24] sm:$0xff]  }
 0x291   : >> { %v13121_v5 = vld [vmem:[%s12422_s29 + $0x7c] sm:$0x1] }
 0x292   : >> { %v1622_v35 = vpop.permute.xlu0 %1621  ;;  %10414 = vmatmul.mubr.msk.bf16.vlgmr.msra.gmra.mrb[0].mxu0 %vm1989_vm12, %v9514_v1  ;;  %v1624_v29 = vpop.permute.xlu1 %1623  ;;  %v2622_v2 = vor.u32 %v2621_v20, %v2617_v22 }
 0x293   : >> { %10422 = vmatpush3.bf16.msra.mxu0 %v12898_v38  ;;  %v4082_v38 = vrot.slane %v9608_v24, 1  ;;  %v1688_v21 = vsel %vm1323_vm8, %v11078_v10, %v1622_v35  ;;  %v1691_v25 = vsel %vm1323_vm8, %v11079_v9, %v1624_v29  ;;  %v9403_v35 = vcombine.low %v9387_v50, %v12965_v41  ;;  %v9390_v29 = vld [vmem:[%s12422_s29 + $0x68] sm:$0xe]  ;;  %v11047_v41 = vld [vmem:[%s15244_s3 + $0x20] ss:$0 sps:$4 sm:$0xff]  }
 0x294   : >> { %4044 = vrot.lane.b32.xlu0 %v4004_v30, %s11560_s22  ;;  %4046 = vrot.lane.b32.xlu1 %v4011_v13, %s11560_s22  ;;  %v9406_v52 = vcombine.low %v9390_v29, %v13003_v59  ;;  %v2452_v59 = vsel %vm2002_vm10, %v11047_v41, 0  ;;  %v11084_v29 = vld [vmem:[%s12422_s29 + $0x90] sm:$0xf] }
 0x295   : >> { %10742 = vmatprep.subr.msk.bf16.mxu0 %vm2002_vm10, %v11037_v34  ;;  %v2615_v34 = vor.u32 %v2614_v58, %v2610_v49  ;;  %v2691_v48 = vrot.slane %v9403_v35, 1  ;;  %v11082_v49 = vld [vmem:[%s12422_s29 + $0x80] sm:$0xf]  ;;  %v13112_v35 = vld [vmem:[%s12422_s29 + $0x74] sm:$0x1] }
 0x296   : >> { %v1626_v8 = vpop.permute.xlu0 %1625  ;;  %v1628_v11 = vpop.permute.xlu1 %1627 }
 0x297   : >> { %10424 = vmatpush3.bf16.msra.mxu0 %v3842_v36  ;;  %v1694_v42 = vsel %vm1323_vm8, %v11080_v39, %v1626_v8  ;;  %v1697_v1 = vsel %vm1323_vm8, %v11081_v0, %v1628_v11  ;;  %v13074_v8 = vld [vmem:[%s12422_s29 + $0xe0] sm:$0xf]  ;;  %v13077_v11 = vld [vmem:[%s12422_s29 + $0xe4] sm:$0x1]  ;;  %v9594_v0 = vld [vmem:[%s12422_s29 + $0xc8] sm:$0xe] }
 0x298   : >> { %4088 = vrot.lane.b32.xlu0 %v4080_v57, %s11559_s19  ;;  %4090 = vrot.lane.b32.xlu1 %v4081_v40, %s11559_s19  ;;  %v9602_v57 = vcombine.low %v13035_v53, %v13038_v45  ;;  %v9603_v40 = vcombine.low %v13044_v61, %v13047_v63  ;;  %v9605_v7 = vcombine.low %v13074_v8, %v13077_v11 }
 0x299   : >> { %10433 = vmatprep.subr.bf16.mxu0 %v13020_v43 }
 0x29a   : >> { %v1670_v23 = vpop.permute.xlu0 %1669  ;;  %v1672_v26 = vpop.permute.xlu1 %1671  ;;  %v4015_v19 = vshll.u32 %v9602_v57, 16  ;;  %v4022_v4 = vshll.u32 %v9603_v40, 16 }
 0x29b   : >> { %v1712_v33 = vsel %vm1710_vm11, %v1688_v21, %v1670_v23  ;;  %v1714_v28 = vsel %vm1710_vm11, %v1691_v25, %v1672_v26  ;;  %v4013_v23 = vshrl.u32 %v9602_v57, 16  ;;  %v2694_v26 = vrot.slane %v9406_v52, 1 }
 0x29c   : >> { %4092 = vrot.lane.b32.xlu0 %v4082_v38, %s11559_s19  ;;  %v9310_v18 = vcombine.low %v1712_v33, %v1714_v28  ;;  %4094 = vrot.lane.b32.xlu1 %v4083_v12, %s11559_s19  ;;  %v9604_v12 = vcombine.low %v13065_v6, %v13068_v62  ;;  %v4017_v9 = vrot.slane %v4015_v19, 1  ;;  %v4020_v33 = vshrl.u32 %v9603_v40, 16  ;;  %v11085_v40 = vld [vmem:[%s12422_s29 + $0x98] sm:$0xf] }
 0x29d   : >> { %v4024_v28 = vrot.slane %v4022_v4, 1 }
 0x29e   : >> { %v1674_v30 = vpop.permute.xlu0 %1673  ;;  %v1676_v13 = vpop.permute.xlu1 %1675  ;;  %10365 = vmatprep.mubr.msk.bf16.mxu1 %vm1989_vm12, %v9310_v18  ;;  %v4029_v25 = vshll.u32 %v9604_v12, 16  ;;  %v11083_v18 = vld [vmem:[%s12422_s29 + $0x88] sm:$0xf] }
 0x29f   : >> { %v1716_v56 = vsel %vm1710_vm11, %v1694_v42, %v1674_v30  ;;  %v1718_v27 = vsel %vm1710_vm11, %v1697_v1, %v1676_v13  ;;  %v4018_v42 = vor.u32 %v4017_v9, %v4013_v23  ;;  %v4027_v30 = vshrl.u32 %v9604_v12, 16  ;;  %v9597_v23 = vld [vmem:[%s12422_s29 + $0xe0] sm:$0xe]  ;;  %v13148_v9 = vld [vmem:[%s12422_s29 + $0x8c] sm:$0x1] }
 0x2a0   : >> { %2651 = vrot.lane.b32.xlu0 %v2601_v17, %s11560_s22  ;;  %v9311_v24 = vcombine.low %v1716_v56, %v1718_v27  ;;  %2653 = vrot.lane.b32.xlu1 %v2608_v14, %s11560_s22  ;;  %v4036_v17 = vshll.u32 %v9605_v7, 16  ;;  %v4031_v46 = vrot.slane %v4029_v25, 1  ;;  %v4025_v13 = vor.u32 %v4024_v28, %v4020_v33 }
 0x2a1   : >> { %v4034_v56 = vshrl.u32 %v9605_v7, 16  ;;  %v9596_v7 = vld [vmem:[%s12422_s29 + $0xd8] sm:$0xe] }
 0x2a2   : >> { %v3354_v36 = vpop.permute.xlu0 %3353  ;;  %v3356_v38 = vpop.permute.xlu1 %3355  ;;  %10366 = vmatmul.mubr.msk.bf16.vlgmr.msra.gmra.mrb[0].mxu1 %vm1989_vm12, %v9311_v24  ;;  %v4038_v27 = vrot.slane %v4036_v17, 1  ;;  %v9595_v24 = vld [vmem:[%s12422_s29 + $0xd0] sm:$0xe] }
 0x2a3   : >> { %10374 = vmatpush3.bf16.msra.mxu1 %v12884_v60  ;;  %v2693_v60 = vrot.slane %v9405_v47, 1  ;;  %v3423_v58 = vsel %vm1323_vm8, %v11082_v49, %v3354_v36  ;;  %v3426_v14 = vsel %vm1323_vm8, %v11083_v18, %v3356_v38  ;;  %v9610_v47 = vcombine.low %v9594_v0, %v13038_v45  ;;  %v13145_v45 = vld [vmem:[%s12422_s29 + $0x88] sm:$0xf]  ;;  %v11086_v0 = vld [vmem:[%s12422_s29 + $0x20] sm:$0xf] }
 0x2a4   : >> { %2655 = vrot.lane.b32.xlu0 %v2615_v34, %s11560_s22  ;;  %2657 = vrot.lane.b32.xlu1 %v2622_v2, %s11560_s22  ;;  %v13109_v34 = vld [vmem:[%s12422_s29 + $0x70] sm:$0xf]  ;;  %v13118_v2 = vld [vmem:[%s12422_s29 + $0x78] sm:$0xf]  ;;  %v9611_v4 = vcombine.low %v9595_v24, %v13047_v63  ;;  %v9613_v49 = vcombine.low %v9597_v23, %v13077_v11 }
 0x2a5   : >> { %10737 = vmatprep.subr.msk.bf16.mxu1 %vm2002_vm10, %v11047_v41  ;;  %v9399_v19 = vcombine.low %v13109_v34, %v13112_v35  ;;  %v4084_v63 = vrot.slane %v9610_v47, 1  ;;  %v13183_v23 = vld [vmem:[%s12422_s29 + $0xbc] sm:$0x1] }
 0x2a6   : >> { %v3358_v10 = vpop.permute.xlu0 %3357  ;;  %v3360_v21 = vpop.permute.xlu1 %3359  ;;  %v4085_v17 = vrot.slane %v9611_v4, 1 }
 0x2a7   : >> { %10376 = vmatpush3.bf16.msra.mxu1 %v2452_v59  ;;  %v3429_v51 = vsel %vm1323_vm8, %v11084_v29, %v3358_v10  ;;  %v3432_v41 = vsel %vm1323_vm8, %v11085_v40, %v3360_v21  ;;  %v9400_v59 = vcombine.low %v13118_v2, %v13121_v5  ;;  %v13138_v10 = vld [vmem:[%s12422_s29 + $0x80] sm:$0xf]  ;;  %v13141_v21 = vld [vmem:[%s12422_s29 + $0x84] sm:$0x1]  ;;  %v2626_v33 = vshll.u32 %v9399_v19, 16 }
 0x2a8   : >> { %2699 = vrot.lane.b32.xlu0 %v2691_v48, %s11559_s19  ;;  %2701 = vrot.lane.b32.xlu1 %v2692_v37, %s11559_s19  ;;  %v4032_v48 = vor.u32 %v4031_v46, %v4027_v30  ;;  %v4039_v37 = vor.u32 %v4038_v27, %v4034_v56  ;;  %v9401_v28 = vcombine.low %v13138_v10, %v13141_v21  ;;  %v11087_v56 = vld [vmem:[%s12422_s29 + $0x28] sm:$0xf] }
 0x2a9   : >> { %10385 = vmatprep.subr.bf16.mxu1 %v13094_v32  ;;  %v2631_v30 = vshrl.u32 %v9400_v59, 16 }
 0x2aa   : >> { %v3402_v50 = vpop.permute.xlu0 %3401  ;;  %v3404_v22 = vpop.permute.xlu1 %3403  ;;  %v2638_v40 = vshrl.u32 %v9401_v28, 16 }
 0x2ab   : >> { %v3442_v20 = vsel %vm1710_vm11, %v3423_v58, %v3402_v50  ;;  %v3444_v39 = vsel %vm1710_vm11, %v3426_v14, %v3404_v22  ;;  %v2633_v58 = vshll.u32 %v9400_v59, 16  ;;  %v9402_v50 = vcombine.low %v13145_v45, %v13148_v9  ;;  %v9392_v59 = vld [vmem:[%s12422_s29 + $0x78] sm:$0xe] }
 0x2ac   : >> { %2703 = vrot.lane.b32.xlu0 %v2693_v60, %s11559_s19  ;;  %v9515_v1 = vcombine.low %v3442_v20, %v3444_v39  ;;  %2705 = vrot.lane.b32.xlu1 %v2694_v26, %s11559_s19  ;;  %v9612_v26 = vcombine.low %v9596_v7, %v13068_v62  ;;  %v2624_v22 = vshrl.u32 %v9399_v19, 16  ;;  %v2628_v20 = vrot.slane %v2626_v33, 1  ;;  %v13171_v19 = vld [vmem:[%s12422_s29 + $0xb0] sm:$0xf] }
 0x2ad   : >> { %v2640_v39 = vshll.u32 %v9401_v28, 16  ;;  %v2635_v46 = vrot.slane %v2633_v58, 1  ;;  %v2647_v11 = vshll.u32 %v9402_v50, 16  ;;  %v13190_v28 = vld [vmem:[%s12422_s29 + $0xc8] sm:$0xf] }
 0x2ae   : >> { %v3406_v57 = vpop.permute.xlu0 %3405  ;;  %v3408_v36 = vpop.permute.xlu1 %3407  ;;  %10417 = vmatprep.mubr.msk.bf16.mxu0 %vm1989_vm12, %v9515_v1  ;;  %v4086_v62 = vrot.slane %v9612_v26, 1  ;;  %v2629_v24 = vor.u32 %v2628_v20, %v2624_v22 }
 0x2af   : >> { %v3446_v38 = vsel %vm1710_vm11, %v3429_v51, %v3406_v57  ;;  %v3448_v52 = vsel %vm1710_vm11, %v3432_v41, %v3408_v36  ;;  %v2642_v41 = vrot.slane %v2640_v39, 1  ;;  %v9391_v36 = vld [vmem:[%s12422_s29 + $0x70] sm:$0xe]  ;;  %v2649_v47 = vrot.slane %v2647_v11, 1 }
 0x2b0   : >> { %4048 = vrot.lane.b32.xlu0 %v4018_v42, %s11560_s22  ;;  %v9516_v12 = vcombine.low %v3446_v38, %v3448_v52  ;;  %4050 = vrot.lane.b32.xlu1 %v4025_v13, %s11560_s22  ;;  %v4087_v42 = vrot.slane %v9613_v49, 1  ;;  %v2636_v52 = vor.u32 %v2635_v46, %v2631_v30  ;;  %v9407_v58 = vcombine.low %v9391_v36, %v13112_v35  ;;  %v9394_v46 = vld [vmem:[%s12422_s29 + $0x88] sm:$0xe] }
 0x2b1   : >> { %v2643_v49 = vor.u32 %v2642_v41, %v2638_v40  ;;  %v9408_v39 = vcombine.low %v9392_v59, %v13121_v5 }
 0x2b2   : >> { %v1630_v60 = vpop.permute.xlu0 %1629  ;;  %v1632_v25 = vpop.permute.xlu1 %1631  ;;  %10418 = vmatmul.mubr.msk.bf16.gmra.mrb[4].mxu0 %vm1989_vm12, %v9516_v12  ;;  %v13174_v12 = vld [vmem:[%s12422_s29 + $0xb4] sm:$0x1] }
 0x2b3   : >> { %v1700_v1 = vsel %vm1323_vm8, %v11086_v0, %v1630_v60  ;;  %v1703_v27 = vsel %vm1323_vm8, %v11087_v56, %v1632_v25  ;;  %v13180_v60 = vld [vmem:[%s12422_s29 + $0xb8] sm:$0xf] }
 0x2b4   : >> { %4052 = vrot.lane.b32.xlu0 %v4032_v48, %s11560_s22  ;;  %4054 = vrot.lane.b32.xlu1 %v4039_v37, %s11560_s22  ;;  %v2645_v48 = vshrl.u32 %v9402_v50, 16  ;;  %v11088_v37 = vld [vmem:[%s12422_s29 + $0x30] sm:$0xf]  ;;  %v11089_v25 = vld [vmem:[%s12422_s29 + $0x38] sm:$0xf]  ;;  %v9649_v50 = vcombine.low %v13171_v19, %v13174_v12  ;;  %v9650_v30 = vcombine.low %v13180_v60, %v13183_v23 }
 0x2b6   : >> { %v1634_v18 = vpop.permute.xlu0 %1633  ;;  %v1636_v14 = vpop.permute.xlu1 %1635  ;;  %v2650_v20 = vor.u32 %v2649_v47, %v2645_v48  ;;  %v4334_v56 = vshll.u32 %v9649_v50, 16  ;;  %v4339_v48 = vshrl.u32 %v9650_v30, 16 }
 0x2b7   : >> { %v1706_v4 = vsel %vm1323_vm8, %v11088_v37, %v1634_v18  ;;  %v13198_v18 = vld [vmem:[%s12422_s29 + $0xcc] sm:$0x1] }
 0x2b8   : >> { %4096 = vrot.lane.b32.xlu0 %v4084_v63, %s11559_s19  ;;  %4098 = vrot.lane.b32.xlu1 %v4085_v17, %s11559_s19  ;;  %v1709_v63 = vsel %vm1323_vm8, %v11089_v25, %v1636_v14  ;;  %v13201_v14 = vld [vmem:[%s12422_s29 + $0xc0] sm:$0xf]  ;;  %v13215_v0 = vcombine.low %v13190_v28, %v13198_v18  ;;  %v11091_v25 = vld [vmem:[%s12422_s29 + $0xa8] sm:$0xf] }
 0x2ba   : >> { %v1678_v13 = vpop.permute.xlu0 %1677  ;;  %v1680_v29 = vpop.permute.xlu1 %1679  ;;  %v4355_v40 = vshll.u32 %v13215_v0, 16 }
 0x2bb   : >> { %v1720_v51 = vsel %vm1710_vm11, %v1700_v1, %v1678_v13  ;;  %v1722_v57 = vsel %vm1710_vm11, %v1703_v27, %v1680_v29  ;;  %v2695_v13 = vrot.slane %v9407_v58, 1  ;;  %v2696_v27 = vrot.slane %v9408_v39, 1  ;;  %v13237_v39 = vld [vmem:[%s12422_s29 + $0x80] sm:$0xf] }
 0x2bc   : >> { %4100 = vrot.lane.b32.xlu0 %v4086_v62, %s11559_s19  ;;  %v9312_v38 = vcombine.low %v1720_v51, %v1722_v57  ;;  %4102 = vrot.lane.b32.xlu1 %v4087_v42, %s11559_s19  ;;  %v13204_v62 = vld [vmem:[%s12422_s29 + $0xc4] sm:$0x1]  ;;  %v9393_v42 = vld [vmem:[%s12422_s29 + $0x80] sm:$0xe]  ;;  %v9410_v29 = vcombine.low %v9394_v46, %v13148_v9  ;;  %v4341_v51 = vshll.u32 %v9650_v30, 16 }
 0x2bd   : >> { %v9651_v1 = vcombine.low %v13201_v14, %v13204_v62  ;;  %v9409_v5 = vcombine.low %v9393_v42, %v13141_v21  ;;  %v11090_v9 = vld [vmem:[%s12422_s29 + $0xa0] sm:$0xf]  ;;  %v13244_v46 = vld [vmem:[%s12422_s29 + $0x78] sm:$0xf] }
 0x2be   : >> { %v1682_v7 = vpop.permute.xlu0 %1681  ;;  %v1684_v26 = vpop.permute.xlu1 %1683  ;;  %10369 = vmatprep.mubr.msk.bf16.mxu1 %vm1989_vm12, %v9312_v38  ;;  %v4332_v38 = vshrl.u32 %v9649_v50, 16  ;;  %v2698_v21 = vrot.slane %v9410_v29, 1  ;;  %v4343_v47 = vrot.slane %v4341_v51, 1 }
 0x2bf   : >> { %v1724_v33 = vsel %vm1710_vm11, %v1706_v4, %v1682_v7  ;;  %v1726_v17 = vsel %vm1710_vm11, %v1709_v63, %v1684_v26  ;;  %v4348_v41 = vshll.u32 %v9651_v1, 16  ;;  %v2697_v36 = vrot.slane %v9409_v5, 1  ;;  %v11093_v5 = vld [vmem:[%s12422_s29 + $0xb8] sm:$0xf] }
 0x2c0   : >> { %2659 = vrot.lane.b32.xlu0 %v2629_v24, %s11560_s22  ;;  %v9313_v22 = vcombine.low %v1724_v33, %v1726_v17  ;;  %2661 = vrot.lane.b32.xlu1 %v2636_v52, %s11560_s22  ;;  %v4336_v52 = vrot.slane %v4334_v56, 1  ;;  %v4353_v7 = vshrl.u32 %v13215_v0, 16  ;;  %v4346_v59 = vshrl.u32 %v9651_v1, 16  ;;  %v11092_v0 = vld [vmem:[%s12422_s29 + $0xb0] sm:$0xf] }
 0x2c1   : >> { %v4357_v17 = vrot.slane %v4355_v40, 1  ;;  %v4344_v30 = vor.u32 %v4343_v47, %v4339_v48  ;;  %v9643_v47 = vld [vmem:[%s12422_s29 + $0xc0] sm:$0xe] }
 0x2c2   : >> { %v3694_v35 = vpop.permute.xlu0 %3693  ;;  %v3696_v11 = vpop.permute.xlu1 %3695  ;;  %10370 = vmatmul.mubr.msk.bf16.gmra.mrb[4].mxu1 %vm1989_vm12, %v9313_v22  ;;  %v4337_v50 = vor.u32 %v4336_v52, %v4332_v38  ;;  %v9642_v22 = vld [vmem:[%s12422_s29 + $0xb8] sm:$0xe]  ;;  %v13269_v52 = vld [vmem:[%s12422_s29 + $0xdc] sm:$0x1] }
 0x2c3   : >> { %v3759_v37 = vsel %vm1323_vm8, %v11090_v9, %v3694_v35  ;;  %v3762_v63 = vsel %vm1323_vm8, %v11091_v25, %v3696_v11  ;;  %v13241_v35 = vld [vmem:[%s12422_s29 + $0x84] sm:$0x1]  ;;  %v13247_v11 = vld [vmem:[%s12422_s29 + $0x7c] sm:$0x1]  ;;  %v9658_v51 = vcombine.low %v9642_v22, %v13183_v23  ;;  %v13272_v23 = vld [vmem:[%s12422_s29 + $0xd0] sm:$0xf]  ;;  %v4358_v48 = vor.u32 %v4357_v17, %v4353_v7 }
 0x2c4   : >> { %2663 = vrot.lane.b32.xlu0 %v2643_v49, %s11560_s22  ;;  %2665 = vrot.lane.b32.xlu1 %v2650_v20, %s11560_s22  ;;  %v4350_v49 = vrot.slane %v4348_v41, 1  ;;  %v9641_v20 = vld [vmem:[%s12422_s29 + $0xb0] sm:$0xe]  ;;  %v13258_v41 = vld [vmem:[%s12422_s29 + $0xd8] sm:$0xf]  ;;  %v9450_v38 = vcombine.low %v13244_v46, %v13247_v11 }
 0x2c5   : >> { %v9657_v40 = vcombine.low %v9641_v20, %v13174_v12  ;;  %v13275_v12 = vld [vmem:[%s12422_s29 + $0xd4] sm:$0x1]  ;;  %v11065_v9 = vld [vmem:[%s15244_s3 + $0x5c] ss:$0 sps:$4 sm:$0xff]   ;;  %v4428_v25 = vrot.slane %v9658_v51, 1 }
 0x2c6   : >> { %v3698_v57 = vpop.permute.xlu0 %3697  ;;  %v3700_v24 = vpop.permute.xlu1 %3699  ;;  %v13290_v7 = vcombine.low %v13272_v23, %v13275_v12  ;;  %v13302_v22 = vld [vmem:[%s12422_s29 + $0x8c] sm:$0x1]  ;;  %v4189_v20 = vsel %vm2002_vm10, %v11065_v9, 0 }
 0x2c7   : >> { %v3765_v1 = vsel %vm1323_vm8, %v11092_v0, %v3698_v57  ;;  %v3768_v56 = vsel %vm1323_vm8, %v11093_v5, %v3700_v24  ;;  %v13264_v24 = vcombine.low %v13237_v39, %v13241_v35  ;;  %v2971_v5 = vshrl.u32 %v9450_v38, 16 }
 0x2c8   : >> { %2707 = vrot.lane.b32.xlu0 %v2695_v13, %s11559_s19  ;;  %2709 = vrot.lane.b32.xlu1 %v2696_v27, %s11559_s19 }
 0x2c9   : >> { %v2980_v17 = vshll.u32 %v13264_v24, 16  ;;  %v2978_v51 = vshrl.u32 %v13264_v24, 16 }
 0x2ca   : >> { %v3742_v4 = vpop.permute.xlu0 %3741  ;;  %v3744_v26 = vpop.permute.xlu1 %3743 }
 0x2cb   : >> { %v3782_v33 = vsel %vm1710_vm11, %v3759_v37, %v3742_v4  ;;  %v3784_v58 = vsel %vm1710_vm11, %v3762_v63, %v3744_v26  ;;  %v9644_v4 = vld [vmem:[%s12422_s29 + $0xc8] sm:$0xe]  ;;  %v13286_v63 = vcombine.low %v13258_v41, %v13269_v52  ;;  %v4427_v26 = vrot.slane %v9657_v40, 1 }
 0x2cc   : >> { %2711 = vrot.lane.b32.xlu0 %v2697_v36, %s11559_s19  ;;  %v9563_v42 = vcombine.low %v3782_v33, %v3784_v58  ;;  %2713 = vrot.lane.b32.xlu1 %v2698_v21, %s11559_s19  ;;  %v4351_v36 = vor.u32 %v4350_v49, %v4346_v59  ;;  %v9659_v33 = vcombine.low %v9643_v47, %v13204_v62  ;;  %v2973_v49 = vshll.u32 %v9450_v38, 16  ;;  %v13309_v62 = vld [vmem:[%s15244_s3 + $0x60] sm:$0xff]  }
 0x2cd   : >> { %v9660_v58 = vcombine.low %v9644_v4, %v13198_v18  ;;  %v4369_v0 = vshll.u32 %v13286_v63, 16  ;;  %v2982_v40 = vrot.slane %v2980_v17, 1  ;;  %v4360_v47 = vshrl.u32 %v13290_v7, 16 }
 0x2ce   : >> { %v3746_v13 = vpop.permute.xlu0 %3745  ;;  %v3748_v27 = vpop.permute.xlu1 %3747  ;;  %10425 = vmatprep.mubr.msk.bf16.mxu0 %vm1989_vm12, %v9563_v42 }
 0x2cf   : >> { %v3786_v29 = vsel %vm1710_vm11, %v3765_v1, %v3746_v13  ;;  %v3788_v57 = vsel %vm1710_vm11, %v3768_v56, %v3748_v27  ;;  %v4362_v1 = vshll.u32 %v13290_v7, 16  ;;  %v4429_v13 = vrot.slane %v9659_v33, 1 }
 0x2d0   : >> { %4387 = vrot.lane.b32.xlu0 %v4337_v50, %s11560_s22  ;;  %v9564_v21 = vcombine.low %v3786_v29, %v3788_v57  ;;  %4389 = vrot.lane.b32.xlu1 %v4344_v30, %s11560_s22  ;;  %v13299_v50 = vld [vmem:[%s12422_s29 + $0x88] sm:$0xf]  ;;  %v13312_v30 = vld [vmem:[%s12422_s29 + $0x90] sm:$0xf]  ;;  %v2975_v56 = vrot.slane %v2973_v49, 1  ;;  %v4430_v29 = vrot.slane %v9660_v58, 1  ;;  %v2983_v49 = vor.u32 %v2982_v40, %v2978_v51 }
 0x2d1   : >> { %v9452_v27 = vcombine.low %v13299_v50, %v13302_v22  ;;  %v4364_v33 = vrot.slane %v4362_v1, 1 }
 0x2d2   : >> { %v2304_v37 = vpop.permute.xlu0 %2303  ;;  %v2306_v59 = vpop.permute.xlu1 %2305  ;;  %10426 = vmatmul.mubr.msk.bf16.vlgmr.msra.gmra.mrb[0].mxu0 %vm1989_vm12, %v9564_v21 }
 0x2d3   : >> { %10434 = vmatpush3.bf16.msra.mxu0 %v13020_v43  ;;  %v13315_v43 = vld [vmem:[%s12422_s29 + $0x94] sm:$0x1]  ;;  %v2987_v17 = vshll.u32 %v9452_v27, 16  ;;  %v4365_v40 = vor.u32 %v4364_v33, %v4360_v47 }
 0x2d4   : >> { %4391 = vrot.lane.b32.xlu0 %v4351_v36, %s11560_s22  ;;  %4393 = vrot.lane.b32.xlu1 %v4358_v48, %s11560_s22  ;;  %v9453_v57 = vcombine.low %v13312_v30, %v13315_v43  ;;  %v11094_v36 = vld [vmem:[%s12422_s29 + $0x10] sm:$0xf]  ;;  %v4367_v48 = vshrl.u32 %v13286_v63, 16  ;;  %v2976_v63 = vor.u32 %v2975_v56, %v2971_v5 }
 0x2d5   : >> { %10743 = vmatprep.subr.msk.bf16.mxu0 %vm2002_vm10, %v11065_v9  ;;  %v2369_v21 = vsel %vm1323_vm8, %v11094_v36, %v2304_v37  ;;  %v11095_v9 = vld [vmem:[%s12422_s29 + $0x18] sm:$0xf]  ;;  %v11096_v36 = vld [vmem:[%s12422_s29 + $0x20] sm:$0xf] }
 0x2d6   : >> { %v2308_v42 = vpop.permute.xlu0 %2307  ;;  %v2310_v18 = vpop.permute.xlu1 %2309  ;;  %v2372_v24 = vsel %vm1323_vm8, %v11095_v9, %v2306_v59  ;;  %v2994_v58 = vshll.u32 %v9453_v57, 16  ;;  %v13338_v59 = vld [vmem:[%s12422_s29 + $0xe0] sm:$0xf] }
 0x2d7   : >> { %10436 = vmatpush3.bf16.msra.mxu0 %v4189_v20  ;;  %v13341_v20 = vld [vmem:[%s12422_s29 + $0xe4] sm:$0x1] }
 0x2d8   : >> { %4435 = vrot.lane.b32.xlu0 %v4427_v26, %s11559_s19  ;;  %4437 = vrot.lane.b32.xlu1 %v4428_v25, %s11559_s19  ;;  %v4371_v26 = vrot.slane %v4369_v0, 1  ;;  %v2375_v0 = vsel %vm1323_vm8, %v11096_v36, %v2308_v42  ;;  %v2985_v42 = vshrl.u32 %v9452_v27, 16 }
 0x2d9   : >> { %10445 = vmatprep.subr.bf16.mxu0 %v13309_v62 }
 0x2da   : >> { %v2352_v38 = vpop.permute.xlu0 %2351  ;;  %v2354_v4 = vpop.permute.xlu1 %2353  ;;  %v4372_v51 = vor.u32 %v4371_v26, %v4367_v48  ;;  %v11067_v48 = vld [vmem:[%s15244_s3 + $0x2c] ss:$0 sps:$4 sm:$0xff]   ;;  %v9443_v26 = vld [vmem:[%s12422_s29 + $0x80] sm:$0xe] }
 0x2db   : >> { %v2392_v25 = vsel %vm1710_vm11, %v2369_v21, %v2352_v38  ;;  %v2394_v37 = vsel %vm1710_vm11, %v2372_v24, %v2354_v4  ;;  %v13346_v21 = vld [vmem:[%s12422_s29 + $0xe8] sm:$0xf]  ;;  %v13349_v38 = vld [vmem:[%s12422_s29 + $0xec] sm:$0x1]  ;;  %v2989_v24 = vrot.slane %v2987_v17, 1  ;;  %v9655_v4 = vcombine.low %v13338_v59, %v13341_v20 }
 0x2dc   : >> { %4439 = vrot.lane.b32.xlu0 %v4429_v13, %s11559_s19  ;;  %v9361_v7 = vcombine.low %v2392_v25, %v2394_v37  ;;  %4441 = vrot.lane.b32.xlu1 %v4430_v29, %s11559_s19  ;;  %v11097_v13 = vld [vmem:[%s12422_s29 + $0x28] sm:$0xf]  ;;  %v2996_v37 = vrot.slane %v2994_v58, 1  ;;  %v9656_v36 = vcombine.low %v13346_v21, %v13349_v38 }
 0x2dd   : >> { %v2378_v5 = vsel %vm1323_vm8, %v11097_v13, %v2310_v18  ;;  %v2992_v18 = vshrl.u32 %v9453_v57, 16  ;;  %v2990_v33 = vor.u32 %v2989_v24, %v2985_v42  ;;  %v4376_v57 = vshll.u32 %v9655_v4, 16 }
 0x2de   : >> { %v2356_v1 = vpop.permute.xlu0 %2355  ;;  %v2358_v56 = vpop.permute.xlu1 %2357  ;;  %10377 = vmatprep.mubr.msk.bf16.mxu1 %vm1989_vm12, %v9361_v7  ;;  %v9442_v7 = vld [vmem:[%s12422_s29 + $0x78] sm:$0xe]  ;;  %v4383_v58 = vshll.u32 %v9656_v36, 16 }
 0x2df   : >> { %v2396_v29 = vsel %vm1710_vm11, %v2375_v0, %v2356_v1  ;;  %v2398_v9 = vsel %vm1710_vm11, %v2378_v5, %v2358_v56  ;;  %v2997_v17 = vor.u32 %v2996_v37, %v2992_v18  ;;  %v2800_v0 = vsel %vm2002_vm10, %v11067_v48, 0 }
 0x2e0   : >> { %3006 = vrot.lane.b32.xlu0 %v2976_v63, %s11560_s22  ;;  %v9362_v25 = vcombine.low %v2396_v29, %v2398_v9  ;;  %3008 = vrot.lane.b32.xlu1 %v2983_v49, %s11560_s22  ;;  %v9458_v63 = vcombine.low %v9442_v7, %v13247_v11  ;;  %v9459_v49 = vcombine.low %v9443_v26, %v13241_v35  ;;  %v4378_v5 = vrot.slane %v4376_v57, 1  ;;  %v11099_v9 = vld [vmem:[%s12422_s29 + $0xc0] sm:$0xf]  ;;  %v9444_v57 = vld [vmem:[%s12422_s29 + $0x88] sm:$0xe] }
 0x2e1   : >> { %v4381_v35 = vshrl.u32 %v9656_v36, 16  ;;  %v4385_v29 = vrot.slane %v4383_v58, 1  ;;  %v9445_v58 = vld [vmem:[%s12422_s29 + $0x90] sm:$0xe] }
 0x2e2   : >> { %v3702_v47 = vpop.permute.xlu0 %3701  ;;  %v3704_v27 = vpop.permute.xlu1 %3703  ;;  %10378 = vmatmul.mubr.msk.bf16.vlgmr.msra.gmra.mrb[0].mxu1 %vm1989_vm12, %v9362_v25  ;;  %v3042_v11 = vrot.slane %v9458_v63, 1  ;;  %v3043_v56 = vrot.slane %v9459_v49, 1  ;;  %v11100_v25 = vld [vmem:[%s12422_s29 + $0xc8] sm:$0xf] }
 0x2e3   : >> { %10386 = vmatpush3.bf16.msra.mxu1 %v13094_v32  ;;  %v4374_v32 = vshrl.u32 %v9655_v4, 16  ;;  %v3771_v42 = vsel %vm1323_vm8, %v11099_v9, %v3702_v47  ;;  %v9646_v4 = vld [vmem:[%s12422_s29 + $0xd8] sm:$0xe]  ;;  %v3774_v18 = vsel %vm1323_vm8, %v11100_v25, %v3704_v27  ;;  %v4386_v47 = vor.u32 %v4385_v29, %v4381_v35  ;;  %v9648_v9 = vld [vmem:[%s12422_s29 + $0xe8] sm:$0xe] }
 0x2e4   : >> { %4395 = vrot.lane.b32.xlu0 %v4365_v40, %s11560_s22  ;;  %4397 = vrot.lane.b32.xlu1 %v4372_v51, %s11560_s22  ;;  %v9645_v51 = vld [vmem:[%s12422_s29 + $0xd0] sm:$0xe]  ;;  %v9662_v63 = vcombine.low %v9646_v4, %v13269_v52  ;;  %v9461_v29 = vcombine.low %v9445_v58, %v13315_v43  ;;  %v9664_v25 = vcombine.low %v9648_v9, %v13349_v38  ;;  %v11106_v58 = vld [vmem:[%s12422_s29 + $0x48] sm:$0xf] }
 0x2e5   : >> { %10738 = vmatprep.subr.msk.bf16.mxu1 %vm2002_vm10, %v11067_v48  ;;  %v13381_v40 = vld [vmem:[%s15244_s3 + $0x30] sm:$0xff]   ;;  %v4379_v48 = vor.u32 %v4378_v5, %v4374_v32  ;;  %v9661_v26 = vcombine.low %v9645_v51, %v13275_v12  ;;  %v9647_v51 = vld [vmem:[%s12422_s29 + $0xe0] sm:$0xe] }
 0x2e6   : >> { %v3706_v1 = vpop.permute.xlu0 %3705  ;;  %v3708_v13 = vpop.permute.xlu1 %3707  ;;  %v4432_v35 = vrot.slane %v9662_v63, 1  ;;  %v9663_v4 = vcombine.low %v9647_v51, %v13341_v20  ;;  %v11104_v20 = vld [vmem:[%s12422_s29 + $0x38] sm:$0xf]  ;;  %v11108_v9 = vld [vmem:[%s12422_s29 + $0xb0] sm:$0xf] }
 0x2e7   : >> { %10388 = vmatpush3.bf16.msra.mxu1 %v2800_v0  ;;  %v11102_v0 = vld [vmem:[%s12422_s29 + $0xd8] sm:$0xf]  ;;  %v4431_v52 = vrot.slane %v9661_v26, 1 }
 0x2e8   : >> { %3010 = vrot.lane.b32.xlu0 %v2990_v33, %s11560_s22  ;;  %3012 = vrot.lane.b32.xlu1 %v2997_v17, %s11560_s22  ;;  %v11101_v17 = vld [vmem:[%s12422_s29 + $0xd0] sm:$0xf] }
 0x2e9   : >> { %10597 = vmatprep.subr.bf16.mxu1 %v13381_v40  ;;  %v3777_v27 = vsel %vm1323_vm8, %v11101_v17, %v3706_v1  ;;  %v11105_v17 = vld [vmem:[%s12422_s29 + $0x40] sm:$0xf] }
 0x2ea   : >> { %v3750_v24 = vpop.permute.xlu0 %3749  ;;  %v3752_v37 = vpop.permute.xlu1 %3751 }
 0x2eb   : >> { %v3790_v7 = vsel %vm1710_vm11, %v3771_v42, %v3750_v24  ;;  %v3792_v36 = vsel %vm1710_vm11, %v3774_v18, %v3752_v37  ;;  %v4433_v37 = vrot.slane %v9663_v4, 1 }
 0x2ec   : >> { %3054 = vrot.lane.b32.xlu0 %v3042_v11, %s11559_s19  ;;  %v9565_v33 = vcombine.low %v3790_v7, %v3792_v36  ;;  %3056 = vrot.lane.b32.xlu1 %v3043_v56, %s11559_s19  ;;  %v3780_v11 = vsel %vm1323_vm8, %v11102_v0, %v3708_v13  ;;  %v9460_v56 = vcombine.low %v9444_v57, %v13302_v22  ;;  %v3045_v22 = vrot.slane %v9461_v29, 1  ;;  %v11103_v36 = vld [vmem:[%s12422_s29 + $0x30] sm:$0xf]  ;;  %v11107_v29 = vld [vmem:[%s12422_s29 + $0xa8] sm:$0xf] }
 0x2ed   : >> { %v4434_v7 = vrot.slane %v9664_v25, 1 }
 0x2ee   : >> { %v3754_v49 = vpop.permute.xlu0 %3753  ;;  %v3756_v32 = vpop.permute.xlu1 %3755  ;;  %10429 = vmatprep.mubr.msk.bf16.mxu0 %vm1989_vm12, %v9565_v33  ;;  %v3044_v24 = vrot.slane %v9460_v56, 1 }
 0x2ef   : >> { %v3794_v12 = vsel %vm1710_vm11, %v3777_v27, %v3754_v49  ;;  %v3796_v5 = vsel %vm1710_vm11, %v3780_v11, %v3756_v32 }
 0x2f0   : >> { %4399 = vrot.lane.b32.xlu0 %v4379_v48, %s11560_s22  ;;  %v9566_v1 = vcombine.low %v3794_v12, %v3796_v5  ;;  %4401 = vrot.lane.b32.xlu1 %v4386_v47, %s11560_s22 }
 0x2f2   : >> { %v2312_v13 = vpop.permute.xlu0 %2311  ;;  %v2314_v42 = vpop.permute.xlu1 %2313  ;;  %10430 = vmatmul.mubr.msk.bf16.gmra.mrb[4].mxu0 %vm1989_vm12, %v9566_v1 }
 0x2f3   : >> { %v2381_v48 = vsel %vm1323_vm8, %v11103_v36, %v2312_v13  ;;  %v2384_v33 = vsel %vm1323_vm8, %v11104_v20, %v2314_v42 }
 0x2f4   : >> { %4443 = vrot.lane.b32.xlu0 %v4431_v52, %s11559_s19  ;;  %4445 = vrot.lane.b32.xlu1 %v4432_v35, %s11559_s19 }
 0x2f6   : >> { %v2316_v18 = vpop.permute.xlu0 %2315  ;;  %v2318_v43 = vpop.permute.xlu1 %2317 }
 0x2f7   : >> { %v2387_v27 = vsel %vm1323_vm8, %v11105_v17, %v2316_v18  ;;  %v2390_v0 = vsel %vm1323_vm8, %v11106_v58, %v2318_v43  ;;  %v11109_v18 = vld [vmem:[%s12422_s29 + $0xb8] sm:$0xf] }
 0x2f8   : >> { %3058 = vrot.lane.b32.xlu0 %v3044_v24, %s11559_s19  ;;  %3060 = vrot.lane.b32.xlu1 %v3045_v22, %s11559_s19 }
 0x2fa   : >> { %v2360_v26 = vpop.permute.xlu0 %2359  ;;  %v2362_v47 = vpop.permute.xlu1 %2361 }
 0x2fb   : >> { %v2400_v38 = vsel %vm1710_vm11, %v2381_v48, %v2360_v26  ;;  %v2402_v63 = vsel %vm1710_vm11, %v2384_v33, %v2362_v47  ;;  %v11069_v47 = vld [vmem:[%s15244_s3 + $0x68] ss:$0 sps:$4 sm:$0xff]  }
 0x2fc   : >> { %4447 = vrot.lane.b32.xlu0 %v4433_v37, %s11559_s19  ;;  %v9363_v57 = vcombine.low %v2400_v38, %v2402_v63  ;;  %4449 = vrot.lane.b32.xlu1 %v4434_v7, %s11559_s19  ;;  %v11110_v7 = vld [vmem:[%s12422_s29 + $0xc0] sm:$0xf] }
 0x2fe   : >> { %v2364_v49 = vpop.permute.xlu0 %2363  ;;  %v2366_v11 = vpop.permute.xlu1 %2365  ;;  %10381 = vmatprep.mubr.msk.bf16.mxu1 %vm1989_vm12, %v9363_v57  ;;  %v4536_v57 = vsel %vm2002_vm10, %v11069_v47, 0 }
 0x2ff   : >> { %v2404_v32 = vsel %vm1710_vm11, %v2387_v27, %v2364_v49  ;;  %v2406_v12 = vsel %vm1710_vm11, %v2390_v0, %v2366_v11  ;;  %v11111_v49 = vld [vmem:[%s12422_s29 + $0x50] sm:$0xf] }
 0x300   : >> { %v9364_v5 = vcombine.low %v2404_v32, %v2406_v12 }
 0x302   : >> { %v4041_v52 = vpop.permute.xlu0 %4040  ;;  %v4043_v56 = vpop.permute.xlu1 %4042  ;;  %10382 = vmatmul.mubr.msk.bf16.gmra.mrb[4].mxu1 %vm1989_vm12, %v9364_v5 }
 0x303   : >> { %v4106_v51 = vsel %vm1323_vm8, %v11107_v29, %v4041_v52  ;;  %v4109_v42 = vsel %vm1323_vm8, %v11108_v9, %v4043_v56 }
 0x306   : >> { %v4045_v1 = vpop.permute.xlu0 %4044  ;;  %v4047_v35 = vpop.permute.xlu1 %4046 }
 0x307   : >> { %v4112_v43 = vsel %vm1323_vm8, %v11109_v18, %v4045_v1  ;;  %v4115_v36 = vsel %vm1323_vm8, %v11110_v7, %v4047_v35 }
 0x30a   : >> { %v4089_v13 = vpop.permute.xlu0 %4088  ;;  %v4091_v24 = vpop.permute.xlu1 %4090 }
 0x30b   : >> { %v4129_v4 = vsel %vm1710_vm11, %v4106_v51, %v4089_v13  ;;  %v4131_v22 = vsel %vm1710_vm11, %v4109_v42, %v4091_v24 }
 0x30c   : >> { %v9614_v25 = vcombine.low %v4129_v4, %v4131_v22 }
 0x30e   : >> { %v4093_v37 = vpop.permute.xlu0 %4092  ;;  %v4095_v48 = vpop.permute.xlu1 %4094  ;;  %10437 = vmatprep.mubr.msk.bf16.mxu0 %vm1989_vm12, %v9614_v25 }
 0x30f   : >> { %v4133_v26 = vsel %vm1710_vm11, %v4112_v43, %v4093_v37  ;;  %v4135_v20 = vsel %vm1710_vm11, %v4115_v36, %v4095_v48 }
 0x310   : >> { %v9615_v33 = vcombine.low %v4133_v26, %v4135_v20 }
 0x312   : >> { %v2652_v38 = vpop.permute.xlu0 %2651  ;;  %v2654_v63 = vpop.permute.xlu1 %2653  ;;  %10438 = vmatmul.mubr.msk.bf16.vlgmr.msra.gmra.mrb[0].mxu0 %vm1989_vm12, %v9615_v33 }
 0x313   : >> { %10446 = vmatpush3.bf16.msra.mxu0 %v13309_v62  ;;  %v2717_v58 = vsel %vm1323_vm8, %v11111_v49, %v2652_v38  ;;  %v2720_v11 = vsel %vm1323_vm8, %v12971_v55, %v2654_v63 }
 0x314   : >> { %10744 = vmatprep.subr.msk.bf16.mxu0 %vm2002_vm10, %v11069_v47 }
 0x316   : >> { %v2656_v17 = vpop.permute.xlu0 %2655  ;;  %v2658_v27 = vpop.permute.xlu1 %2657 }
 0x317   : >> { %10448 = vmatpush3.bf16.msra.mxu0 %v4536_v57  ;;  %v2723_v52 = vsel %vm1323_vm8, %v12991_v31, %v2656_v17  ;;  %v2726_v1 = vsel %vm1323_vm8, %v13000_v54, %v2658_v27  ;;  %v11112_v31 = vld [vmem:[%s15244_s3 + $0x38] ss:$0 sps:$4 sm:$0xff]  }
 0x31a   : >> { %v2700_v0 = vpop.permute.xlu0 %2699  ;;  %v2702_v32 = vpop.permute.xlu1 %2701 }
 0x31b   : >> { %v2740_v12 = vsel %vm1710_vm11, %v2717_v58, %v2700_v0  ;;  %v2742_v5 = vsel %vm1710_vm11, %v2720_v11, %v2702_v32 }
 0x31c   : >> { %v9411_v62 = vcombine.low %v2740_v12, %v2742_v5 }
 0x31e   : >> { %v2704_v56 = vpop.permute.xlu0 %2703  ;;  %v2706_v35 = vpop.permute.xlu1 %2705  ;;  %10389 = vmatprep.mubr.msk.bf16.mxu1 %vm1989_vm12, %v9411_v62 }
 0x31f   : >> { %v2744_v29 = vsel %vm1710_vm11, %v2723_v52, %v2704_v56  ;;  %v2746_v55 = vsel %vm1710_vm11, %v2726_v1, %v2706_v35 }
 0x320   : >> { %v9412_v51 = vcombine.low %v2744_v29, %v2746_v55 }
 0x322   : >> { %v4049_v13 = vpop.permute.xlu0 %4048  ;;  %v4051_v9 = vpop.permute.xlu1 %4050  ;;  %10390 = vmatmul.mubr.msk.bf16.vlgmr.msra.gmra.mrb[0].mxu1 %vm1989_vm12, %v9412_v51 }
 0x323   : >> { %10599 = vmatpush3.bf16.msra.mxu1 %v13381_v40  ;;  %v4118_v24 = vsel %vm1323_vm8, %v13035_v53, %v4049_v13  ;;  %v4121_v22 = vsel %vm1323_vm8, %v13044_v61, %v4051_v9 }
 0x324   : >> { %10740 = vmatprep.subr.msk.bf16.mxu1 %vm2002_vm10, %v11112_v31 }
 0x326   : >> { %v4053_v54 = vpop.permute.xlu0 %4052  ;;  %v4055_v42 = vpop.permute.xlu1 %4054 }
 0x327   : >> { %10600 = vmatpush3.bf16.msra.mxu1 %v12626_v44  ;;  %v4124_v37 = vsel %vm1323_vm8, %v13065_v6, %v4053_v54  ;;  %v4127_v44 = vsel %vm1323_vm8, %v13074_v8, %v4055_v42 }
 0x32a   : >> { %v4097_v4 = vpop.permute.xlu0 %4096  ;;  %v4099_v25 = vpop.permute.xlu1 %4098 }
 0x32b   : >> { %v4137_v40 = vsel %vm1710_vm11, %v4118_v24, %v4097_v4  ;;  %v4139_v18 = vsel %vm1710_vm11, %v4121_v22, %v4099_v25 }
 0x32c   : >> { %v9616_v43 = vcombine.low %v4137_v40, %v4139_v18 }
 0x32e   : >> { %v4101_v7 = vpop.permute.xlu0 %4100  ;;  %v4103_v36 = vpop.permute.xlu1 %4102  ;;  %10441 = vmatprep.mubr.msk.bf16.mxu0 %vm1989_vm12, %v9616_v43 }
 0x32f   : >> { %v4141_v53 = vsel %vm1710_vm11, %v4124_v37, %v4101_v7  ;;  %v4143_v61 = vsel %vm1710_vm11, %v4127_v44, %v4103_v36 }
 0x330   : >> { %v9617_v48 = vcombine.low %v4141_v53, %v4143_v61 }
 0x332   : >> { %v2660_v26 = vpop.permute.xlu0 %2659  ;;  %v2662_v20 = vpop.permute.xlu1 %2661  ;;  %10442 = vmatmul.mubr.msk.bf16.gmra.mrb[4].mxu0 %vm1989_vm12, %v9617_v48 }
 0x333   : >> { %v2729_v6 = vsel %vm1323_vm8, %v13109_v34, %v2660_v26  ;;  %v2732_v8 = vsel %vm1323_vm8, %v13118_v2, %v2662_v20 }
 0x336   : >> { %v2664_v33 = vpop.permute.xlu0 %2663  ;;  %v2666_v47 = vpop.permute.xlu1 %2665 }
 0x337   : >> { %v2735_v49 = vsel %vm1323_vm8, %v13138_v10, %v2664_v33  ;;  %v2738_v0 = vsel %vm1323_vm8, %v13145_v45, %v2666_v47 }
 0x33a   : >> { %v2708_v38 = vpop.permute.xlu0 %2707  ;;  %v2710_v63 = vpop.permute.xlu1 %2709 }
 0x33b   : >> { %v2748_v57 = vsel %vm1710_vm11, %v2729_v6, %v2708_v38  ;;  %v2750_v17 = vsel %vm1710_vm11, %v2732_v8, %v2710_v63 }
 0x33c   : >> { %v9413_v27 = vcombine.low %v2748_v57, %v2750_v17 }
 0x33e   : >> { %v2712_v58 = vpop.permute.xlu0 %2711  ;;  %v2714_v11 = vpop.permute.xlu1 %2713  ;;  %10393 = vmatprep.mubr.msk.bf16.mxu1 %vm1989_vm12, %v9413_v27 }
 0x33f   : >> { %v2752_v34 = vsel %vm1710_vm11, %v2735_v49, %v2712_v58  ;;  %v2754_v2 = vsel %vm1710_vm11, %v2738_v0, %v2714_v11 }
 0x340   : >> { %v9414_v32 = vcombine.low %v2752_v34, %v2754_v2 }
 0x342   : >> { %v4388_v12 = vpop.permute.xlu0 %4387  ;;  %v4390_v5 = vpop.permute.xlu1 %4389  ;;  %10394 = vmatmul.mubr.msk.bf16.gmra.mrb[4].mxu1 %vm1989_vm12, %v9414_v32 }
 0x343   : >> { %v4453_v10 = vsel %vm1323_vm8, %v13171_v19, %v4388_v12  ;;  %v4456_v45 = vsel %vm1323_vm8, %v13180_v60, %v4390_v5 }
 0x346   : >> { %v4392_v62 = vpop.permute.xlu0 %4391  ;;  %v4394_v52 = vpop.permute.xlu1 %4393 }
 0x347   : >> { %v4459_v51 = vsel %vm1323_vm8, %v13201_v14, %v4392_v62  ;;  %v4462_v9 = vsel %vm1323_vm8, %v13190_v28, %v4394_v52 }
 0x34a   : >> { %v4436_v56 = vpop.permute.xlu0 %4435  ;;  %v4438_v1 = vpop.permute.xlu1 %4437 }
 0x34b   : >> { %v4476_v35 = vsel %vm1710_vm11, %v4453_v10, %v4436_v56  ;;  %v4478_v29 = vsel %vm1710_vm11, %v4456_v45, %v4438_v1 }
 0x34c   : >> { %v9665_v55 = vcombine.low %v4476_v35, %v4478_v29 }
 0x34e   : >> { %v4440_v13 = vpop.permute.xlu0 %4439  ;;  %v4442_v31 = vpop.permute.xlu1 %4441  ;;  %10449 = vmatprep.mubr.msk.bf16.mxu0 %vm1989_vm12, %v9665_v55 }
 0x34f   : >> { %v4480_v19 = vsel %vm1710_vm11, %v4459_v51, %v4440_v13  ;;  %v4482_v60 = vsel %vm1710_vm11, %v4462_v9, %v4442_v31 }
 0x350   : >> { %v9666_v54 = vcombine.low %v4480_v19, %v4482_v60 }
 0x352   : >> { %v3007_v42 = vpop.permute.xlu0 %3006  ;;  %v3009_v24 = vpop.permute.xlu1 %3008  ;;  %10450 = vmatmul.mubr.msk.bf16.vlgmr.msra.gmra.mrb[0].mxu0 %vm1989_vm12, %v9666_v54 }
 0x353   : >> { %v3076_v40 = vsel %vm1323_vm8, %v13244_v46, %v3007_v42  ;;  %v3079_v18 = vsel %vm1323_vm8, %v13237_v39, %v3009_v24 }
 0x356   : >> { %v4396_v4 = vpop.permute.xlu0 %4395  ;;  %v4398_v22 = vpop.permute.xlu1 %4397 }
 0x357   : >> { %v4465_v61 = vsel %vm1323_vm8, %v13272_v23, %v4396_v4  ;;  %v4468_v46 = vsel %vm1323_vm8, %v13258_v41, %v4398_v22 }
 0x35a   : >> { %v3011_v25 = vpop.permute.xlu0 %3010  ;;  %v3013_v14 = vpop.permute.xlu1 %3012 }
 0x35b   : >> { %v3082_v47 = vsel %vm1323_vm8, %v13299_v50, %v3011_v25  ;;  %v3085_v38 = vsel %vm1323_vm8, %v13312_v30, %v3013_v14 }
 0x35e   : >> { %v3055_v28 = vpop.permute.xlu0 %3054  ;;  %v3057_v43 = vpop.permute.xlu1 %3056 }
 0x35f   : >> { %v3095_v37 = vsel %vm1710_vm11, %v3076_v40, %v3055_v28  ;;  %v3097_v7 = vsel %vm1710_vm11, %v3079_v18, %v3057_v43 }
 0x360   : >> { %v9464_v44 = vcombine.low %v3095_v37, %v3097_v7 }
 0x362   : >> { %v4400_v36 = vpop.permute.xlu0 %4399  ;;  %v4402_v53 = vpop.permute.xlu1 %4401  ;;  %10405 = vmatprep.mubr.msk.bf16.mxu1 %vm1989_vm12, %v9464_v44 }
 0x363   : >> { %v4471_v57 = vsel %vm1323_vm8, %v13338_v59, %v4400_v36  ;;  %v4474_v50 = vsel %vm1323_vm8, %v13346_v21, %v4402_v53 }
 0x366   : >> { %v4444_v48 = vpop.permute.xlu0 %4443  ;;  %v4446_v26 = vpop.permute.xlu1 %4445 }
 0x367   : >> { %v4484_v39 = vsel %vm1710_vm11, %v4465_v61, %v4444_v48  ;;  %v4486_v20 = vsel %vm1710_vm11, %v4468_v46, %v4446_v26 }
 0x368   : >> { %v9667_v33 = vcombine.low %v4484_v39, %v4486_v20 }
 0x36a   : >> { %v3059_v6 = vpop.permute.xlu0 %3058  ;;  %v3061_v8 = vpop.permute.xlu1 %3060  ;;  %10453 = vmatprep.mubr.msk.bf16.mxu0 %vm1989_vm12, %v9667_v33  ;;  %v13579_v33 = vld [vmem:[%s15225_s15] sm:$0xff] (%p1493_p12) }
 0x36b   : >> { %v3099_v23 = vsel %vm1710_vm11, %v3082_v47, %v3059_v6  ;;  %v3101_v41 = vsel %vm1710_vm11, %v3085_v38, %v3061_v8  ;;  %v11561_v47 = vmov (%p1493_p12), 0.0   ;;  %v13588_v38 = vmov (%p1493_p12), 0.0  }
 0x36c   : >> { %v9465_v63 = vcombine.low %v3099_v23, %v3101_v41  ;;  %10457 = vmatprep.subr.mxu0 (%p1493_p12), %v11561_v47 }
 0x36d   : > { %10458 = vmatpush3.msra.mxu0 (%p1493_p12), %v13579_v33 }
 0x36e   : >> { %v4448_v17 = vpop.permute.xlu0 %4447  ;;  %v4450_v27 = vpop.permute.xlu1 %4449  ;;  %10406 = vmatmul.mubr.msk.bf16.vlgmr.msra.gmra.mrb[4].mxu1 %vm1989_vm12, %v9465_v63 }
 0x36f   : >> { %v4488_v30 = vsel %vm1710_vm11, %v4471_v57, %v4448_v17  ;;  %v4490_v49 = vsel %vm1710_vm11, %v4474_v50, %v4450_v27 }
 0x370   : >> { %v9668_v58 = vcombine.low %v4488_v30, %v4490_v49 }
 0x372   : >> { %10454 = vmatmul.mubr.msk.bf16.gmra.mrb[4].mxu0 %vm1989_vm12, %v9668_v58 }
 0x373   : > { %10459 = vmatprep.mubr.msk.f32.mxu0 (%p1493_p12), %vm11562_vm13, %v11561_v47 }
 0x3f5   : >> { %v10391_v0 = vpop.f32.mrb[0].mxu1 }
 0x3f6   : >> { %v2836_v11 = vpop.f32.mrb[1].mxu1 }
 0x3f7   : >> { %v10392_v34 = vpop.f32.mrb[2].mxu1 }
 0x3f8   : >> { %v2839_v2 = vpop.f32.mrb[3].mxu1 }
 0x425   : >> { %v10451_v59 = vpop.f32.mrb[0].mxu0 }
 0x426   : >> { %v10601_v32 = vadd.f32 %v10451_v59, %v10391_v0  ;;  %v4572_v12 = vpop.f32.mrb[1].mxu0 }
 0x427   : >> { %v10602_v5 = vadd.f32 %v4572_v12, %v2836_v11  ;;  %v10452_v21 = vpop.f32.mrb[2].mxu0 }
 0x428   : >> { %4615 = vst.msk [vmem:[%s13544_s2 + $0x10] sm:$0xff] %vm1323_vm8, %v10601_v32  ;;  %v10603_v62 = vadd.f32 %v10452_v21, %v10392_v34  ;;  %v4575_v52 = vpop.f32.mrb[3].mxu0  ;;  %v4624_v35 = vsel %vm1323_vm8, %v10601_v32, 0.0 }
 0x429   : >> { %4613 = vst.msk [vmem:[%s13544_s2] sm:$0xff] %vm1323_vm8, %v10602_v5  ;;  %v10604_v10 = vadd.f32 %v4575_v52, %v2839_v2  ;;  %v4621_v56 = vsel %vm1323_vm8, %v10602_v5, 0.0 }
 0x42a   : >> { %4616 = vst.msk [vmem:[%s13544_s2 + $0x18] sm:$0xff] %vm1323_vm8, %v10603_v62  ;;  %v4626_v55 = vsel %vm1323_vm8, %v10603_v62, 0.0 }
 0x42b   : >> { %4614 = vst.msk [vmem:[%s13544_s2 + $0x8] sm:$0xff] %vm1323_vm8, %v10604_v10  ;;  %v4622_v45 = vsel %vm1323_vm8, %v10604_v10, 0.0 }
 0x42c   : >> { %v4623_v1 = vadd.f32 %v4622_v45, %v4621_v56 }
 0x42e   : >> { %v4625_v29 = vadd.f32 %v4624_v35, %v4623_v1 }
 0x430   : >> { %v4627_v51 = vadd.f32 %v4626_v55, %v4625_v29 }
 0x441   : >> { %v10407_v13 = vpop.f32.mrb[4].mxu1 }
 0x442   : >> { %v3199_v9 = vpop.f32.mrb[5].mxu1 }
 0x443   : >> { %v10408_v31 = vpop.f32.mrb[6].mxu1 }
 0x444   : >> { %v3202_v19 = vpop.f32.mrb[7].mxu1 }
 0x445   : >> { %v10455_v60 = vpop.f32.mrb[4].mxu0 }
 0x446   : >> { %v10605_v54 = vadd.f32 %v10455_v60, %v10407_v13  ;;  %v4588_v42 = vpop.f32.mrb[5].mxu0 }
 0x447   : >> { %v10606_v24 = vadd.f32 %v4588_v42, %v3199_v9  ;;  %v10456_v4 = vpop.f32.mrb[6].mxu0 }
 0x448   : >> { %4619 = vst.msk [vmem:[%s13544_s2 + $0x30] sm:$0xff] %vm1323_vm8, %v10605_v54  ;;  %v10607_v22 = vadd.f32 %v10456_v4, %v10408_v31  ;;  %v4591_v25 = vpop.f32.mrb[7].mxu0  ;;  %v4632_v37 = vsel %vm1323_vm8, %v10605_v54, 0.0 }
 0x449   : >> { %4617 = vst.msk [vmem:[%s13544_s2 + $0x20] sm:$0xff] %vm1323_vm8, %v10606_v24  ;;  %v4628_v14 = vsel %vm1323_vm8, %v10606_v24, 0.0  ;;  %v10608_v40 = vadd.f32 %v4591_v25, %v3202_v19 }
 0x44a   : >> { %v4629_v28 = vadd.f32 %v4628_v14, %v4627_v51  ;;  %4620 = vst.msk [vmem:[%s13544_s2 + $0x38] sm:$0xff] %vm1323_vm8, %v10607_v22  ;;  %v4634_v44 = vsel %vm1323_vm8, %v10607_v22, 0.0 }
 0x44b   : >> { %4618 = vst.msk [vmem:[%s13544_s2 + $0x28] sm:$0xff] %vm1323_vm8, %v10608_v40  ;;  %v4630_v18 = vsel %vm1323_vm8, %v10608_v40, 0.0 }
 0x44c   : >> { %v4631_v43 = vadd.f32 %v4630_v18, %v4629_v28 }
 0x44e   : >> { %v4633_v7 = vadd.f32 %v4632_v37, %v4631_v43 }
 0x450   : >> { %v4635_v36 = vadd.f32 %v4634_v44, %v4633_v7 }
 0x452   : >> { %v4636_v53 = vrot.slane %v4635_v36, 4 }
 0x454   : >> { %v4637_v61 = vadd.f32 %v4636_v53, %v4635_v36 }
 0x456   : >> { %v4638_v48 = vrot.slane %v4637_v61, 2 }
 0x458   : >> { %v4639_v46 = vadd.f32 %v4638_v48, %v4637_v61 }
 0x45a   : >> { %v4640_v26 = vrot.slane %v4639_v46, 1  ;;  %1495 = sbr.rel (!%p1493_p12) target bundleno = 467 (0x1d3), region = 219 }
 0x45c   : >> { %v4641_v39 = vadd.f32 %v4640_v26, %v4639_v46 }
 0x45e   : >> { %v4642_v20 = vadd.f32 %v11512_v16, %v4641_v39  }
 0x460   : >> { %v15245_v16 = vmov %v4642_v20  ;;  %10460 = vmatmul.mubr.msk.f32.vlgmr.msra.gmra.mrb[0].mxu0 (%p1493_p12), %vm1323_vm8, %v4642_v20 }
 0x533   : > { %v13586_v16 = vpop.f32.mrb[0].mxu0 }
 0x534   : > { %v10461_v6 = vpop.f32.mrb[1].mxu0 }
 0x535 LB: >> { %v4735_v8 = vlaneseq  ;;  %s9677_s22 = sshll.u32 %s11524_s1, 6  ;;  %s4723_s1 = sadd.s32 1, %s11524_s1   ;;  %s11524_s1 = sphi %s13590_s1, %s4723_s1   ;;  %v11520_v38 = vphi %v13588_v38, %v15246_v38  }
 0x536   : >> { %s4726_s29 = scalar_lea.vmem [#allocation3], %s9677_s22  ;;  %p4720_p13 = scmp.ge.s32.totalorder %s4723_s1, 8  }
 0x537   : >> { %v4736_v23 = vshrl.u32 %v4735_v8, 7  ;;  %v4727_v41 = vld [vmem:[%s4726_s29] sm:$0xff]  ;;  %v4728_v57 = vld [vmem:[%s4726_s29 + $0x8] sm:$0xff]  ;;  %v4729_v17 = vld [vmem:[%s4726_s29 + $0x10] sm:$0xff]  ;;  %10462 = vmatprep.subr.mxu1 (%p4720_p13), %v11561_v47  ;;  %10464 = vmatprep.mubr.msk.f32.mxu1 (%p4720_p13), %vm11562_vm13, %v11561_v47  ;;  %s15247_s4 = sld [smem:[#allocation13_spill]] (%p4720_p13)  ;;  %s13635_s19 = smov (%p4720_p13), 0  }
 0x538   : >> { %v4730_v50 = vld [vmem:[%s4726_s29 + $0x18] sm:$0xff]  ;;  %v4731_v27 = vld [vmem:[%s4726_s29 + $0x20] sm:$0xff]  ;;  %v4732_v30 = vld [vmem:[%s4726_s29 + $0x28] sm:$0xff]  ;;  %10463 = vmatpush3.msra.mxu1 (%p4720_p13), %v13579_v33 }
 0x539   : >> { %v13597_v63 = vsub.s32 0, %v4736_v23  ;;  %v4733_v58 = vld [vmem:[%s4726_s29 + $0x30] sm:$0xff]  ;;  %v4734_v52 = vld [vmem:[%s4726_s29 + $0x38] sm:$0xff]  ;;  %v13627_v20 = vld [vmem:[%s15215_s5] sm:$0x1] (%p4720_p13) }
 0x53b   : >> { %v4738_v49 = vrot.slane %v13586_v16, %v13597_v63 }
 0x53d   : >> { %v4739_v0 = vsub.f32 %v4727_v41, %v4738_v49  ;;  %v4740_v11 = vsub.f32 %v4728_v57, %v4738_v49  ;;  %v4741_v34 = vsub.f32 %v4729_v17, %v4738_v49  ;;  %v4742_v2 = vsub.f32 %v4730_v50, %v4738_v49  ;;  %v4777_v46 = vld [vmem:[%s15247_s4] sm:$0x1] (%p4720_p13) }
 0x53e   : >> { %v4743_v59 = vsub.f32 %v4731_v27, %v4738_v49  ;;  %v4744_v32 = vsub.f32 %v4732_v30, %v4738_v49  ;;  %v4745_v10 = vsub.f32 %v4733_v58, %v4738_v49  ;;  %v4746_v55 = vsub.f32 %v4734_v52, %v4738_v49 }
 0x53f   : >> { %v4747_v12 = vmul.f32 %v4739_v0, %v4739_v0  ;;  %v4748_v5 = vmul.f32 %v4740_v11, %v4740_v11  ;;  %v4749_v21 = vmul.f32 %v4741_v34, %v4741_v34  ;;  %v4750_v62 = vmul.f32 %v4742_v2, %v4742_v2 }
 0x540   : >> { %v4751_v56 = vmul.f32 %v4743_v59, %v4743_v59  ;;  %v4752_v51 = vmul.f32 %v4744_v32, %v4744_v32  ;;  %v4753_v31 = vmul.f32 %v4745_v10, %v4745_v10  ;;  %v4754_v54 = vmul.f32 %v4746_v55, %v4746_v55 }
 0x541   : >> { %v4755_v45 = vsel %vm1323_vm8, %v4747_v12, 0.0  ;;  %v4756_v1 = vsel %vm1323_vm8, %v4748_v5, 0.0  ;;  %v4758_v35 = vsel %vm1323_vm8, %v4749_v21, 0.0  ;;  %v4760_v13 = vsel %vm1323_vm8, %v4750_v62, 0.0 }
 0x542   : >> { %v4757_v29 = vadd.f32 %v4756_v1, %v4755_v45  ;;  %v4762_v19 = vsel %vm1323_vm8, %v4751_v56, 0.0  ;;  %v4764_v42 = vsel %vm1323_vm8, %v4752_v51, 0.0  ;;  %v4766_v4 = vsel %vm1323_vm8, %v4753_v31, 0.0 }
 0x543   : >> { %v4768_v25 = vsel %vm1323_vm8, %v4754_v54, 0.0 }
 0x544   : >> { %v4759_v9 = vadd.f32 %v4758_v35, %v4757_v29 }
 0x546   : >> { %v4761_v60 = vadd.f32 %v4760_v13, %v4759_v9 }
 0x548   : >> { %v4763_v24 = vadd.f32 %v4762_v19, %v4761_v60 }
 0x54a   : >> { %v4765_v22 = vadd.f32 %v4764_v42, %v4763_v24 }
 0x54c   : >> { %v4767_v14 = vadd.f32 %v4766_v4, %v4765_v22 }
 0x54e   : >> { %v4769_v40 = vadd.f32 %v4768_v25, %v4767_v14 }
 0x550   : >> { %v4770_v28 = vrot.slane %v4769_v40, 4 }
 0x552   : >> { %v4771_v18 = vadd.f32 %v4770_v28, %v4769_v40 }
 0x554   : >> { %v4772_v43 = vrot.slane %v4771_v18, 2 }
 0x556   : >> { %v4773_v37 = vadd.f32 %v4772_v43, %v4771_v18 }
 0x558   : >> { %v4774_v7 = vrot.slane %v4773_v37, 1  ;;  %4722 = sbr.rel (!%p4720_p13) target bundleno = 1333 (0x535), region = 230 }
 0x55a   : >> { %v4775_v44 = vadd.f32 %v4774_v7, %v4773_v37 }
 0x55c   : >> { %v4776_v36 = vadd.f32 %v11520_v38, %v4775_v44  }
 0x55e   : >> { %v15246_v38 = vmov %v4776_v36  ;;  %10465 = vmatmul.mubr.msk.f32.vlgmr.msra.gmra.mrb[0].mxu1 (%p4720_p13), %vm1323_vm8, %v4776_v36 }
 0x631   : > { %v4847_v53 = vpop.f32.mrb[0].mxu1 }
 0x632   : > { %v4848_v61 = vadd.f32 1e-05, %v4847_v53  ;;  %v10466_v48 = vpop.f32.mrb[1].mxu1 }
 0x634   : > { %11113 = vrsqrt.f32 %v4848_v61 }
 0x63e   : > { %v11114_v26 = vpop.eup %11113 }
 0x63f   : > { %v13622_v39 = vmul.f32 %v11114_v26, %v4777_v46 }
 0x641   : > { %v13631_v33 = vmul.f32 %v13622_v39, %v13586_v16 }
 0x643   : > { %v4855_v6 = vsub.f32 %v13627_v20, %v13631_v33 }
 0x644 LB: >> { %v4876_v38 = vrot.slane %v13622_v39, %v13597_v63  ;;  %s9679_s1 = sshll.u32 %s11528_s19, 6  ;;  %s9696_s29 = smul.u32 80, %s11528_s19  ;;  %s11528_s19 = sphi %s13635_s19, %s4861_s19  }
 0x645   : >> { %v4890_v16 = vrot.slane %v4855_v6, %v13597_v63  ;;  %s4863_s22 = scalar_lea.vmem [#allocation3], %s9679_s1  ;;  %s4861_s19 = sadd.s32 1, %s11528_s19  }
 0x646   : >> { %v4864_v8 = vld [vmem:[%s4863_s22] sm:$0xff]  ;;  %v4865_v23 = vld [vmem:[%s4863_s22 + $0x8] sm:$0xff]  ;;  %v4866_v41 = vld [vmem:[%s4863_s22 + $0x10] sm:$0xff]  ;;  %s13666_s30 = scalar_lea.vmem [#allocation2], %s9696_s29  ;;  %p4858_p0 = scmp.ge.s32.totalorder %s4861_s19, 8  }
 0x647   : >> { %v4878_v57 = vmul.f32 %v4876_v38, %v4864_v8  ;;  %v4879_v17 = vmul.f32 %v4876_v38, %v4865_v23  ;;  %v4880_v50 = vmul.f32 %v4876_v38, %v4866_v41  ;;  %v4867_v58 = vld [vmem:[%s4863_s22 + $0x18] sm:$0xff]  ;;  %v4868_v11 = vld [vmem:[%s4863_s22 + $0x20] sm:$0xff]  ;;  %v4869_v59 = vld [vmem:[%s4863_s22 + $0x28] sm:$0xff]  ;;  %s13749_s27 = smov (%p4858_p0), 0  }
 0x648   : >> { %v4881_v0 = vmul.f32 %v4876_v38, %v4867_v58  ;;  %v4870_v32 = vld [vmem:[%s4863_s22 + $0x30] sm:$0xff]  ;;  %v4882_v21 = vmul.f32 %v4876_v38, %v4868_v11  ;;  %v4883_v10 = vmul.f32 %v4876_v38, %v4869_v59  ;;  %v4871_v51 = vld [vmem:[%s4863_s22 + $0x38] sm:$0xff] }
 0x649   : >> { %v4892_v27 = vadd.f32 %v4890_v16, %v4878_v57  ;;  %v4893_v30 = vadd.f32 %v4890_v16, %v4879_v17  ;;  %v4894_v49 = vadd.f32 %v4890_v16, %v4880_v50  ;;  %v4884_v56 = vmul.f32 %v4876_v38, %v4870_v32 }
 0x64a   : >> { %v4895_v5 = vadd.f32 %v4890_v16, %v4881_v0  ;;  %v13647_v35 = vadd.f32 %v4890_v16, %v4882_v21  ;;  %v13649_v29 = vadd.f32 %v4890_v16, %v4883_v10  ;;  %v4885_v60 = vmul.f32 %v4876_v38, %v4871_v51  ;;  %v9705_v51 = vld [vmem:[%s13666_s30 + $0x68] sm:$0xf] }
 0x64b   : >> { %v4908_v34 = vmin.f32 %v4892_v27, 0.0  ;;  %v4909_v2 = vmin.f32 %v4893_v30, 0.0  ;;  %v4910_v12 = vmin.f32 %v4894_v49, 0.0  ;;  %v13651_v55 = vadd.f32 %v4890_v16, %v4884_v56 }
 0x64c   : >> { %v4911_v1 = vmin.f32 %v4895_v5, 0.0  ;;  %v4912_v9 = vmin.f32 %v13647_v35, 0.0  ;;  %v4913_v31 = vmin.f32 %v13649_v29, 0.0  ;;  %v13656_v24 = vadd.f32 %v4890_v16, %v4885_v60 }
 0x64d   : >> { %v4916_v62 = vmul.f32 1.442695, %v4908_v34  ;;  %v4918_v52 = vmul.f32 1.442695, %v4909_v2  ;;  %v4920_v45 = vmul.f32 1.442695, %v4910_v12 }
 0x64e   : >> { %v4922_v13 = vmul.f32 1.442695, %v4911_v1  ;;  %v4924_v19 = vmul.f32 1.442695, %v4912_v9  ;;  %v4926_v54 = vmul.f32 1.442695, %v4913_v31 }
 0x64f   : >> { %11115 = vpow2.f32 %v4916_v62  ;;  %v4914_v42 = vmin.f32 %v13651_v55, 0.0  ;;  %v4915_v4 = vmin.f32 %v13656_v24, 0.0  ;;  %vm4900_vm14 = vcmp.gt.f32.partialorder %v4892_v27, 0.0  ;;  %v9699_v34 = vld [vmem:[%s13666_s30 + $0x5c] sm:$0x1] }
 0x650   : >> { %11117 = vpow2.f32 %v4918_v52  ;;  %vm4901_vm15 = vcmp.gt.f32.partialorder %v4893_v30, 0.0  ;;  %vm4902_vm0 = vcmp.gt.f32.partialorder %v4894_v49, 0.0  ;;  %vm4903_vm1 = vcmp.gt.f32.partialorder %v4895_v5, 0.0  ;;  %v9701_v62 = vld [vmem:[%s13666_s30 + $0x60] sm:$0xf] }
 0x651   : >> { %11119 = vpow2.f32 %v4920_v45  ;;  %v4928_v22 = vmul.f32 1.442695, %v4914_v42  ;;  %v4930_v25 = vmul.f32 1.442695, %v4915_v4  ;;  %vm4904_vm2 = vcmp.gt.f32.partialorder %v13647_v35, 0.0 }
 0x652   : >> { %11121 = vpow2.f32 %v4922_v13  ;;  %vm4905_vm4 = vcmp.gt.f32.partialorder %v13649_v29, 0.0  ;;  %vm4906_vm5 = vcmp.gt.f32.partialorder %v13651_v55, 0.0  ;;  %vm4907_vm6 = vcmp.gt.f32.partialorder %v13656_v24, 0.0  ;;  %v9703_v52 = vld [vmem:[%s13666_s30 + $0x64] sm:$0x1] }
 0x653   : >> { %11123 = vpow2.f32 %v4924_v19  ;;  %v9707_v13 = vld [vmem:[%s13666_s30 + $0x6c] sm:$0x1]  ;;  %v9709_v4 = vld [vmem:[%s13666_s30 + $0x70] sm:$0xf] }
 0x654   : >> { %11125 = vpow2.f32 %v4926_v54 }
 0x655   : >> { %11127 = vpow2.f32 %v4928_v22  ;;  %v9711_v22 = vld [vmem:[%s13666_s30 + $0x74] sm:$0x1] }
 0x656   : >> { %11129 = vpow2.f32 %v4930_v25 }
 0x659   : >> { %v11116_v14 = vpop.eup %11115 }
 0x65a   : >> { %v11118_v40 = vpop.eup %11117  ;;  %v9680_v28 = vadd.f32 -1.0, %v11116_v14 }
 0x65b   : >> { %v11120_v18 = vpop.eup %11119  ;;  %v9681_v43 = vadd.f32 -1.0, %v11118_v40 }
 0x65c   : >> { %v11122_v37 = vpop.eup %11121  ;;  %v4940_v7 = vsel %vm4900_vm14, %v4892_v27, %v9680_v28  ;;  %v9682_v44 = vadd.f32 -1.0, %v11120_v18 }
 0x65d   : >> { %v10204_v36 = vpack.c.bf16 %v4940_v7, %v4940_v7  ;;  %v4941_v53 = vsel %vm4901_vm15, %v4893_v30, %v9681_v43  ;;  %v9683_v61 = vadd.f32 -1.0, %v11122_v37  ;;  %v11124_v48 = vpop.eup %11123 }
 0x65e   : >> { %v10205_v46 = vpack.c.bf16 %v4941_v53, %v4941_v53  ;;  %v4942_v26 = vsel %vm4902_vm0, %v4894_v49, %v9682_v44  ;;  %v11126_v38 = vpop.eup %11125  ;;  %v9684_v27 = vadd.f32 -1.0, %v11124_v48  ;;  %v9697_v49 = vld [vmem:[%s13666_s30 + $0x58] sm:$0xf] }
 0x65f   : >> { %v4974_v16 = vshrl.u32 %v10204_v36, 16  ;;  %v4977_v8 = vshll.u32 %v10204_v36, 16  ;;  %v10206_v23 = vpack.c.bf16 %v4942_v26, %v4942_v26  ;;  %v4943_v41 = vsel %vm4903_vm1, %v4895_v5, %v9683_v61  ;;  %v11128_v31 = vpop.eup %11127  ;;  %v9713_v26 = vld [vmem:[%s13666_s30 + $0x78] sm:$0xf] }
 0x660   : >> { %v4982_v57 = vshrl.u32 %v10205_v46, 16  ;;  %v4985_v17 = vshll.u32 %v10205_v46, 16  ;;  %v10207_v50 = vpack.c.bf16 %v4943_v41, %v4943_v41  ;;  %v9685_v11 = vadd.f32 -1.0, %v11126_v38  ;;  %v11130_v25 = vpop.eup %11129  ;;  %v9715_v38 = vld [vmem:[%s13666_s30 + $0x7c] sm:$0x1] }
 0x661   : >> { %v4976_v30 = vrot.slane %v4974_v16, 7  ;;  %v4990_v58 = vshrl.u32 %v10206_v23, 16  ;;  %v4993_v0 = vshll.u32 %v10206_v23, 16  ;;  %v4944_v12 = vsel %vm4904_vm2, %v13647_v35, %v9684_v27 }
 0x662   : >> { %v4984_v2 = vrot.slane %v4982_v57, 7  ;;  %v4998_v59 = vshrl.u32 %v10207_v50, 16  ;;  %v5001_v32 = vshll.u32 %v10207_v50, 16  ;;  %v10208_v56 = vpack.c.bf16 %v4944_v12, %v4944_v12 }
 0x663   : >> { %v4979_v5 = vor.u32 %v4977_v8, %v4976_v30  ;;  %v4980_v21 = vrot.slane %v4976_v30, 4  ;;  %v4992_v10 = vrot.slane %v4990_v58, 7  ;;  %v4945_v35 = vsel %vm4905_vm4, %v13649_v29, %v9685_v11 }
 0x664   : >> { %v4987_v45 = vor.u32 %v4985_v17, %v4984_v2  ;;  %v4988_v1 = vrot.slane %v4984_v2, 4  ;;  %v5000_v9 = vrot.slane %v4998_v59, 7  ;;  %v5006_v37 = vshrl.u32 %v10208_v56, 16 }
 0x665   : >> { %v5060_v19 = vsel %vm12340_vm9, %v4979_v5, %v9697_v49  ;;  %v5063_v60 = vsel %vm11872_vm3, %v4980_v21, %v9699_v34  ;;  %v4995_v54 = vor.u32 %v4993_v0, %v4992_v10  ;;  %v4996_v42 = vrot.slane %v4992_v10, 4  ;;  %v9717_v0 = vld [vmem:[%s13666_s30 + $0x80] sm:$0xf] }
 0x666   : >> { %9698 = vst [vmem:[%s13666_s30 + $0x58] sm:$0xf] %v5060_v19  ;;  %9700 = vst [vmem:[%s13666_s30 + $0x5c] sm:$0x1] %v5063_v60  ;;  %v5066_v29 = vsel %vm12340_vm9, %v4987_v45, %v9701_v62  ;;  %v5069_v14 = vsel %vm11872_vm3, %v4988_v1, %v9703_v52  ;;  %v5003_v40 = vor.u32 %v5001_v32, %v5000_v9  ;;  %v5004_v28 = vrot.slane %v5000_v9, 4 }
 0x667   : >> { %9702 = vst [vmem:[%s13666_s30 + $0x60] sm:$0xf] %v5066_v29  ;;  %9704 = vst [vmem:[%s13666_s30 + $0x64] sm:$0x1] %v5069_v14  ;;  %v5072_v18 = vsel %vm12340_vm9, %v4995_v54, %v9705_v51  ;;  %v5075_v43 = vsel %vm11872_vm3, %v4996_v42, %v9707_v13  ;;  %v5009_v7 = vshll.u32 %v10208_v56, 16  ;;  %v10209_v53 = vpack.c.bf16 %v4945_v35, %v4945_v35 }
 0x668   : >> { %9706 = vst [vmem:[%s13666_s30 + $0x68] sm:$0xf] %v5072_v18  ;;  %9708 = vst [vmem:[%s13666_s30 + $0x6c] sm:$0x1] %v5075_v43  ;;  %v5078_v44 = vsel %vm12340_vm9, %v5003_v40, %v9709_v4  ;;  %v5081_v36 = vsel %vm11872_vm3, %v5004_v28, %v9711_v22  ;;  %v9686_v61 = vadd.f32 -1.0, %v11128_v31  ;;  %v5008_v48 = vrot.slane %v5006_v37, 7 }
 0x669   : >> { %9710 = vst [vmem:[%s13666_s30 + $0x70] sm:$0xf] %v5078_v44  ;;  %9712 = vst [vmem:[%s13666_s30 + $0x74] sm:$0x1] %v5081_v36  ;;  %v9687_v46 = vadd.f32 -1.0, %v11130_v25  ;;  %v5014_v16 = vshrl.u32 %v10209_v53, 16 }
 0x66a   : >> { %v5017_v8 = vshll.u32 %v10209_v53, 16  ;;  %v4946_v23 = vsel %vm4906_vm5, %v13651_v55, %v9686_v61  ;;  %v5011_v41 = vor.u32 %v5009_v7, %v5008_v48  ;;  %v5012_v57 = vrot.slane %v5008_v48, 4  ;;  %v9719_v55 = vld [vmem:[%s13666_s30 + $0x84] sm:$0x1]  ;;  %v9721_v62 = vld [vmem:[%s13666_s30 + $0x88] sm:$0xf] }
 0x66b   : >> { %v10210_v17 = vpack.c.bf16 %v4946_v23, %v4946_v23  ;;  %v4947_v50 = vsel %vm4907_vm6, %v13656_v24, %v9687_v46  ;;  %v5016_v27 = vrot.slane %v5014_v16, 7  ;;  %v9723_v52 = vld [vmem:[%s13666_s30 + $0x8c] sm:$0x1]  ;;  %v9725_v1 = vld [vmem:[%s13666_s30 + $0x90] sm:$0xf]  ;;  %v13747_v54 = vmov (%p4858_p0), 0.0  }
 0x66c   : >> { %v10211_v30 = vpack.c.bf16 %v4947_v50, %v4947_v50  ;;  %v5084_v49 = vsel %vm12340_vm9, %v5011_v41, %v9713_v26  ;;  %v5087_v58 = vsel %vm11872_vm3, %v5012_v57, %v9715_v38  ;;  %v9727_v51 = vld [vmem:[%s13666_s30 + $0x94] sm:$0x1] }
 0x66d   : >> { %v5022_v11 = vshrl.u32 %v10210_v17, 16  ;;  %v5025_v34 = vshll.u32 %v10210_v17, 16  ;;  %9714 = vst [vmem:[%s13666_s30 + $0x78] sm:$0xf] %v5084_v49  ;;  %9716 = vst [vmem:[%s13666_s30 + $0x7c] sm:$0x1] %v5087_v58  ;;  %v5019_v24 = vor.u32 %v5017_v8, %v5016_v27 }
 0x66e   : >> { %v5020_v2 = vrot.slane %v5016_v27, 4  ;;  %v5030_v59 = vshrl.u32 %v10211_v30, 16  ;;  %v5033_v32 = vshll.u32 %v10211_v30, 16 }
 0x66f   : >> { %v5024_v12 = vrot.slane %v5022_v11, 7  ;;  %v5090_v5 = vsel %vm12340_vm9, %v5019_v24, %v9717_v0  ;;  %4860 = sbr.rel (!%p4858_p0) target bundleno = 1604 (0x644), region = 241 }
 0x670   : >> { %v5093_v21 = vsel %vm11872_vm3, %v5020_v2, %v9719_v55  ;;  %v5032_v10 = vrot.slane %v5030_v59, 7  ;;  %9718 = vst [vmem:[%s13666_s30 + $0x80] sm:$0xf] %v5090_v5 }
 0x671   : >> { %9720 = vst [vmem:[%s13666_s30 + $0x84] sm:$0x1] %v5093_v21  ;;  %v5027_v56 = vor.u32 %v5025_v34, %v5024_v12  ;;  %v5028_v45 = vrot.slane %v5024_v12, 4 }
 0x672   : >> { %v5035_v13 = vor.u32 %v5033_v32, %v5032_v10  ;;  %v5036_v9 = vrot.slane %v5032_v10, 4 }
 0x673   : >> { %v5096_v35 = vsel %vm12340_vm9, %v5027_v56, %v9721_v62  ;;  %v5099_v31 = vsel %vm11872_vm3, %v5028_v45, %v9723_v52 }
 0x674   : >> { %9722 = vst [vmem:[%s13666_s30 + $0x88] sm:$0xf] %v5096_v35  ;;  %9724 = vst [vmem:[%s13666_s30 + $0x8c] sm:$0x1] %v5099_v31  ;;  %v5102_v19 = vsel %vm12340_vm9, %v5035_v13, %v9725_v1  ;;  %v5105_v60 = vsel %vm11872_vm3, %v5036_v9, %v9727_v51 }
 0x675   : >> { %9726 = vst [vmem:[%s13666_s30 + $0x90] sm:$0xf] %v5102_v19  ;;  %9728 = vst [vmem:[%s13666_s30 + $0x94] sm:$0x1] %v5105_v60 }
 0x676 LB: >> { %s10212_s2 = smul.u32 80, %s11536_s27  ;;  %s11563_s19 = smov 16   ;;  %v11199_v1 = vld [vmem:[%s15216_s6 + $0xc] sm:$0xff]   ;;  %s11536_s27 = sphi %s13749_s27, %s5112_s27   ;;  %v11532_v54 = vphi %v13747_v54, %v15248_v54  }
 0x677   : >> { %s11564_s1 = smov 8   ;;  %10467 = vmatprep.subr.bf16.mxu1 %v11199_v1  ;;  %s10162_s29 = sshll.u32 %s11536_s27, 6 }
 0x678   : >> { %s13758_s21 = scalar_lea.vmem [#allocation2], %s10212_s2  ;;  %10468 = vmatpush3.bf16.msra.mxu1 %v11199_v1  ;;  %s14887_s30 = scalar_lea.vmem [#allocation3], %s10162_s29 }
 0x679   : >> { %s5112_s27 = sadd.s32 1, %s11536_s27  }
 0x67a   : >> { %p5109_p1 = scmp.ge.s32.totalorder %s5112_s27, 8  }
 0x67b   : > { %s14931_s27 = smov (%p5109_p1), 0  }
 0x67c   : >> { %v9756_v3 = vld [vmem:[%s13758_s21 + $0x14] sm:$0x1]  ;;  %v9764_v15 = vld [vmem:[%s13758_s21 + $0x10] sm:$0xe]  ;;  %v9755_v6 = vld [vmem:[%s13758_s21 + $0xc] sm:$0x1] }
 0x67d   : >> { %v13763_v39 = vld [vmem:[%s13758_s21 + $0x10] sm:$0xf]  ;;  %v9780_v20 = vcombine.low %v9764_v15, %v9756_v3  ;;  %v9763_v42 = vld [vmem:[%s13758_s21 + $0x8] sm:$0xe]  ;;  %v13773_v29 = vld [vmem:[%s13758_s21 + $0x58] sm:$0xf] }
 0x67e   : >> { %v9772_v33 = vcombine.low %v13763_v39, %v9756_v3  ;;  %v13769_v4 = vld [vmem:[%s13758_s21 + $0x8] sm:$0xf]  ;;  %v9779_v22 = vcombine.low %v9763_v42, %v9755_v6  ;;  %v13776_v14 = vld [vmem:[%s13758_s21 + $0x5c] sm:$0x1]  ;;  %v13779_v40 = vld [vmem:[%s13758_s21 + $0x60] sm:$0xf] }
 0x67f   : >> { %v9771_v25 = vcombine.low %v13769_v4, %v9755_v6  ;;  %v5509_v28 = vrot.slane %v9780_v20, 1  ;;  %v9933_v43 = vcombine.low %v13773_v29, %v13776_v14  ;;  %v13784_v37 = vld [vmem:[%s13758_s21 + $0x64] sm:$0x1]  ;;  %v13789_v61 = vld [vmem:[%s13758_s21 + $0x20] sm:$0xf]  ;;  %v11203_v20 = vld [vmem:[%s15216_s6 + $0x30] sm:$0xff]  }
 0x680   : >> { %v5422_v18 = vshll.u32 %v9772_v33, 16  ;;  %v5508_v7 = vrot.slane %v9779_v22, 1  ;;  %v9934_v53 = vcombine.low %v13779_v40, %v13784_v37  ;;  %v5420_v26 = vshrl.u32 %v9772_v33, 16  ;;  %v13793_v16 = vld [vmem:[%s13758_s21 + $0x24] sm:$0x1]  ;;  %10515 = vmatprep.subr.bf16.mxu0 %v11203_v20 }
 0x681   : >> { %v5415_v44 = vshll.u32 %v9771_v25, 16  ;;  %v5413_v36 = vshrl.u32 %v9771_v25, 16  ;;  %5518 = vrot.lane.b32.xlu1 %v5509_v28, %s11563_s19  ;;  %v6558_v48 = vshrl.u32 %v9933_v43, 16  ;;  %v6560_v46 = vshll.u32 %v9933_v43, 16  ;;  %v13799_v17 = vld [vmem:[%s13758_s21 + $0x18] sm:$0xf]  ;;  %10516 = vmatpush3.bf16.msra.mxu0 %v11203_v20 }
 0x682   : >> { %v5424_v38 = vrot.slane %v5422_v18, 1  ;;  %5516 = vrot.lane.b32.xlu0 %v5508_v7, %s11563_s19  ;;  %v6565_v23 = vshrl.u32 %v9934_v53, 16  ;;  %v6567_v41 = vshll.u32 %v9934_v53, 16  ;;  %v9774_v57 = vcombine.low %v13789_v61, %v13793_v16  ;;  %v13802_v27 = vld [vmem:[%s13758_s21 + $0x1c] sm:$0x1] }
 0x683   : >> { %v5417_v8 = vrot.slane %v5415_v44, 1  ;;  %v6562_v50 = vrot.slane %v6560_v46, 1  ;;  %v13805_v30 = vld [vmem:[%s13758_s21 + $0x70] sm:$0xf]  ;;  %v13808_v55 = vld [vmem:[%s13758_s21 + $0x74] sm:$0x1]  ;;  %v9773_v34 = vcombine.low %v13799_v17, %v13802_v27 }
 0x684   : >> { %v6569_v58 = vrot.slane %v6567_v41, 1  ;;  %v5436_v0 = vshll.u32 %v9774_v57, 16  ;;  %v9936_v24 = vcombine.low %v13805_v30, %v13808_v55  ;;  %v13815_v2 = vld [vmem:[%s13758_s21 + $0x68] sm:$0xf]  ;;  %v13818_v59 = vld [vmem:[%s13758_s21 + $0x6c] sm:$0x1]  ;;  %v5425_v12 = vor.u32 %v5424_v38, %v5420_v26 }
 0x685   : >> { %v5418_v49 = vor.u32 %v5417_v8, %v5413_v36  ;;  %v6563_v11 = vor.u32 %v6562_v50, %v6558_v48  ;;  %v5434_v5 = vshrl.u32 %v9774_v57, 16  ;;  %v9935_v21 = vcombine.low %v13815_v2, %v13818_v59  ;;  %v9926_v3 = vld [vmem:[%s13758_s21 + $0x60] sm:$0xe]  ;;  %v9925_v15 = vld [vmem:[%s13758_s21 + $0x58] sm:$0xe] }
 0x686   : >> { %v6570_v32 = vor.u32 %v6569_v58, %v6565_v23  ;;  %v5438_v62 = vrot.slane %v5436_v0, 1  ;;  %v5427_v52 = vshrl.u32 %v9773_v34, 16  ;;  %v5429_v10 = vshll.u32 %v9773_v34, 16  ;;  %v9765_v25 = vld [vmem:[%s13758_s21 + $0x18] sm:$0xe] }
 0x687   : >> { %5468 = vrot.lane.b32.xlu0 %v5418_v49, %s11564_s1  ;;  %6613 = vrot.lane.b32.xlu1 %v6563_v11, %s11564_s1  ;;  %v6581_v56 = vshll.u32 %v9936_v24, 16  ;;  %v6574_v45 = vshll.u32 %v9935_v21, 16  ;;  %v6572_v13 = vshrl.u32 %v9935_v21, 16  ;;  %v6579_v19 = vshrl.u32 %v9936_v24, 16  ;;  %v13840_v28 = vld [vmem:[%s13758_s21 + $0x28] sm:$0xf] }
 0x688   : >> { %v5431_v51 = vrot.slane %v5429_v10, 1  ;;  %v5439_v35 = vor.u32 %v5438_v62, %v5434_v5  ;;  %v9942_v6 = vcombine.low %v9926_v3, %v13784_v37  ;;  %v9941_v42 = vcombine.low %v9925_v15, %v13776_v14  ;;  %v13843_v18 = vld [vmem:[%s13758_s21 + $0x2c] sm:$0x1]  ;;  %v9766_v43 = vld [vmem:[%s13758_s21 + $0x20] sm:$0xe] }
 0x689   : >> { %v6576_v9 = vrot.slane %v6574_v45, 1  ;;  %v6583_v60 = vrot.slane %v6581_v56, 1  ;;  %v13847_v37 = vld [vmem:[%s13758_s21 + $0x30] sm:$0xf]  ;;  %v13850_v14 = vld [vmem:[%s13758_s21 + $0x34] sm:$0x1]  ;;  %v9781_v36 = vcombine.low %v9765_v25, %v13802_v27  ;;  %v9775_v53 = vcombine.low %v13840_v28, %v13843_v18 }
 0x68a   : >> { %v5432_v31 = vor.u32 %v5431_v51, %v5427_v52  ;;  %v6654_v7 = vrot.slane %v9942_v6, 1  ;;  %v6653_v44 = vrot.slane %v9941_v42, 1  ;;  %v9782_v48 = vcombine.low %v9766_v43, %v13793_v16  ;;  %v9927_v46 = vld [vmem:[%s13758_s21 + $0x68] sm:$0xe]  ;;  %v9753_v38 = vld [vmem:[%s13758_s21 + $0x38] sm:$0xf] }
 0x68b   : >> { %5470 = vrot.lane.b32.xlu0 %v5425_v12, %s11564_s1  ;;  %6615 = vrot.lane.b32.xlu1 %v6570_v32, %s11564_s1  ;;  %v6577_v33 = vor.u32 %v6576_v9, %v6572_v13  ;;  %v6584_v22 = vor.u32 %v6583_v60, %v6579_v19  ;;  %v9776_v26 = vcombine.low %v13847_v37, %v13850_v14  ;;  %v13863_v8 = vld [vmem:[%s13758_s21 + $0x3c] sm:$0x1]  ;;  %v9928_v23 = vld [vmem:[%s13758_s21 + $0x70] sm:$0xe]  ;;  %v5510_v50 = vrot.slane %v9781_v36, 1 }
 0x68c   : >> { %v9754_v41 = vld [vmem:[%s13758_s21 + $0x40] sm:$0xf]  ;;  %v13868_v57 = vld [vmem:[%s13758_s21 + $0x44] sm:$0x1]  ;;  %v9943_v27 = vcombine.low %v9927_v46, %v13818_v59  ;;  %v5443_v49 = vshll.u32 %v9775_v53, 16  ;;  %v9777_v58 = vcombine.low %v9753_v38, %v13863_v8  ;;  %v5511_v16 = vrot.slane %v9782_v48, 1 }
 0x68d   : >> { %v9944_v0 = vcombine.low %v9928_v23, %v13808_v55  ;;  %v5450_v11 = vshll.u32 %v9776_v26, 16  ;;  %v9778_v34 = vcombine.low %v9754_v41, %v13868_v57  ;;  %v5441_v32 = vshrl.u32 %v9775_v53, 16  ;;  %v9767_v45 = vld [vmem:[%s13758_s21 + $0x28] sm:$0xe]  ;;  %v9960_v9 = vld [vmem:[%s13758_s21 + $0x60] sm:$0xf] }
 0x68e   : >> { %v6655_v24 = vrot.slane %v9943_v27, 1  ;;  %v5445_v12 = vrot.slane %v5443_v49, 1  ;;  %v5457_v5 = vshll.u32 %v9777_v58, 16  ;;  %v5448_v21 = vshrl.u32 %v9776_v26, 16  ;;  %v9961_v19 = vld [vmem:[%s13758_s21 + $0x68] sm:$0xf] }
 0x68f   : >> { %5472 = vrot.lane.b32.xlu0 %v5432_v31, %s11564_s1  ;;  %5474 = vrot.lane.b32.xlu1 %v5439_v35, %s11564_s1  ;;  %v6656_v59 = vrot.slane %v9944_v0, 1  ;;  %v5452_v55 = vrot.slane %v5450_v11, 1  ;;  %v5464_v62 = vshll.u32 %v9778_v34, 16  ;;  %v5455_v10 = vshrl.u32 %v9777_v58, 16  ;;  %v13883_v35 = vld [vmem:[%s13758_s21 + $0x64] sm:$0x1] }
 0x690   : >> { %v5446_v52 = vor.u32 %v5445_v12, %v5441_v32  ;;  %v5459_v56 = vrot.slane %v5457_v5, 1  ;;  %v5462_v51 = vshrl.u32 %v9778_v34, 16  ;;  %v9768_v31 = vld [vmem:[%s13758_s21 + $0x30] sm:$0xe]  ;;  %v13888_v60 = vld [vmem:[%s13758_s21 + $0x6c] sm:$0x1]  ;;  %v9783_v15 = vcombine.low %v9767_v45, %v13843_v18 }
 0x691   : >> { %v5453_v1 = vor.u32 %v5452_v55, %v5448_v21  ;;  %v5466_v13 = vrot.slane %v5464_v62, 1  ;;  %v9984_v20 = vcombine.low %v9960_v9, %v13883_v35  ;;  %v9784_v6 = vcombine.low %v9768_v31, %v13850_v14  ;;  %v9769_v42 = vld [vmem:[%s13758_s21 + $0x38] sm:$0xe]  ;;  %v9962_v25 = vld [vmem:[%s13758_s21 + $0x70] sm:$0xf] }
 0x692   : >> { %v5460_v3 = vor.u32 %v5459_v56, %v5455_v10  ;;  %v13899_v43 = vld [vmem:[%s13758_s21 + $0x74] sm:$0x1]  ;;  %v13904_v36 = vld [vmem:[%s13758_s21 + $0x7c] sm:$0x1]  ;;  %v5512_v18 = vrot.slane %v9783_v15, 1  ;;  %v9785_v53 = vcombine.low %v9769_v42, %v13863_v8 }
 0x693   : >> { %6617 = vrot.lane.b32.xlu0 %v6577_v33, %s11564_s1  ;;  %6619 = vrot.lane.b32.xlu1 %v6584_v22, %s11564_s1  ;;  %v5467_v33 = vor.u32 %v5466_v13, %v5462_v51  ;;  %v9985_v22 = vcombine.low %v9961_v19, %v13888_v60  ;;  %v6907_v48 = vshll.u32 %v9984_v20, 16  ;;  %v9986_v46 = vcombine.low %v9962_v25, %v13899_v43  ;;  %v13919_v21 = vld [vmem:[%s13758_s21 + $0x4] sm:$0x1]  ;;  %v9977_v55 = vld [vmem:[%s13758_s21 + $0x68] sm:$0xe] }
 0x694   : >> { %v5513_v14 = vrot.slane %v9784_v6, 1  ;;  %v5514_v41 = vrot.slane %v9785_v53, 1  ;;  %v5118_v62 = vld [vmem:[%s13758_s21 + $0x8] sm:$0xf]  ;;  %v9993_v51 = vcombine.low %v9977_v55, %v13888_v60  ;;  %v9978_v13 = vld [vmem:[%s13758_s21 + $0x70] sm:$0xe] }
 0x695   : >> { %v6914_v38 = vshll.u32 %v9985_v22, 16  ;;  %v6909_v27 = vrot.slane %v6907_v48, 1  ;;  %v6921_v49 = vshll.u32 %v9986_v46, 16  ;;  %v6912_v58 = vshrl.u32 %v9985_v22, 16  ;;  %v5119_v31 = vld [vmem:[%s13758_s21 + $0x10] sm:$0xf] }
 0x696   : >> { %v6919_v11 = vshrl.u32 %v9986_v46, 16  ;;  %v13935_v19 = vld [vmem:[%s13758_s21 + $0x14] sm:$0x1]  ;;  %v5120_v15 = vld [vmem:[%s13758_s21 + $0x18] sm:$0xf]  ;;  %v7001_v60 = vrot.slane %v9993_v51, 1 }
 0x697   : >> { %6661 = vrot.lane.b32.xlu0 %v6653_v44, %s11563_s19  ;;  %6663 = vrot.lane.b32.xlu1 %v6654_v7, %s11563_s19  ;;  %v9770_v7 = vld [vmem:[%s13758_s21 + $0x40] sm:$0xe]  ;;  %v9963_v44 = vld [vmem:[%s13758_s21 + $0x78] sm:$0xf]  ;;  %v6923_v34 = vrot.slane %v6921_v49, 1  ;;  %v9732_v42 = vcombine.low %v5119_v31, %v13935_v19 }
 0x698   : >> { %v9786_v26 = vcombine.low %v9770_v7, %v13868_v57  ;;  %v9987_v23 = vcombine.low %v9963_v44, %v13904_v36  ;;  %v6916_v57 = vrot.slane %v6914_v38, 1  ;;  %v11202_v44 = vld [vmem:[%s15216_s6 + $0x14] ss:$0 sps:$4 sm:$0xff]   ;;  %v11206_v46 = vld [vmem:[%s15216_s6 + $0x38] ss:$0 sps:$4 sm:$0xff]  }
 0x699   : >> { %v6924_v10 = vor.u32 %v6923_v34, %v6919_v11  ;;  %v5198_v48 = vshll.u32 %v9732_v42, 16  ;;  %10745 = vmatprep.subr.msk.bf16.mxu1 %vm2002_vm10, %v11202_v44  ;;  %10749 = vmatprep.subr.msk.bf16.mxu0 %vm2002_vm10, %v11206_v46  ;;  %v5196_v49 = vshrl.u32 %v9732_v42, 16  ;;  %v9964_v34 = vld [vmem:[%s13758_s21 + $0x80] sm:$0xf]  ;;  %v9966_v51 = vld [vmem:[%s13758_s21 + $0x90] sm:$0xf] }
 0x69a   : >> { %v5515_v8 = vrot.slane %v9786_v26, 1  ;;  %v6917_v32 = vor.u32 %v6916_v57, %v6912_v58  ;;  %v6926_v12 = vshrl.u32 %v9987_v23, 16  ;;  %v5133_v58 = vld [vmem:[%s13758_s21] sm:$0xe]  ;;  %v13972_v57 = vsel %vm2002_vm10, %v11206_v46, 0 }
 0x69b   : >> { %5520 = vrot.lane.b32.xlu0 %v5510_v50, %s11563_s19  ;;  %5522 = vrot.lane.b32.xlu1 %v5511_v16, %s11563_s19  ;;  %v6905_v50 = vshrl.u32 %v9984_v20, 16  ;;  %v6928_v16 = vshll.u32 %v9987_v23, 16  ;;  %v13940_v20 = vld [vmem:[%s13758_s21 + $0x1c] sm:$0x1]  ;;  %v9738_v55 = vcombine.low %v5133_v58, %v13919_v21  ;;  %v9967_v31 = vld [vmem:[%s13758_s21 + $0x98] sm:$0xf] }
 0x69c   : >> { %v9733_v7 = vcombine.low %v5120_v15, %v13940_v20  ;;  %v13961_v23 = vld [vmem:[%s15216_s6 + $0x3c] sm:$0xff]   ;;  %10518 = vmatpush3.bf16.msra.mxu0 %v13972_v57  ;;  %v14021_v58 = vld [vmem:[%s13758_s21 + $0x2c] sm:$0x1] }
 0x69d   : >> { %v6910_v0 = vor.u32 %v6909_v27, %v6905_v50  ;;  %v6930_v5 = vrot.slane %v6928_v16, 1  ;;  %v5619_v50 = vsel %vm2002_vm10, %v11202_v44, 0  ;;  %10527 = vmatprep.subr.bf16.mxu0 %v13961_v23 }
 0x69e   : >> { %v5205_v38 = vshll.u32 %v9733_v7, 16  ;;  %10470 = vmatpush3.bf16.msra.mxu1 %v5619_v50  ;;  %v5121_v50 = vld [vmem:[%s13758_s21 + $0x20] sm:$0xf] }
 0x69f   : >> { %6665 = vrot.lane.b32.xlu0 %v6655_v24, %s11563_s19  ;;  %6667 = vrot.lane.b32.xlu1 %v6656_v59, %s11563_s19  ;;  %v9976_v24 = vld [vmem:[%s13758_s21 + $0x60] sm:$0xe] }
 0x6a0   : >> { %v5117_v59 = vld [vmem:[%s13758_s21] sm:$0xf]  ;;  %v9992_v56 = vcombine.low %v9976_v24, %v13883_v35  ;;  %v5207_v11 = vrot.slane %v5205_v38, 1  ;;  %v13977_v24 = vld [vmem:[%s13758_s21 + $0x84] sm:$0x1] }
 0x6a1   : >> { %v9730_v45 = vcombine.low %v5117_v59, %v13919_v21  ;;  %v5277_v21 = vrot.slane %v9738_v55, 1  ;;  %v5123_v55 = vld [vmem:[%s13758_s21 + $0x30] sm:$0xf] }
 0x6a2   : >> { %v7000_v35 = vrot.slane %v9992_v56, 1 }
 0x6a3   : >> { %5476 = vrot.lane.b32.xlu0 %v5446_v52, %s11564_s1  ;;  %5478 = vrot.lane.b32.xlu1 %v5453_v1, %s11564_s1  ;;  %v13924_v52 = vld [vmem:[%s13758_s21 + $0xc] sm:$0x1]  ;;  %v6931_v1 = vor.u32 %v6930_v5, %v6926_v12  ;;  %v5184_v6 = vshll.u32 %v9730_v45, 16  ;;  %v5182_v53 = vshrl.u32 %v9730_v45, 16  ;;  %v9965_v12 = vld [vmem:[%s13758_s21 + $0x88] sm:$0xf] }
 0x6a4   : >> { %v9731_v9 = vcombine.low %v5118_v62, %v13924_v52  ;;  %v13983_v5 = vld [vmem:[%s13758_s21 + $0x8c] sm:$0x1]  ;;  %v9988_v62 = vcombine.low %v9964_v34, %v13977_v24  ;;  %v5135_v45 = vld [vmem:[%s13758_s21 + $0x10] sm:$0xe] }
 0x6a5   : >> { %v9740_v15 = vcombine.low %v5135_v45, %v13935_v19  ;;  %v14037_v45 = vld [vmem:[%s13758_s21 + $0x3c] sm:$0x1] }
 0x6a6   : >> { %v5191_v25 = vshll.u32 %v9731_v9, 16 }
 0x6a7   : >> { %5480 = vrot.lane.b32.xlu0 %v5460_v3, %s11564_s1  ;;  %5482 = vrot.lane.b32.xlu1 %v5467_v33, %s11564_s1  ;;  %v9979_v3 = vld [vmem:[%s13758_s21 + $0x78] sm:$0xe]  ;;  %v9994_v33 = vcombine.low %v9978_v13, %v13899_v43  ;;  %v5186_v43 = vrot.slane %v5184_v6, 1  ;;  %v13996_v13 = vld [vmem:[%s13758_s21 + $0x94] sm:$0x1] }
 0x6a8   : >> { %v9995_v22 = vcombine.low %v9979_v3, %v13904_v36  ;;  %v5193_v26 = vrot.slane %v5191_v25, 1  ;;  %v14001_v3 = vld [vmem:[%s13758_s21 + $0x9c] sm:$0x1]  ;;  %v6933_v25 = vshrl.u32 %v9988_v62, 16 }
 0x6a9   : >> { %v5187_v27 = vor.u32 %v5186_v43, %v5182_v53 }
 0x6aa   : >> { %v7003_v36 = vrot.slane %v9995_v22, 1  ;;  %v5279_v22 = vrot.slane %v9740_v15, 1 }
 0x6ab   : >> { %5524 = vrot.lane.b32.xlu0 %v5512_v18, %s11563_s19  ;;  %5526 = vrot.lane.b32.xlu1 %v5513_v14, %s11563_s19  ;;  %v7002_v18 = vrot.slane %v9994_v33, 1  ;;  %v5189_v14 = vshrl.u32 %v9731_v9, 16  ;;  %v5136_v9 = vld [vmem:[%s13758_s21 + $0x18] sm:$0xe]  ;;  %v9990_v33 = vcombine.low %v9966_v51, %v13996_v13 }
 0x6ac   : >> { %v9741_v6 = vcombine.low %v5136_v9, %v13940_v20 }
 0x6ad   : >> { %v5194_v16 = vor.u32 %v5193_v26, %v5189_v14  ;;  %v6949_v44 = vshll.u32 %v9990_v33, 16 }
 0x6ae   : >> { %v5280_v19 = vrot.slane %v9741_v6, 1 }
 0x6af   : >> { %5528 = vrot.lane.b32.xlu0 %v5514_v41, %s11563_s19  ;;  %5530 = vrot.lane.b32.xlu1 %v5515_v8, %s11563_s19  ;;  %v13966_v41 = vld [vmem:[%s15216_s6] sm:$0xff]   ;;  %v5200_v8 = vrot.slane %v5198_v48, 1  ;;  %v6947_v48 = vshrl.u32 %v9990_v33, 16  ;;  %v6951_v46 = vrot.slane %v6949_v44, 1 }
 0x6b0   : >> { %10479 = vmatprep.subr.bf16.mxu1 %v13966_v41  ;;  %v5137_v44 = vld [vmem:[%s13758_s21 + $0x20] sm:$0xe] }
 0x6b1   : >> { %v5201_v59 = vor.u32 %v5200_v8, %v5196_v49  ;;  %v9981_v49 = vld [vmem:[%s13758_s21 + $0x88] sm:$0xe] }
 0x6b2   : >> { %v5122_v8 = vld [vmem:[%s13758_s21 + $0x28] sm:$0xf] }
 0x6b3   : >> { %6960 = vrot.lane.b32.xlu0 %v6910_v0, %s11564_s1  ;;  %6962 = vrot.lane.b32.xlu1 %v6917_v32, %s11564_s1  ;;  %v5203_v0 = vshrl.u32 %v9733_v7, 16  ;;  %v5134_v32 = vld [vmem:[%s13758_s21 + $0x8] sm:$0xe] }
 0x6b4   : >> { %v9739_v56 = vcombine.low %v5134_v32, %v13924_v52  ;;  %v9997_v32 = vcombine.low %v9981_v49, %v13983_v5 }
 0x6b6   : >> { %v5278_v52 = vrot.slane %v9739_v56, 1  ;;  %v5124_v56 = vld [vmem:[%s13758_s21 + $0x38] sm:$0xf] }
 0x6b7   : >> { %6964 = vrot.lane.b32.xlu0 %v6924_v10, %s11564_s1  ;;  %6966 = vrot.lane.b32.xlu1 %v6931_v1, %s11564_s1  ;;  %v5208_v10 = vor.u32 %v5207_v11, %v5203_v0  ;;  %v9989_v1 = vcombine.low %v9965_v12, %v13983_v5  ;;  %v9982_v12 = vld [vmem:[%s13758_s21 + $0x90] sm:$0xe]  ;;  %v7005_v5 = vrot.slane %v9997_v32, 1  ;;  %v9737_v15 = vcombine.low %v5124_v56, %v14037_v45  ;;  %v10013_v32 = vld [vmem:[%s13758_s21 + $0xb8] sm:$0xf] }
 0x6b9   : >> { %v6942_v42 = vshll.u32 %v9989_v1, 16 }
 0x6bb   : >> { %7008 = vrot.lane.b32.xlu0 %v7000_v35, %s11563_s19  ;;  %7010 = vrot.lane.b32.xlu1 %v7001_v60, %s11563_s19  ;;  %v6935_v35 = vshll.u32 %v9988_v62, 16  ;;  %v9991_v60 = vcombine.low %v9967_v31, %v14001_v3  ;;  %v6944_v20 = vrot.slane %v6942_v42, 1  ;;  %v14032_v62 = vld [vmem:[%s13758_s21 + $0x34] sm:$0x1] }
 0x6bc   : >> { %v9736_v9 = vcombine.low %v5123_v55, %v14032_v62 }
 0x6bd   : >> { %v6937_v7 = vrot.slane %v6935_v35, 1  ;;  %v6956_v53 = vshll.u32 %v9991_v60, 16  ;;  %v6954_v26 = vshrl.u32 %v9991_v60, 16  ;;  %v5233_v60 = vshll.u32 %v9737_v15, 16 }
 0x6be   : >> { %v5226_v6 = vshll.u32 %v9736_v9, 16 }
 0x6bf   : >> { %7012 = vrot.lane.b32.xlu0 %v7002_v18, %s11563_s19  ;;  %7014 = vrot.lane.b32.xlu1 %v7003_v36, %s11563_s19  ;;  %v6940_v18 = vshrl.u32 %v9989_v1, 16  ;;  %v6938_v43 = vor.u32 %v6937_v7, %v6933_v25  ;;  %v9980_v36 = vld [vmem:[%s13758_s21 + $0x80] sm:$0xe]  ;;  %v6958_v38 = vrot.slane %v6956_v53, 1  ;;  %v9998_v1 = vcombine.low %v9982_v12, %v13996_v13  ;;  %v14073_v12 = vld [vmem:[%s13758_s21 + $0xbc] sm:$0x1] }
 0x6c0   : >> { %v9996_v0 = vcombine.low %v9980_v36, %v13977_v24  ;;  %v5224_v25 = vshrl.u32 %v9736_v9, 16  ;;  %v5228_v7 = vrot.slane %v5226_v6, 1  ;;  %v10010_v53 = vld [vmem:[%s13758_s21 + $0xa0] sm:$0xf]  ;;  %v14057_v36 = vld [vmem:[%s13758_s21 + $0xac] sm:$0x1] }
 0x6c1   : >> { %v6945_v14 = vor.u32 %v6944_v20, %v6940_v18  ;;  %v6959_v34 = vor.u32 %v6958_v38, %v6954_v26  ;;  %v7006_v35 = vrot.slane %v9998_v1, 1  ;;  %v5231_v18 = vshrl.u32 %v9737_v15, 16  ;;  %v10026_v6 = vld [vmem:[%s13758_s21 + $0xa0] sm:$0xe] }
 0x6c2   : >> { %v7004_v24 = vrot.slane %v9996_v0, 1  ;;  %v5235_v20 = vrot.slane %v5233_v60, 1  ;;  %v10012_v0 = vld [vmem:[%s13758_s21 + $0xb0] sm:$0xf]  ;;  %v10037_v1 = vcombine.low %v10013_v32, %v14073_v12 }
 0x6c3   : >> { %5237 = vrot.lane.b32.xlu0 %v5187_v27, %s11564_s1  ;;  %5239 = vrot.lane.b32.xlu1 %v5194_v16, %s11564_s1  ;;  %v14016_v27 = vld [vmem:[%s13758_s21 + $0x24] sm:$0x1]  ;;  %v6952_v16 = vor.u32 %v6951_v46, %v6947_v48  ;;  %v5138_v48 = vld [vmem:[%s13758_s21 + $0x28] sm:$0xe] }
 0x6c4   : >> { %v9734_v11 = vcombine.low %v5121_v50, %v14016_v27  ;;  %v10011_v46 = vld [vmem:[%s13758_s21 + $0xa8] sm:$0xf]  ;;  %v9742_v26 = vcombine.low %v5137_v44, %v14016_v27  ;;  %v5236_v50 = vor.u32 %v5235_v20, %v5231_v18  ;;  %v9743_v49 = vcombine.low %v5138_v48, %v14021_v58  ;;  %v9808_v60 = vld [vmem:[%s13758_s21 + $0x10] sm:$0xf]  ;;  %v14093_v44 = vld [vmem:[%s13758_s21 + $0x1c] sm:$0x1] }
 0x6c5   : >> { %v7276_v15 = vshll.u32 %v10037_v1, 16  ;;  %v10028_v18 = vld [vmem:[%s13758_s21 + $0xb0] sm:$0xe] }
 0x6c6   : >> { %v5212_v51 = vshll.u32 %v9734_v11, 16  ;;  %v5210_v33 = vshrl.u32 %v9734_v11, 16  ;;  %v14068_v11 = vld [vmem:[%s13758_s21 + $0xb4] sm:$0x1]  ;;  %v5281_v27 = vrot.slane %v9742_v26, 1 }
 0x6c7   : >> { %5241 = vrot.lane.b32.xlu0 %v5201_v59, %s11564_s1  ;;  %5243 = vrot.lane.b32.xlu1 %v5208_v10, %s11564_s1  ;;  %v9735_v59 = vcombine.low %v5122_v8, %v14021_v58  ;;  %v9983_v10 = vld [vmem:[%s13758_s21 + $0x98] sm:$0xe]  ;;  %v5139_v8 = vld [vmem:[%s13758_s21 + $0x30] sm:$0xe]  ;;  %v5282_v58 = vrot.slane %v9743_v49, 1  ;;  %v10044_v32 = vcombine.low %v10028_v18, %v14068_v11 }
 0x6c8   : >> { %v9999_v31 = vcombine.low %v9983_v10, %v14001_v3  ;;  %v10036_v10 = vcombine.low %v10012_v0, %v14068_v11  ;;  %v9810_v49 = vld [vmem:[%s13758_s21 + $0x20] sm:$0xf]  ;;  %v14109_v0 = vld [vmem:[%s13758_s21 + $0x2c] sm:$0x1]  ;;  %v9825_v18 = vld [vmem:[%s13758_s21 + $0x18] sm:$0xe] }
 0x6c9   : >> { %v5217_v42 = vshrl.u32 %v9735_v59, 16 }
 0x6ca   : >> { %v7007_v13 = vrot.slane %v9999_v31, 1  ;;  %v7269_v31 = vshll.u32 %v10036_v10, 16 }
 0x6cb   : >> { %5285 = vrot.lane.b32.xlu0 %v5277_v21, %s11563_s19  ;;  %5287 = vrot.lane.b32.xlu1 %v5278_v52, %s11563_s19  ;;  %v5219_v21 = vshll.u32 %v9735_v59, 16  ;;  %v5214_v52 = vrot.slane %v5212_v51, 1  ;;  %v9744_v59 = vcombine.low %v5139_v8, %v14032_v62  ;;  %v14106_v8 = vld [vmem:[%s13758_s21 + $0x24] sm:$0x1] }
 0x6cd   : >> { %v5221_v3 = vrot.slane %v5219_v21, 1  ;;  %v5283_v51 = vrot.slane %v9744_v59, 1  ;;  %v9834_v59 = vcombine.low %v9810_v49, %v14106_v8 }
 0x6cf   : >> { %5289 = vrot.lane.b32.xlu0 %v5279_v22, %s11563_s19  ;;  %5291 = vrot.lane.b32.xlu1 %v5280_v19, %s11563_s19  ;;  %v5215_v22 = vor.u32 %v5214_v52, %v5210_v33  ;;  %v5222_v19 = vor.u32 %v5221_v3, %v5217_v42  ;;  %v7267_v33 = vshrl.u32 %v10036_v10, 16  ;;  %v7271_v52 = vrot.slane %v7269_v31, 1 }
 0x6d0   : >> { %v7274_v42 = vshrl.u32 %v10037_v1, 16  ;;  %v7278_v3 = vrot.slane %v7276_v15, 1 }
 0x6d1   : >> { %v7272_v20 = vor.u32 %v7271_v52, %v7267_v33 }
 0x6d2   : >> { %v7279_v26 = vor.u32 %v7278_v3, %v7274_v42 }
 0x6d3   : >> { %6968 = vrot.lane.b32.xlu0 %v6938_v43, %s11564_s1  ;;  %6970 = vrot.lane.b32.xlu1 %v6945_v14, %s11564_s1  ;;  %v14052_v43 = vld [vmem:[%s13758_s21 + $0xa4] sm:$0x1]  ;;  %v5229_v14 = vor.u32 %v5228_v7, %v5224_v25  ;;  %v10027_v25 = vld [vmem:[%s13758_s21 + $0xa8] sm:$0xe] }
 0x6d4   : >> { %v10034_v38 = vcombine.low %v10010_v53, %v14052_v43  ;;  %v9809_v7 = vld [vmem:[%s13758_s21 + $0x18] sm:$0xf]  ;;  %v10042_v53 = vcombine.low %v10026_v6, %v14052_v43 }
 0x6d6   : >> { %v7255_v55 = vshll.u32 %v10034_v38, 16  ;;  %v7253_v9 = vshrl.u32 %v10034_v38, 16  ;;  %v10043_v38 = vcombine.low %v10027_v25, %v14057_v36  ;;  %v7348_v43 = vrot.slane %v10042_v53, 1  ;;  %v10014_v25 = vld [vmem:[%s13758_s21 + $0xc0] sm:$0xf] }
 0x6d7   : >> { %6972 = vrot.lane.b32.xlu0 %v6952_v16, %s11564_s1  ;;  %6974 = vrot.lane.b32.xlu1 %v6959_v34, %s11564_s1  ;;  %v10035_v16 = vcombine.low %v10011_v46, %v14057_v36  ;;  %v5140_v34 = vld [vmem:[%s13758_s21 + $0x38] sm:$0xe]  ;;  %v9811_v46 = vld [vmem:[%s13758_s21 + $0x28] sm:$0xf] }
 0x6d8   : >> { %v9745_v56 = vcombine.low %v5140_v34, %v14037_v45  ;;  %v7349_v36 = vrot.slane %v10043_v38, 1  ;;  %v9835_v10 = vcombine.low %v9811_v46, %v14109_v0  ;;  %v14135_v53 = vld [vmem:[%s13758_s21 + $0xcc] sm:$0x1] }
 0x6d9   : >> { %v7260_v21 = vshrl.u32 %v10035_v16, 16 }
 0x6da   : >> { %v5284_v62 = vrot.slane %v9745_v56, 1 }
 0x6db   : >> { %7016 = vrot.lane.b32.xlu0 %v7004_v24, %s11563_s19  ;;  %7018 = vrot.lane.b32.xlu1 %v7005_v5, %s11563_s19  ;;  %v7262_v24 = vshll.u32 %v10035_v16, 16  ;;  %v7257_v5 = vrot.slane %v7255_v55, 1 }
 0x6dd   : >> { %v7264_v45 = vrot.slane %v7262_v24, 1 }
 0x6df   : >> { %7020 = vrot.lane.b32.xlu0 %v7006_v35, %s11563_s19  ;;  %7022 = vrot.lane.b32.xlu1 %v7007_v13, %s11563_s19  ;;  %v7258_v35 = vor.u32 %v7257_v5, %v7253_v9  ;;  %v7265_v13 = vor.u32 %v7264_v45, %v7260_v21  ;;  %v5879_v9 = vshll.u32 %v9834_v59, 16 }
 0x6e1   : >> { %v5881_v6 = vrot.slane %v5879_v9, 1 }
 0x6e3   : >> { %5245 = vrot.lane.b32.xlu0 %v5215_v22, %s11564_s1  ;;  %5247 = vrot.lane.b32.xlu1 %v5222_v19, %s11564_s1  ;;  %v14088_v22 = vld [vmem:[%s13758_s21 + $0x14] sm:$0x1]  ;;  %v10029_v19 = vld [vmem:[%s13758_s21 + $0xb8] sm:$0xe] }
 0x6e4   : >> { %v9832_v48 = vcombine.low %v9808_v60, %v14088_v22  ;;  %v10045_v34 = vcombine.low %v10029_v19, %v14073_v12  ;;  %v7350_v12 = vrot.slane %v10044_v32, 1  ;;  %v10016_v32 = vld [vmem:[%s13758_s21 + $0xd0] sm:$0xf] }
 0x6e6   : >> { %v7351_v24 = vrot.slane %v10045_v34, 1  ;;  %v5863_v1 = vshrl.u32 %v9832_v48, 16 }
 0x6e7   : >> { %5249 = vrot.lane.b32.xlu0 %v5229_v14, %s11564_s1  ;;  %5251 = vrot.lane.b32.xlu1 %v5236_v50, %s11564_s1  ;;  %v9833_v50 = vcombine.low %v9809_v7, %v14093_v44  ;;  %v14130_v7 = vld [vmem:[%s13758_s21 + $0xc4] sm:$0x1] }
 0x6e8   : >> { %v10038_v38 = vcombine.low %v10014_v25, %v14130_v7 }
 0x6e9   : >> { %v5872_v55 = vshll.u32 %v9833_v50, 16  ;;  %v5870_v5 = vshrl.u32 %v9833_v50, 16  ;;  %v10017_v50 = vld [vmem:[%s13758_s21 + $0xd8] sm:$0xf] }
 0x6eb   : >> { %5293 = vrot.lane.b32.xlu0 %v5281_v27, %s11563_s19  ;;  %5295 = vrot.lane.b32.xlu1 %v5282_v58, %s11563_s19  ;;  %v5865_v27 = vshll.u32 %v9832_v48, 16  ;;  %v5874_v31 = vrot.slane %v5872_v55, 1 }
 0x6ed   : >> { %v5875_v3 = vor.u32 %v5874_v31, %v5870_v5 }
 0x6ef   : >> { %5297 = vrot.lane.b32.xlu0 %v5283_v51, %s11563_s19  ;;  %5299 = vrot.lane.b32.xlu1 %v5284_v62, %s11563_s19  ;;  %v5867_v51 = vrot.slane %v5865_v27, 1  ;;  %v5886_v62 = vshll.u32 %v9835_v10, 16  ;;  %v14151_v27 = vld [vmem:[%s13758_s21 + $0xd4] sm:$0x1] }
 0x6f1   : >> { %v5868_v52 = vor.u32 %v5867_v51, %v5863_v1  ;;  %v5888_v60 = vrot.slane %v5886_v62, 1 }
 0x6f3   : >> { %7308 = vrot.lane.b32.xlu0 %v7258_v35, %s11564_s1  ;;  %7310 = vrot.lane.b32.xlu1 %v7265_v13, %s11564_s1  ;;  %v5519_v14 = vpop.permute.xlu1 %5518  ;;  %v5877_v35 = vshrl.u32 %v9834_v59, 16  ;;  %v9824_v13 = vld [vmem:[%s13758_s21 + $0x10] sm:$0xe] }
 0x6f4   : >> { %v5517_v16 = vpop.permute.xlu0 %5516 }
 0x6f5   : >> { %v5882_v46 = vor.u32 %v5881_v6, %v5877_v35 }
 0x6f7   : >> { %7312 = vrot.lane.b32.xlu0 %v7272_v20, %s11564_s1  ;;  %7314 = vrot.lane.b32.xlu1 %v7279_v26, %s11564_s1  ;;  %v10015_v20 = vld [vmem:[%s13758_s21 + $0xc8] sm:$0xf]  ;;  %v9826_v26 = vld [vmem:[%s13758_s21 + $0x20] sm:$0xe] }
 0x6f8   : >> { %v10039_v34 = vcombine.low %v10015_v20, %v14135_v53 }
 0x6f9   : >> { %v5469_v58 = vpop.permute.xlu0 %5468  ;;  %v6614_v56 = vpop.permute.xlu1 %6613 }
 0x6fa   : >> { %v5534_v11 = vsel %vm1323_vm8, %v13769_v4, %v5469_v58  ;;  %v7283_v58 = vshll.u32 %v10038_v38, 16  ;;  %v7290_v51 = vshll.u32 %v10039_v34, 16  ;;  %v6679_v9 = vsel %vm1323_vm8, %v13773_v29, %v6614_v56 }
 0x6fb   : >> { %7356 = vrot.lane.b32.xlu0 %v7348_v43, %s11563_s19  ;;  %7358 = vrot.lane.b32.xlu1 %v7349_v36, %s11563_s19  ;;  %v5557_v4 = vsel %vm1710_vm11, %v5534_v11, %v5517_v16  ;;  %v9841_v16 = vcombine.low %v9825_v18, %v14093_v44  ;;  %v14147_v43 = vld [vmem:[%s13758_s21 + $0xdc] sm:$0x1]  ;;  %v9827_v36 = vld [vmem:[%s13758_s21 + $0x28] sm:$0xe]  ;;  %v10040_v44 = vcombine.low %v10016_v32, %v14151_v27 }
 0x6fc   : >> { %v9843_v1 = vcombine.low %v9827_v36, %v14109_v0  ;;  %v7285_v35 = vrot.slane %v7283_v58, 1  ;;  %v10030_v18 = vld [vmem:[%s13758_s21 + $0xc0] sm:$0xe] }
 0x6fd   : >> { %v5471_v21 = vpop.permute.xlu0 %5470  ;;  %v6616_v45 = vpop.permute.xlu1 %6615 }
 0x6fe   : >> { %v5537_v15 = vsel %vm1323_vm8, %v13763_v39, %v5471_v21  ;;  %v5884_v39 = vshrl.u32 %v9835_v10, 16  ;;  %v7281_v21 = vshrl.u32 %v10038_v38, 16  ;;  %v5961_v56 = vrot.slane %v9843_v1, 1 }
 0x6ff   : >> { %7360 = vrot.lane.b32.xlu0 %v7350_v12, %s11563_s19  ;;  %v5559_v33 = vsel %vm1710_vm11, %v5537_v15, %v5519_v14  ;;  %7362 = vrot.lane.b32.xlu1 %v7351_v24, %s11563_s19  ;;  %v9840_v14 = vcombine.low %v9824_v13, %v14088_v22  ;;  %v9842_v22 = vcombine.low %v9826_v26, %v14106_v8  ;;  %v5959_v12 = vrot.slane %v9841_v16, 1  ;;  %v11234_v26 = vld [vmem:[%s15216_s6 + $0x8] ss:$0 sps:$4 sm:$0xff]   ;;  %v14194_v16 = vld [vmem:[%s13758_s21 + $0x3c] sm:$0x1] }
 0x700   : >> { %v9787_v42 = vcombine.low %v5557_v4, %v5559_v33  ;;  %v5889_v49 = vor.u32 %v5888_v60, %v5884_v39  ;;  %v14157_v24 = vcombine.low %v10017_v50, %v14147_v43  ;;  %v6682_v8 = vsel %vm1323_vm8, %v13779_v40, %v6616_v45 }
 0x701   : >> { %v5473_v19 = vpop.permute.xlu0 %5472  ;;  %v5475_v48 = vpop.permute.xlu1 %5474  ;;  %v5958_v10 = vrot.slane %v9840_v14, 1  ;;  %v5960_v62 = vrot.slane %v9842_v22, 1  ;;  %v7297_v4 = vshll.u32 %v10040_v44, 16  ;;  %v7288_v33 = vshrl.u32 %v10039_v34, 16  ;;  %v14185_v14 = vld [vmem:[%s13758_s21 + $0x34] sm:$0x1] }
 0x702   : >> { %10471 = vmatprep.mubr.msk.bf16.mxu1 %vm1989_vm12, %v9787_v42  ;;  %v7304_v0 = vshll.u32 %v14157_v24, 16  ;;  %v7292_v40 = vrot.slane %v7290_v51, 1  ;;  %v5540_v45 = vsel %vm1323_vm8, %v13799_v17, %v5473_v19  ;;  %v5543_v6 = vsel %vm1323_vm8, %v13789_v61, %v5475_v48  ;;  %v10031_v61 = vld [vmem:[%s13758_s21 + $0xc8] sm:$0xe]  ;;  %v10033_v51 = vld [vmem:[%s13758_s21 + $0xd8] sm:$0xe] }
 0x703   : >> { %5918 = vrot.lane.b32.xlu0 %v5868_v52, %s11564_s1  ;;  %5920 = vrot.lane.b32.xlu1 %v5875_v3, %s11564_s1  ;;  %v7302_v3 = vshrl.u32 %v14157_v24, 16  ;;  %v7295_v39 = vshrl.u32 %v10040_v44, 16  ;;  %v7286_v17 = vor.u32 %v7285_v35, %v7281_v21  ;;  %v7299_v19 = vrot.slane %v7297_v4, 1  ;;  %v14211_v44 = vld [vmem:[%s13758_s21 + $0x44] sm:$0x1] }
 0x704   : >> { %v7306_v25 = vrot.slane %v7304_v0, 1  ;;  %v7293_v48 = vor.u32 %v7292_v40, %v7288_v33  ;;  %v10047_v22 = vcombine.low %v10031_v61, %v14135_v53  ;;  %v10049_v0 = vcombine.low %v10033_v51, %v14147_v43 }
 0x705   : >> { %v6618_v59 = vpop.permute.xlu0 %6617  ;;  %v6620_v55 = vpop.permute.xlu1 %6619 }
 0x706   : >> { %v6685_v38 = vsel %vm1323_vm8, %v13815_v2, %v6618_v59  ;;  %v6688_v34 = vsel %vm1323_vm8, %v13805_v30, %v6620_v55  ;;  %v7300_v59 = vor.u32 %v7299_v19, %v7295_v39  ;;  %v10032_v30 = vld [vmem:[%s13758_s21 + $0xd0] sm:$0xe]  ;;  %v7307_v24 = vor.u32 %v7306_v25, %v7302_v3 }
 0x707   : >> { %5922 = vrot.lane.b32.xlu0 %v5882_v46, %s11564_s1  ;;  %5924 = vrot.lane.b32.xlu1 %v5889_v49, %s11564_s1  ;;  %v9812_v46 = vld [vmem:[%s13758_s21 + $0x30] sm:$0xf]  ;;  %v9813_v49 = vld [vmem:[%s13758_s21 + $0x38] sm:$0xf]  ;;  %v10048_v21 = vcombine.low %v10032_v30, %v14151_v27 }
 0x708   : >> { %v9836_v55 = vcombine.low %v9812_v46, %v14185_v14  ;;  %v9837_v53 = vcombine.low %v9813_v49, %v14194_v16  ;;  %v14241_v27 = vld [vmem:[%s15216_s6 + $0x48] sm:$0xff]  }
 0x709   : >> { %v6662_v11 = vpop.permute.xlu0 %6661  ;;  %v6664_v5 = vpop.permute.xlu1 %6663  ;;  %v14258_v49 = vld [vmem:[%s13758_s21 + $0xac] sm:$0x1] }
 0x70a   : >> { %v6702_v31 = vsel %vm1710_vm11, %v6679_v9, %v6662_v11  ;;  %v6704_v15 = vsel %vm1710_vm11, %v6682_v8, %v6664_v5  ;;  %v9815_v9 = vld [vmem:[%s13758_s21 + $0x48] sm:$0xf]  ;;  %v14220_v11 = vld [vmem:[%s13758_s21 + $0x4c] sm:$0x1]  ;;  %v7353_v8 = vrot.slane %v10047_v22, 1  ;;  %v5728_v5 = vsel %vm2002_vm10, %v11234_v26, 0 }
 0x70b   : >> { %5966 = vrot.lane.b32.xlu0 %v5958_v10, %s11563_s19  ;;  %5968 = vrot.lane.b32.xlu1 %v5959_v12, %s11563_s19  ;;  %v9949_v29 = vcombine.low %v6702_v31, %v6704_v15  ;;  %v10046_v10 = vcombine.low %v10030_v18, %v14130_v7  ;;  %v9814_v7 = vld [vmem:[%s13758_s21 + $0x40] sm:$0xf]  ;;  %v11224_v12 = vld [vmem:[%s15216_s6 + $0x44] ss:$0 sps:$4 sm:$0xff]   ;;  %v5893_v15 = vshll.u32 %v9836_v55, 16  ;;  %v5900_v4 = vshll.u32 %v9837_v53, 16 }
 0x70c   : >> { %v14227_v31 = vld [vmem:[%s15216_s6 + $0x18] sm:$0xff]   ;;  %v9838_v35 = vcombine.low %v9814_v7, %v14211_v44  ;;  %v5891_v43 = vshrl.u32 %v9836_v55, 16 }
 0x70d   : >> { %v5521_v52 = vpop.permute.xlu0 %5520  ;;  %v5523_v13 = vpop.permute.xlu1 %5522  ;;  %10519 = vmatprep.mubr.msk.bf16.mxu0 %vm1989_vm12, %v9949_v29  ;;  %v9839_v29 = vcombine.low %v9815_v9, %v14220_v11  ;;  %v9829_v22 = vld [vmem:[%s13758_s21 + $0x38] sm:$0xe] }
 0x70e   : >> { %v5561_v42 = vsel %vm1710_vm11, %v5540_v45, %v5521_v52  ;;  %v5563_v60 = vsel %vm1710_vm11, %v5543_v6, %v5523_v13  ;;  %v5895_v45 = vrot.slane %v5893_v15, 1  ;;  %v5907_v52 = vshll.u32 %v9838_v35, 16  ;;  %v9831_v15 = vld [vmem:[%s13758_s21 + $0x48] sm:$0xe] }
 0x70f   : >> { %5970 = vrot.lane.b32.xlu0 %v5960_v62, %s11563_s19  ;;  %v9788_v20 = vcombine.low %v5561_v42, %v5563_v60  ;;  %5972 = vrot.lane.b32.xlu1 %v5961_v56, %s11563_s19  ;;  %v7352_v62 = vrot.slane %v10046_v10, 1  ;;  %v7109_v56 = vsel %vm2002_vm10, %v11224_v12, 0  ;;  %v7355_v6 = vrot.slane %v10049_v0, 1  ;;  %v10062_v10 = vld [vmem:[%s13758_s21 + $0xb0] sm:$0xf] }
 0x710   : >> { %v5898_v13 = vshrl.u32 %v9837_v53, 16  ;;  %v5902_v42 = vrot.slane %v5900_v4, 1  ;;  %v5914_v3 = vshll.u32 %v9839_v29, 16  ;;  %v5896_v18 = vor.u32 %v5895_v45, %v5891_v43  ;;  %v14286_v0 = vld [vmem:[%s13758_s21 + $0xc4] sm:$0x1] }
 0x711   : >> { %v6666_v50 = vpop.permute.xlu0 %6665  ;;  %v6668_v32 = vpop.permute.xlu1 %6667  ;;  %10472 = vmatmul.mubr.msk.bf16.vlgmr.msra.gmra.mrb[0].mxu1 %vm1989_vm12, %v9788_v20  ;;  %v5905_v20 = vshrl.u32 %v9838_v35, 16  ;;  %v9845_v9 = vcombine.low %v9829_v22, %v14194_v16  ;;  %v10064_v35 = vld [vmem:[%s13758_s21 + $0xc0] sm:$0xf] }
 0x712   : >> { %v6706_v36 = vsel %vm1710_vm11, %v6685_v38, %v6666_v50  ;;  %v6708_v2 = vsel %vm1710_vm11, %v6688_v34, %v6668_v32  ;;  %10480 = vmatpush3.bf16.msra.mxu1 %v13966_v41  ;;  %v5916_v38 = vrot.slane %v5914_v3, 1  ;;  %v10061_v50 = vld [vmem:[%s13758_s21 + $0xa8] sm:$0xf]  ;;  %v11293_v34 = vld [vmem:[%s13758_s21 + $0x38] sm:$0xf]  ;;  %v10088_v43 = vcombine.low %v10064_v35, %v14286_v0 }
 0x713   : >> { %7316 = vrot.lane.b32.xlu0 %v7286_v17, %s11564_s1  ;;  %v9950_v58 = vcombine.low %v6706_v36, %v6708_v2  ;;  %7318 = vrot.lane.b32.xlu1 %v7293_v48, %s11564_s1  ;;  %v9828_v48 = vld [vmem:[%s13758_s21 + $0x30] sm:$0xe]  ;;  %v14265_v2 = vld [vmem:[%s13758_s21 + $0xb4] sm:$0x1] }
 0x714   : >> { %10746 = vmatprep.subr.msk.bf16.mxu1 %vm2002_vm10, %v11234_v26  ;;  %v5912_v26 = vshrl.u32 %v9839_v29, 16  ;;  %v9844_v7 = vcombine.low %v9828_v48, %v14185_v14 }
 0x715   : >> { %v5477_v1 = vpop.permute.xlu0 %5476  ;;  %v5479_v41 = vpop.permute.xlu1 %5478  ;;  %10520 = vmatmul.mubr.msk.bf16.vlgmr.msra.gmra.mrb[0].mxu0 %vm1989_vm12, %v9950_v58 }
 0x716   : >> { %10528 = vmatpush3.bf16.msra.mxu0 %v13961_v23  ;;  %10482 = vmatpush3.bf16.msra.mxu1 %v5728_v5  ;;  %v7354_v23 = vrot.slane %v10048_v21, 1  ;;  %v5546_v39 = vsel %vm1323_vm8, %v13840_v28, %v5477_v1  ;;  %v5549_v17 = vsel %vm1323_vm8, %v13847_v37, %v5479_v41  ;;  %v5909_v28 = vrot.slane %v5907_v52, 1  ;;  %v9830_v41 = vld [vmem:[%s13758_s21 + $0x40] sm:$0xe]  ;;  %v10063_v5 = vld [vmem:[%s13758_s21 + $0xb8] sm:$0xf] }
 0x717   : >> { %7320 = vrot.lane.b32.xlu0 %v7300_v59, %s11564_s1  ;;  %7322 = vrot.lane.b32.xlu1 %v7307_v24, %s11564_s1  ;;  %v5903_v37 = vor.u32 %v5902_v42, %v5898_v13  ;;  %v11294_v59 = vld [vmem:[%s13758_s21 + $0x40] sm:$0xf]  ;;  %v5917_v51 = vor.u32 %v5916_v38, %v5912_v26  ;;  %v5962_v4 = vrot.slane %v9844_v7, 1  ;;  %v9846_v29 = vcombine.low %v9830_v41, %v14211_v44  ;;  %v10078_v38 = vld [vmem:[%s13758_s21 + $0xb0] sm:$0xe] }
 0x718   : >> { %10751 = vmatprep.subr.msk.bf16.mxu0 %vm2002_vm10, %v11224_v12  ;;  %10491 = vmatprep.subr.bf16.mxu1 %v14227_v31  ;;  %v5910_v53 = vor.u32 %v5909_v28, %v5905_v20  ;;  %v10085_v12 = vcombine.low %v10061_v50, %v14258_v49  ;;  %v10077_v50 = vld [vmem:[%s13758_s21 + $0xa8] sm:$0xe]  ;;  %v11298_v7 = vld [vmem:[%s13758_s21 + $0x78] sm:$0xf] }
 0x719   : >> { %v5481_v33 = vpop.permute.xlu0 %5480  ;;  %v5483_v40 = vpop.permute.xlu1 %5482 }
 0x71a   : >> { %10530 = vmatpush3.bf16.msra.mxu0 %v7109_v56  ;;  %v5552_v32 = vsel %vm1323_vm8, %v11293_v34, %v5481_v33  ;;  %v5555_v30 = vsel %vm1323_vm8, %v11294_v59, %v5483_v40  ;;  %v7602_v16 = vshll.u32 %v10085_v12, 16  ;;  %v5963_v33 = vrot.slane %v9845_v9, 1  ;;  %v14309_v59 = vld [vmem:[%s13758_s21 + $0x54] sm:$0x1] }
 0x71b   : >> { %7364 = vrot.lane.b32.xlu0 %v7352_v62, %s11563_s19  ;;  %7366 = vrot.lane.b32.xlu1 %v7353_v8, %s11563_s19  ;;  %v10086_v8 = vcombine.low %v10062_v10, %v14265_v2  ;;  %v14281_v62 = vld [vmem:[%s13758_s21 + $0xbc] sm:$0x1]  ;;  %v9847_v40 = vcombine.low %v9831_v15, %v14220_v11  ;;  %v7600_v13 = vshrl.u32 %v10085_v12, 16  ;;  %v7623_v11 = vshll.u32 %v10088_v43, 16  ;;  %v9858_v10 = vld [vmem:[%s13758_s21 + $0x50] sm:$0xf] }
 0x71c   : >> { %10539 = vmatprep.subr.bf16.mxu0 %v14241_v27  ;;  %v10087_v56 = vcombine.low %v10063_v5, %v14281_v62  ;;  %v7604_v44 = vrot.slane %v7602_v16, 1  ;;  %v10094_v9 = vcombine.low %v10078_v38, %v14265_v2  ;;  %v10093_v5 = vcombine.low %v10077_v50, %v14258_v49  ;;  %v14333_v2 = vld [vmem:[%s13758_s21 + $0x60] sm:$0xf]  ;;  %v11260_v16 = vld [vmem:[%s15216_s6 + $0x50] ss:$0 sps:$4 sm:$0xff]  }
 0x71d   : >> { %v5525_v60 = vpop.permute.xlu0 %5524  ;;  %v5527_v25 = vpop.permute.xlu1 %5526  ;;  %v5965_v3 = vrot.slane %v9847_v40, 1  ;;  %v7625_v22 = vrot.slane %v7623_v11, 1  ;;  %v9882_v15 = vcombine.low %v9858_v10, %v14309_v59  ;;  %v10080_v49 = vld [vmem:[%s13758_s21 + $0xc0] sm:$0xe]  ;;  %v14346_v40 = vld [vmem:[%s13758_s21 + $0x6c] sm:$0x1] }
 0x71e   : >> { %v5565_v19 = vsel %vm1710_vm11, %v5546_v39, %v5525_v60  ;;  %v5567_v61 = vsel %vm1710_vm11, %v5549_v17, %v5527_v25  ;;  %v7616_v42 = vshll.u32 %v10087_v56, 16  ;;  %v7607_v39 = vshrl.u32 %v10086_v8, 16  ;;  %v11295_v17 = vld [vmem:[%s13758_s21 + $0x60] sm:$0xf]  ;;  %v9875_v10 = vld [vmem:[%s13758_s21 + $0x58] sm:$0xe] }
 0x71f   : >> { %7368 = vrot.lane.b32.xlu0 %v7354_v23, %s11563_s19  ;;  %v9789_v46 = vcombine.low %v5565_v19, %v5567_v61  ;;  %7370 = vrot.lane.b32.xlu1 %v7355_v6, %s11563_s19  ;;  %v7609_v23 = vshll.u32 %v10086_v8, 16  ;;  %v5964_v6 = vrot.slane %v9846_v29, 1  ;;  %v11296_v61 = vld [vmem:[%s13758_s21 + $0x68] sm:$0xf]  ;;  %v14336_v29 = vld [vmem:[%s13758_s21 + $0x64] sm:$0x1] }
 0x720   : >> { %v7618_v26 = vrot.slane %v7616_v42, 1  ;;  %v6211_v11 = vshrl.u32 %v9882_v15, 16 }
 0x721   : >> { %v5529_v36 = vpop.permute.xlu0 %5528  ;;  %v5531_v55 = vpop.permute.xlu1 %5530  ;;  %10475 = vmatprep.mubr.msk.bf16.mxu1 %vm1989_vm12, %v9789_v46  ;;  %v7611_v60 = vrot.slane %v7609_v23, 1  ;;  %v7605_v46 = vor.u32 %v7604_v44, %v7600_v13  ;;  %v9884_v13 = vcombine.low %v14333_v2, %v14336_v29  ;;  %v10096_v44 = vcombine.low %v10080_v49, %v14286_v0 }
 0x722   : >> { %v5569_v58 = vsel %vm1710_vm11, %v5552_v32, %v5529_v36  ;;  %v5571_v24 = vsel %vm1710_vm11, %v5555_v30, %v5531_v55  ;;  %v7621_v36 = vshrl.u32 %v10088_v43, 16  ;;  %v11297_v30 = vld [vmem:[%s13758_s21 + $0x70] sm:$0xf]  ;;  %v7696_v43 = vrot.slane %v10094_v9, 1 }
 0x723   : >> { %5926 = vrot.lane.b32.xlu0 %v5896_v18, %s11564_s1  ;;  %v9790_v1 = vcombine.low %v5569_v58, %v5571_v24  ;;  %5928 = vrot.lane.b32.xlu1 %v5903_v37, %s11564_s1  ;;  %v7614_v37 = vshrl.u32 %v10087_v56, 16  ;;  %v7612_v32 = vor.u32 %v7611_v60, %v7607_v39  ;;  %v14314_v24 = vld [vmem:[%s13758_s21 + $0x58] sm:$0xf]  ;;  %v7457_v39 = vsel %vm2002_vm10, %v11260_v16, 0  ;;  %v11301_v9 = vld [vmem:[%s13758_s21 + $0x10] sm:$0xf] }
 0x725   : >> { %v6961_v21 = vpop.permute.xlu0 %6960  ;;  %v6963_v14 = vpop.permute.xlu1 %6962  ;;  %10476 = vmatmul.mubr.msk.bf16.gmra.mrb[4].mxu1 %vm1989_vm12, %v9790_v1  ;;  %v7619_v8 = vor.u32 %v7618_v26, %v7614_v37  ;;  %v11300_v37 = vld [vmem:[%s13758_s21 + $0x8] sm:$0xf] }
 0x726   : >> { %v7026_v25 = vsel %vm1323_vm8, %v11295_v17, %v6961_v21  ;;  %v7029_v18 = vsel %vm1323_vm8, %v11296_v61, %v6963_v14  ;;  %v10079_v21 = vld [vmem:[%s13758_s21 + $0xb8] sm:$0xe]  ;;  %v7626_v14 = vor.u32 %v7625_v22, %v7621_v36  ;;  %v6225_v36 = vshrl.u32 %v9884_v13, 16 }
 0x727   : >> { %5930 = vrot.lane.b32.xlu0 %v5910_v53, %s11564_s1  ;;  %5932 = vrot.lane.b32.xlu1 %v5917_v51, %s11564_s1  ;;  %v14317_v53 = vld [vmem:[%s13758_s21 + $0x5c] sm:$0x1] }
 0x729   : >> { %v6965_v45 = vpop.permute.xlu0 %6964  ;;  %v6967_v52 = vpop.permute.xlu1 %6966 }
 0x72a   : >> { %v7032_v55 = vsel %vm1323_vm8, %v11297_v30, %v6965_v45  ;;  %v7035_v12 = vsel %vm1323_vm8, %v11298_v7, %v6967_v52  ;;  %v7695_v45 = vrot.slane %v10093_v5, 1  ;;  %v10095_v52 = vcombine.low %v10079_v21, %v14281_v62  ;;  %v14363_v62 = vld [vmem:[%s15216_s6 + $0x54] sm:$0xff]   ;;  %v9874_v30 = vld [vmem:[%s13758_s21 + $0x50] sm:$0xe] }
 0x72b   : >> { %5974 = vrot.lane.b32.xlu0 %v5962_v4, %s11563_s19  ;;  %5976 = vrot.lane.b32.xlu1 %v5963_v33, %s11563_s19  ;;  %v9883_v4 = vcombine.low %v14314_v24, %v14317_v53  ;;  %v14343_v33 = vld [vmem:[%s13758_s21 + $0x68] sm:$0xf]  ;;  %v14387_v5 = vld [vmem:[%s13758_s21 + $0xd0] sm:$0xf] }
 0x72c   : >> { %v7697_v0 = vrot.slane %v10095_v52, 1  ;;  %v14390_v21 = vld [vmem:[%s13758_s21 + $0xd4] sm:$0x1] }
 0x72d   : >> { %v7009_v19 = vpop.permute.xlu0 %7008  ;;  %v7011_v20 = vpop.permute.xlu1 %7010  ;;  %v6220_v42 = vshll.u32 %v9883_v4, 16  ;;  %v6218_v61 = vshrl.u32 %v9883_v4, 16 }
 0x72e   : >> { %v7049_v28 = vsel %vm1710_vm11, %v7026_v25, %v7009_v19  ;;  %v7051_v48 = vsel %vm1710_vm11, %v7029_v18, %v7011_v20  ;;  %v6227_v25 = vshll.u32 %v9884_v13, 16  ;;  %v7698_v19 = vrot.slane %v10096_v44, 1  ;;  %v14407_v13 = vld [vmem:[%s13758_s21 + $0xd8] sm:$0xf]  ;;  %v14410_v44 = vld [vmem:[%s13758_s21 + $0xdc] sm:$0x1] }
 0x72f   : >> { %5978 = vrot.lane.b32.xlu0 %v5964_v6, %s11563_s19  ;;  %v10000_v34 = vcombine.low %v7049_v28, %v7051_v48  ;;  %5980 = vrot.lane.b32.xlu1 %v5965_v3, %s11563_s19  ;;  %v6213_v6 = vshll.u32 %v9882_v15, 16  ;;  %v9885_v3 = vcombine.low %v14343_v33, %v14346_v40  ;;  %v6222_v18 = vrot.slane %v6220_v42, 1  ;;  %v11299_v28 = vld [vmem:[%s13758_s21] sm:$0xf]  ;;  %v11302_v15 = vld [vmem:[%s13758_s21 + $0x18] sm:$0xf] }
 0x730   : >> { %v6229_v22 = vrot.slane %v6227_v25, 1  ;;  %v11270_v42 = vld [vmem:[%s15216_s6 + $0x20] ss:$0 sps:$4 sm:$0xff]  }
 0x731   : >> { %v7013_v58 = vpop.permute.xlu0 %7012  ;;  %v7015_v1 = vpop.permute.xlu1 %7014  ;;  %10531 = vmatprep.mubr.msk.bf16.mxu0 %vm1989_vm12, %v10000_v34  ;;  %v6215_v17 = vrot.slane %v6213_v6, 1  ;;  %v6234_v20 = vshll.u32 %v9885_v3, 16  ;;  %v6232_v7 = vshrl.u32 %v9885_v3, 16  ;;  %v9877_v3 = vld [vmem:[%s13758_s21 + $0x68] sm:$0xe] }
 0x732   : >> { %v7053_v51 = vsel %vm1710_vm11, %v7032_v55, %v7013_v58  ;;  %v7055_v41 = vsel %vm1710_vm11, %v7035_v12, %v7015_v1  ;;  %v6223_v58 = vor.u32 %v6222_v18, %v6218_v61  ;;  %v14379_v1 = vld [vmem:[%s13758_s21 + $0xc8] sm:$0xf]  ;;  %v6230_v49 = vor.u32 %v6229_v22, %v6225_v36  ;;  %v11303_v36 = vld [vmem:[%s13758_s21 + $0x80] sm:$0xf] }
 0x733   : >> { %7655 = vrot.lane.b32.xlu0 %v7605_v46, %s11564_s1  ;;  %v10001_v35 = vcombine.low %v7053_v51, %v7055_v41  ;;  %7657 = vrot.lane.b32.xlu1 %v7612_v32, %s11564_s1  ;;  %v6216_v32 = vor.u32 %v6215_v17, %v6211_v11  ;;  %v6236_v12 = vrot.slane %v6234_v20, 1  ;;  %v14382_v51 = vld [vmem:[%s13758_s21 + $0xcc] sm:$0x1]  ;;  %v9893_v61 = vcombine.low %v9877_v3, %v14346_v40 }
 0x735   : >> { %v5238_v56 = vpop.permute.xlu0 %5237  ;;  %10532 = vmatmul.mubr.msk.bf16.vlgmr.msra.gmra.mrb[0].mxu0 %vm1989_vm12, %v10001_v35  ;;  %v5240_v23 = vpop.permute.xlu1 %5239  ;;  %v6237_v6 = vor.u32 %v6236_v12, %v6232_v7 }
 0x736   : >> { %10540 = vmatpush3.bf16.msra.mxu0 %v14241_v27  ;;  %v5303_v48 = vsel %vm1323_vm8, %v11299_v28, %v5238_v56  ;;  %v5306_v26 = vsel %vm1323_vm8, %v11300_v37, %v5240_v23  ;;  %v9890_v23 = vcombine.low %v9874_v30, %v14309_v59  ;;  %v6067_v28 = vsel %vm2002_vm10, %v11270_v42, 0  ;;  %v11304_v30 = vld [vmem:[%s13758_s21 + $0x88] sm:$0xf] }
 0x737   : >> { %7659 = vrot.lane.b32.xlu0 %v7619_v8, %s11564_s1  ;;  %7661 = vrot.lane.b32.xlu1 %v7626_v14, %s11564_s1 }
 0x738   : >> { %10752 = vmatprep.subr.msk.bf16.mxu0 %vm2002_vm10, %v11260_v16  ;;  %v9891_v16 = vcombine.low %v9875_v10, %v14317_v53  ;;  %v10090_v53 = vcombine.low %v14387_v5, %v14390_v21  ;;  %v6306_v11 = vrot.slane %v9890_v23, 1  ;;  %v11305_v23 = vld [vmem:[%s13758_s21 + $0x90] sm:$0xf] }
 0x739   : >> { %v5242_v60 = vpop.permute.xlu0 %5241  ;;  %v5244_v27 = vpop.permute.xlu1 %5243 }
 0x73a   : >> { %10542 = vmatpush3.bf16.msra.mxu0 %v7457_v39  ;;  %v5309_v41 = vsel %vm1323_vm8, %v11301_v9, %v5242_v60  ;;  %v5312_v35 = vsel %vm1323_vm8, %v11302_v15, %v5244_v27  ;;  %v14417_v39 = vld [vmem:[%s13758_s21 + $0xe0] sm:$0xf]  ;;  %v14420_v60 = vld [vmem:[%s13758_s21 + $0xe4] sm:$0x1]  ;;  %v7637_v18 = vshll.u32 %v10090_v53, 16 }
 0x73b   : >> { %7703 = vrot.lane.b32.xlu0 %v7695_v45, %s11563_s19  ;;  %7705 = vrot.lane.b32.xlu1 %v7696_v43, %s11563_s19  ;;  %v9876_v43 = vld [vmem:[%s13758_s21 + $0x60] sm:$0xe]  ;;  %v10089_v45 = vcombine.low %v14379_v1, %v14382_v51  ;;  %v10092_v20 = vcombine.low %v14417_v39, %v14420_v60  ;;  %v10081_v15 = vld [vmem:[%s13758_s21 + $0xc8] sm:$0xe] }
 0x73c   : >> { %10551 = vmatprep.subr.bf16.mxu0 %v14363_v62  ;;  %v9892_v17 = vcombine.low %v9876_v43, %v14336_v29  ;;  %v14437_v29 = vld [vmem:[%s15216_s6 + $0x24] sm:$0xff]  }
 0x73d   : >> { %v5286_v46 = vpop.permute.xlu0 %5285  ;;  %v5288_v38 = vpop.permute.xlu1 %5287  ;;  %v7630_v25 = vshll.u32 %v10089_v45, 16 }
 0x73e   : >> { %v5327_v50 = vsel %vm1710_vm11, %v5303_v48, %v5286_v46  ;;  %v5329_v34 = vsel %vm1710_vm11, %v5306_v26, %v5288_v38  ;;  %v6308_v40 = vrot.slane %v9892_v17, 1  ;;  %v7628_v46 = vshrl.u32 %v10089_v45, 16 }
 0x73f   : >> { %7707 = vrot.lane.b32.xlu0 %v7697_v0, %s11563_s19  ;;  %v9797_v55 = vcombine.low %v5327_v50, %v5329_v34  ;;  %7709 = vrot.lane.b32.xlu1 %v7698_v19, %s11563_s19  ;;  %v6307_v0 = vrot.slane %v9891_v16, 1  ;;  %v10091_v19 = vcombine.low %v14407_v13, %v14410_v44  ;;  %v7632_v37 = vrot.slane %v7630_v25, 1 }
 0x740   : >> { %v6309_v38 = vrot.slane %v9893_v61, 1  ;;  %v7635_v50 = vshrl.u32 %v10090_v53, 16  ;;  %v7639_v34 = vrot.slane %v7637_v18, 1  ;;  %v14464_v53 = vld [vmem:[%s13758_s21 + $0x7c] sm:$0x1]  ;;  %v10097_v17 = vcombine.low %v10081_v15, %v14382_v51 }
 0x741   : >> { %v5290_v8 = vpop.permute.xlu0 %5289  ;;  %v5292_v14 = vpop.permute.xlu1 %5291  ;;  %10483 = vmatprep.mubr.msk.bf16.mxu1 %vm1989_vm12, %v9797_v55  ;;  %v7644_v26 = vshll.u32 %v10091_v19, 16  ;;  %v7633_v9 = vor.u32 %v7632_v37, %v7628_v46  ;;  %v10084_v46 = vld [vmem:[%s13758_s21 + $0xe0] sm:$0xe]  ;;  %v14488_v51 = vld [vmem:[%s13758_s21 + $0x88] sm:$0xf] }
 0x742   : >> { %v5331_v4 = vsel %vm1710_vm11, %v5309_v41, %v5290_v8  ;;  %v5333_v56 = vsel %vm1710_vm11, %v5312_v35, %v5292_v14  ;;  %v7642_v41 = vshrl.u32 %v10091_v19, 16  ;;  %v7640_v14 = vor.u32 %v7639_v34, %v7635_v50  ;;  %v14491_v37 = vld [vmem:[%s13758_s21 + $0x8c] sm:$0x1]  ;;  %v11307_v15 = vld [vmem:[%s13758_s21 + $0x20] sm:$0xf] }
 0x743   : >> { %6266 = vrot.lane.b32.xlu0 %v6216_v32, %s11564_s1  ;;  %v9798_v52 = vcombine.low %v5331_v4, %v5333_v56  ;;  %6268 = vrot.lane.b32.xlu1 %v6223_v58, %s11564_s1  ;;  %v7651_v32 = vshll.u32 %v10092_v20, 16  ;;  %v7646_v8 = vrot.slane %v7644_v26, 1  ;;  %v7649_v4 = vshrl.u32 %v10092_v20, 16  ;;  %v14452_v56 = vld [vmem:[%s13758_s21 + $0x70] sm:$0xf] }
 0x744   : >> { %v10083_v20 = vld [vmem:[%s13758_s21 + $0xd8] sm:$0xe] }
 0x745   : >> { %v6969_v59 = vpop.permute.xlu0 %6968  ;;  %v6971_v27 = vpop.permute.xlu1 %6970  ;;  %10484 = vmatmul.mubr.msk.bf16.vlgmr.msra.gmra.mrb[0].mxu1 %vm1989_vm12, %v9798_v52  ;;  %v7653_v16 = vrot.slane %v7651_v32, 1  ;;  %v10082_v52 = vld [vmem:[%s13758_s21 + $0xd0] sm:$0xe] }
 0x746   : >> { %10492 = vmatpush3.bf16.msra.mxu1 %v14227_v31  ;;  %v7038_v22 = vsel %vm1323_vm8, %v11303_v36, %v6969_v59  ;;  %v7041_v55 = vsel %vm1323_vm8, %v11304_v30, %v6971_v27  ;;  %v10098_v18 = vcombine.low %v10082_v52, %v14390_v21  ;;  %v7699_v21 = vrot.slane %v10097_v17, 1 }
 0x747   : >> { %6270 = vrot.lane.b32.xlu0 %v6230_v49, %s11564_s1  ;;  %6272 = vrot.lane.b32.xlu1 %v6237_v6, %s11564_s1  ;;  %v14455_v49 = vld [vmem:[%s13758_s21 + $0x74] sm:$0x1]  ;;  %v14461_v6 = vld [vmem:[%s13758_s21 + $0x78] sm:$0xf]  ;;  %v7654_v61 = vor.u32 %v7653_v16, %v7649_v4  ;;  %v10100_v36 = vcombine.low %v10084_v46, %v14420_v60 }
 0x748   : >> { %10747 = vmatprep.subr.msk.bf16.mxu1 %vm2002_vm10, %v11270_v42  ;;  %v11306_v42 = vld [vmem:[%s13758_s21 + $0x98] sm:$0xf]  ;;  %v9886_v25 = vcombine.low %v14452_v56, %v14455_v49  ;;  %v7700_v32 = vrot.slane %v10098_v18, 1  ;;  %v11308_v4 = vld [vmem:[%s13758_s21 + $0x28] sm:$0xf] }
 0x749   : >> { %v6973_v48 = vpop.permute.xlu0 %6972  ;;  %v6975_v31 = vpop.permute.xlu1 %6974  ;;  %v14526_v46 = vld [vmem:[%s13758_s21 + $0xbc] sm:$0x1] }
 0x74a   : >> { %10494 = vmatpush3.bf16.msra.mxu1 %v6067_v28  ;;  %v7044_v43 = vsel %vm1323_vm8, %v11305_v23, %v6973_v48  ;;  %v7047_v59 = vsel %vm1323_vm8, %v11306_v42, %v6975_v31  ;;  %v9887_v28 = vcombine.low %v14461_v6, %v14464_v53  ;;  %v14481_v48 = vld [vmem:[%s13758_s21 + $0x80] sm:$0xf]  ;;  %v14484_v31 = vld [vmem:[%s13758_s21 + $0x84] sm:$0x1]  ;;  %v6241_v50 = vshll.u32 %v9886_v25, 16 }
 0x74b   : >> { %6314 = vrot.lane.b32.xlu0 %v6306_v11, %s11563_s19  ;;  %6316 = vrot.lane.b32.xlu1 %v6307_v0, %s11563_s19  ;;  %v7647_v11 = vor.u32 %v7646_v8, %v7642_v41  ;;  %v9888_v34 = vcombine.low %v14481_v48, %v14484_v31 }
 0x74c   : >> { %10503 = vmatprep.subr.bf16.mxu1 %v14437_v29  ;;  %v6246_v41 = vshrl.u32 %v9887_v28, 16 }
 0x74d   : >> { %v7017_v10 = vpop.permute.xlu0 %7016  ;;  %v7019_v58 = vpop.permute.xlu1 %7018  ;;  %v6253_v42 = vshrl.u32 %v9888_v34, 16 }
 0x74e   : >> { %v7057_v7 = vsel %vm1710_vm11, %v7038_v22, %v7017_v10  ;;  %v7059_v12 = vsel %vm1710_vm11, %v7041_v55, %v7019_v58  ;;  %v6248_v22 = vshll.u32 %v9887_v28, 16  ;;  %v9889_v10 = vcombine.low %v14488_v51, %v14491_v37  ;;  %v9879_v28 = vld [vmem:[%s13758_s21 + $0x78] sm:$0xe] }
 0x74f   : >> { %6318 = vrot.lane.b32.xlu0 %v6308_v40, %s11563_s19  ;;  %v10002_v35 = vcombine.low %v7057_v7, %v7059_v12  ;;  %6320 = vrot.lane.b32.xlu1 %v6309_v38, %s11563_s19  ;;  %v10099_v38 = vcombine.low %v10083_v20, %v14410_v44  ;;  %v6239_v58 = vshrl.u32 %v9886_v25, 16  ;;  %v6243_v7 = vrot.slane %v6241_v50, 1  ;;  %v14514_v25 = vld [vmem:[%s13758_s21 + $0xb0] sm:$0xf] }
 0x750   : >> { %v6255_v12 = vshll.u32 %v9888_v34, 16  ;;  %v6250_v8 = vrot.slane %v6248_v22, 1  ;;  %v6262_v60 = vshll.u32 %v9889_v10, 16  ;;  %v14533_v34 = vld [vmem:[%s13758_s21 + $0xc8] sm:$0xf] }
 0x751   : >> { %v7021_v45 = vpop.permute.xlu0 %7020  ;;  %v7023_v3 = vpop.permute.xlu1 %7022  ;;  %10535 = vmatprep.mubr.msk.bf16.mxu0 %vm1989_vm12, %v10002_v35  ;;  %v7701_v44 = vrot.slane %v10099_v38, 1  ;;  %v6244_v52 = vor.u32 %v6243_v7, %v6239_v58 }
 0x752   : >> { %v7061_v27 = vsel %vm1710_vm11, %v7044_v43, %v7021_v45  ;;  %v7063_v0 = vsel %vm1710_vm11, %v7047_v59, %v7023_v3  ;;  %v6257_v59 = vrot.slane %v6255_v12, 1  ;;  %v9878_v3 = vld [vmem:[%s13758_s21 + $0x70] sm:$0xe]  ;;  %v6264_v17 = vrot.slane %v6262_v60, 1  ;;  %v9881_v60 = vld [vmem:[%s13758_s21 + $0x88] sm:$0xe] }
 0x753   : >> { %7663 = vrot.lane.b32.xlu0 %v7633_v9, %s11564_s1  ;;  %v10003_v19 = vcombine.low %v7061_v27, %v7063_v0  ;;  %7665 = vrot.lane.b32.xlu1 %v7640_v14, %s11564_s1  ;;  %v7702_v9 = vrot.slane %v10100_v36, 1  ;;  %v6251_v0 = vor.u32 %v6250_v8, %v6246_v41  ;;  %v9895_v12 = vcombine.low %v9879_v28, %v14464_v53 }
 0x754   : >> { %v6258_v22 = vor.u32 %v6257_v59, %v6253_v42 }
 0x755   : >> { %v5246_v40 = vpop.permute.xlu0 %5245  ;;  %v5248_v26 = vpop.permute.xlu1 %5247  ;;  %10536 = vmatmul.mubr.msk.bf16.gmra.mrb[4].mxu0 %vm1989_vm12, %v10003_v19  ;;  %v14517_v19 = vld [vmem:[%s13758_s21 + $0xb4] sm:$0x1] }
 0x756   : >> { %v5315_v35 = vsel %vm1323_vm8, %v11307_v15, %v5246_v40  ;;  %v5318_v16 = vsel %vm1323_vm8, %v11308_v4, %v5248_v26  ;;  %v14523_v40 = vld [vmem:[%s13758_s21 + $0xb8] sm:$0xf] }
 0x757   : >> { %7667 = vrot.lane.b32.xlu0 %v7647_v11, %s11564_s1  ;;  %7669 = vrot.lane.b32.xlu1 %v7654_v61, %s11564_s1  ;;  %v6260_v11 = vshrl.u32 %v9889_v10, 16  ;;  %v11309_v61 = vld [vmem:[%s13758_s21 + $0x30] sm:$0xf]  ;;  %v11310_v26 = vld [vmem:[%s13758_s21 + $0x38] sm:$0xf]  ;;  %v9894_v10 = vcombine.low %v9878_v3, %v14455_v49  ;;  %v10137_v41 = vcombine.low %v14523_v40, %v14526_v46 }
 0x759   : >> { %v5250_v30 = vpop.permute.xlu0 %5249  ;;  %v5252_v55 = vpop.permute.xlu1 %5251  ;;  %v6265_v7 = vor.u32 %v6264_v17, %v6260_v11  ;;  %v7954_v11 = vshrl.u32 %v10137_v41, 16 }
 0x75a   : >> { %v5321_v18 = vsel %vm1323_vm8, %v11309_v61, %v5250_v30  ;;  %v10136_v30 = vcombine.low %v14514_v25, %v14517_v19 }
 0x75b   : >> { %7711 = vrot.lane.b32.xlu0 %v7699_v21, %s11563_s19  ;;  %7713 = vrot.lane.b32.xlu1 %v7700_v32, %s11563_s19  ;;  %v5324_v21 = vsel %vm1323_vm8, %v11310_v26, %v5252_v55  ;;  %v14536_v32 = vld [vmem:[%s13758_s21 + $0xcc] sm:$0x1]  ;;  %v14544_v55 = vld [vmem:[%s13758_s21 + $0xc0] sm:$0xf] }
 0x75c   : >> { %v14557_v49 = vcombine.low %v14533_v34, %v14536_v32  ;;  %v7949_v4 = vshll.u32 %v10136_v30, 16  ;;  %v11312_v26 = vld [vmem:[%s13758_s21 + $0xa8] sm:$0xf] }
 0x75d   : >> { %v5294_v14 = vpop.permute.xlu0 %5293  ;;  %v5296_v23 = vpop.permute.xlu1 %5295 }
 0x75e   : >> { %v5335_v43 = vsel %vm1710_vm11, %v5315_v35, %v5294_v14  ;;  %v5337_v45 = vsel %vm1710_vm11, %v5318_v16, %v5296_v23  ;;  %v6310_v14 = vrot.slane %v9894_v10, 1  ;;  %v6311_v16 = vrot.slane %v9895_v12, 1  ;;  %v14580_v12 = vld [vmem:[%s13758_s21 + $0x80] sm:$0xf] }
 0x75f   : >> { %7715 = vrot.lane.b32.xlu0 %v7701_v44, %s11563_s19  ;;  %v9799_v27 = vcombine.low %v5335_v43, %v5337_v45  ;;  %7717 = vrot.lane.b32.xlu1 %v7702_v9, %s11563_s19  ;;  %v14547_v44 = vld [vmem:[%s13758_s21 + $0xc4] sm:$0x1]  ;;  %v9880_v9 = vld [vmem:[%s13758_s21 + $0x80] sm:$0xe]  ;;  %v9897_v23 = vcombine.low %v9881_v60, %v14491_v37  ;;  %v7956_v43 = vshll.u32 %v10137_v41, 16 }
 0x760   : >> { %v10138_v35 = vcombine.low %v14544_v55, %v14547_v44  ;;  %v9896_v53 = vcombine.low %v9880_v9, %v14484_v31  ;;  %v11311_v37 = vld [vmem:[%s13758_s21 + $0xa0] sm:$0xf]  ;;  %v14587_v60 = vld [vmem:[%s13758_s21 + $0x78] sm:$0xf] }
 0x761   : >> { %v5298_v20 = vpop.permute.xlu0 %5297  ;;  %v5300_v38 = vpop.permute.xlu1 %5299  ;;  %10487 = vmatprep.mubr.msk.bf16.mxu1 %vm1989_vm12, %v9799_v27  ;;  %v7947_v27 = vshrl.u32 %v10136_v30, 16  ;;  %v6313_v31 = vrot.slane %v9897_v23, 1  ;;  %v7958_v17 = vrot.slane %v7956_v43, 1 }
 0x762   : >> { %v5339_v50 = vsel %vm1710_vm11, %v5321_v18, %v5298_v20  ;;  %v5341_v36 = vsel %vm1710_vm11, %v5324_v21, %v5300_v38  ;;  %v7963_v59 = vshll.u32 %v10138_v35, 16  ;;  %v6312_v3 = vrot.slane %v9896_v53, 1  ;;  %v11314_v53 = vld [vmem:[%s13758_s21 + $0xb8] sm:$0xf] }
 0x763   : >> { %6274 = vrot.lane.b32.xlu0 %v6244_v52, %s11564_s1  ;;  %v9800_v58 = vcombine.low %v5339_v50, %v5341_v36  ;;  %6276 = vrot.lane.b32.xlu1 %v6251_v0, %s11564_s1  ;;  %v7970_v52 = vshll.u32 %v14557_v49, 16  ;;  %v7951_v0 = vrot.slane %v7949_v4, 1  ;;  %v7968_v20 = vshrl.u32 %v14557_v49, 16  ;;  %v14590_v49 = vld [vmem:[%s13758_s21 + $0x7c] sm:$0x1] }
 0x764   : >> { %v7961_v36 = vshrl.u32 %v10138_v35, 16  ;;  %v7959_v41 = vor.u32 %v7958_v17, %v7954_v11  ;;  %v10130_v17 = vld [vmem:[%s13758_s21 + $0xc0] sm:$0xe] }
 0x765   : >> { %v7309_v8 = vpop.permute.xlu0 %7308  ;;  %v7311_v15 = vpop.permute.xlu1 %7310  ;;  %10488 = vmatmul.mubr.msk.bf16.gmra.mrb[4].mxu1 %vm1989_vm12, %v9800_v58  ;;  %v7972_v28 = vrot.slane %v7970_v52, 1  ;;  %v7952_v30 = vor.u32 %v7951_v0, %v7947_v27  ;;  %v10129_v58 = vld [vmem:[%s13758_s21 + $0xb8] sm:$0xe]  ;;  %v9937_v27 = vcombine.low %v14587_v60, %v14590_v49  ;;  %v14612_v0 = vld [vmem:[%s13758_s21 + $0xdc] sm:$0x1] }
 0x766   : >> { %v7374_v61 = vsel %vm1323_vm8, %v11311_v37, %v7309_v8  ;;  %v7377_v21 = vsel %vm1323_vm8, %v11312_v26, %v7311_v15  ;;  %v14584_v8 = vld [vmem:[%s13758_s21 + $0x84] sm:$0x1]  ;;  %v11313_v15 = vld [vmem:[%s13758_s21 + $0xb0] sm:$0xf]  ;;  %v10145_v43 = vcombine.low %v10129_v58, %v14526_v46  ;;  %v11288_v37 = vld [vmem:[%s15216_s6 + $0x5c] ss:$0 sps:$4 sm:$0xff]  }
 0x767   : >> { %6278 = vrot.lane.b32.xlu0 %v6258_v22, %s11564_s1  ;;  %6280 = vrot.lane.b32.xlu1 %v6265_v7, %s11564_s1  ;;  %v7965_v22 = vrot.slane %v7963_v59, 1  ;;  %v10128_v7 = vld [vmem:[%s13758_s21 + $0xb0] sm:$0xe]  ;;  %v14601_v59 = vld [vmem:[%s13758_s21 + $0xd8] sm:$0xf]  ;;  %v7973_v11 = vor.u32 %v7972_v28, %v7968_v20 }
 0x768   : >> { %v10144_v52 = vcombine.low %v10128_v7, %v14517_v19  ;;  %v14615_v46 = vld [vmem:[%s13758_s21 + $0xd0] sm:$0xf]  ;;  %v14618_v19 = vld [vmem:[%s13758_s21 + $0xd4] sm:$0x1]  ;;  %v14645_v58 = vld [vmem:[%s13758_s21 + $0x8c] sm:$0x1] }
 0x769   : >> { %v7313_v45 = vpop.permute.xlu0 %7312  ;;  %v7315_v42 = vpop.permute.xlu1 %7314  ;;  %v14633_v20 = vcombine.low %v14615_v46, %v14618_v19  ;;  %v7804_v7 = vsel %vm2002_vm10, %v11288_v37, 0 }
 0x76a   : >> { %v7380_v35 = vsel %vm1323_vm8, %v11313_v15, %v7313_v45  ;;  %v7383_v4 = vsel %vm1323_vm8, %v11314_v53, %v7315_v42  ;;  %v14607_v42 = vcombine.low %v14580_v12, %v14584_v8  ;;  %v8042_v28 = vrot.slane %v10144_v52, 1 }
 0x76b   : >> { %6322 = vrot.lane.b32.xlu0 %v6310_v14, %s11563_s19  ;;  %6324 = vrot.lane.b32.xlu1 %v6311_v16, %s11563_s19  ;;  %v6586_v53 = vshrl.u32 %v9937_v27, 16 }
 0x76d   : >> { %v7357_v18 = vpop.permute.xlu0 %7356  ;;  %v7359_v38 = vpop.permute.xlu1 %7358 }
 0x76e   : >> { %v7397_v50 = vsel %vm1710_vm11, %v7374_v61, %v7357_v18  ;;  %v7399_v10 = vsel %vm1710_vm11, %v7377_v21, %v7359_v38  ;;  %v10131_v18 = vld [vmem:[%s13758_s21 + $0xc8] sm:$0xe]  ;;  %v8043_v21 = vrot.slane %v10145_v43, 1  ;;  %v14629_v38 = vcombine.low %v14601_v59, %v14612_v0 }
 0x76f   : >> { %6326 = vrot.lane.b32.xlu0 %v6312_v3, %s11563_s19  ;;  %v10050_v9 = vcombine.low %v7397_v50, %v7399_v10  ;;  %6328 = vrot.lane.b32.xlu1 %v6313_v31, %s11563_s19  ;;  %v7966_v3 = vor.u32 %v7965_v22, %v7961_v36  ;;  %v10146_v50 = vcombine.low %v10130_v17, %v14547_v44  ;;  %v6595_v36 = vshll.u32 %v14607_v42, 16  ;;  %v14652_v44 = vld [vmem:[%s15216_s6 + $0x60] sm:$0xff]  }
 0x770   : >> { %v6588_v22 = vshll.u32 %v9937_v27, 16  ;;  %v10147_v10 = vcombine.low %v10131_v18, %v14536_v32  ;;  %v7984_v15 = vshll.u32 %v14629_v38, 16  ;;  %v6593_v43 = vshrl.u32 %v14607_v42, 16 }
 0x771   : >> { %v7361_v14 = vpop.permute.xlu0 %7360  ;;  %v7363_v16 = vpop.permute.xlu1 %7362  ;;  %10543 = vmatprep.mubr.msk.bf16.mxu0 %vm1989_vm12, %v10050_v9  ;;  %v6597_v52 = vrot.slane %v6595_v36, 1  ;;  %v7975_v17 = vshrl.u32 %v14633_v20, 16 }
 0x772   : >> { %v7401_v23 = vsel %vm1710_vm11, %v7380_v35, %v7361_v14  ;;  %v7403_v45 = vsel %vm1710_vm11, %v7383_v4, %v7363_v16  ;;  %v7977_v35 = vshll.u32 %v14633_v20, 16  ;;  %v8044_v14 = vrot.slane %v10146_v50, 1 }
 0x773   : >> { %8002 = vrot.lane.b32.xlu0 %v7952_v30, %s11564_s1  ;;  %v10051_v31 = vcombine.low %v7401_v23, %v7403_v45  ;;  %8004 = vrot.lane.b32.xlu1 %v7959_v41, %s11564_s1  ;;  %v14642_v30 = vld [vmem:[%s13758_s21 + $0x88] sm:$0xf]  ;;  %v14655_v41 = vld [vmem:[%s13758_s21 + $0x90] sm:$0xf]  ;;  %v6590_v4 = vrot.slane %v6588_v22, 1  ;;  %v8045_v23 = vrot.slane %v10147_v10, 1  ;;  %v6598_v22 = vor.u32 %v6597_v52, %v6593_v43 }
 0x774   : >> { %v9939_v16 = vcombine.low %v14642_v30, %v14645_v58  ;;  %v7979_v50 = vrot.slane %v7977_v35, 1 }
 0x775   : >> { %v5919_v61 = vpop.permute.xlu0 %5918  ;;  %v5921_v26 = vpop.permute.xlu1 %5920  ;;  %10544 = vmatmul.mubr.msk.bf16.vlgmr.msra.gmra.mrb[0].mxu0 %vm1989_vm12, %v10051_v31 }
 0x776   : >> { %10552 = vmatpush3.bf16.msra.mxu0 %v14363_v62  ;;  %v14658_v62 = vld [vmem:[%s13758_s21 + $0x94] sm:$0x1]  ;;  %v6602_v36 = vshll.u32 %v9939_v16, 16  ;;  %v7980_v52 = vor.u32 %v7979_v50, %v7975_v17 }
 0x777   : >> { %8006 = vrot.lane.b32.xlu0 %v7966_v3, %s11564_s1  ;;  %8008 = vrot.lane.b32.xlu1 %v7973_v11, %s11564_s1  ;;  %v9940_v45 = vcombine.low %v14655_v41, %v14658_v62  ;;  %v11315_v3 = vld [vmem:[%s13758_s21 + $0x10] sm:$0xf]  ;;  %v7982_v11 = vshrl.u32 %v14629_v38, 16  ;;  %v6591_v38 = vor.u32 %v6590_v4, %v6586_v53 }
 0x778   : >> { %10753 = vmatprep.subr.msk.bf16.mxu0 %vm2002_vm10, %v11288_v37  ;;  %v5984_v31 = vsel %vm1323_vm8, %v11315_v3, %v5919_v61  ;;  %v11316_v37 = vld [vmem:[%s13758_s21 + $0x18] sm:$0xf]  ;;  %v11317_v3 = vld [vmem:[%s13758_s21 + $0x20] sm:$0xf] }
 0x779   : >> { %v5923_v9 = vpop.permute.xlu0 %5922  ;;  %v5925_v32 = vpop.permute.xlu1 %5924  ;;  %v5987_v42 = vsel %vm1323_vm8, %v11316_v37, %v5921_v26  ;;  %v6609_v10 = vshll.u32 %v9940_v45, 16  ;;  %v14681_v26 = vld [vmem:[%s13758_s21 + $0xe0] sm:$0xf] }
 0x77a   : >> { %10554 = vmatpush3.bf16.msra.mxu0 %v7804_v7  ;;  %v14684_v7 = vld [vmem:[%s13758_s21 + $0xe4] sm:$0x1] }
 0x77b   : >> { %8050 = vrot.lane.b32.xlu0 %v8042_v28, %s11563_s19  ;;  %8052 = vrot.lane.b32.xlu1 %v8043_v21, %s11563_s19  ;;  %v7986_v28 = vrot.slane %v7984_v15, 1  ;;  %v5990_v15 = vsel %vm1323_vm8, %v11317_v3, %v5923_v9  ;;  %v6600_v9 = vshrl.u32 %v9939_v16, 16 }
 0x77c   : >> { %10563 = vmatprep.subr.bf16.mxu0 %v14652_v44 }
 0x77d   : >> { %v5967_v27 = vpop.permute.xlu0 %5966  ;;  %v5969_v18 = vpop.permute.xlu1 %5968  ;;  %v7987_v43 = vor.u32 %v7986_v28, %v7982_v11  ;;  %v11290_v11 = vld [vmem:[%s15216_s6 + $0x2c] ss:$0 sps:$4 sm:$0xff]   ;;  %v9930_v28 = vld [vmem:[%s13758_s21 + $0x80] sm:$0xe] }
 0x77e   : >> { %v6007_v21 = vsel %vm1710_vm11, %v5984_v31, %v5967_v27  ;;  %v6009_v61 = vsel %vm1710_vm11, %v5987_v42, %v5969_v18  ;;  %v14689_v31 = vld [vmem:[%s13758_s21 + $0xe8] sm:$0xf]  ;;  %v14692_v27 = vld [vmem:[%s13758_s21 + $0xec] sm:$0x1]  ;;  %v6604_v42 = vrot.slane %v6602_v36, 1  ;;  %v10142_v18 = vcombine.low %v14681_v26, %v14684_v7 }
 0x77f   : >> { %8054 = vrot.lane.b32.xlu0 %v8044_v14, %s11563_s19  ;;  %v9848_v20 = vcombine.low %v6007_v21, %v6009_v61  ;;  %8056 = vrot.lane.b32.xlu1 %v8045_v23, %s11563_s19  ;;  %v11318_v14 = vld [vmem:[%s13758_s21 + $0x28] sm:$0xf]  ;;  %v6611_v61 = vrot.slane %v6609_v10, 1  ;;  %v10143_v3 = vcombine.low %v14689_v31, %v14692_v27 }
 0x780   : >> { %v5993_v53 = vsel %vm1323_vm8, %v11318_v14, %v5925_v32  ;;  %v6607_v32 = vshrl.u32 %v9940_v45, 16  ;;  %v6605_v50 = vor.u32 %v6604_v42, %v6600_v9  ;;  %v7991_v45 = vshll.u32 %v10142_v18, 16 }
 0x781   : >> { %v5971_v35 = vpop.permute.xlu0 %5970  ;;  %v5973_v4 = vpop.permute.xlu1 %5972  ;;  %10495 = vmatprep.mubr.msk.bf16.mxu1 %vm1989_vm12, %v9848_v20  ;;  %v9929_v20 = vld [vmem:[%s13758_s21 + $0x78] sm:$0xe]  ;;  %v7998_v10 = vshll.u32 %v10143_v3, 16 }
 0x782   : >> { %v6011_v23 = vsel %vm1710_vm11, %v5990_v15, %v5971_v35  ;;  %v6013_v37 = vsel %vm1710_vm11, %v5993_v53, %v5973_v4  ;;  %v6612_v36 = vor.u32 %v6611_v61, %v6607_v32  ;;  %v6415_v15 = vsel %vm2002_vm10, %v11290_v11, 0 }
 0x783   : >> { %6621 = vrot.lane.b32.xlu0 %v6591_v38, %s11564_s1  ;;  %v9849_v21 = vcombine.low %v6011_v23, %v6013_v37  ;;  %6623 = vrot.lane.b32.xlu1 %v6598_v22, %s11564_s1  ;;  %v9945_v38 = vcombine.low %v9929_v20, %v14590_v49  ;;  %v9946_v22 = vcombine.low %v9930_v28, %v14584_v8  ;;  %v7993_v53 = vrot.slane %v7991_v45, 1  ;;  %v11320_v37 = vld [vmem:[%s13758_s21 + $0xc0] sm:$0xf]  ;;  %v9931_v45 = vld [vmem:[%s13758_s21 + $0x88] sm:$0xe] }
 0x784   : >> { %v7996_v8 = vshrl.u32 %v10143_v3, 16  ;;  %v8000_v23 = vrot.slane %v7998_v10, 1  ;;  %v9932_v10 = vld [vmem:[%s13758_s21 + $0x90] sm:$0xe] }
 0x785   : >> { %v7317_v17 = vpop.permute.xlu0 %7316  ;;  %v7319_v16 = vpop.permute.xlu1 %7318  ;;  %10496 = vmatmul.mubr.msk.bf16.vlgmr.msra.gmra.mrb[0].mxu1 %vm1989_vm12, %v9849_v21  ;;  %v6657_v49 = vrot.slane %v9945_v38, 1  ;;  %v6658_v4 = vrot.slane %v9946_v22, 1  ;;  %v11321_v21 = vld [vmem:[%s13758_s21 + $0xc8] sm:$0xf] }
 0x786   : >> { %10504 = vmatpush3.bf16.msra.mxu1 %v14437_v29  ;;  %v7989_v29 = vshrl.u32 %v10142_v18, 16  ;;  %v7386_v9 = vsel %vm1323_vm8, %v11320_v37, %v7317_v17  ;;  %v10133_v18 = vld [vmem:[%s13758_s21 + $0xd8] sm:$0xe]  ;;  %v7389_v32 = vsel %vm1323_vm8, %v11321_v21, %v7319_v16  ;;  %v8001_v17 = vor.u32 %v8000_v23, %v7996_v8  ;;  %v10135_v37 = vld [vmem:[%s13758_s21 + $0xe8] sm:$0xe] }
 0x787   : >> { %8010 = vrot.lane.b32.xlu0 %v7980_v52, %s11564_s1  ;;  %8012 = vrot.lane.b32.xlu1 %v7987_v43, %s11564_s1  ;;  %v10132_v43 = vld [vmem:[%s13758_s21 + $0xd0] sm:$0xe]  ;;  %v10149_v38 = vcombine.low %v10133_v18, %v14612_v0  ;;  %v9948_v23 = vcombine.low %v9932_v10, %v14658_v62  ;;  %v10151_v21 = vcombine.low %v10135_v37, %v14692_v27  ;;  %v11327_v10 = vld [vmem:[%s13758_s21 + $0x48] sm:$0xf] }
 0x788   : >> { %10748 = vmatprep.subr.msk.bf16.mxu1 %vm2002_vm10, %v11290_v11  ;;  %v14724_v52 = vld [vmem:[%s15216_s6 + $0x30] sm:$0xff]   ;;  %v7994_v11 = vor.u32 %v7993_v53, %v7989_v29  ;;  %v10148_v28 = vcombine.low %v10132_v43, %v14618_v19  ;;  %v10134_v43 = vld [vmem:[%s13758_s21 + $0xe0] sm:$0xe] }
 0x789   : >> { %v7321_v35 = vpop.permute.xlu0 %7320  ;;  %v7323_v14 = vpop.permute.xlu1 %7322  ;;  %v8047_v8 = vrot.slane %v10149_v38, 1  ;;  %v10150_v18 = vcombine.low %v10134_v43, %v14684_v7  ;;  %v11325_v7 = vld [vmem:[%s13758_s21 + $0x38] sm:$0xf]  ;;  %v11329_v37 = vld [vmem:[%s13758_s21 + $0xb0] sm:$0xf] }
 0x78a   : >> { %10506 = vmatpush3.bf16.msra.mxu1 %v6415_v15  ;;  %v11323_v15 = vld [vmem:[%s13758_s21 + $0xd8] sm:$0xf]  ;;  %v8046_v0 = vrot.slane %v10148_v28, 1 }
 0x78b   : >> { %6625 = vrot.lane.b32.xlu0 %v6605_v50, %s11564_s1  ;;  %6627 = vrot.lane.b32.xlu1 %v6612_v36, %s11564_s1  ;;  %v11322_v36 = vld [vmem:[%s13758_s21 + $0xd0] sm:$0xf] }
 0x78c   : >> { %10665 = vmatprep.subr.bf16.mxu1 %v14724_v52  ;;  %v7392_v16 = vsel %vm1323_vm8, %v11322_v36, %v7321_v35  ;;  %v11326_v36 = vld [vmem:[%s13758_s21 + $0x40] sm:$0xf] }
 0x78d   : >> { %v7365_v42 = vpop.permute.xlu0 %7364  ;;  %v7367_v61 = vpop.permute.xlu1 %7366 }
 0x78e   : >> { %v7405_v20 = vsel %vm1710_vm11, %v7386_v9, %v7365_v42  ;;  %v7407_v3 = vsel %vm1710_vm11, %v7389_v32, %v7367_v61  ;;  %v8048_v61 = vrot.slane %v10150_v18, 1 }
 0x78f   : >> { %6669 = vrot.lane.b32.xlu0 %v6657_v49, %s11563_s19  ;;  %v10052_v50 = vcombine.low %v7405_v20, %v7407_v3  ;;  %6671 = vrot.lane.b32.xlu1 %v6658_v4, %s11563_s19  ;;  %v7395_v49 = vsel %vm1323_vm8, %v11323_v15, %v7323_v14  ;;  %v9947_v4 = vcombine.low %v9931_v45, %v14645_v58  ;;  %v6660_v58 = vrot.slane %v9948_v23, 1  ;;  %v11324_v3 = vld [vmem:[%s13758_s21 + $0x30] sm:$0xf]  ;;  %v11328_v23 = vld [vmem:[%s13758_s21 + $0xa8] sm:$0xf] }
 0x790   : >> { %v8049_v20 = vrot.slane %v10151_v21, 1 }
 0x791   : >> { %v7369_v22 = vpop.permute.xlu0 %7368  ;;  %v7371_v29 = vpop.permute.xlu1 %7370  ;;  %10547 = vmatprep.mubr.msk.bf16.mxu0 %vm1989_vm12, %v10052_v50  ;;  %v6659_v42 = vrot.slane %v9947_v4, 1 }
 0x792   : >> { %v7409_v19 = vsel %vm1710_vm11, %v7392_v16, %v7369_v22  ;;  %v7411_v53 = vsel %vm1710_vm11, %v7395_v49, %v7371_v29 }
 0x793   : >> { %8014 = vrot.lane.b32.xlu0 %v7994_v11, %s11564_s1  ;;  %v10053_v35 = vcombine.low %v7409_v19, %v7411_v53  ;;  %8016 = vrot.lane.b32.xlu1 %v8001_v17, %s11564_s1 }
 0x795   : >> { %v5927_v14 = vpop.permute.xlu0 %5926  ;;  %v5929_v9 = vpop.permute.xlu1 %5928  ;;  %10548 = vmatmul.mubr.msk.bf16.gmra.mrb[4].mxu0 %vm1989_vm12, %v10053_v35 }
 0x796   : >> { %v5996_v11 = vsel %vm1323_vm8, %v11324_v3, %v5927_v14  ;;  %v5999_v50 = vsel %vm1323_vm8, %v11325_v7, %v5929_v9 }
 0x797   : >> { %8058 = vrot.lane.b32.xlu0 %v8046_v0, %s11563_s19  ;;  %8060 = vrot.lane.b32.xlu1 %v8047_v8, %s11563_s19 }
 0x799   : >> { %v5931_v32 = vpop.permute.xlu0 %5930  ;;  %v5933_v62 = vpop.permute.xlu1 %5932 }
 0x79a   : >> { %v6002_v16 = vsel %vm1323_vm8, %v11326_v36, %v5931_v32  ;;  %v6005_v15 = vsel %vm1323_vm8, %v11327_v10, %v5933_v62  ;;  %v11330_v32 = vld [vmem:[%s13758_s21 + $0xb8] sm:$0xf] }
 0x79b   : >> { %6673 = vrot.lane.b32.xlu0 %v6659_v42, %s11563_s19  ;;  %6675 = vrot.lane.b32.xlu1 %v6660_v58, %s11563_s19 }
 0x79d   : >> { %v5975_v28 = vpop.permute.xlu0 %5974  ;;  %v5977_v17 = vpop.permute.xlu1 %5976 }
 0x79e   : >> { %v6015_v27 = vsel %vm1710_vm11, %v5996_v11, %v5975_v28  ;;  %v6017_v38 = vsel %vm1710_vm11, %v5999_v50, %v5977_v17  ;;  %v11292_v17 = vld [vmem:[%s15216_s6 + $0x68] ss:$0 sps:$4 sm:$0xff]  }
 0x79f   : >> { %8062 = vrot.lane.b32.xlu0 %v8048_v61, %s11563_s19  ;;  %v9850_v45 = vcombine.low %v6015_v27, %v6017_v38  ;;  %8064 = vrot.lane.b32.xlu1 %v8049_v20, %s11563_s19  ;;  %v11331_v20 = vld [vmem:[%s13758_s21 + $0xc0] sm:$0xf] }
 0x7a1   : >> { %v5979_v22 = vpop.permute.xlu0 %5978  ;;  %v5981_v49 = vpop.permute.xlu1 %5980  ;;  %10499 = vmatprep.mubr.msk.bf16.mxu1 %vm1989_vm12, %v9850_v45  ;;  %v8151_v45 = vsel %vm2002_vm10, %v11292_v17, 0 }
 0x7a2   : >> { %v6019_v29 = vsel %vm1710_vm11, %v6002_v16, %v5979_v22  ;;  %v6021_v19 = vsel %vm1710_vm11, %v6005_v15, %v5981_v49  ;;  %v11332_v22 = vld [vmem:[%s13758_s21 + $0x50] sm:$0xf] }
 0x7a3   : >> { %v9851_v53 = vcombine.low %v6019_v29, %v6021_v19 }
 0x7a5   : >> { %v7656_v0 = vpop.permute.xlu0 %7655  ;;  %v7658_v4 = vpop.permute.xlu1 %7657  ;;  %10500 = vmatmul.mubr.msk.bf16.gmra.mrb[4].mxu1 %vm1989_vm12, %v9851_v53 }
 0x7a6   : >> { %v7721_v43 = vsel %vm1323_vm8, %v11328_v23, %v7656_v0  ;;  %v7724_v9 = vsel %vm1323_vm8, %v11329_v37, %v7658_v4 }
 0x7a9   : >> { %v7660_v35 = vpop.permute.xlu0 %7659  ;;  %v7662_v8 = vpop.permute.xlu1 %7661 }
 0x7aa   : >> { %v7727_v62 = vsel %vm1323_vm8, %v11330_v32, %v7660_v35  ;;  %v7730_v3 = vsel %vm1323_vm8, %v11331_v20, %v7662_v8 }
 0x7ad   : >> { %v7704_v14 = vpop.permute.xlu0 %7703  ;;  %v7706_v42 = vpop.permute.xlu1 %7705 }
 0x7ae   : >> { %v7744_v18 = vsel %vm1710_vm11, %v7721_v43, %v7704_v14  ;;  %v7746_v58 = vsel %vm1710_vm11, %v7724_v9, %v7706_v42 }
 0x7af   : >> { %v10101_v21 = vcombine.low %v7744_v18, %v7746_v58 }
 0x7b1   : >> { %v7708_v61 = vpop.permute.xlu0 %7707  ;;  %v7710_v11 = vpop.permute.xlu1 %7709  ;;  %10555 = vmatprep.mubr.msk.bf16.mxu0 %vm1989_vm12, %v10101_v21 }
 0x7b2   : >> { %v7748_v28 = vsel %vm1710_vm11, %v7727_v62, %v7708_v61  ;;  %v7750_v7 = vsel %vm1710_vm11, %v7730_v3, %v7710_v11 }
 0x7b3   : >> { %v10102_v50 = vcombine.low %v7748_v28, %v7750_v7 }
 0x7b5   : >> { %v6267_v27 = vpop.permute.xlu0 %6266  ;;  %v6269_v38 = vpop.permute.xlu1 %6268  ;;  %10556 = vmatmul.mubr.msk.bf16.vlgmr.msra.gmra.mrb[0].mxu0 %vm1989_vm12, %v10102_v50 }
 0x7b6   : >> { %10564 = vmatpush3.bf16.msra.mxu0 %v14652_v44  ;;  %v6332_v10 = vsel %vm1323_vm8, %v11332_v22, %v6267_v27  ;;  %v6335_v49 = vsel %vm1323_vm8, %v14314_v24, %v6269_v38 }
 0x7b7   : >> { %10754 = vmatprep.subr.msk.bf16.mxu0 %vm2002_vm10, %v11292_v17 }
 0x7b9   : >> { %v6271_v36 = vpop.permute.xlu0 %6270  ;;  %v6273_v16 = vpop.permute.xlu1 %6272 }
 0x7ba   : >> { %10566 = vmatpush3.bf16.msra.mxu0 %v8151_v45  ;;  %v6338_v0 = vsel %vm1323_vm8, %v14333_v2, %v6271_v36  ;;  %v6341_v35 = vsel %vm1323_vm8, %v14343_v33, %v6273_v16  ;;  %v11333_v2 = vld [vmem:[%s15216_s6 + $0x38] ss:$0 sps:$4 sm:$0xff]  }
 0x7bb   : > { %10575 = vmatprep.subr.mxu0 (%p5109_p1), %v11561_v47 }
 0x7bd   : >> { %v6315_v15 = vpop.permute.xlu0 %6314  ;;  %v6317_v29 = vpop.permute.xlu1 %6316 }
 0x7be   : >> { %v6355_v19 = vsel %vm1710_vm11, %v6332_v10, %v6315_v15  ;;  %v6357_v53 = vsel %vm1710_vm11, %v6335_v49, %v6317_v29 }
 0x7bf   : >> { %v9898_v44 = vcombine.low %v6355_v19, %v6357_v53 }
 0x7c1   : >> { %v6319_v4 = vpop.permute.xlu0 %6318  ;;  %v6321_v8 = vpop.permute.xlu1 %6320  ;;  %10507 = vmatprep.mubr.msk.bf16.mxu1 %vm1989_vm12, %v9898_v44 }
 0x7c2   : >> { %v6359_v23 = vsel %vm1710_vm11, %v6338_v0, %v6319_v4  ;;  %v6361_v24 = vsel %vm1710_vm11, %v6341_v35, %v6321_v8 }
 0x7c3   : >> { %v9899_v43 = vcombine.low %v6359_v23, %v6361_v24 }
 0x7c5   : >> { %v7664_v14 = vpop.permute.xlu0 %7663  ;;  %v7666_v37 = vpop.permute.xlu1 %7665  ;;  %10508 = vmatmul.mubr.msk.bf16.vlgmr.msra.gmra.mrb[0].mxu1 %vm1989_vm12, %v9899_v43 }
 0x7c6   : >> { %10667 = vmatpush3.bf16.msra.mxu1 %v14724_v52  ;;  %v7733_v42 = vsel %vm1323_vm8, %v14379_v1, %v7664_v14  ;;  %v7736_v58 = vsel %vm1323_vm8, %v14387_v5, %v7666_v37 }
 0x7c7   : >> { %10750 = vmatprep.subr.msk.bf16.mxu1 %vm2002_vm10, %v11333_v2 }
 0x7c9   : >> { %v7668_v33 = vpop.permute.xlu0 %7667  ;;  %v7670_v9 = vpop.permute.xlu1 %7669 }
 0x7ca   : >> { %10668 = vmatpush3.bf16.msra.mxu1 %v13972_v57  ;;  %v7739_v61 = vsel %vm1323_vm8, %v14407_v13, %v7668_v33  ;;  %v7742_v57 = vsel %vm1323_vm8, %v14417_v39, %v7670_v9 }
 0x7cd   : >> { %v7712_v18 = vpop.permute.xlu0 %7711  ;;  %v7714_v21 = vpop.permute.xlu1 %7713 }
 0x7ce   : >> { %v7752_v52 = vsel %vm1710_vm11, %v7733_v42, %v7712_v18  ;;  %v7754_v32 = vsel %vm1710_vm11, %v7736_v58, %v7714_v21 }
 0x7cf   : >> { %v10103_v62 = vcombine.low %v7752_v52, %v7754_v32 }
 0x7d1   : >> { %v7716_v20 = vpop.permute.xlu0 %7715  ;;  %v7718_v3 = vpop.permute.xlu1 %7717  ;;  %10559 = vmatprep.mubr.msk.bf16.mxu0 %vm1989_vm12, %v10103_v62 }
 0x7d2   : >> { %v7756_v1 = vsel %vm1710_vm11, %v7739_v61, %v7716_v20  ;;  %v7758_v5 = vsel %vm1710_vm11, %v7742_v57, %v7718_v3 }
 0x7d3   : >> { %v10104_v11 = vcombine.low %v7756_v1, %v7758_v5 }
 0x7d5   : >> { %v6275_v28 = vpop.permute.xlu0 %6274  ;;  %v6277_v7 = vpop.permute.xlu1 %6276  ;;  %10560 = vmatmul.mubr.msk.bf16.gmra.mrb[4].mxu0 %vm1989_vm12, %v10104_v11 }
 0x7d6   : >> { %v6344_v13 = vsel %vm1323_vm8, %v14452_v56, %v6275_v28  ;;  %v6347_v39 = vsel %vm1323_vm8, %v14461_v6, %v6277_v7 }
 0x7d9   : >> { %v6279_v50 = vpop.permute.xlu0 %6278  ;;  %v6281_v17 = vpop.permute.xlu1 %6280 }
 0x7da   : >> { %v6350_v22 = vsel %vm1323_vm8, %v14481_v48, %v6279_v50  ;;  %v6353_v15 = vsel %vm1323_vm8, %v14488_v51, %v6281_v17 }
 0x7dd   : >> { %v6323_v27 = vpop.permute.xlu0 %6322  ;;  %v6325_v38 = vpop.permute.xlu1 %6324 }
 0x7de   : >> { %v6363_v45 = vsel %vm1710_vm11, %v6344_v13, %v6323_v27  ;;  %v6365_v36 = vsel %vm1710_vm11, %v6347_v39, %v6325_v38 }
 0x7df   : >> { %v9900_v16 = vcombine.low %v6363_v45, %v6365_v36 }
 0x7e1   : >> { %v6327_v10 = vpop.permute.xlu0 %6326  ;;  %v6329_v49 = vpop.permute.xlu1 %6328  ;;  %10511 = vmatprep.mubr.msk.bf16.mxu1 %vm1989_vm12, %v9900_v16 }
 0x7e2   : >> { %v6367_v56 = vsel %vm1710_vm11, %v6350_v22, %v6327_v10  ;;  %v6369_v6 = vsel %vm1710_vm11, %v6353_v15, %v6329_v49 }
 0x7e3   : >> { %v9901_v29 = vcombine.low %v6367_v56, %v6369_v6 }
 0x7e5   : >> { %v8003_v19 = vpop.permute.xlu0 %8002  ;;  %v8005_v53 = vpop.permute.xlu1 %8004  ;;  %10512 = vmatmul.mubr.msk.bf16.gmra.mrb[4].mxu1 %vm1989_vm12, %v9901_v29 }
 0x7e6   : >> { %v8068_v48 = vsel %vm1323_vm8, %v14514_v25, %v8003_v19  ;;  %v8071_v51 = vsel %vm1323_vm8, %v14523_v40, %v8005_v53 }
 0x7e9   : >> { %v8007_v44 = vpop.permute.xlu0 %8006  ;;  %v8009_v0 = vpop.permute.xlu1 %8008 }
 0x7ea   : >> { %v8074_v43 = vsel %vm1323_vm8, %v14544_v55, %v8007_v44  ;;  %v8077_v37 = vsel %vm1323_vm8, %v14533_v34, %v8009_v0 }
 0x7ed   : >> { %v8051_v4 = vpop.permute.xlu0 %8050  ;;  %v8053_v35 = vpop.permute.xlu1 %8052 }
 0x7ee   : >> { %v8091_v8 = vsel %vm1710_vm11, %v8068_v48, %v8051_v4  ;;  %v8093_v23 = vsel %vm1710_vm11, %v8071_v51, %v8053_v35 }
 0x7ef   : >> { %v10152_v24 = vcombine.low %v8091_v8, %v8093_v23 }
 0x7f1   : >> { %v8055_v14 = vpop.permute.xlu0 %8054  ;;  %v8057_v2 = vpop.permute.xlu1 %8056  ;;  %10567 = vmatprep.mubr.msk.bf16.mxu0 %vm1989_vm12, %v10152_v24 }
 0x7f2   : >> { %v8095_v25 = vsel %vm1710_vm11, %v8074_v43, %v8055_v14  ;;  %v8097_v40 = vsel %vm1710_vm11, %v8077_v37, %v8057_v2 }
 0x7f3   : >> { %v10153_v33 = vcombine.low %v8095_v25, %v8097_v40 }
 0x7f5   : >> { %v6622_v9 = vpop.permute.xlu0 %6621  ;;  %v6624_v42 = vpop.permute.xlu1 %6623  ;;  %10568 = vmatmul.mubr.msk.bf16.vlgmr.msra.gmra.mrb[0].mxu0 %vm1989_vm12, %v10153_v33 }
 0x7f6   : >> { %v6691_v52 = vsel %vm1323_vm8, %v14587_v60, %v6622_v9  ;;  %v6694_v32 = vsel %vm1323_vm8, %v14580_v12, %v6624_v42 }
 0x7f9   : >> { %v8011_v18 = vpop.permute.xlu0 %8010  ;;  %v8013_v58 = vpop.permute.xlu1 %8012 }
 0x7fa   : >> { %v8080_v5 = vsel %vm1323_vm8, %v14615_v46, %v8011_v18  ;;  %v8083_v60 = vsel %vm1323_vm8, %v14601_v59, %v8013_v58 }
 0x7fd   : >> { %v6626_v21 = vpop.permute.xlu0 %6625  ;;  %v6628_v55 = vpop.permute.xlu1 %6627 }
 0x7fe   : >> { %v6697_v17 = vsel %vm1323_vm8, %v14642_v30, %v6626_v21  ;;  %v6700_v27 = vsel %vm1323_vm8, %v14655_v41, %v6628_v55 }
 0x801   : >> { %v6670_v34 = vpop.permute.xlu0 %6669  ;;  %v6672_v62 = vpop.permute.xlu1 %6671 }
 0x802   : >> { %v6710_v61 = vsel %vm1710_vm11, %v6691_v52, %v6670_v34  ;;  %v6712_v20 = vsel %vm1710_vm11, %v6694_v32, %v6672_v62 }
 0x803   : >> { %v9951_v57 = vcombine.low %v6710_v61, %v6712_v20 }
 0x805   : >> { %v8015_v3 = vpop.permute.xlu0 %8014  ;;  %v8017_v1 = vpop.permute.xlu1 %8016  ;;  %10523 = vmatprep.mubr.msk.bf16.mxu1 %vm1989_vm12, %v9951_v57 }
 0x806   : >> { %v8086_v45 = vsel %vm1323_vm8, %v14681_v26, %v8015_v3  ;;  %v8089_v30 = vsel %vm1323_vm8, %v14689_v31, %v8017_v1 }
 0x809   : >> { %v8059_v11 = vpop.permute.xlu0 %8058  ;;  %v8061_v28 = vpop.permute.xlu1 %8060 }
 0x80a   : >> { %v8099_v12 = vsel %vm1710_vm11, %v8080_v5, %v8059_v11  ;;  %v8101_v7 = vsel %vm1710_vm11, %v8083_v60, %v8061_v28 }
 0x80b   : >> { %v10154_v50 = vcombine.low %v8099_v12, %v8101_v7 }
 0x80d   : >> { %v6674_v13 = vpop.permute.xlu0 %6673  ;;  %v6676_v39 = vpop.permute.xlu1 %6675  ;;  %10571 = vmatprep.mubr.msk.bf16.mxu0 %vm1989_vm12, %v10154_v50  ;;  %v14923_v50 = vld [vmem:[%s15225_s15] sm:$0xff] (%p5109_p1) }
 0x80e   : >> { %v6714_v46 = vsel %vm1710_vm11, %v6697_v17, %v6674_v13  ;;  %v6716_v59 = vsel %vm1710_vm11, %v6700_v27, %v6676_v39  ;;  %10576 = vmatpush3.msra.mxu0 (%p5109_p1), %v14923_v50  ;;  %v11538_v13 = vmov (%p5109_p1), 0.0  }
 0x80f   : >> { %v9952_v38 = vcombine.low %v6714_v46, %v6716_v59 }
 0x811   : >> { %v8063_v36 = vpop.permute.xlu0 %8062  ;;  %v8065_v16 = vpop.permute.xlu1 %8064  ;;  %10524 = vmatmul.mubr.msk.bf16.vlgmr.msra.gmra.mrb[4].mxu1 %vm1989_vm12, %v9952_v38 }
 0x812   : >> { %v8103_v41 = vsel %vm1710_vm11, %v8086_v45, %v8063_v36  ;;  %v8105_v22 = vsel %vm1710_vm11, %v8089_v30, %v8065_v16 }
 0x813   : >> { %v10155_v10 = vcombine.low %v8103_v41, %v8105_v22 }
 0x815   : >> { %10572 = vmatmul.mubr.msk.bf16.gmra.mrb[4].mxu0 %vm1989_vm12, %v10155_v10 }
 0x816   : > { %10577 = vmatprep.mubr.msk.f32.mxu0 (%p5109_p1), %vm11562_vm13, %v11561_v47 }
 0x898   : >> { %v10509_v15 = vpop.f32.mrb[0].mxu1 }
 0x899   : >> { %v6451_v49 = vpop.f32.mrb[1].mxu1 }
 0x89a   : >> { %v10510_v56 = vpop.f32.mrb[2].mxu1 }
 0x89b   : >> { %v6454_v6 = vpop.f32.mrb[3].mxu1 }
 0x8c8   : >> { %v10569_v26 = vpop.f32.mrb[0].mxu0 }
 0x8c9   : >> { %v10669_v29 = vadd.f32 %v10569_v26, %v10509_v15  ;;  %v8187_v19 = vpop.f32.mrb[1].mxu0 }
 0x8ca   : >> { %v10670_v53 = vadd.f32 %v8187_v19, %v6451_v49  ;;  %v10570_v31 = vpop.f32.mrb[2].mxu0 }
 0x8cb   : >> { %8230 = vst.msk [vmem:[%s14887_s30 + $0x10] sm:$0xff] %vm1323_vm8, %v10669_v29  ;;  %v10671_v44 = vadd.f32 %v10570_v31, %v10510_v56  ;;  %v8190_v0 = vpop.f32.mrb[3].mxu0  ;;  %v8239_v8 = vsel %vm1323_vm8, %v10669_v29, 0.0 }
 0x8cc   : >> { %8228 = vst.msk [vmem:[%s14887_s30] sm:$0xff] %vm1323_vm8, %v10670_v53  ;;  %v10672_v48 = vadd.f32 %v8190_v0, %v6454_v6  ;;  %v8236_v4 = vsel %vm1323_vm8, %v10670_v53, 0.0 }
 0x8cd   : >> { %8231 = vst.msk [vmem:[%s14887_s30 + $0x18] sm:$0xff] %vm1323_vm8, %v10671_v44  ;;  %v8241_v24 = vsel %vm1323_vm8, %v10671_v44, 0.0 }
 0x8ce   : >> { %8229 = vst.msk [vmem:[%s14887_s30 + $0x8] sm:$0xff] %vm1323_vm8, %v10672_v48  ;;  %v8237_v51 = vsel %vm1323_vm8, %v10672_v48, 0.0 }
 0x8cf   : >> { %v8238_v35 = vadd.f32 %v8237_v51, %v8236_v4 }
 0x8d1   : >> { %v8240_v23 = vadd.f32 %v8239_v8, %v8238_v35 }
 0x8d3   : >> { %v8242_v43 = vadd.f32 %v8241_v24, %v8240_v23 }
 0x8e4   : >> { %v10525_v14 = vpop.f32.mrb[4].mxu1 }
 0x8e5   : >> { %v6814_v37 = vpop.f32.mrb[5].mxu1 }
 0x8e6   : >> { %v10526_v2 = vpop.f32.mrb[6].mxu1 }
 0x8e7   : >> { %v6817_v25 = vpop.f32.mrb[7].mxu1 }
 0x8e8   : >> { %v10573_v40 = vpop.f32.mrb[4].mxu0 }
 0x8e9   : >> { %v10673_v33 = vadd.f32 %v10573_v40, %v10525_v14  ;;  %v8203_v9 = vpop.f32.mrb[5].mxu0 }
 0x8ea   : >> { %v10674_v42 = vadd.f32 %v8203_v9, %v6814_v37  ;;  %v10574_v18 = vpop.f32.mrb[6].mxu0 }
 0x8eb   : >> { %8234 = vst.msk [vmem:[%s14887_s30 + $0x30] sm:$0xff] %vm1323_vm8, %v10673_v33  ;;  %v10675_v58 = vadd.f32 %v10574_v18, %v10526_v2  ;;  %v8206_v21 = vpop.f32.mrb[7].mxu0  ;;  %v8247_v61 = vsel %vm1323_vm8, %v10673_v33, 0.0 }
 0x8ec   : >> { %8232 = vst.msk [vmem:[%s14887_s30 + $0x20] sm:$0xff] %vm1323_vm8, %v10674_v42  ;;  %v8243_v55 = vsel %vm1323_vm8, %v10674_v42, 0.0  ;;  %v10676_v52 = vadd.f32 %v8206_v21, %v6817_v25 }
 0x8ed   : >> { %v8244_v34 = vadd.f32 %v8243_v55, %v8242_v43  ;;  %8235 = vst.msk [vmem:[%s14887_s30 + $0x38] sm:$0xff] %vm1323_vm8, %v10675_v58  ;;  %v8249_v57 = vsel %vm1323_vm8, %v10675_v58, 0.0 }
 0x8ee   : >> { %8233 = vst.msk [vmem:[%s14887_s30 + $0x28] sm:$0xff] %vm1323_vm8, %v10676_v52  ;;  %v8245_v32 = vsel %vm1323_vm8, %v10676_v52, 0.0 }
 0x8ef   : >> { %v8246_v62 = vadd.f32 %v8245_v32, %v8244_v34 }
 0x8f1   : >> { %v8248_v20 = vadd.f32 %v8247_v61, %v8246_v62 }
 0x8f3   : >> { %v8250_v3 = vadd.f32 %v8249_v57, %v8248_v20 }
 0x8f5   : >> { %v8251_v1 = vrot.slane %v8250_v3, 4 }
 0x8f7   : >> { %v8252_v5 = vadd.f32 %v8251_v1, %v8250_v3 }
 0x8f9   : >> { %v8253_v11 = vrot.slane %v8252_v5, 2 }
 0x8fb   : >> { %v8254_v60 = vadd.f32 %v8253_v11, %v8252_v5 }
 0x8fd   : >> { %v8255_v28 = vrot.slane %v8254_v60, 1  ;;  %5111 = sbr.rel (!%p5109_p1) target bundleno = 1654 (0x676), region = 252 }
 0x8ff   : >> { %v8256_v12 = vadd.f32 %v8255_v28, %v8254_v60 }
 0x901   : >> { %v8257_v7 = vadd.f32 %v11532_v54, %v8256_v12  }
 0x903   : >> { %v15248_v54 = vmov %v8257_v7  ;;  %10578 = vmatmul.mubr.msk.f32.vlgmr.msra.gmra.mrb[0].mxu0 (%p5109_p1), %vm1323_vm8, %v8257_v7 }
 0x9d6   : > { %v14929_v54 = vpop.f32.mrb[0].mxu0 }
 0x9d7   : > { %v10579_v17 = vpop.f32.mrb[1].mxu0 }
 0x9d8 LB: >> { %v8352_v27 = vrot.slane %v14929_v54, %v13597_v63  ;;  %s10164_s1 = sshll.u32 %s11544_s27, 6  ;;  %s8337_s27 = sadd.s32 1, %s11544_s27   ;;  %s11544_s27 = sphi %s14931_s27, %s8337_s27   ;;  %v11540_v13 = vphi %v11538_v13, %v11539_v13  }
 0x9d9   : >> { %s8340_s21 = scalar_lea.vmem [#allocation3], %s10164_s1  ;;  %p8334_p2 = scmp.ge.s32.totalorder %s8337_s27, 8  }
 0x9da   : >> { %v8341_v39 = vld [vmem:[%s8340_s21] sm:$0xff]  ;;  %v8342_v46 = vld [vmem:[%s8340_s21 + $0x8] sm:$0xff]  ;;  %v8343_v59 = vld [vmem:[%s8340_s21 + $0x10] sm:$0xff]  ;;  %10580 = vmatprep.subr.mxu1 (%p8334_p2), %v11561_v47  ;;  %10582 = vmatprep.mubr.msk.f32.mxu1 (%p8334_p2), %vm11562_vm13, %v11561_v47  ;;  %v14971_v12 = vmov (%p8334_p2), 0.0   ;;  %s14973_s19 = smov (%p8334_p2), 0  }
 0x9db   : >> { %v8344_v38 = vld [vmem:[%s8340_s21 + $0x18] sm:$0xff]  ;;  %v8345_v45 = vld [vmem:[%s8340_s21 + $0x20] sm:$0xff]  ;;  %v8346_v36 = vld [vmem:[%s8340_s21 + $0x28] sm:$0xff]  ;;  %v8353_v30 = vsub.f32 %v8341_v39, %v8352_v27  ;;  %v8354_v16 = vsub.f32 %v8342_v46, %v8352_v27  ;;  %v8355_v41 = vsub.f32 %v8343_v59, %v8352_v27  ;;  %10581 = vmatpush3.msra.mxu1 (%p8334_p2), %v14923_v50 }
 0x9dc   : >> { %v8347_v22 = vld [vmem:[%s8340_s21 + $0x30] sm:$0xff]  ;;  %v8356_v10 = vsub.f32 %v8344_v38, %v8352_v27  ;;  %v8357_v15 = vsub.f32 %v8345_v45, %v8352_v27  ;;  %v8358_v49 = vsub.f32 %v8346_v36, %v8352_v27  ;;  %v8348_v26 = vld [vmem:[%s8340_s21 + $0x38] sm:$0xff]  ;;  %v8391_v3 = vld [vmem:[%s15217_s7] sm:$0x1] (%p8334_p2) }
 0x9dd   : >> { %v8361_v56 = vmul.f32 %v8353_v30, %v8353_v30  ;;  %v8362_v6 = vmul.f32 %v8354_v16, %v8354_v16  ;;  %v8363_v29 = vmul.f32 %v8355_v41, %v8355_v41  ;;  %v8359_v53 = vsub.f32 %v8347_v22, %v8352_v27  ;;  %v14963_v11 = vld [vmem:[%s15218_s8] sm:$0x1] (%p8334_p2) }
 0x9de   : >> { %v8364_v19 = vmul.f32 %v8356_v10, %v8356_v10  ;;  %v8365_v31 = vmul.f32 %v8357_v15, %v8357_v15  ;;  %v8360_v51 = vsub.f32 %v8348_v26, %v8352_v27  ;;  %v8366_v35 = vmul.f32 %v8358_v49, %v8358_v49 }
 0x9df   : >> { %v8369_v44 = vsel %vm1323_vm8, %v8361_v56, 0.0  ;;  %v8370_v0 = vsel %vm1323_vm8, %v8362_v6, 0.0  ;;  %v8372_v4 = vsel %vm1323_vm8, %v8363_v29, 0.0  ;;  %v8367_v24 = vmul.f32 %v8359_v53, %v8359_v53 }
 0x9e0   : >> { %v8371_v48 = vadd.f32 %v8370_v0, %v8369_v44  ;;  %v8374_v8 = vsel %vm1323_vm8, %v8364_v19, 0.0  ;;  %v8376_v43 = vsel %vm1323_vm8, %v8365_v31, 0.0  ;;  %v8368_v37 = vmul.f32 %v8360_v51, %v8360_v51 }
 0x9e1   : >> { %v8378_v2 = vsel %vm1323_vm8, %v8366_v35, 0.0  ;;  %v8380_v40 = vsel %vm1323_vm8, %v8367_v24, 0.0 }
 0x9e2   : >> { %v8373_v23 = vadd.f32 %v8372_v4, %v8371_v48  ;;  %v8382_v9 = vsel %vm1323_vm8, %v8368_v37, 0.0 }
 0x9e4   : >> { %v8375_v14 = vadd.f32 %v8374_v8, %v8373_v23 }
 0x9e6   : >> { %v8377_v25 = vadd.f32 %v8376_v43, %v8375_v14 }
 0x9e8   : >> { %v8379_v33 = vadd.f32 %v8378_v2, %v8377_v25 }
 0x9ea   : >> { %v8381_v42 = vadd.f32 %v8380_v40, %v8379_v33 }
 0x9ec   : >> { %v8383_v18 = vadd.f32 %v8382_v9, %v8381_v42 }
 0x9ee   : >> { %v8384_v58 = vrot.slane %v8383_v18, 4 }
 0x9f0   : >> { %v8385_v21 = vadd.f32 %v8384_v58, %v8383_v18 }
 0x9f2   : >> { %v8386_v55 = vrot.slane %v8385_v21, 2 }
 0x9f4   : >> { %v8387_v52 = vadd.f32 %v8386_v55, %v8385_v21 }
 0x9f6   : >> { %v8388_v34 = vrot.slane %v8387_v52, 1  ;;  %8336 = sbr.rel (!%p8334_p2) target bundleno = 2520 (0x9d8), region = 263 }
 0x9f8   : >> { %v8389_v32 = vadd.f32 %v8388_v34, %v8387_v52 }
 0x9fa   : >> { %v8390_v62 = vadd.f32 %v11540_v13, %v8389_v32  }
 0x9fc   : >> { %v11539_v13 = vmov %v8390_v62   ;;  %10583 = vmatmul.mubr.msk.f32.vlgmr.msra.gmra.mrb[0].mxu1 (%p8334_p2), %vm1323_vm8, %v8390_v62 }
 0xacf   : > { %v8461_v61 = vpop.f32.mrb[0].mxu1 }
 0xad0   : > { %v8462_v20 = vadd.f32 1e-05, %v8461_v61  ;;  %v10584_v57 = vpop.f32.mrb[1].mxu1 }
 0xad2   : > { %11334 = vrsqrt.f32 %v8462_v20 }
 0xadc   : > { %v11335_v1 = vpop.eup %11334 }
 0xadd   : > { %v14958_v5 = vmul.f32 %v11335_v1, %v8391_v3 }
 0xadf   : > { %v14967_v60 = vmul.f32 %v14958_v5, %v14929_v54 }
 0xae1   : > { %v8469_v28 = vsub.f32 %v14963_v11, %v14967_v60 }
 0xae2 LB: >> { %v8491_v7 = vrot.slane %v14958_v5, %v13597_v63  ;;  %s10166_s27 = sshll.u32 %s11552_s19, 6  ;;  %s8475_s19 = sadd.s32 1, %s11552_s19   ;;  %s11552_s19 = sphi %s14973_s19, %s8475_s19   ;;  %v11548_v12 = vphi %v14971_v12, %v15249_v12  }
 0xae3   : >> { %v8505_v50 = vrot.slane %v8469_v28, %v13597_v63  ;;  %s14988_s1 = scalar_lea.vmem [#allocation3], %s10166_s27  ;;  %s14992_s21 = scalar_lea.vmem [#allocation4], %s10166_s27 }
 0xae4   : >> { %v8479_v54 = vld [vmem:[%s14988_s1] sm:$0xff]  ;;  %v8480_v17 = vld [vmem:[%s14988_s1 + $0x8] sm:$0xff]  ;;  %v8481_v46 = vld [vmem:[%s14988_s1 + $0x10] sm:$0xff]  ;;  %p8472_p3 = scmp.ge.s32.totalorder %s8475_s19, 8  }
 0xae5   : >> { %v8493_v13 = vmul.f32 %v8491_v7, %v8479_v54  ;;  %v8516_v27 = vld [vmem:[%s14992_s21] sm:$0xff]  ;;  %v8494_v39 = vmul.f32 %v8491_v7, %v8480_v17  ;;  %v8517_v59 = vld [vmem:[%s14992_s21 + $0x8] sm:$0xff]  ;;  %v8495_v38 = vmul.f32 %v8491_v7, %v8481_v46  ;;  %v8482_v45 = vld [vmem:[%s14988_s1 + $0x18] sm:$0xff]  ;;  %10585 = vmatprep.subr.mxu0 (%p8472_p3), %v11561_v47  ;;  %10587 = vmatprep.mubr.msk.f32.mxu0 (%p8472_p3), %vm11562_vm13, %v11561_v47  ;;  %s15071_s22 = smov (%p8472_p3), 0  }
 0xae6   : >> { %v8483_v36 = vld [vmem:[%s14988_s1 + $0x20] sm:$0xff]  ;;  %v8518_v41 = vld [vmem:[%s14992_s21 + $0x10] sm:$0xff]  ;;  %v8496_v22 = vmul.f32 %v8491_v7, %v8482_v45  ;;  %v8484_v15 = vld [vmem:[%s14988_s1 + $0x28] sm:$0xff]  ;;  %10590 = vmatprep.subr.mxu1 (%p8472_p3), %v11561_v47  ;;  %10592 = vmatprep.mubr.msk.f32.mxu1 (%p8472_p3), %vm11562_vm13, %v11561_v47 }
 0xae7   : >> { %v8507_v30 = vadd.f32 %v8505_v50, %v8493_v13  ;;  %v8508_v16 = vadd.f32 %v8505_v50, %v8494_v39  ;;  %v8497_v10 = vmul.f32 %v8491_v7, %v8483_v36  ;;  %v8509_v49 = vadd.f32 %v8505_v50, %v8495_v38  ;;  %v8485_v6 = vld [vmem:[%s14988_s1 + $0x30] sm:$0xff]  ;;  %v8519_v53 = vld [vmem:[%s14992_s21 + $0x18] sm:$0xff]  ;;  %v8520_v44 = vld [vmem:[%s14992_s21 + $0x20] sm:$0xff] }
 0xae8   : >> { %v8498_v56 = vmul.f32 %v8491_v7, %v8484_v15  ;;  %v8510_v19 = vadd.f32 %v8505_v50, %v8496_v22  ;;  %v8486_v0 = vld [vmem:[%s14988_s1 + $0x38] sm:$0xff]  ;;  %v8521_v51 = vld [vmem:[%s14992_s21 + $0x28] sm:$0xff]  ;;  %v8499_v35 = vmul.f32 %v8491_v7, %v8485_v6  ;;  %v8522_v9 = vld [vmem:[%s14992_s21 + $0x30] sm:$0xff] }
 0xae9   : >> { %v8524_v26 = vadd.f32 %v8516_v27, %v8507_v30  ;;  %v8525_v29 = vadd.f32 %v8517_v59, %v8508_v16  ;;  %v8511_v31 = vadd.f32 %v8505_v50, %v8497_v10  ;;  %v8526_v48 = vadd.f32 %v8518_v41, %v8509_v49  ;;  %v8523_v55 = vld [vmem:[%s14992_s21 + $0x38] sm:$0xff]  ;;  %v8687_v5 = vld [vmem:[%s15221_s11] sm:$0xff] (%p8472_p3) }
 0xaea   : >> { %v8512_v4 = vadd.f32 %v8505_v50, %v8498_v56  ;;  %v8527_v43 = vadd.f32 %v8519_v53, %v8510_v19  ;;  %v8500_v37 = vmul.f32 %v8491_v7, %v8486_v0  ;;  %v8513_v33 = vadd.f32 %v8505_v50, %v8499_v35  ;;  %10591 = vmatpush3.msra.mxu1 (%p8472_p3), %v8687_v5  ;;  %v8612_v11 = vld [vmem:[%s15220_s10] sm:$0x1] (%p8472_p3) }
 0xaeb   : >> { %v8540_v8 = vmin.f32 %v8524_v26, 0.0  ;;  %v8541_v23 = vmin.f32 %v8525_v29, 0.0  ;;  %v8542_v24 = vmin.f32 %v8526_v48, 0.0  ;;  %v15006_v14 = vadd.f32 %v8520_v44, %v8511_v31 }
 0xaec   : >> { %v15008_v40 = vadd.f32 %v8521_v51, %v8512_v4  ;;  %v8543_v18 = vmin.f32 %v8527_v43, 0.0  ;;  %v8530_v34 = vadd.f32 %v8522_v9, %v8513_v33  ;;  %v8514_v32 = vadd.f32 %v8505_v50, %v8500_v37 }
 0xaed   : >> { %v8548_v2 = vmul.f32 1.442695, %v8540_v8  ;;  %v8550_v25 = vmul.f32 1.442695, %v8541_v23  ;;  %v8552_v42 = vmul.f32 1.442695, %v8542_v24 }
 0xaee   : >> { %v8544_v58 = vmin.f32 %v15006_v14, 0.0  ;;  %v8545_v21 = vmin.f32 %v15008_v40, 0.0  ;;  %v8554_v52 = vmul.f32 1.442695, %v8543_v18  ;;  %v8546_v20 = vmin.f32 %v8530_v34, 0.0 }
 0xaef   : >> { %11336 = vpow2.f32 %v8548_v2  ;;  %v8531_v57 = vadd.f32 %v8523_v55, %v8514_v32  ;;  %vm8532_vm3 = vcmp.gt.f32.partialorder %v8524_v26, 0.0  ;;  %vm8533_vm7 = vcmp.gt.f32.partialorder %v8525_v29, 0.0  ;;  %v8611_v55 = vld [vmem:[%s15219_s9] sm:$0xff] (%p8472_p3) }
 0xaf0   : >> { %11338 = vpow2.f32 %v8550_v25  ;;  %v8556_v62 = vmul.f32 1.442695, %v8544_v58  ;;  %v8558_v61 = vmul.f32 1.442695, %v8545_v21  ;;  %v8560_v3 = vmul.f32 1.442695, %v8546_v20  ;;  %10586 = vmatpush3.msra.mxu0 (%p8472_p3), %v8611_v55 }
 0xaf1   : >> { %11340 = vpow2.f32 %v8552_v42  ;;  %v8547_v1 = vmin.f32 %v8531_v57, 0.0  ;;  %vm8534_vm9 = vcmp.gt.f32.partialorder %v8526_v48, 0.0  ;;  %vm8535_vm10 = vcmp.gt.f32.partialorder %v8527_v43, 0.0  ;;  %v8688_v32 = vld [vmem:[%s15222_s12] sm:$0x1] (%p8472_p3) }
 0xaf2   : >> { %11342 = vpow2.f32 %v8554_v52  ;;  %vm8536_vm11 = vcmp.gt.f32.partialorder %v15006_v14, 0.0  ;;  %vm8537_vm12 = vcmp.gt.f32.partialorder %v15008_v40, 0.0  ;;  %vm8538_vm14 = vcmp.gt.f32.partialorder %v8530_v34, 0.0 }
 0xaf3   : >> { %11344 = vpow2.f32 %v8556_v62  ;;  %v8562_v7 = vmul.f32 1.442695, %v8547_v1  ;;  %vm8539_vm15 = vcmp.gt.f32.partialorder %v8531_v57, 0.0 }
 0xaf4   : >> { %11346 = vpow2.f32 %v8558_v61 }
 0xaf5   : >> { %11348 = vpow2.f32 %v8560_v3 }
 0xaf6   : >> { %11350 = vpow2.f32 %v8562_v7 }
 0xaf9   : >> { %v11337_v54 = vpop.eup %11336 }
 0xafa   : >> { %v11339_v17 = vpop.eup %11338  ;;  %v10167_v13 = vadd.f32 -1.0, %v11337_v54 }
 0xafb   : >> { %v11341_v50 = vpop.eup %11340  ;;  %v10168_v27 = vadd.f32 -1.0, %v11339_v17 }
 0xafc   : >> { %v11343_v39 = vpop.eup %11342  ;;  %v8572_v46 = vsel %vm8532_vm3, %v8524_v26, %v10167_v13  ;;  %v10169_v59 = vadd.f32 -1.0, %v11341_v50 }
 0xafd   : >> { %v11345_v38 = vpop.eup %11344  ;;  %8580 = vst.msk [vmem:[%s14988_s1] sm:$0xff] %vm1323_vm8, %v8572_v46  ;;  %v8588_v45 = vsel %vm1323_vm8, %v8572_v46, 0.0  ;;  %v8573_v36 = vsel %vm8533_vm7, %v8525_v29, %v10168_v27  ;;  %v10170_v30 = vadd.f32 -1.0, %v11343_v39 }
 0xafe   : >> { %v11347_v16 = vpop.eup %11346  ;;  %8581 = vst.msk [vmem:[%s14988_s1 + $0x8] sm:$0xff] %vm1323_vm8, %v8573_v36  ;;  %v8589_v41 = vsel %vm1323_vm8, %v8573_v36, 0.0  ;;  %v8574_v22 = vsel %vm8534_vm9, %v8526_v48, %v10169_v59  ;;  %v10171_v10 = vadd.f32 -1.0, %v11345_v38 }
 0xaff   : >> { %v8590_v15 = vadd.f32 %v8589_v41, %v8588_v45  ;;  %8582 = vst.msk [vmem:[%s14988_s1 + $0x10] sm:$0xff] %vm1323_vm8, %v8574_v22  ;;  %v8591_v49 = vsel %vm1323_vm8, %v8574_v22, 0.0  ;;  %v8575_v56 = vsel %vm8535_vm10, %v8527_v43, %v10170_v30  ;;  %v10172_v6 = vadd.f32 -1.0, %v11347_v16  ;;  %v11349_v26 = vpop.eup %11348 }
 0xb00   : >> { %8583 = vst.msk [vmem:[%s14988_s1 + $0x18] sm:$0xff] %vm1323_vm8, %v8575_v56  ;;  %v8593_v29 = vsel %vm1323_vm8, %v8575_v56, 0.0  ;;  %v8576_v19 = vsel %vm8536_vm11, %v15006_v14, %v10171_v10  ;;  %v10173_v44 = vadd.f32 -1.0, %v11349_v26  ;;  %v11351_v0 = vpop.eup %11350 }
 0xb01   : >> { %v8592_v53 = vadd.f32 %v8591_v49, %v8590_v15  ;;  %8584 = vst.msk [vmem:[%s14988_s1 + $0x20] sm:$0xff] %vm1323_vm8, %v8576_v19  ;;  %v8577_v31 = vsel %vm8537_vm12, %v15008_v40, %v10172_v6  ;;  %v8595_v48 = vsel %vm1323_vm8, %v8576_v19, 0.0  ;;  %v10174_v35 = vadd.f32 -1.0, %v11351_v0 }
 0xb02   : >> { %8585 = vst.msk [vmem:[%s14988_s1 + $0x28] sm:$0xff] %vm1323_vm8, %v8577_v31  ;;  %v8578_v51 = vsel %vm8538_vm14, %v8530_v34, %v10173_v44  ;;  %v8597_v8 = vsel %vm1323_vm8, %v8577_v31, 0.0 }
 0xb03   : >> { %v8594_v4 = vadd.f32 %v8593_v29, %v8592_v53  ;;  %8586 = vst.msk [vmem:[%s14988_s1 + $0x30] sm:$0xff] %vm1323_vm8, %v8578_v51  ;;  %v8579_v24 = vsel %vm8539_vm15, %v8531_v57, %v10174_v35  ;;  %v8599_v43 = vsel %vm1323_vm8, %v8578_v51, 0.0 }
 0xb04   : >> { %8587 = vst.msk [vmem:[%s14988_s1 + $0x38] sm:$0xff] %vm1323_vm8, %v8579_v24  ;;  %v8601_v37 = vsel %vm1323_vm8, %v8579_v24, 0.0 }
 0xb05   : >> { %v8596_v23 = vadd.f32 %v8595_v48, %v8594_v4 }
 0xb07   : >> { %v8598_v14 = vadd.f32 %v8597_v8, %v8596_v23 }
 0xb09   : >> { %v8600_v2 = vadd.f32 %v8599_v43, %v8598_v14 }
 0xb0b   : >> { %v8602_v25 = vadd.f32 %v8601_v37, %v8600_v2 }
 0xb0d   : >> { %v8603_v40 = vrot.slane %v8602_v25, 4 }
 0xb0f   : >> { %v8604_v33 = vadd.f32 %v8603_v40, %v8602_v25 }
 0xb11   : >> { %v8605_v9 = vrot.slane %v8604_v33, 2 }
 0xb13   : >> { %v8606_v42 = vadd.f32 %v8605_v9, %v8604_v33 }
 0xb15   : >> { %v8607_v18 = vrot.slane %v8606_v42, 1  ;;  %8474 = sbr.rel (!%p8472_p3) target bundleno = 2786 (0xae2), region = 274 }
 0xb17   : >> { %v8608_v58 = vadd.f32 %v8607_v18, %v8606_v42 }
 0xb19   : >> { %v8609_v21 = vadd.f32 %v11548_v12, %v8608_v58  }
 0xb1b   : >> { %v15249_v12 = vmov %v8609_v21  ;;  %v8610_v52 = vmul.f32 (%p8472_p3), 0.001953125, %v8609_v21 }
 0xb1d   : > { %10588 = vmatmul.mubr.msk.f32.vlgmr.msra.gmra.mrb[2].mxu0 %vm1323_vm8, %v8610_v52 }
 0xbf0   : > { %v8682_v60 = vpop.f32.mrb[2].mxu0 }
 0xbf1   : > { %v8683_v28 = vadd.f32 %v8682_v60, %v8612_v11  ;;  %v10589_v12 = vpop.f32.mrb[3].mxu0 }
 0xbf3   : > { %v8686_v34 = vmax.f32 %v8683_v28, 0.0 }
 0xbf5   : > { %10593 = vmatmul.mubr.msk.f32.vlgmr.msra.gmra.mrb[2].mxu1 %vm1323_vm8, %v8686_v34 }
 0xcc8   : > { %v8758_v47 = vpop.f32.mrb[2].mxu1 }
 0xcc9   : > { %v8759_v62 = vadd.f32 %v8758_v47, %v8688_v32  ;;  %v10594_v61 = vpop.f32.mrb[3].mxu1 }
 0xccb   : > { %v10177_v20 = vmul.f32 -1.442695, %v8759_v62 }
 0xccd   : > { %11352 = vpow2.f32 %v10177_v20 }
 0xcd7   : > { %v11353_v57 = vpop.eup %11352 }
 0xcd8   : > { %v8765_v3 = vadd.f32 1.0, %v11353_v57 }
 0xcda   : > { %11354 = vrcp.f32 %v8765_v3 }
 0xce4   : > { %v15069_v1 = vpop.eup %11354 }
 0xce5 LB: >> { %s10178_s29 = sshll.u32 %s11556_s22, 6  ;;  %v10179_v7 = vld [vmem:[%s15223_s13] ss:$0 sm:$0xff]  ;;  %v11565_v31 = vmov 0   ;;  %s15250_s27 = scalar_lea.vmem [#allocation6], %s11709_s20  ;;  %s11556_s22 = sphi %s15071_s22, %s8773_s22  }
 0xce6   : >> { %s8775_s19 = scalar_lea.vmem [#allocation3], %s10178_s29  ;;  %11356 = vset.pattern.permute.xlu0 %v11565_v31  ;;  %11357 = vset.pattern.permute.xlu1 %v11565_v31  ;;  %v10180_v44 = vld [vmem:[#allocation5] ss:$0 sm:$0xff]  ;;  %s15122_s1 = scalar_lea.vmem %s15250_s27, %s10178_s29 [#allocation6] }
 0xce7   : >> { %v15082_v54 = vld [vmem:[%s8775_s19] sm:$0xff]  ;;  %v15084_v17 = vld [vmem:[%s8775_s19 + $0x8] sm:$0xff]  ;;  %v15086_v13 = vld [vmem:[%s8775_s19 + $0x10] sm:$0xff]  ;;  %s8773_s22 = sadd.s32 1, %s11556_s22  }
 0xce8   : >> { %v8791_v50 = vmul.f32 %v10179_v7, %v15082_v54  ;;  %v8792_v27 = vmul.f32 %v10179_v7, %v15084_v17  ;;  %v8793_v39 = vmul.f32 %v10179_v7, %v15086_v13  ;;  %v15091_v46 = vld [vmem:[%s8775_s19 + $0x18] sm:$0xff]  ;;  %v15094_v38 = vld [vmem:[%s8775_s19 + $0x20] sm:$0xff]  ;;  %v15096_v45 = vld [vmem:[%s8775_s19 + $0x28] sm:$0xff]  ;;  %p8770_p4 = scmp.ge.s32.totalorder %s8773_s22, 8  }
 0xce9   : >> { %v8794_v59 = vmul.f32 %v10179_v7, %v15091_v46  ;;  %v8795_v22 = vmul.f32 %v10179_v7, %v15094_v38  ;;  %v8796_v10 = vmul.f32 %v10179_v7, %v15096_v45  ;;  %v15104_v15 = vld [vmem:[%s8775_s19 + $0x30] sm:$0xff]  ;;  %v15106_v49 = vld [vmem:[%s8775_s19 + $0x38] sm:$0xff]  ;;  %s10213_s21 = sshll.u32 (%p8770_p4), %s11678_s14, 13  ;;  %s15251_s19 = scalar_lea.vmem (%p8770_p4), [#allocation6], %s11709_s20 }
 0xcea   : >> { %v8799_v36 = vsel %vm1323_vm8, %v8791_v50, 0.0  ;;  %v8805_v30 = vsel %vm1323_vm8, %v8793_v39, 0.0  ;;  %v8802_v16 = vsel %vm1323_vm8, %v8792_v27, 0.0  ;;  %v8797_v26 = vmul.f32 %v10179_v7, %v15104_v15  ;;  %s15161_s2 = scalar_lea.hbm (%p8770_p4), %s15226_s16, %s10213_s21  ;;  %s8977_s27 = sshll.u32 (%p8770_p4), %s15251_s19, 4  ;;  %s15165_s27 = int_to_ptr.vmem [resolvable:$true] %s8977_s27 }
 0xceb   : >> { %8800 = vadd.xlane.f32.xlu0 %v8799_v36  ;;  %8806 = vadd.xlane.f32.xlu1 %v8805_v30  ;;  %v8808_v41 = vsel %vm1323_vm8, %v8794_v59, 0.0  ;;  %v8811_v56 = vsel %vm1323_vm8, %v8795_v22, 0.0  ;;  %v8814_v6 = vsel %vm1323_vm8, %v8796_v10, 0.0  ;;  %v8798_v29 = vmul.f32 %v10179_v7, %v15106_v49  ;;  %s11390_s3 = scalar_lea.vmem (%p8770_p4), %s15165_s27, 8192  ;;  %s11566_s14 = smov (%p8770_p4), [#allocation6]  }
 0xcec   : >> { %v8817_v19 = vsel %vm1323_vm8, %v8797_v26, 0.0  ;;  %v8889_v26 = vrot.slane %v15069_v1, %v13597_v63  ;;  %p11391_p7 = scmp.ne.s32.totalorder (%p8770_p4), %s15165_s27, %s11390_s3  ;;  %s11394_s4 = sshll.u32 (%p8770_p4), %s11566_s14, 4  ;;  %s11395_s4 = int_to_ptr.vmem [resolvable:$false] %s11394_s4 }
 0xced   : >> { %v8820_v53 = vsel %vm1323_vm8, %v8798_v29, 0.0  ;;  %s11396_s21 = scalar_lea.vmem (%p8770_p4), %s11395_s4, 16384  ;;  %p11397_p10 = scmp.lt.s32.totalorder (%p8770_p4), %s15165_s27, %s11395_s4 }
 0xcee   : >> { %v8890_v29 = vmul.f32 %v8889_v26, %v15082_v54  ;;  %p11392_p8 = pnand (%p8770_p4), %p11391_p7, %p11695_p5  ;;  %p11398_p11 = scmp.lt.s32.totalorder (%p8770_p4), %s11396_s21, %s11390_s3 }
 0xcef   : >> { %8803 = vadd.xlane.f32.xlu0 %v8802_v16  ;;  %8809 = vadd.xlane.f32.xlu1 %v8808_v41 }
 0xcf0   : > { %p11393_p9 = pneg (%p8770_p4), %p11392_p8  ;;  %p11399_p12 = por (%p8770_p4), %p11398_p11, %p11397_p10 }
 0xcf2   : > { %p11400_p13 = pnand (%p8770_p4), %p11399_p12, %p11393_p9 }
 0xcf3   : >> { %8812 = vadd.xlane.f32.xlu0 %v8811_v56  ;;  %8815 = vadd.xlane.f32.xlu1 %v8814_v6 }
 0xcf7   : >> { %8818 = vadd.xlane.f32.xlu0 %v8817_v19  ;;  %8821 = vadd.xlane.f32.xlu1 %v8820_v53 }
 0xd78   : >> { %v8801_v0 = vpop.xlane.xlu0 %8800  ;;  %v8807_v48 = vpop.xlane.xlu1 %8806 }
 0xd79   : >> { %v8830_v4 = vadd.f32 %v10180_v44, %v8801_v0  ;;  %v8832_v51 = vadd.f32 %v10180_v44, %v8807_v48 }
 0xd7b   : >> { %v10181_v35 = vmul.f32 -1.442695, %v8830_v4  ;;  %v10183_v8 = vmul.f32 -1.442695, %v8832_v51  ;;  %v8892_v51 = vmul.f32 %v8889_v26, %v15086_v13 }
 0xd7c   : >> { %v8804_v23 = vpop.xlane.xlu0 %8803  ;;  %v8810_v24 = vpop.xlane.xlu1 %8809 }
 0xd7d   : >> { %11358 = vpow2.f32 %v10181_v35  ;;  %v8831_v43 = vadd.f32 %v10180_v44, %v8804_v23  ;;  %v8833_v14 = vadd.f32 %v10180_v44, %v8810_v24  ;;  %v8893_v23 = vmul.f32 %v8889_v26, %v15091_v46 }
 0xd7e   : >> { %11360 = vpow2.f32 %v10183_v8 }
 0xd7f   : >> { %v10182_v37 = vmul.f32 -1.442695, %v8831_v43  ;;  %v10184_v2 = vmul.f32 -1.442695, %v8833_v14 }
 0xd80   : >> { %v8813_v25 = vpop.xlane.xlu0 %8812  ;;  %v8816_v40 = vpop.xlane.xlu1 %8815 }
 0xd81   : >> { %11362 = vpow2.f32 %v10182_v37  ;;  %v8834_v33 = vadd.f32 %v10180_v44, %v8813_v25  ;;  %v8835_v42 = vadd.f32 %v10180_v44, %v8816_v40 }
 0xd82   : >> { %11364 = vpow2.f32 %v10184_v2 }
 0xd83   : >> { %v10185_v9 = vmul.f32 -1.442695, %v8834_v33  ;;  %v10186_v21 = vmul.f32 -1.442695, %v8835_v42 }
 0xd84   : >> { %v8819_v18 = vpop.xlane.xlu0 %8818  ;;  %v8822_v5 = vpop.xlane.xlu1 %8821 }
 0xd85   : >> { %11366 = vpow2.f32 %v10185_v9  ;;  %v8836_v55 = vadd.f32 %v10180_v44, %v8819_v18  ;;  %v8837_v12 = vadd.f32 %v10180_v44, %v8822_v5  ;;  %v8891_v44 = vmul.f32 %v8889_v26, %v15084_v17 }
 0xd87   : >> { %v11359_v58 = vpop.eup %11358  ;;  %v10187_v28 = vmul.f32 -1.442695, %v8836_v55  ;;  %v10188_v62 = vmul.f32 -1.442695, %v8837_v12 }
 0xd88   : >> { %v8862_v52 = vadd.f32 1.0, %v11359_v58  ;;  %v11361_v11 = vpop.eup %11360 }
 0xd89   : >> { %v8864_v32 = vadd.f32 1.0, %v11361_v11 }
 0xd8a   : >> { %11368 = vrcp.f32 %v8862_v52 }
 0xd8b   : >> { %v11363_v60 = vpop.eup %11362  ;;  %11370 = vpow2.f32 %v10186_v21 }
 0xd8c   : >> { %v8863_v34 = vadd.f32 1.0, %v11363_v60  ;;  %v11365_v47 = vpop.eup %11364 }
 0xd8d   : >> { %v8865_v61 = vadd.f32 1.0, %v11365_v47 }
 0xd8e   : >> { %11372 = vrcp.f32 %v8863_v34 }
 0xd8f   : >> { %11374 = vpow2.f32 %v10187_v28  ;;  %v11367_v20 = vpop.eup %11366 }
 0xd90   : >> { %11376 = vrcp.f32 %v8864_v32  ;;  %v8866_v3 = vadd.f32 1.0, %v11367_v20 }
 0xd91   : >> { %11378 = vpow2.f32 %v10188_v62 }
 0xd92   : >> { %11380 = vrcp.f32 %v8865_v61 }
 0xd93   : >> { %11382 = vrcp.f32 %v8866_v3 }
 0xd94   : >> { %v11369_v57 = vpop.eup %11368 }
 0xd95   : >> { %v11371_v7 = vpop.eup %11370  ;;  %8900 = vperm.xlu0 %11356, %v11369_v57  }
 0xd96   : >> { %v8867_v27 = vadd.f32 1.0, %v11371_v7 }
 0xd98   : >> { %v11373_v50 = vpop.eup %11372  ;;  %11384 = vrcp.f32 %v8867_v27 }
 0xd99   : >> { %v11375_v39 = vpop.eup %11374  ;;  %8905 = vperm.xlu1 %11357, %v11373_v50  }
 0xd9a   : >> { %v11377_v59 = vpop.eup %11376  ;;  %v8868_v36 = vadd.f32 1.0, %v11375_v39 }
 0xd9b   : >> { %v11379_v30 = vpop.eup %11378 }
 0xd9c   : >> { %v11381_v16 = vpop.eup %11380  ;;  %11386 = vrcp.f32 %v8868_v36  ;;  %v8869_v41 = vadd.f32 1.0, %v11379_v30 }
 0xd9d   : >> { %8910 = vperm.xlu1 %11357, %v11377_v59   ;;  %v11383_v22 = vpop.eup %11382 }
 0xd9e   : >> { %11388 = vrcp.f32 %v8869_v41 }
 0xda1   : >> { %8915 = vperm.xlu1 %11357, %v11381_v16  }
 0xda2   : >> { %v11385_v10 = vpop.eup %11384 }
 0xda5   : >> { %8920 = vperm.xlu1 %11357, %v11383_v22  }
 0xda6   : >> { %v11387_v56 = vpop.eup %11386 }
 0xda8   : >> { %v11389_v6 = vpop.eup %11388 }
 0xda9   : >> { %8925 = vperm.xlu1 %11357, %v11385_v10  }
 0xdad   : >> { %8930 = vperm.xlu1 %11357, %v11387_v56  }
 0xdb1   : >> { %8935 = vperm.xlu1 %11357, %v11389_v6  }
 0xe14   : >> { %v8901_v19 = vpop.permute.xlu0 %8900 }
 0xe15   : >> { %v8938_v53 = vmul.f32 %v8901_v19, %v15082_v54 }
 0xe17   : >> { %v8946_v31 = vmax.f32 %v8890_v29, %v8938_v53 }
 0xe18   : >> { %v8906_v0 = vpop.permute.xlu1 %8905 }
 0xe19   : >> { %8955 = vst.msk [vmem:[%s15122_s1] sm:$0xff] %vm1323_vm8, %v8946_v31  ;;  %v8939_v48 = vmul.f32 %v8906_v0, %v15084_v17  ;;  %v8894_v17 = vmul.f32 %v8889_v26, %v15094_v38 }
 0xe1b   : >> { %v8947_v4 = vmax.f32 %v8891_v44, %v8939_v48 }
 0xe1c   : >> { %v8911_v54 = vpop.permute.xlu1 %8910 }
 0xe1d   : >> { %8956 = vst.msk [vmem:[%s15122_s1 + $0x8] sm:$0xff] %vm1323_vm8, %v8947_v4  ;;  %v8940_v35 = vmul.f32 %v8911_v54, %v15086_v13  ;;  %v8895_v13 = vmul.f32 %v8889_v26, %v15096_v45 }
 0xe1f   : >> { %v8948_v8 = vmax.f32 %v8892_v51, %v8940_v35 }
 0xe20   : >> { %v8916_v24 = vpop.permute.xlu1 %8915 }
 0xe21   : >> { %8957 = vst.msk [vmem:[%s15122_s1 + $0x10] sm:$0xff] %vm1323_vm8, %v8948_v8  ;;  %v8941_v43 = vmul.f32 %v8916_v24, %v15091_v46  ;;  %v8896_v46 = vmul.f32 %v8889_v26, %v15104_v15 }
 0xe23   : >> { %v8949_v14 = vmax.f32 %v8893_v23, %v8941_v43 }
 0xe24   : >> { %v8921_v37 = vpop.permute.xlu1 %8920 }
 0xe25   : >> { %8958 = vst.msk [vmem:[%s15122_s1 + $0x18] sm:$0xff] %vm1323_vm8, %v8949_v14  ;;  %v8942_v2 = vmul.f32 %v8921_v37, %v15094_v38  ;;  %v8897_v38 = vmul.f32 %v8889_v26, %v15106_v49 }
 0xe27   : >> { %v8950_v25 = vmax.f32 %v8894_v17, %v8942_v2 }
 0xe28   : >> { %v8926_v40 = vpop.permute.xlu1 %8925 }
 0xe29   : >> { %8959 = vst.msk [vmem:[%s15122_s1 + $0x20] sm:$0xff] %vm1323_vm8, %v8950_v25  ;;  %v8943_v33 = vmul.f32 %v8926_v40, %v15096_v45 }
 0xe2b   : >> { %v8951_v9 = vmax.f32 %v8895_v13, %v8943_v33 }
 0xe2c   : >> { %v8931_v42 = vpop.permute.xlu1 %8930 }
 0xe2d   : >> { %8960 = vst.msk [vmem:[%s15122_s1 + $0x28] sm:$0xff] %vm1323_vm8, %v8951_v9  ;;  %v8944_v18 = vmul.f32 %v8931_v42, %v15104_v15 }
 0xe2f   : >> { %v8952_v58 = vmax.f32 %v8896_v46, %v8944_v18  ;;  %8772 = sbr.rel (!%p8770_p4) target bundleno = 3301 (0xce5), region = 285 }
 0xe30   : >> { %v8936_v21 = vpop.permute.xlu1 %8935 }
 0xe31   : >> { %8961 = vst.msk [vmem:[%s15122_s1 + $0x30] sm:$0xff] %vm1323_vm8, %v8952_v58  ;;  %v8945_v55 = vmul.f32 %v8936_v21, %v15106_v49 }
 0xe33   : >> { %v8953_v52 = vmax.f32 %v8897_v38, %v8945_v55 }
 0xe35   : >> { %8962 = vst.msk [vmem:[%s15122_s1 + $0x38] sm:$0xff] %vm1323_vm8, %v8953_v52  ;;  %s15252_s1 = sand.u32 (%p8770_p4), 1, %s11496_s24  }
 0xe36   : > { %s15169_s22 = scalar_lea.sflag [#allocation7], %s15252_s1 }
 0xe37   : > { %11403 = shalt.err (!%p11400_p13)
}
 0xe38   : > { %s11404_s20 = scalar_lea.hbm %s15161_s2, 8192  ;;  %s11408_s19 = scalar_lea.hbm %s15226_s16, 16384 }
 0xe39   : > { %p11405_p0 = scmp.ne.s32.totalorder %s15161_s2, %s11404_s20  ;;  %p11409_p3 = scmp.lt.u32.totalorder %s15161_s2, %s15226_s16 }
 0xe3a   : > { %p11410_p4 = scmp.lt.u32.totalorder %s11408_s19, %s11404_s20  ;;  %p11412_p8 = scmp.lt.u32.totalorder %s11404_s20, %s15161_s2 }
 0xe3b   : > { %p11406_p1 = pnand %p11405_p0, %p11695_p5 }
 0xe3c   : > { %p11411_p7 = por %p11410_p4, %p11409_p3 }
 0xe3d   : > { %p11407_p2 = pneg %p11406_p1 }
 0xe3e   : > { %p11413_p9 = por %p11412_p8, %p11411_p7 }
 0xe40   : > { %p11414_p10 = pnand %p11413_p9, %p11407_p2 }
 0xe42   : > { %11417 = shalt.err (!%p11414_p10)
}
 0xe43   : > { %s11567_s3 = smov 128   ;;  %s11568_s14 = smov 8  }
 0xe44   : > { %10755 = dma.vmem_to_hbm [thread:$0]  (%p11695_p5), %s15165_s27, 8192, %s15161_s2, %s15169_s22, %s11567_s3, %s11567_s3, %s11568_s14  }
 0xe45 PF: > { %p10761_p11 = scmp.ge.s32.totalorder %s11504_s26, 2  ;;  %s8992_s21 = sand.u32 1, %s11492_s23  }
 0xe46   : > { %s8993_s20 = scalar_lea.sflag [#allocation7], %s8992_s21 }
 0xe47   : > { %p10758_p12 = pnand %p10761_p11, %p11699_p6 }
 0xe49   : > { %11487 = dma.done.wait (!%p10758_p12), %s8993_s20, 8192  }
 0xe4a   : > { %11489 = vsyncadd (!%p10758_p12), %s8993_s20, 4294959104  ;;  %p28_p13 = scmp.ge.s32.totalorder %s11682_s28, 4   ;;  %s15253_s23 = smov %s11496_s24 }
 0xe4b   : > { %s15254_s24 = smov %s11500_s25  ;;  %s15255_s25 = smov %s11693_s0 }
 0xe4c   : > { %s15256_s26 = smov %s11682_s28  ;;  %30 = sbr.rel (!%p28_p13) target bundleno = 9 (0x9), region = 296 }
 0xe53   :  { %8998 = vsyncpa [#allocation7], 1 }
 0xe54   :  { %9000 = vsyncpa [#allocation7 + $0x1], 1 }

</bundles_post_ra>
